<compile_context>
chip_gen: v6e
topology: v6e:2x2x1
jax: 0.10.0
libtpu: 0.0.40
codegen_flags: <defaults>
</compile_context>

<pallas_src>
import jax
import jax.numpy as jnp
from jax import lax
from jax.experimental import pallas as pl
from jax.experimental.pallas import tpu as pltpu

LANE = 128


def _round_up(x, m):
    return (x + m - 1) // m * m


def _upconv_phase_kernel(x_ref, w_ref, y_ref, stats_ref):
    """Fused [nearest-2x upsample -> 3x3 conv] for one image, all 4 output phases.

    x_ref:     (1, H+2, W+2, Cin_p)   bf16  zero-padded ORIGINAL-resolution image
    w_ref:     (16, Cin_p, Cout_p)    bf16  phase-combined 2x2-tap weights
    y_ref:     (4, H*W, Cout_p)       f32   bias-free conv output, phase-major
    stats_ref: (1, 2, Cout_p)         f32   per-image partial (sum, sum_sq)
    """
    H = x_ref.shape[1] - 2
    W = x_ref.shape[2] - 2
    cin_p = x_ref.shape[3]
    cp = y_ref.shape[-1]

    s_sum = jnp.zeros((1, cp), jnp.float32)
    s_sq = jnp.zeros((1, cp), jnp.float32)

    # 4 output phases (a, b) = (row parity, col parity); each is a 2x2-tap conv
    # on the original-resolution padded image (taps read straight from VMEM --
    # no im2col, no upsample).  Static unroll: 16 small MXU matmuls.
    for a in range(2):
        for b in range(2):
            p = a * 2 + b
            acc = jnp.zeros((H * W, cp), jnp.float32)
            for r in range(2):
                for s in range(2):
                    xs = x_ref[0, a + r:a + r + H, b + s:b + s + W, :]
                    xs = xs.reshape(H * W, cin_p)
                    acc = acc + jnp.dot(xs, w_ref[p * 4 + r * 2 + s],
                                        preferred_element_type=jnp.float32)
            y_ref[p] = acc
            # Partial BN statistics (bias-free; the conv bias folds exactly
            # into the BN shift).  One full-block reduce per (image, phase)
            # instead of a per-row-tile reduce on the hot loop.
            s_sum = s_sum + jnp.sum(acc, axis=0, keepdims=True)
            s_sq = s_sq + jnp.sum(acc * acc, axis=0, keepdims=True)

    stats_ref[0, 0:1, :] = s_sum
    stats_ref[0, 1:2, :] = s_sq


def _bn_relu_kernel(y_ref, scale_ref, shift_ref, o_ref):
    """Fused affine BatchNorm + ReLU over lane-dense (TM, Cout_p) tiles (f32)."""
    o_ref[...] = jnp.maximum(y_ref[...] * scale_ref[...] + shift_ref[...], 0.0)


@jax.jit
def up_conv_forward(x_nchw, weight, bias, gamma, beta, eps=1e-5):
    """x: (N, Cin, H, W) f32; weight: (Cout, Cin, 3, 3). Returns (N, Cout, 2H, 2W) f32."""
    N, Cin, H, W = x_nchw.shape
    Cout = weight.shape[0]
    cin_p = _round_up(Cin, LANE)    # lane/K-dense channels (no-op for real widths)
    cout_p = _round_up(Cout, LANE)  # lane-dense output channels

    # ---- weight prep (tiny, once per layer): fold the nearest-2x upsample into
    #      the 3x3 kernel -> per phase a 2x2 kernel of pairwise row/col sums.
    #   a=0 rows: [w_ky0, w_ky1 + w_ky2]   a=1 rows: [w_ky0 + w_ky1, w_ky2]
    R = jnp.array([[[1, 0, 0], [0, 1, 1]],
                   [[1, 1, 0], [0, 0, 1]]], dtype=jnp.float32)
    w2 = jnp.einsum('ary,bsx,oiyx->abrsio', R, R, weight.astype(jnp.float32))
    w2 = jnp.pad(w2, ((0, 0), (0, 0), (0, 0), (0, 0),
                      (0, cin_p - Cin), (0, cout_p - Cout)))
    w2 = w2.reshape(16, cin_p, cout_p).astype(jnp.bfloat16)

    # ---- input prep: NCHW -> NHWC, +1 spatial halo, channel pad, bf16 ----
    xh = jnp.transpose(x_nchw, (0, 2, 3, 1))
    xh = jnp.pad(xh, ((0, 0), (1, 1), (1, 1), (0, cin_p - Cin))).astype(jnp.bfloat16)

    HW = H * W

    # ---- pass 1: conv (bias-free) + per-image partial BN stats ----
    y, stats = pl.pallas_call(
        _upconv_phase_kernel,
        out_shape=(jax.ShapeDtypeStruct((N * 4, HW, cout_p), jnp.float32),
                   jax.ShapeDtypeStruct((N, 2, cout_p), jnp.float32)),
        grid_spec=pltpu.PrefetchScalarGridSpec(
            num_scalar_prefetch=0,
            grid=(N,),
            in_specs=[pl.BlockSpec((1, H + 2, W + 2, cin_p), lambda n: (n, 0, 0, 0)),
                      pl.BlockSpec((16, cin_p, cout_p), lambda n: (0, 0, 0))],
            out_specs=(pl.BlockSpec((4, HW, cout_p), lambda n: (n, 0, 0)),
                       pl.BlockSpec((1, 2, cout_p), lambda n: (n, 0, 0)))),
        compiler_params=pltpu.CompilerParams(
            dimension_semantics=("parallel",)),
    )(xh, w2)

    # ---- BatchNorm2d (training-mode batch stats), computed from partial sums.
    # NOTE: E[y^2]-E[y]^2 can cancel for large-mean activations; per-block
    # centered (Welford) merges would be the production-scale fix.
    cnt = jnp.float32(N * 4 * HW)
    s_sum = jnp.sum(stats[:, 0, :], axis=0)
    s_sq = jnp.sum(stats[:, 1, :], axis=0)
    mean_nb = s_sum / cnt
    var = jnp.maximum(s_sq / cnt - mean_nb * mean_nb, 0.0)
    inv_std = 1.0 / jnp.sqrt(var + eps)

    gamma_p = jnp.pad(gamma.astype(jnp.float32), (0, cout_p - Cout), constant_values=1.0)
    beta_p = jnp.pad(beta.astype(jnp.float32), (0, cout_p - Cout))
    bias_p = jnp.pad(bias.astype(jnp.float32), (0, cout_p - Cout))

    scale = gamma_p * inv_std
    mean_b = mean_nb + bias_p                      # mean of the biased conv output
    shift = beta_p + (bias_p - mean_b) * scale     # conv bias folded into BN shift

    # ---- pass 2: BN + ReLU, large lane-dense tiles, written in place ----
    Mo = N * 4 * HW
    tm2 = Mo
    for cand in (2048, 1024, 512, 256, 128, 64, 32, 16, 8):
        if Mo % cand == 0:
            tm2 = cand
            break

    y2 = y.reshape(Mo, cout_p)
    out = pl.pallas_call(
        _bn_relu_kernel,
        out_shape=jax.ShapeDtypeStruct((Mo, cout_p), jnp.float32),
        grid_spec=pltpu.PrefetchScalarGridSpec(
            num_scalar_prefetch=0,
            grid=(Mo // tm2,),
            in_specs=[pl.BlockSpec((tm2, cout_p), lambda i: (i, 0)),
                      pl.BlockSpec((1, cout_p), lambda i: (0, 0)),
                      pl.BlockSpec((1, cout_p), lambda i: (0, 0))],
            out_specs=pl.BlockSpec((tm2, cout_p), lambda i: (i, 0))),
        input_output_aliases={0: 0},
        compiler_params=pltpu.CompilerParams(
            dimension_semantics=("parallel",)),
    )(y2, scale.reshape(1, cout_p), shift.reshape(1, cout_p))

    # phase-major (n, a, b, i, j, c) -> NCHW (n, c, 2i+a, 2j+b)
    # TODO(synk): fuse this phase->NCHW interleave (or the next conv_block's
    # patch read) into the BN kernel to save one more full-tensor HBM pass.
    out = out.reshape(N, 2, 2, H, W, cout_p)
    out = jnp.transpose(out, (0, 5, 3, 1, 4, 2)).reshape(N, cout_p, 2 * H, 2 * W)
    return out[:, :Cout]


def reference_forward(x, weight, bias, gamma, beta, eps=1e-5):
    """Pure-JAX f32 reference matching PyTorch up_conv.forward (training-mode BN)."""
    xu = jnp.repeat(jnp.repeat(x, 2, axis=2), 2, axis=3)
    y = lax.conv_general_dilated(xu, weight, window_strides=(1, 1),
                                 padding=((1, 1), (1, 1)),
                                 dimension_numbers=('NCHW', 'OIHW', 'NCHW'))
    y = y + bias.reshape(1, -1, 1, 1)
    mean = jnp.mean(y, axis=(0, 2, 3), keepdims=True)
    var = jnp.mean((y - mean) ** 2, axis=(0, 2, 3), keepdims=True)
    yn = (y - mean) / jnp.sqrt(var + eps)
    yn = yn * gamma.reshape(1, -1, 1, 1) + beta.reshape(1, -1, 1, 1)
    return jnp.maximum(yn, 0.0)


if __name__ == "__main__":
    key = jax.random.PRNGKey(0)
    k_x, k_w, k_b, k_g, k_bt = jax.random.split(key, 5)

    N, Cin, H, W = 2, 4, 16, 16
    Cout = 8

    # Inputs are snapped to bf16-representable values and the conv weights to a
    # 1/64 grid, so the kernel's bf16 operands (including the phase-combined
    # weight sums) are exact and a tight f32 reference comparison is valid.
    x = jax.random.normal(k_x, (N, Cin, H, W), dtype=jnp.float32)
    x = x.astype(jnp.bfloat16).astype(jnp.float32)
    weight = jnp.round(0.1 * jax.random.normal(k_w, (Cout, Cin, 3, 3),
                                               dtype=jnp.float32) * 64.0) / 64.0
    bias = 0.1 * jax.random.normal(k_b, (Cout,), dtype=jnp.float32)
    gamma = 1.0 + 0.1 * jax.random.normal(k_g, (Cout,), dtype=jnp.float32)
    beta = 0.1 * jax.random.normal(k_bt, (Cout,), dtype=jnp.float32)

    out = up_conv_forward(x, weight, bias, gamma, beta)
    out = jax.block_until_ready(out)

    ref = reference_forward(x, weight, bias, gamma, beta)
    assert out.shape == (N, Cout, 2 * H, 2 * W)
    assert jnp.allclose(out, ref, atol=1e-3, rtol=1e-3), "mismatch vs reference"

    print("KERNEL_OK")
</pallas_src>

<mosaic_0001>
module attributes {stable_mosaic.version = 11 : i64} {
  func.func @_upconv_phase_kernel(%arg0: i32, %arg1: memref<1x18x18x128xbf16, #tpu.memory_space<vmem>>, %arg2: memref<16x128x128xbf16, #tpu.memory_space<vmem>>, %arg3: memref<4x256x128xf32, #tpu.memory_space<vmem>>, %arg4: memref<1x2x128xf32, #tpu.memory_space<vmem>>) attributes {dimension_semantics = [#tpu.dimension_semantics<parallel>], iteration_bounds = array<i64: 2>, scalar_prefetch = 0 : i64, scratch_operands = 0 : i64, tpu.core_type = #tpu.core_type<tc>, window_params = [{transform_indices = @transform_0, window_bounds = array<i64: 1, 18, 18, 128>}, {pipeline_mode = #tpu.pipeline_mode<synchronous>, transform_indices = @transform_1, window_bounds = array<i64: 16, 128, 128>}, {transform_indices = @transform_2, window_bounds = array<i64: 4, 256, 128>}, {transform_indices = @transform_3, window_bounds = array<i64: 1, 2, 128>}]} {
    %cst = arith.constant 0.000000e+00 : f32
    %0 = vector.broadcast %cst : f32 to vector<1x128xf32>
    %cst_0 = arith.constant 0.000000e+00 : f32
    %1 = vector.broadcast %cst_0 : f32 to vector<1x128xf32>
    %cst_1 = arith.constant 0.000000e+00 : f32
    %2 = vector.broadcast %cst_1 : f32 to vector<256x128xf32>
    %c0 = arith.constant 0 : index
    %c0_2 = arith.constant 0 : index
    %c0_3 = arith.constant 0 : index
    %c0_4 = arith.constant 0 : index
    %3 = vector.load %arg1[%c0, %c0_2, %c0_3, %c0_4] : memref<1x18x18x128xbf16, #tpu.memory_space<vmem>>, vector<1x16x16x128xbf16>
    %4 = vector.shape_cast %3 : vector<1x16x16x128xbf16> to vector<16x16x128xbf16>
    %5 = vector.shape_cast %4 : vector<16x16x128xbf16> to vector<256x128xbf16>
    %c0_5 = arith.constant 0 : index
    %c0_6 = arith.constant 0 : index
    %c0_7 = arith.constant 0 : index
    %6 = vector.load %arg2[%c0_5, %c0_6, %c0_7] : memref<16x128x128xbf16, #tpu.memory_space<vmem>>, vector<1x128x128xbf16>
    %7 = vector.shape_cast %6 : vector<1x128x128xbf16> to vector<128x128xbf16>
    %cst_8 = arith.constant dense<0.000000e+00> : vector<256x128xf32>
    %8 = tpu.matmul %5, %7, %cst_8 {dimension_numbers = #tpu.dot_dimension_numbers<[1], [0], [0], [1], [0, 0, 1, 1], [], []>} : vector<256x128xbf16>, vector<128x128xbf16>, vector<256x128xf32> -> vector<256x128xf32>
    %9 = arith.addf %2, %8 : vector<256x128xf32>
    %c0_9 = arith.constant 0 : index
    %c0_10 = arith.constant 0 : index
    %c1 = arith.constant 1 : index
    %c0_11 = arith.constant 0 : index
    %10 = vector.load %arg1[%c0_9, %c0_10, %c1, %c0_11] : memref<1x18x18x128xbf16, #tpu.memory_space<vmem>>, vector<1x16x16x128xbf16>
    %11 = vector.shape_cast %10 : vector<1x16x16x128xbf16> to vector<16x16x128xbf16>
    %12 = vector.shape_cast %11 : vector<16x16x128xbf16> to vector<256x128xbf16>
    %c1_12 = arith.constant 1 : index
    %c0_13 = arith.constant 0 : index
    %c0_14 = arith.constant 0 : index
    %13 = vector.load %arg2[%c1_12, %c0_13, %c0_14] : memref<16x128x128xbf16, #tpu.memory_space<vmem>>, vector<1x128x128xbf16>
    %14 = vector.shape_cast %13 : vector<1x128x128xbf16> to vector<128x128xbf16>
    %cst_15 = arith.constant dense<0.000000e+00> : vector<256x128xf32>
    %15 = tpu.matmul %12, %14, %cst_15 {dimension_numbers = #tpu.dot_dimension_numbers<[1], [0], [0], [1], [0, 0, 1, 1], [], []>} : vector<256x128xbf16>, vector<128x128xbf16>, vector<256x128xf32> -> vector<256x128xf32>
    %16 = arith.addf %9, %15 : vector<256x128xf32>
    %c0_16 = arith.constant 0 : index
    %c1_17 = arith.constant 1 : index
    %c0_18 = arith.constant 0 : index
    %c0_19 = arith.constant 0 : index
    %17 = vector.load %arg1[%c0_16, %c1_17, %c0_18, %c0_19] : memref<1x18x18x128xbf16, #tpu.memory_space<vmem>>, vector<1x16x16x128xbf16>
    %18 = vector.shape_cast %17 : vector<1x16x16x128xbf16> to vector<16x16x128xbf16>
    %19 = vector.shape_cast %18 : vector<16x16x128xbf16> to vector<256x128xbf16>
    %c2 = arith.constant 2 : index
    %c0_20 = arith.constant 0 : index
    %c0_21 = arith.constant 0 : index
    %20 = vector.load %arg2[%c2, %c0_20, %c0_21] : memref<16x128x128xbf16, #tpu.memory_space<vmem>>, vector<1x128x128xbf16>
    %21 = vector.shape_cast %20 : vector<1x128x128xbf16> to vector<128x128xbf16>
    %cst_22 = arith.constant dense<0.000000e+00> : vector<256x128xf32>
    %22 = tpu.matmul %19, %21, %cst_22 {dimension_numbers = #tpu.dot_dimension_numbers<[1], [0], [0], [1], [0, 0, 1, 1], [], []>} : vector<256x128xbf16>, vector<128x128xbf16>, vector<256x128xf32> -> vector<256x128xf32>
    %23 = arith.addf %16, %22 : vector<256x128xf32>
    %c0_23 = arith.constant 0 : index
    %c1_24 = arith.constant 1 : index
    %c1_25 = arith.constant 1 : index
    %c0_26 = arith.constant 0 : index
    %24 = vector.load %arg1[%c0_23, %c1_24, %c1_25, %c0_26] : memref<1x18x18x128xbf16, #tpu.memory_space<vmem>>, vector<1x16x16x128xbf16>
    %25 = vector.shape_cast %24 : vector<1x16x16x128xbf16> to vector<16x16x128xbf16>
    %26 = vector.shape_cast %25 : vector<16x16x128xbf16> to vector<256x128xbf16>
    %c3 = arith.constant 3 : index
    %c0_27 = arith.constant 0 : index
    %c0_28 = arith.constant 0 : index
    %27 = vector.load %arg2[%c3, %c0_27, %c0_28] : memref<16x128x128xbf16, #tpu.memory_space<vmem>>, vector<1x128x128xbf16>
    %28 = vector.shape_cast %27 : vector<1x128x128xbf16> to vector<128x128xbf16>
    %cst_29 = arith.constant dense<0.000000e+00> : vector<256x128xf32>
    %29 = tpu.matmul %26, %28, %cst_29 {dimension_numbers = #tpu.dot_dimension_numbers<[1], [0], [0], [1], [0, 0, 1, 1], [], []>} : vector<256x128xbf16>, vector<128x128xbf16>, vector<256x128xf32> -> vector<256x128xf32>
    %30 = arith.addf %23, %29 : vector<256x128xf32>
    %c0_30 = arith.constant 0 : index
    %c0_31 = arith.constant 0 : index
    %c0_32 = arith.constant 0 : index
    %31 = vector.load %arg3[%c0_30, %c0_31, %c0_32] : memref<4x256x128xf32, #tpu.memory_space<vmem>>, vector<1x256x128xf32>
    %32 = vector.shape_cast %31 : vector<1x256x128xf32> to vector<256x128xf32>
    %33 = vector.shape_cast %30 : vector<256x128xf32> to vector<1x256x128xf32>
    tpu.vector_store %arg3[%c0_30, %c0_31, %c0_32], %33 {strides = array<i32>} : memref<4x256x128xf32, #tpu.memory_space<vmem>>, vector<1x256x128xf32>,
    %cst_33 = arith.constant dense<0.000000e+00> : vector<128xf32>
    %34 = vector.multi_reduction <add>, %30, %cst_33 [0] : vector<256x128xf32> to vector<128xf32>
    %35 = vector.shape_cast %34 : vector<128xf32> to vector<1x128xf32>
    %36 = arith.addf %0, %35 : vector<1x128xf32>
    %37 = arith.mulf %30, %30 : vector<256x128xf32>
    %cst_34 = arith.constant dense<0.000000e+00> : vector<128xf32>
    %38 = vector.multi_reduction <add>, %37, %cst_34 [0] : vector<256x128xf32> to vector<128xf32>
    %39 = vector.shape_cast %38 : vector<128xf32> to vector<1x128xf32>
    %40 = arith.addf %1, %39 : vector<1x128xf32>
    %cst_35 = arith.constant 0.000000e+00 : f32
    %41 = vector.broadcast %cst_35 : f32 to vector<256x128xf32>
    %c0_36 = arith.constant 0 : index
    %c0_37 = arith.constant 0 : index
    %c1_38 = arith.constant 1 : index
    %c0_39 = arith.constant 0 : index
    %42 = vector.load %arg1[%c0_36, %c0_37, %c1_38, %c0_39] : memref<1x18x18x128xbf16, #tpu.memory_space<vmem>>, vector<1x16x16x128xbf16>
    %43 = vector.shape_cast %42 : vector<1x16x16x128xbf16> to vector<16x16x128xbf16>
    %44 = vector.shape_cast %43 : vector<16x16x128xbf16> to vector<256x128xbf16>
    %c4 = arith.constant 4 : index
    %c0_40 = arith.constant 0 : index
    %c0_41 = arith.constant 0 : index
    %45 = vector.load %arg2[%c4, %c0_40, %c0_41] : memref<16x128x128xbf16, #tpu.memory_space<vmem>>, vector<1x128x128xbf16>
    %46 = vector.shape_cast %45 : vector<1x128x128xbf16> to vector<128x128xbf16>
    %cst_42 = arith.constant dense<0.000000e+00> : vector<256x128xf32>
    %47 = tpu.matmul %44, %46, %cst_42 {dimension_numbers = #tpu.dot_dimension_numbers<[1], [0], [0], [1], [0, 0, 1, 1], [], []>} : vector<256x128xbf16>, vector<128x128xbf16>, vector<256x128xf32> -> vector<256x128xf32>
    %48 = arith.addf %41, %47 : vector<256x128xf32>
    %c0_43 = arith.constant 0 : index
    %c0_44 = arith.constant 0 : index
    %c2_45 = arith.constant 2 : index
    %c0_46 = arith.constant 0 : index
    %49 = vector.load %arg1[%c0_43, %c0_44, %c2_45, %c0_46] : memref<1x18x18x128xbf16, #tpu.memory_space<vmem>>, vector<1x16x16x128xbf16>
    %50 = vector.shape_cast %49 : vector<1x16x16x128xbf16> to vector<16x16x128xbf16>
    %51 = vector.shape_cast %50 : vector<16x16x128xbf16> to vector<256x128xbf16>
    %c5 = arith.constant 5 : index
    %c0_47 = arith.constant 0 : index
    %c0_48 = arith.constant 0 : index
    %52 = vector.load %arg2[%c5, %c0_47, %c0_48] : memref<16x128x128xbf16, #tpu.memory_space<vmem>>, vector<1x128x128xbf16>
    %53 = vector.shape_cast %52 : vector<1x128x128xbf16> to vector<128x128xbf16>
    %cst_49 = arith.constant dense<0.000000e+00> : vector<256x128xf32>
    %54 = tpu.matmul %51, %53, %cst_49 {dimension_numbers = #tpu.dot_dimension_numbers<[1], [0], [0], [1], [0, 0, 1, 1], [], []>} : vector<256x128xbf16>, vector<128x128xbf16>, vector<256x128xf32> -> vector<256x128xf32>
    %55 = arith.addf %48, %54 : vector<256x128xf32>
    %c0_50 = arith.constant 0 : index
    %c1_51 = arith.constant 1 : index
    %c1_52 = arith.constant 1 : index
    %c0_53 = arith.constant 0 : index
    %56 = vector.load %arg1[%c0_50, %c1_51, %c1_52, %c0_53] : memref<1x18x18x128xbf16, #tpu.memory_space<vmem>>, vector<1x16x16x128xbf16>
    %57 = vector.shape_cast %56 : vector<1x16x16x128xbf16> to vector<16x16x128xbf16>
    %58 = vector.shape_cast %57 : vector<16x16x128xbf16> to vector<256x128xbf16>
    %c6 = arith.constant 6 : index
    %c0_54 = arith.constant 0 : index
    %c0_55 = arith.constant 0 : index
    %59 = vector.load %arg2[%c6, %c0_54, %c0_55] : memref<16x128x128xbf16, #tpu.memory_space<vmem>>, vector<1x128x128xbf16>
    %60 = vector.shape_cast %59 : vector<1x128x128xbf16> to vector<128x128xbf16>
    %cst_56 = arith.constant dense<0.000000e+00> : vector<256x128xf32>
    %61 = tpu.matmul %58, %60, %cst_56 {dimension_numbers = #tpu.dot_dimension_numbers<[1], [0], [0], [1], [0, 0, 1, 1], [], []>} : vector<256x128xbf16>, vector<128x128xbf16>, vector<256x128xf32> -> vector<256x128xf32>
    %62 = arith.addf %55, %61 : vector<256x128xf32>
    %c0_57 = arith.constant 0 : index
    %c1_58 = arith.constant 1 : index
    %c2_59 = arith.constant 2 : index
    %c0_60 = arith.constant 0 : index
    %63 = vector.load %arg1[%c0_57, %c1_58, %c2_59, %c0_60] : memref<1x18x18x128xbf16, #tpu.memory_space<vmem>>, vector<1x16x16x128xbf16>
    %64 = vector.shape_cast %63 : vector<1x16x16x128xbf16> to vector<16x16x128xbf16>
    %65 = vector.shape_cast %64 : vector<16x16x128xbf16> to vector<256x128xbf16>
    %c7 = arith.constant 7 : index
    %c0_61 = arith.constant 0 : index
    %c0_62 = arith.constant 0 : index
    %66 = vector.load %arg2[%c7, %c0_61, %c0_62] : memref<16x128x128xbf16, #tpu.memory_space<vmem>>, vector<1x128x128xbf16>
    %67 = vector.shape_cast %66 : vector<1x128x128xbf16> to vector<128x128xbf16>
    %cst_63 = arith.constant dense<0.000000e+00> : vector<256x128xf32>
    %68 = tpu.matmul %65, %67, %cst_63 {dimension_numbers = #tpu.dot_dimension_numbers<[1], [0], [0], [1], [0, 0, 1, 1], [], []>} : vector<256x128xbf16>, vector<128x128xbf16>, vector<256x128xf32> -> vector<256x128xf32>
    %69 = arith.addf %62, %68 : vector<256x128xf32>
    %c1_64 = arith.constant 1 : index
    %c0_65 = arith.constant 0 : index
    %c0_66 = arith.constant 0 : index
    %70 = vector.load %arg3[%c1_64, %c0_65, %c0_66] : memref<4x256x128xf32, #tpu.memory_space<vmem>>, vector<1x256x128xf32>
    %71 = vector.shape_cast %70 : vector<1x256x128xf32> to vector<256x128xf32>
    %72 = vector.shape_cast %69 : vector<256x128xf32> to vector<1x256x128xf32>
    tpu.vector_store %arg3[%c1_64, %c0_65, %c0_66], %72 {strides = array<i32>} : memref<4x256x128xf32, #tpu.memory_space<vmem>>, vector<1x256x128xf32>,
    %cst_67 = arith.constant dense<0.000000e+00> : vector<128xf32>
    %73 = vector.multi_reduction <add>, %69, %cst_67 [0] : vector<256x128xf32> to vector<128xf32>
    %74 = vector.shape_cast %73 : vector<128xf32> to vector<1x128xf32>
    %75 = arith.addf %36, %74 : vector<1x128xf32>
    %76 = arith.mulf %69, %69 : vector<256x128xf32>
    %cst_68 = arith.constant dense<0.000000e+00> : vector<128xf32>
    %77 = vector.multi_reduction <add>, %76, %cst_68 [0] : vector<256x128xf32> to vector<128xf32>
    %78 = vector.shape_cast %77 : vector<128xf32> to vector<1x128xf32>
    %79 = arith.addf %40, %78 : vector<1x128xf32>
    %cst_69 = arith.constant 0.000000e+00 : f32
    %80 = vector.broadcast %cst_69 : f32 to vector<256x128xf32>
    %c0_70 = arith.constant 0 : index
    %c1_71 = arith.constant 1 : index
    %c0_72 = arith.constant 0 : index
    %c0_73 = arith.constant 0 : index
    %81 = vector.load %arg1[%c0_70, %c1_71, %c0_72, %c0_73] : memref<1x18x18x128xbf16, #tpu.memory_space<vmem>>, vector<1x16x16x128xbf16>
    %82 = vector.shape_cast %81 : vector<1x16x16x128xbf16> to vector<16x16x128xbf16>
    %83 = vector.shape_cast %82 : vector<16x16x128xbf16> to vector<256x128xbf16>
    %c8 = arith.constant 8 : index
    %c0_74 = arith.constant 0 : index
    %c0_75 = arith.constant 0 : index
    %84 = vector.load %arg2[%c8, %c0_74, %c0_75] : memref<16x128x128xbf16, #tpu.memory_space<vmem>>, vector<1x128x128xbf16>
    %85 = vector.shape_cast %84 : vector<1x128x128xbf16> to vector<128x128xbf16>
    %cst_76 = arith.constant dense<0.000000e+00> : vector<256x128xf32>
    %86 = tpu.matmul %83, %85, %cst_76 {dimension_numbers = #tpu.dot_dimension_numbers<[1], [0], [0], [1], [0, 0, 1, 1], [], []>} : vector<256x128xbf16>, vector<128x128xbf16>, vector<256x128xf32> -> vector<256x128xf32>
    %87 = arith.addf %80, %86 : vector<256x128xf32>
    %c0_77 = arith.constant 0 : index
    %c1_78 = arith.constant 1 : index
    %c1_79 = arith.constant 1 : index
    %c0_80 = arith.constant 0 : index
    %88 = vector.load %arg1[%c0_77, %c1_78, %c1_79, %c0_80] : memref<1x18x18x128xbf16, #tpu.memory_space<vmem>>, vector<1x16x16x128xbf16>
    %89 = vector.shape_cast %88 : vector<1x16x16x128xbf16> to vector<16x16x128xbf16>
    %90 = vector.shape_cast %89 : vector<16x16x128xbf16> to vector<256x128xbf16>
    %c9 = arith.constant 9 : index
    %c0_81 = arith.constant 0 : index
    %c0_82 = arith.constant 0 : index
    %91 = vector.load %arg2[%c9, %c0_81, %c0_82] : memref<16x128x128xbf16, #tpu.memory_space<vmem>>, vector<1x128x128xbf16>
    %92 = vector.shape_cast %91 : vector<1x128x128xbf16> to vector<128x128xbf16>
    %cst_83 = arith.constant dense<0.000000e+00> : vector<256x128xf32>
    %93 = tpu.matmul %90, %92, %cst_83 {dimension_numbers = #tpu.dot_dimension_numbers<[1], [0], [0], [1], [0, 0, 1, 1], [], []>} : vector<256x128xbf16>, vector<128x128xbf16>, vector<256x128xf32> -> vector<256x128xf32>
    %94 = arith.addf %87, %93 : vector<256x128xf32>
    %c0_84 = arith.constant 0 : index
    %c2_85 = arith.constant 2 : index
    %c0_86 = arith.constant 0 : index
    %c0_87 = arith.constant 0 : index
    %95 = vector.load %arg1[%c0_84, %c2_85, %c0_86, %c0_87] : memref<1x18x18x128xbf16, #tpu.memory_space<vmem>>, vector<1x16x16x128xbf16>
    %96 = vector.shape_cast %95 : vector<1x16x16x128xbf16> to vector<16x16x128xbf16>
    %97 = vector.shape_cast %96 : vector<16x16x128xbf16> to vector<256x128xbf16>
    %c10 = arith.constant 10 : index
    %c0_88 = arith.constant 0 : index
    %c0_89 = arith.constant 0 : index
    %98 = vector.load %arg2[%c10, %c0_88, %c0_89] : memref<16x128x128xbf16, #tpu.memory_space<vmem>>, vector<1x128x128xbf16>
    %99 = vector.shape_cast %98 : vector<1x128x128xbf16> to vector<128x128xbf16>
    %cst_90 = arith.constant dense<0.000000e+00> : vector<256x128xf32>
    %100 = tpu.matmul %97, %99, %cst_90 {dimension_numbers = #tpu.dot_dimension_numbers<[1], [0], [0], [1], [0, 0, 1, 1], [], []>} : vector<256x128xbf16>, vector<128x128xbf16>, vector<256x128xf32> -> vector<256x128xf32>
    %101 = arith.addf %94, %100 : vector<256x128xf32>
    %c0_91 = arith.constant 0 : index
    %c2_92 = arith.constant 2 : index
    %c1_93 = arith.constant 1 : index
    %c0_94 = arith.constant 0 : index
    %102 = vector.load %arg1[%c0_91, %c2_92, %c1_93, %c0_94] : memref<1x18x18x128xbf16, #tpu.memory_space<vmem>>, vector<1x16x16x128xbf16>
    %103 = vector.shape_cast %102 : vector<1x16x16x128xbf16> to vector<16x16x128xbf16>
    %104 = vector.shape_cast %103 : vector<16x16x128xbf16> to vector<256x128xbf16>
    %c11 = arith.constant 11 : index
    %c0_95 = arith.constant 0 : index
    %c0_96 = arith.constant 0 : index
    %105 = vector.load %arg2[%c11, %c0_95, %c0_96] : memref<16x128x128xbf16, #tpu.memory_space<vmem>>, vector<1x128x128xbf16>
    %106 = vector.shape_cast %105 : vector<1x128x128xbf16> to vector<128x128xbf16>
    %cst_97 = arith.constant dense<0.000000e+00> : vector<256x128xf32>
    %107 = tpu.matmul %104, %106, %cst_97 {dimension_numbers = #tpu.dot_dimension_numbers<[1], [0], [0], [1], [0, 0, 1, 1], [], []>} : vector<256x128xbf16>, vector<128x128xbf16>, vector<256x128xf32> -> vector<256x128xf32>
    %108 = arith.addf %101, %107 : vector<256x128xf32>
    %c2_98 = arith.constant 2 : index
    %c0_99 = arith.constant 0 : index
    %c0_100 = arith.constant 0 : index
    %109 = vector.load %arg3[%c2_98, %c0_99, %c0_100] : memref<4x256x128xf32, #tpu.memory_space<vmem>>, vector<1x256x128xf32>
    %110 = vector.shape_cast %109 : vector<1x256x128xf32> to vector<256x128xf32>
    %111 = vector.shape_cast %108 : vector<256x128xf32> to vector<1x256x128xf32>
    tpu.vector_store %arg3[%c2_98, %c0_99, %c0_100], %111 {strides = array<i32>} : memref<4x256x128xf32, #tpu.memory_space<vmem>>, vector<1x256x128xf32>,
    %cst_101 = arith.constant dense<0.000000e+00> : vector<128xf32>
    %112 = vector.multi_reduction <add>, %108, %cst_101 [0] : vector<256x128xf32> to vector<128xf32>
    %113 = vector.shape_cast %112 : vector<128xf32> to vector<1x128xf32>
    %114 = arith.addf %75, %113 : vector<1x128xf32>
    %115 = arith.mulf %108, %108 : vector<256x128xf32>
    %cst_102 = arith.constant dense<0.000000e+00> : vector<128xf32>
    %116 = vector.multi_reduction <add>, %115, %cst_102 [0] : vector<256x128xf32> to vector<128xf32>
    %117 = vector.shape_cast %116 : vector<128xf32> to vector<1x128xf32>
    %118 = arith.addf %79, %117 : vector<1x128xf32>
    %cst_103 = arith.constant 0.000000e+00 : f32
    %119 = vector.broadcast %cst_103 : f32 to vector<256x128xf32>
    %c0_104 = arith.constant 0 : index
    %c1_105 = arith.constant 1 : index
    %c1_106 = arith.constant 1 : index
    %c0_107 = arith.constant 0 : index
    %120 = vector.load %arg1[%c0_104, %c1_105, %c1_106, %c0_107] : memref<1x18x18x128xbf16, #tpu.memory_space<vmem>>, vector<1x16x16x128xbf16>
    %121 = vector.shape_cast %120 : vector<1x16x16x128xbf16> to vector<16x16x128xbf16>
    %122 = vector.shape_cast %121 : vector<16x16x128xbf16> to vector<256x128xbf16>
    %c12 = arith.constant 12 : index
    %c0_108 = arith.constant 0 : index
    %c0_109 = arith.constant 0 : index
    %123 = vector.load %arg2[%c12, %c0_108, %c0_109] : memref<16x128x128xbf16, #tpu.memory_space<vmem>>, vector<1x128x128xbf16>
    %124 = vector.shape_cast %123 : vector<1x128x128xbf16> to vector<128x128xbf16>
    %cst_110 = arith.constant dense<0.000000e+00> : vector<256x128xf32>
    %125 = tpu.matmul %122, %124, %cst_110 {dimension_numbers = #tpu.dot_dimension_numbers<[1], [0], [0], [1], [0, 0, 1, 1], [], []>} : vector<256x128xbf16>, vector<128x128xbf16>, vector<256x128xf32> -> vector<256x128xf32>
    %126 = arith.addf %119, %125 : vector<256x128xf32>
    %c0_111 = arith.constant 0 : index
    %c1_112 = arith.constant 1 : index
    %c2_113 = arith.constant 2 : index
    %c0_114 = arith.constant 0 : index
    %127 = vector.load %arg1[%c0_111, %c1_112, %c2_113, %c0_114] : memref<1x18x18x128xbf16, #tpu.memory_space<vmem>>, vector<1x16x16x128xbf16>
    %128 = vector.shape_cast %127 : vector<1x16x16x128xbf16> to vector<16x16x128xbf16>
    %129 = vector.shape_cast %128 : vector<16x16x128xbf16> to vector<256x128xbf16>
    %c13 = arith.constant 13 : index
    %c0_115 = arith.constant 0 : index
    %c0_116 = arith.constant 0 : index
    %130 = vector.load %arg2[%c13, %c0_115, %c0_116] : memref<16x128x128xbf16, #tpu.memory_space<vmem>>, vector<1x128x128xbf16>
    %131 = vector.shape_cast %130 : vector<1x128x128xbf16> to vector<128x128xbf16>
    %cst_117 = arith.constant dense<0.000000e+00> : vector<256x128xf32>
    %132 = tpu.matmul %129, %131, %cst_117 {dimension_numbers = #tpu.dot_dimension_numbers<[1], [0], [0], [1], [0, 0, 1, 1], [], []>} : vector<256x128xbf16>, vector<128x128xbf16>, vector<256x128xf32> -> vector<256x128xf32>
    %133 = arith.addf %126, %132 : vector<256x128xf32>
    %c0_118 = arith.constant 0 : index
    %c2_119 = arith.constant 2 : index
    %c1_120 = arith.constant 1 : index
    %c0_121 = arith.constant 0 : index
    %134 = vector.load %arg1[%c0_118, %c2_119, %c1_120, %c0_121] : memref<1x18x18x128xbf16, #tpu.memory_space<vmem>>, vector<1x16x16x128xbf16>
    %135 = vector.shape_cast %134 : vector<1x16x16x128xbf16> to vector<16x16x128xbf16>
    %136 = vector.shape_cast %135 : vector<16x16x128xbf16> to vector<256x128xbf16>
    %c14 = arith.constant 14 : index
    %c0_122 = arith.constant 0 : index
    %c0_123 = arith.constant 0 : index
    %137 = vector.load %arg2[%c14, %c0_122, %c0_123] : memref<16x128x128xbf16, #tpu.memory_space<vmem>>, vector<1x128x128xbf16>
    %138 = vector.shape_cast %137 : vector<1x128x128xbf16> to vector<128x128xbf16>
    %cst_124 = arith.constant dense<0.000000e+00> : vector<256x128xf32>
    %139 = tpu.matmul %136, %138, %cst_124 {dimension_numbers = #tpu.dot_dimension_numbers<[1], [0], [0], [1], [0, 0, 1, 1], [], []>} : vector<256x128xbf16>, vector<128x128xbf16>, vector<256x128xf32> -> vector<256x128xf32>
    %140 = arith.addf %133, %139 : vector<256x128xf32>
    %c0_125 = arith.constant 0 : index
    %c2_126 = arith.constant 2 : index
    %c2_127 = arith.constant 2 : index
    %c0_128 = arith.constant 0 : index
    %141 = vector.load %arg1[%c0_125, %c2_126, %c2_127, %c0_128] : memref<1x18x18x128xbf16, #tpu.memory_space<vmem>>, vector<1x16x16x128xbf16>
    %142 = vector.shape_cast %141 : vector<1x16x16x128xbf16> to vector<16x16x128xbf16>
    %143 = vector.shape_cast %142 : vector<16x16x128xbf16> to vector<256x128xbf16>
    %c15 = arith.constant 15 : index
    %c0_129 = arith.constant 0 : index
    %c0_130 = arith.constant 0 : index
    %144 = vector.load %arg2[%c15, %c0_129, %c0_130] : memref<16x128x128xbf16, #tpu.memory_space<vmem>>, vector<1x128x128xbf16>
    %145 = vector.shape_cast %144 : vector<1x128x128xbf16> to vector<128x128xbf16>
    %cst_131 = arith.constant dense<0.000000e+00> : vector<256x128xf32>
    %146 = tpu.matmul %143, %145, %cst_131 {dimension_numbers = #tpu.dot_dimension_numbers<[1], [0], [0], [1], [0, 0, 1, 1], [], []>} : vector<256x128xbf16>, vector<128x128xbf16>, vector<256x128xf32> -> vector<256x128xf32>
    %147 = arith.addf %140, %146 : vector<256x128xf32>
    %c3_132 = arith.constant 3 : index
    %c0_133 = arith.constant 0 : index
    %c0_134 = arith.constant 0 : index
    %148 = vector.load %arg3[%c3_132, %c0_133, %c0_134] : memref<4x256x128xf32, #tpu.memory_space<vmem>>, vector<1x256x128xf32>
    %149 = vector.shape_cast %148 : vector<1x256x128xf32> to vector<256x128xf32>
    %150 = vector.shape_cast %147 : vector<256x128xf32> to vector<1x256x128xf32>
    tpu.vector_store %arg3[%c3_132, %c0_133, %c0_134], %150 {strides = array<i32>} : memref<4x256x128xf32, #tpu.memory_space<vmem>>, vector<1x256x128xf32>,
    %cst_135 = arith.constant dense<0.000000e+00> : vector<128xf32>
    %151 = vector.multi_reduction <add>, %147, %cst_135 [0] : vector<256x128xf32> to vector<128xf32>
    %152 = vector.shape_cast %151 : vector<128xf32> to vector<1x128xf32>
    %153 = arith.addf %114, %152 : vector<1x128xf32>
    %154 = arith.mulf %147, %147 : vector<256x128xf32>
    %cst_136 = arith.constant dense<0.000000e+00> : vector<128xf32>
    %155 = vector.multi_reduction <add>, %154, %cst_136 [0] : vector<256x128xf32> to vector<128xf32>
    %156 = vector.shape_cast %155 : vector<128xf32> to vector<1x128xf32>
    %157 = arith.addf %118, %156 : vector<1x128xf32>
    %c0_137 = arith.constant 0 : index
    %c0_138 = arith.constant 0 : index
    %c0_139 = arith.constant 0 : index
    %158 = vector.load %arg4[%c0_137, %c0_138, %c0_139] : memref<1x2x128xf32, #tpu.memory_space<vmem>>, vector<1x1x128xf32>
    %159 = vector.shape_cast %158 : vector<1x1x128xf32> to vector<1x128xf32>
    %160 = vector.shape_cast %153 : vector<1x128xf32> to vector<1x1x128xf32>
    tpu.vector_store %arg4[%c0_137, %c0_138, %c0_139], %160 {strides = array<i32>} : memref<1x2x128xf32, #tpu.memory_space<vmem>>, vector<1x1x128xf32>,
    %c0_140 = arith.constant 0 : index
    %c1_141 = arith.constant 1 : index
    %c0_142 = arith.constant 0 : index
    %161 = vector.load %arg4[%c0_140, %c1_141, %c0_142] : memref<1x2x128xf32, #tpu.memory_space<vmem>>, vector<1x1x128xf32>
    %162 = vector.shape_cast %161 : vector<1x1x128xf32> to vector<1x128xf32>
    %163 = vector.shape_cast %157 : vector<1x128xf32> to vector<1x1x128xf32>
    tpu.vector_store %arg4[%c0_140, %c1_141, %c0_142], %163 {strides = array<i32>} : memref<1x2x128xf32, #tpu.memory_space<vmem>>, vector<1x1x128xf32>,
    return
  }
  func.func @transform_0(%arg0: i32) -> (i32, i32, i32, i32) {
    %c0_i32 = arith.constant 0 : i32
    %c0_i32_0 = arith.constant 0 : i32
    %c0_i32_1 = arith.constant 0 : i32
    %c0_i32_2 = arith.constant 0 : i32
    return %arg0, %c0_i32, %c0_i32_0, %c0_i32_1 : i32, i32, i32, i32
  }
  func.func @transform_1(%arg0: i32) -> (i32, i32, i32) {
    %c0_i32 = arith.constant 0 : i32
    %c0_i32_0 = arith.constant 0 : i32
    %c0_i32_1 = arith.constant 0 : i32
    %c0_i32_2 = arith.constant 0 : i32
    return %c0_i32, %c0_i32_0, %c0_i32_1 : i32, i32, i32
  }
  func.func @transform_2(%arg0: i32) -> (i32, i32, i32) {
    %c0_i32 = arith.constant 0 : i32
    %c0_i32_0 = arith.constant 0 : i32
    %c0_i32_1 = arith.constant 0 : i32
    return %arg0, %c0_i32, %c0_i32_0 : i32, i32, i32
  }
  func.func @transform_3(%arg0: i32) -> (i32, i32, i32) {
    %c0_i32 = arith.constant 0 : i32
    %c0_i32_0 = arith.constant 0 : i32
    %c0_i32_1 = arith.constant 0 : i32
    return %arg0, %c0_i32, %c0_i32_0 : i32, i32, i32
  }
}

module attributes {stable_mosaic.version = 11 : i64} {
  func.func @_bn_relu_kernel(%arg0: i32, %arg1: memref<2048x128xf32, #tpu.memory_space<vmem>>, %arg2: memref<1x128xf32, #tpu.memory_space<vmem>>, %arg3: memref<1x128xf32, #tpu.memory_space<vmem>>, %arg4: memref<2048x128xf32, #tpu.memory_space<vmem>>) attributes {dimension_semantics = [#tpu.dimension_semantics<parallel>], iteration_bounds = array<i64: 1>, scalar_prefetch = 0 : i64, scratch_operands = 0 : i64, tpu.core_type = #tpu.core_type<tc>, window_params = [{transform_indices = @transform_0, window_bounds = array<i64: 2048, 128>}, {pipeline_mode = #tpu.pipeline_mode<synchronous>, transform_indices = @transform_1, window_bounds = array<i64: 1, 128>}, {pipeline_mode = #tpu.pipeline_mode<synchronous>, transform_indices = @transform_2, window_bounds = array<i64: 1, 128>}, {transform_indices = @transform_3, window_bounds = array<i64: 2048, 128>}]} {
    %c0 = arith.constant 0 : index
    %c0_0 = arith.constant 0 : index
    %0 = vector.load %arg1[%c0, %c0_0] : memref<2048x128xf32, #tpu.memory_space<vmem>>, vector<2048x128xf32>
    %c0_1 = arith.constant 0 : index
    %c0_2 = arith.constant 0 : index
    %1 = vector.load %arg2[%c0_1, %c0_2] : memref<1x128xf32, #tpu.memory_space<vmem>>, vector<1x128xf32>
    %2 = vector.broadcast %1 : vector<1x128xf32> to vector<2048x128xf32>
    %3 = arith.mulf %0, %2 : vector<2048x128xf32>
    %c0_3 = arith.constant 0 : index
    %c0_4 = arith.constant 0 : index
    %4 = vector.load %arg3[%c0_3, %c0_4] : memref<1x128xf32, #tpu.memory_space<vmem>>, vector<1x128xf32>
    %5 = vector.broadcast %4 : vector<1x128xf32> to vector<2048x128xf32>
    %6 = arith.addf %3, %5 : vector<2048x128xf32>
    %cst = arith.constant 0.000000e+00 : f32
    %7 = vector.broadcast %cst : f32 to vector<2048x128xf32>
    %8 = arith.maximumf %6, %7 : vector<2048x128xf32>
    %c0_5 = arith.constant 0 : index
    %c0_6 = arith.constant 0 : index
    %9 = vector.load %arg4[%c0_5, %c0_6] : memref<2048x128xf32, #tpu.memory_space<vmem>>, vector<2048x128xf32>
    tpu.vector_store %arg4[%c0_5, %c0_6], %8 {strides = array<i32>} : memref<2048x128xf32, #tpu.memory_space<vmem>>, vector<2048x128xf32>,
    return
  }
  func.func @transform_0(%arg0: i32) -> (i32, i32) {
    %c0_i32 = arith.constant 0 : i32
    %c0_i32_0 = arith.constant 0 : i32
    return %arg0, %c0_i32 : i32, i32
  }
  func.func @transform_1(%arg0: i32) -> (i32, i32) {
    %c0_i32 = arith.constant 0 : i32
    %c0_i32_0 = arith.constant 0 : i32
    %c0_i32_1 = arith.constant 0 : i32
    return %c0_i32, %c0_i32_0 : i32, i32
  }
  func.func @transform_2(%arg0: i32) -> (i32, i32) {
    %c0_i32 = arith.constant 0 : i32
    %c0_i32_0 = arith.constant 0 : i32
    %c0_i32_1 = arith.constant 0 : i32
    return %c0_i32, %c0_i32_0 : i32, i32
  }
  func.func @transform_3(%arg0: i32) -> (i32, i32) {
    %c0_i32 = arith.constant 0 : i32
    %c0_i32_0 = arith.constant 0 : i32
    return %arg0, %c0_i32 : i32, i32
  }
}

</mosaic_0001>

<bundles_post_ra>
// kernel: up_conv_forward.3
= control target key start
LH: loop header
LB: loop body
LE: loop exit
PB: predicated region body
PF: predicated region fallthrough
CT: control target
= control target key end

     0   :  { %s3416_s0 = inlined_call_operand.vmem [shape: f32[2048,128], index: 0, kind: input, shape index: {}, may-alias: {0,3}]   ;;  %s3417_s1 = inlined_call_operand.vmem [shape: f32[1,128], index: 1, kind: input, shape index: {}]   ;;  %s3418_s2 = inlined_call_operand.vmem [shape: f32[1,128], index: 2, kind: input, shape index: {}]   ;;  %s3419_s3 = inlined_call_operand.vmem [shape: f32[2048,128], index: 3, kind: output, shape index: {}, may-alias: {0,3}]  }
   0x1   :  { %v14_v0 = vld [vmem:[%s3416_s0] sm:$0xff]  ;;  %v15_v4 = vld [vmem:[%s3416_s0 + $0x8] sm:$0xff]  ;;  %v16_v5 = vld [vmem:[%s3416_s0 + $0x10] sm:$0xff] }
   0x2   :  { %v1344_v1 = vld [vmem:[%s3417_s1] ss:$0 sm:$0xff]  ;;  %v17_v6 = vld [vmem:[%s3416_s0 + $0x18] sm:$0xff]  ;;  %v19_v11 = vld [vmem:[%s3416_s0 + $0x28] sm:$0xff] }
   0x3   :  { %v1349_v2 = vld [vmem:[%s3418_s2] ss:$0 sm:$0xff]  ;;  %v277_v3 = vmul.f32 %v1344_v1, %v14_v0  ;;  %v278_v7 = vmul.f32 %v1344_v1, %v15_v4  ;;  %v279_v8 = vmul.f32 %v1344_v1, %v16_v5  ;;  %v280_v9 = vmul.f32 %v1344_v1, %v17_v6  ;;  %v20_v12 = vld [vmem:[%s3416_s0 + $0x30] sm:$0xff]  ;;  %v21_v17 = vld [vmem:[%s3416_s0 + $0x38] sm:$0xff] }
   0x4   :  { %v18_v10 = vld [vmem:[%s3416_s0 + $0x20] sm:$0xff]  ;;  %v282_v15 = vmul.f32 %v1344_v1, %v19_v11  ;;  %v283_v16 = vmul.f32 %v1344_v1, %v20_v12  ;;  %v284_v21 = vmul.f32 %v1344_v1, %v21_v17  ;;  %v23_v27 = vld [vmem:[%s3416_s0 + $0x48] sm:$0xff]  ;;  %v24_v28 = vld [vmem:[%s3416_s0 + $0x50] sm:$0xff] }
   0x5   :  { %v540_v13 = vadd.f32 %v1349_v2, %v277_v3  ;;  %v281_v14 = vmul.f32 %v1344_v1, %v18_v10  ;;  %v541_v18 = vadd.f32 %v1349_v2, %v278_v7  ;;  %v542_v19 = vadd.f32 %v1349_v2, %v279_v8  ;;  %v22_v22 = vld [vmem:[%s3416_s0 + $0x40] sm:$0xff]  ;;  %v25_v29 = vld [vmem:[%s3416_s0 + $0x58] sm:$0xff]  ;;  %v27_v35 = vld [vmem:[%s3416_s0 + $0x68] sm:$0xff] }
   0x6   :  { %v543_v20 = vadd.f32 %v1349_v2, %v280_v9  ;;  %v545_v25 = vadd.f32 %v1349_v2, %v282_v15  ;;  %v546_v26 = vadd.f32 %v1349_v2, %v283_v16  ;;  %v547_v33 = vadd.f32 %v1349_v2, %v284_v21  ;;  %v26_v34 = vld [vmem:[%s3416_s0 + $0x60] sm:$0xff]  ;;  %v28_v36 = vld [vmem:[%s3416_s0 + $0x70] sm:$0xff] }
   0x7   :  { %v796_v23 = vmax.f32 %v540_v13, 0.0  ;;  %v544_v24 = vadd.f32 %v1349_v2, %v281_v14  ;;  %v797_v30 = vmax.f32 %v541_v18, 0.0  ;;  %v798_v31 = vmax.f32 %v542_v19, 0.0 }
   0x8   :  { %v799_v32 = vmax.f32 %v543_v20, 0.0  ;;  %v801_v38 = vmax.f32 %v545_v25, 0.0  ;;  %v802_v39 = vmax.f32 %v546_v26, 0.0  ;;  %v285_v40 = vmul.f32 %v1344_v1, %v22_v22 }
   0x9   :  { %1052 = vst [vmem:[%s3419_s3] sm:$0xff] %v796_v23  ;;  %v800_v37 = vmax.f32 %v544_v24, 0.0  ;;  %v803_v42 = vmax.f32 %v547_v33, 0.0  ;;  %v286_v43 = vmul.f32 %v1344_v1, %v23_v27  ;;  %v287_v44 = vmul.f32 %v1344_v1, %v24_v28 }
   0xa   :  { %v288_v45 = vmul.f32 %v1344_v1, %v25_v29  ;;  %v548_v46 = vadd.f32 %v1349_v2, %v285_v40  ;;  %v289_v47 = vmul.f32 %v1344_v1, %v26_v34  ;;  %v290_v48 = vmul.f32 %v1344_v1, %v27_v35 }
   0xb   :  { %v291_v49 = vmul.f32 %v1344_v1, %v28_v36  ;;  %v549_v50 = vadd.f32 %v1349_v2, %v286_v43  ;;  %v550_v51 = vadd.f32 %v1349_v2, %v287_v44 }
   0xc   :  { %v551_v52 = vadd.f32 %v1349_v2, %v288_v45  ;;  %v804_v55 = vmax.f32 %v548_v46, 0.0  ;;  %v552_v56 = vadd.f32 %v1349_v2, %v289_v47  ;;  %v553_v57 = vadd.f32 %v1349_v2, %v290_v48 }
   0xd   :  { %v554_v58 = vadd.f32 %v1349_v2, %v291_v49  ;;  %v805_v62 = vmax.f32 %v549_v50, 0.0  ;;  %v806_v63 = vmax.f32 %v550_v51, 0.0 }
   0xe   :  { %v807_v0 = vmax.f32 %v551_v52, 0.0  ;;  %v808_v7 = vmax.f32 %v552_v56, 0.0  ;;  %v809_v8 = vmax.f32 %v553_v57, 0.0 }
   0xf   :  { %v810_v9 = vmax.f32 %v554_v58, 0.0 }
  0x10   :  { %v29_v41 = vld [vmem:[%s3416_s0 + $0x78] sm:$0xff] }
  0x11   :  { %1053 = vst [vmem:[%s3419_s3 + $0x8] sm:$0xff] %v797_v30  ;;  %1054 = vst [vmem:[%s3419_s3 + $0x10] sm:$0xff] %v798_v31  ;;  %v292_v53 = vmul.f32 %v1344_v1, %v29_v41 }
  0x12   :  { %1055 = vst [vmem:[%s3419_s3 + $0x18] sm:$0xff] %v799_v32  ;;  %1056 = vst [vmem:[%s3419_s3 + $0x20] sm:$0xff] %v800_v37 }
  0x13   :  { %1057 = vst [vmem:[%s3419_s3 + $0x28] sm:$0xff] %v801_v38  ;;  %1058 = vst [vmem:[%s3419_s3 + $0x30] sm:$0xff] %v802_v39  ;;  %v555_v3 = vadd.f32 %v1349_v2, %v292_v53 }
  0x14   :  { %1059 = vst [vmem:[%s3419_s3 + $0x38] sm:$0xff] %v803_v42 }
  0x15   :  { %v811_v12 = vmax.f32 %v555_v3, 0.0 }
  0x1b   :  { %v30_v54 = vld [vmem:[%s3416_s0 + $0x80] sm:$0xff]  ;;  %v31_v59 = vld [vmem:[%s3416_s0 + $0x88] sm:$0xff]  ;;  %v32_v60 = vld [vmem:[%s3416_s0 + $0x90] sm:$0xff] }
  0x1c   :  { %v33_v61 = vld [vmem:[%s3416_s0 + $0x98] sm:$0xff]  ;;  %v34_v4 = vld [vmem:[%s3416_s0 + $0xa0] sm:$0xff]  ;;  %v35_v5 = vld [vmem:[%s3416_s0 + $0xa8] sm:$0xff]  ;;  %v293_v10 = vmul.f32 %v1344_v1, %v30_v54  ;;  %v294_v13 = vmul.f32 %v1344_v1, %v31_v59  ;;  %v295_v14 = vmul.f32 %v1344_v1, %v32_v60 }
  0x1d   :  { %v36_v6 = vld [vmem:[%s3416_s0 + $0xb0] sm:$0xff]  ;;  %v296_v15 = vmul.f32 %v1344_v1, %v33_v61  ;;  %v297_v17 = vmul.f32 %v1344_v1, %v34_v4  ;;  %v298_v18 = vmul.f32 %v1344_v1, %v35_v5 }
  0x1e   :  { %1060 = vst [vmem:[%s3419_s3 + $0x40] sm:$0xff] %v804_v55  ;;  %v556_v16 = vadd.f32 %v1349_v2, %v293_v10  ;;  %v299_v19 = vmul.f32 %v1344_v1, %v36_v6  ;;  %v557_v20 = vadd.f32 %v1349_v2, %v294_v13  ;;  %v558_v21 = vadd.f32 %v1349_v2, %v295_v14 }
  0x1f   :  { %v559_v22 = vadd.f32 %v1349_v2, %v296_v15  ;;  %v560_v26 = vadd.f32 %v1349_v2, %v297_v17  ;;  %v561_v27 = vadd.f32 %v1349_v2, %v298_v18 }
  0x20   :  { %v812_v25 = vmax.f32 %v556_v16, 0.0  ;;  %v562_v28 = vadd.f32 %v1349_v2, %v299_v19  ;;  %v813_v32 = vmax.f32 %v557_v20, 0.0  ;;  %v814_v33 = vmax.f32 %v558_v21, 0.0 }
  0x21   :  { %v815_v34 = vmax.f32 %v559_v22, 0.0  ;;  %v816_v39 = vmax.f32 %v560_v26, 0.0  ;;  %v817_v40 = vmax.f32 %v561_v27, 0.0 }
  0x22   :  { %v818_v41 = vmax.f32 %v562_v28, 0.0 }
  0x25   :  { %v37_v11 = vld [vmem:[%s3416_s0 + $0xb8] sm:$0xff] }
  0x26   :  { %1061 = vst [vmem:[%s3419_s3 + $0x48] sm:$0xff] %v805_v62  ;;  %1062 = vst [vmem:[%s3419_s3 + $0x50] sm:$0xff] %v806_v63  ;;  %v300_v23 = vmul.f32 %v1344_v1, %v37_v11 }
  0x27   :  { %1063 = vst [vmem:[%s3419_s3 + $0x58] sm:$0xff] %v807_v0  ;;  %1064 = vst [vmem:[%s3419_s3 + $0x60] sm:$0xff] %v808_v7 }
  0x28   :  { %1065 = vst [vmem:[%s3419_s3 + $0x68] sm:$0xff] %v809_v8  ;;  %1066 = vst [vmem:[%s3419_s3 + $0x70] sm:$0xff] %v810_v9  ;;  %v563_v35 = vadd.f32 %v1349_v2, %v300_v23 }
  0x29   :  { %1067 = vst [vmem:[%s3419_s3 + $0x78] sm:$0xff] %v811_v12 }
  0x2a   :  { %v819_v44 = vmax.f32 %v563_v35, 0.0 }
  0x30   :  { %v38_v24 = vld [vmem:[%s3416_s0 + $0xc0] sm:$0xff]  ;;  %v39_v29 = vld [vmem:[%s3416_s0 + $0xc8] sm:$0xff]  ;;  %v40_v30 = vld [vmem:[%s3416_s0 + $0xd0] sm:$0xff] }
  0x31   :  { %v41_v31 = vld [vmem:[%s3416_s0 + $0xd8] sm:$0xff]  ;;  %v42_v36 = vld [vmem:[%s3416_s0 + $0xe0] sm:$0xff]  ;;  %v43_v37 = vld [vmem:[%s3416_s0 + $0xe8] sm:$0xff]  ;;  %v301_v42 = vmul.f32 %v1344_v1, %v38_v24  ;;  %v302_v45 = vmul.f32 %v1344_v1, %v39_v29  ;;  %v303_v46 = vmul.f32 %v1344_v1, %v40_v30 }
  0x32   :  { %v44_v38 = vld [vmem:[%s3416_s0 + $0xf0] sm:$0xff]  ;;  %v304_v47 = vmul.f32 %v1344_v1, %v41_v31  ;;  %v305_v49 = vmul.f32 %v1344_v1, %v42_v36  ;;  %v306_v50 = vmul.f32 %v1344_v1, %v43_v37 }
  0x33   :  { %1068 = vst [vmem:[%s3419_s3 + $0x80] sm:$0xff] %v812_v25  ;;  %v564_v48 = vadd.f32 %v1349_v2, %v301_v42  ;;  %v307_v51 = vmul.f32 %v1344_v1, %v44_v38  ;;  %v565_v52 = vadd.f32 %v1349_v2, %v302_v45  ;;  %v566_v53 = vadd.f32 %v1349_v2, %v303_v46 }
  0x34   :  { %v567_v54 = vadd.f32 %v1349_v2, %v304_v47  ;;  %v568_v58 = vadd.f32 %v1349_v2, %v305_v49  ;;  %v569_v59 = vadd.f32 %v1349_v2, %v306_v50 }
  0x35   :  { %v820_v57 = vmax.f32 %v564_v48, 0.0  ;;  %v570_v60 = vadd.f32 %v1349_v2, %v307_v51  ;;  %v821_v0 = vmax.f32 %v565_v52, 0.0  ;;  %v822_v3 = vmax.f32 %v566_v53, 0.0 }
  0x36   :  { %v823_v4 = vmax.f32 %v567_v54, 0.0  ;;  %v824_v9 = vmax.f32 %v568_v58, 0.0  ;;  %v825_v10 = vmax.f32 %v569_v59, 0.0 }
  0x37   :  { %v826_v11 = vmax.f32 %v570_v60, 0.0 }
  0x3a   :  { %v45_v43 = vld [vmem:[%s3416_s0 + $0xf8] sm:$0xff] }
  0x3b   :  { %1069 = vst [vmem:[%s3419_s3 + $0x88] sm:$0xff] %v813_v32  ;;  %1070 = vst [vmem:[%s3419_s3 + $0x90] sm:$0xff] %v814_v33  ;;  %v308_v55 = vmul.f32 %v1344_v1, %v45_v43 }
  0x3c   :  { %1071 = vst [vmem:[%s3419_s3 + $0x98] sm:$0xff] %v815_v34  ;;  %1072 = vst [vmem:[%s3419_s3 + $0xa0] sm:$0xff] %v816_v39 }
  0x3d   :  { %1073 = vst [vmem:[%s3419_s3 + $0xa8] sm:$0xff] %v817_v40  ;;  %1074 = vst [vmem:[%s3419_s3 + $0xb0] sm:$0xff] %v818_v41  ;;  %v571_v5 = vadd.f32 %v1349_v2, %v308_v55 }
  0x3e   :  { %1075 = vst [vmem:[%s3419_s3 + $0xb8] sm:$0xff] %v819_v44 }
  0x3f   :  { %v827_v14 = vmax.f32 %v571_v5, 0.0 }
  0x45   :  { %v46_v56 = vld [vmem:[%s3416_s0 + $0x100] sm:$0xff]  ;;  %v47_v61 = vld [vmem:[%s3416_s0 + $0x108] sm:$0xff]  ;;  %v48_v62 = vld [vmem:[%s3416_s0 + $0x110] sm:$0xff] }
  0x46   :  { %v49_v63 = vld [vmem:[%s3416_s0 + $0x118] sm:$0xff]  ;;  %v50_v6 = vld [vmem:[%s3416_s0 + $0x120] sm:$0xff]  ;;  %v51_v7 = vld [vmem:[%s3416_s0 + $0x128] sm:$0xff]  ;;  %v309_v12 = vmul.f32 %v1344_v1, %v46_v56  ;;  %v310_v15 = vmul.f32 %v1344_v1, %v47_v61  ;;  %v311_v16 = vmul.f32 %v1344_v1, %v48_v62 }
  0x47   :  { %v52_v8 = vld [vmem:[%s3416_s0 + $0x130] sm:$0xff]  ;;  %v312_v17 = vmul.f32 %v1344_v1, %v49_v63  ;;  %v313_v19 = vmul.f32 %v1344_v1, %v50_v6  ;;  %v314_v20 = vmul.f32 %v1344_v1, %v51_v7 }
  0x48   :  { %1076 = vst [vmem:[%s3419_s3 + $0xc0] sm:$0xff] %v820_v57  ;;  %v572_v18 = vadd.f32 %v1349_v2, %v309_v12  ;;  %v315_v21 = vmul.f32 %v1344_v1, %v52_v8  ;;  %v573_v22 = vadd.f32 %v1349_v2, %v310_v15  ;;  %v574_v23 = vadd.f32 %v1349_v2, %v311_v16 }
  0x49   :  { %v575_v24 = vadd.f32 %v1349_v2, %v312_v17  ;;  %v576_v28 = vadd.f32 %v1349_v2, %v313_v19  ;;  %v577_v29 = vadd.f32 %v1349_v2, %v314_v20 }
  0x4a   :  { %v828_v27 = vmax.f32 %v572_v18, 0.0  ;;  %v578_v30 = vadd.f32 %v1349_v2, %v315_v21  ;;  %v829_v34 = vmax.f32 %v573_v22, 0.0  ;;  %v830_v35 = vmax.f32 %v574_v23, 0.0 }
  0x4b   :  { %v831_v36 = vmax.f32 %v575_v24, 0.0  ;;  %v832_v41 = vmax.f32 %v576_v28, 0.0  ;;  %v833_v42 = vmax.f32 %v577_v29, 0.0 }
  0x4c   :  { %v834_v43 = vmax.f32 %v578_v30, 0.0 }
  0x4f   :  { %v53_v13 = vld [vmem:[%s3416_s0 + $0x138] sm:$0xff] }
  0x50   :  { %1077 = vst [vmem:[%s3419_s3 + $0xc8] sm:$0xff] %v821_v0  ;;  %1078 = vst [vmem:[%s3419_s3 + $0xd0] sm:$0xff] %v822_v3  ;;  %v316_v25 = vmul.f32 %v1344_v1, %v53_v13 }
  0x51   :  { %1079 = vst [vmem:[%s3419_s3 + $0xd8] sm:$0xff] %v823_v4  ;;  %1080 = vst [vmem:[%s3419_s3 + $0xe0] sm:$0xff] %v824_v9 }
  0x52   :  { %1081 = vst [vmem:[%s3419_s3 + $0xe8] sm:$0xff] %v825_v10  ;;  %1082 = vst [vmem:[%s3419_s3 + $0xf0] sm:$0xff] %v826_v11  ;;  %v579_v37 = vadd.f32 %v1349_v2, %v316_v25 }
  0x53   :  { %1083 = vst [vmem:[%s3419_s3 + $0xf8] sm:$0xff] %v827_v14 }
  0x54   :  { %v835_v46 = vmax.f32 %v579_v37, 0.0 }
  0x5a   :  { %v54_v26 = vld [vmem:[%s3416_s0 + $0x140] sm:$0xff]  ;;  %v55_v31 = vld [vmem:[%s3416_s0 + $0x148] sm:$0xff]  ;;  %v56_v32 = vld [vmem:[%s3416_s0 + $0x150] sm:$0xff] }
  0x5b   :  { %v57_v33 = vld [vmem:[%s3416_s0 + $0x158] sm:$0xff]  ;;  %v58_v38 = vld [vmem:[%s3416_s0 + $0x160] sm:$0xff]  ;;  %v59_v39 = vld [vmem:[%s3416_s0 + $0x168] sm:$0xff]  ;;  %v317_v44 = vmul.f32 %v1344_v1, %v54_v26  ;;  %v318_v47 = vmul.f32 %v1344_v1, %v55_v31  ;;  %v319_v48 = vmul.f32 %v1344_v1, %v56_v32 }
  0x5c   :  { %v60_v40 = vld [vmem:[%s3416_s0 + $0x170] sm:$0xff]  ;;  %v320_v49 = vmul.f32 %v1344_v1, %v57_v33  ;;  %v321_v51 = vmul.f32 %v1344_v1, %v58_v38  ;;  %v322_v52 = vmul.f32 %v1344_v1, %v59_v39 }
  0x5d   :  { %1084 = vst [vmem:[%s3419_s3 + $0x100] sm:$0xff] %v828_v27  ;;  %v580_v50 = vadd.f32 %v1349_v2, %v317_v44  ;;  %v323_v53 = vmul.f32 %v1344_v1, %v60_v40  ;;  %v581_v54 = vadd.f32 %v1349_v2, %v318_v47  ;;  %v582_v55 = vadd.f32 %v1349_v2, %v319_v48 }
  0x5e   :  { %v583_v56 = vadd.f32 %v1349_v2, %v320_v49  ;;  %v584_v60 = vadd.f32 %v1349_v2, %v321_v51  ;;  %v585_v61 = vadd.f32 %v1349_v2, %v322_v52 }
  0x5f   :  { %v836_v59 = vmax.f32 %v580_v50, 0.0  ;;  %v586_v62 = vadd.f32 %v1349_v2, %v323_v53  ;;  %v837_v4 = vmax.f32 %v581_v54, 0.0  ;;  %v838_v5 = vmax.f32 %v582_v55, 0.0 }
  0x60   :  { %v839_v6 = vmax.f32 %v583_v56, 0.0  ;;  %v840_v11 = vmax.f32 %v584_v60, 0.0  ;;  %v841_v12 = vmax.f32 %v585_v61, 0.0 }
  0x61   :  { %v842_v13 = vmax.f32 %v586_v62, 0.0 }
  0x64   :  { %v61_v45 = vld [vmem:[%s3416_s0 + $0x178] sm:$0xff] }
  0x65   :  { %1085 = vst [vmem:[%s3419_s3 + $0x108] sm:$0xff] %v829_v34  ;;  %1086 = vst [vmem:[%s3419_s3 + $0x110] sm:$0xff] %v830_v35  ;;  %v324_v57 = vmul.f32 %v1344_v1, %v61_v45 }
  0x66   :  { %1087 = vst [vmem:[%s3419_s3 + $0x118] sm:$0xff] %v831_v36  ;;  %1088 = vst [vmem:[%s3419_s3 + $0x120] sm:$0xff] %v832_v41 }
  0x67   :  { %1089 = vst [vmem:[%s3419_s3 + $0x128] sm:$0xff] %v833_v42  ;;  %1090 = vst [vmem:[%s3419_s3 + $0x130] sm:$0xff] %v834_v43  ;;  %v587_v7 = vadd.f32 %v1349_v2, %v324_v57 }
  0x68   :  { %1091 = vst [vmem:[%s3419_s3 + $0x138] sm:$0xff] %v835_v46 }
  0x69   :  { %v843_v16 = vmax.f32 %v587_v7, 0.0 }
  0x6f   :  { %v62_v58 = vld [vmem:[%s3416_s0 + $0x180] sm:$0xff]  ;;  %v63_v63 = vld [vmem:[%s3416_s0 + $0x188] sm:$0xff]  ;;  %v64_v0 = vld [vmem:[%s3416_s0 + $0x190] sm:$0xff] }
  0x70   :  { %v65_v3 = vld [vmem:[%s3416_s0 + $0x198] sm:$0xff]  ;;  %v66_v8 = vld [vmem:[%s3416_s0 + $0x1a0] sm:$0xff]  ;;  %v67_v9 = vld [vmem:[%s3416_s0 + $0x1a8] sm:$0xff]  ;;  %v325_v14 = vmul.f32 %v1344_v1, %v62_v58  ;;  %v326_v17 = vmul.f32 %v1344_v1, %v63_v63  ;;  %v327_v18 = vmul.f32 %v1344_v1, %v64_v0 }
  0x71   :  { %v68_v10 = vld [vmem:[%s3416_s0 + $0x1b0] sm:$0xff]  ;;  %v328_v19 = vmul.f32 %v1344_v1, %v65_v3  ;;  %v329_v21 = vmul.f32 %v1344_v1, %v66_v8  ;;  %v330_v22 = vmul.f32 %v1344_v1, %v67_v9 }
  0x72   :  { %1092 = vst [vmem:[%s3419_s3 + $0x140] sm:$0xff] %v836_v59  ;;  %v588_v20 = vadd.f32 %v1349_v2, %v325_v14  ;;  %v331_v23 = vmul.f32 %v1344_v1, %v68_v10  ;;  %v589_v24 = vadd.f32 %v1349_v2, %v326_v17  ;;  %v590_v25 = vadd.f32 %v1349_v2, %v327_v18 }
  0x73   :  { %v591_v26 = vadd.f32 %v1349_v2, %v328_v19  ;;  %v592_v30 = vadd.f32 %v1349_v2, %v329_v21  ;;  %v593_v31 = vadd.f32 %v1349_v2, %v330_v22 }
  0x74   :  { %v844_v29 = vmax.f32 %v588_v20, 0.0  ;;  %v594_v32 = vadd.f32 %v1349_v2, %v331_v23  ;;  %v845_v36 = vmax.f32 %v589_v24, 0.0  ;;  %v846_v37 = vmax.f32 %v590_v25, 0.0 }
  0x75   :  { %v847_v38 = vmax.f32 %v591_v26, 0.0  ;;  %v848_v43 = vmax.f32 %v592_v30, 0.0  ;;  %v849_v44 = vmax.f32 %v593_v31, 0.0 }
  0x76   :  { %v850_v45 = vmax.f32 %v594_v32, 0.0 }
  0x79   :  { %v69_v15 = vld [vmem:[%s3416_s0 + $0x1b8] sm:$0xff] }
  0x7a   :  { %1093 = vst [vmem:[%s3419_s3 + $0x148] sm:$0xff] %v837_v4  ;;  %1094 = vst [vmem:[%s3419_s3 + $0x150] sm:$0xff] %v838_v5  ;;  %v332_v27 = vmul.f32 %v1344_v1, %v69_v15 }
  0x7b   :  { %1095 = vst [vmem:[%s3419_s3 + $0x158] sm:$0xff] %v839_v6  ;;  %1096 = vst [vmem:[%s3419_s3 + $0x160] sm:$0xff] %v840_v11 }
  0x7c   :  { %1097 = vst [vmem:[%s3419_s3 + $0x168] sm:$0xff] %v841_v12  ;;  %1098 = vst [vmem:[%s3419_s3 + $0x170] sm:$0xff] %v842_v13  ;;  %v595_v39 = vadd.f32 %v1349_v2, %v332_v27 }
  0x7d   :  { %1099 = vst [vmem:[%s3419_s3 + $0x178] sm:$0xff] %v843_v16 }
  0x7e   :  { %v851_v48 = vmax.f32 %v595_v39, 0.0 }
  0x84   :  { %v70_v28 = vld [vmem:[%s3416_s0 + $0x1c0] sm:$0xff]  ;;  %v71_v33 = vld [vmem:[%s3416_s0 + $0x1c8] sm:$0xff]  ;;  %v72_v34 = vld [vmem:[%s3416_s0 + $0x1d0] sm:$0xff] }
  0x85   :  { %v73_v35 = vld [vmem:[%s3416_s0 + $0x1d8] sm:$0xff]  ;;  %v74_v40 = vld [vmem:[%s3416_s0 + $0x1e0] sm:$0xff]  ;;  %v75_v41 = vld [vmem:[%s3416_s0 + $0x1e8] sm:$0xff]  ;;  %v333_v46 = vmul.f32 %v1344_v1, %v70_v28  ;;  %v334_v49 = vmul.f32 %v1344_v1, %v71_v33  ;;  %v335_v50 = vmul.f32 %v1344_v1, %v72_v34 }
  0x86   :  { %v76_v42 = vld [vmem:[%s3416_s0 + $0x1f0] sm:$0xff]  ;;  %v336_v51 = vmul.f32 %v1344_v1, %v73_v35  ;;  %v337_v53 = vmul.f32 %v1344_v1, %v74_v40  ;;  %v338_v54 = vmul.f32 %v1344_v1, %v75_v41 }
  0x87   :  { %1100 = vst [vmem:[%s3419_s3 + $0x180] sm:$0xff] %v844_v29  ;;  %v596_v52 = vadd.f32 %v1349_v2, %v333_v46  ;;  %v339_v55 = vmul.f32 %v1344_v1, %v76_v42  ;;  %v597_v56 = vadd.f32 %v1349_v2, %v334_v49  ;;  %v598_v57 = vadd.f32 %v1349_v2, %v335_v50 }
  0x88   :  { %v599_v58 = vadd.f32 %v1349_v2, %v336_v51  ;;  %v600_v62 = vadd.f32 %v1349_v2, %v337_v53  ;;  %v601_v63 = vadd.f32 %v1349_v2, %v338_v54 }
  0x89   :  { %v852_v61 = vmax.f32 %v596_v52, 0.0  ;;  %v602_v0 = vadd.f32 %v1349_v2, %v339_v55  ;;  %v853_v6 = vmax.f32 %v597_v56, 0.0  ;;  %v854_v7 = vmax.f32 %v598_v57, 0.0 }
  0x8a   :  { %v855_v8 = vmax.f32 %v599_v58, 0.0  ;;  %v856_v13 = vmax.f32 %v600_v62, 0.0  ;;  %v857_v14 = vmax.f32 %v601_v63, 0.0 }
  0x8b   :  { %v858_v15 = vmax.f32 %v602_v0, 0.0 }
  0x8e   :  { %v77_v47 = vld [vmem:[%s3416_s0 + $0x1f8] sm:$0xff] }
  0x8f   :  { %1101 = vst [vmem:[%s3419_s3 + $0x188] sm:$0xff] %v845_v36  ;;  %1102 = vst [vmem:[%s3419_s3 + $0x190] sm:$0xff] %v846_v37  ;;  %v340_v59 = vmul.f32 %v1344_v1, %v77_v47 }
  0x90   :  { %1103 = vst [vmem:[%s3419_s3 + $0x198] sm:$0xff] %v847_v38  ;;  %1104 = vst [vmem:[%s3419_s3 + $0x1a0] sm:$0xff] %v848_v43 }
  0x91   :  { %1105 = vst [vmem:[%s3419_s3 + $0x1a8] sm:$0xff] %v849_v44  ;;  %1106 = vst [vmem:[%s3419_s3 + $0x1b0] sm:$0xff] %v850_v45  ;;  %v603_v9 = vadd.f32 %v1349_v2, %v340_v59 }
  0x92   :  { %1107 = vst [vmem:[%s3419_s3 + $0x1b8] sm:$0xff] %v851_v48 }
  0x93   :  { %v859_v18 = vmax.f32 %v603_v9, 0.0 }
  0x99   :  { %v78_v60 = vld [vmem:[%s3416_s0 + $0x200] sm:$0xff]  ;;  %v79_v3 = vld [vmem:[%s3416_s0 + $0x208] sm:$0xff]  ;;  %v80_v4 = vld [vmem:[%s3416_s0 + $0x210] sm:$0xff] }
  0x9a   :  { %v81_v5 = vld [vmem:[%s3416_s0 + $0x218] sm:$0xff]  ;;  %v82_v10 = vld [vmem:[%s3416_s0 + $0x220] sm:$0xff]  ;;  %v83_v11 = vld [vmem:[%s3416_s0 + $0x228] sm:$0xff]  ;;  %v341_v16 = vmul.f32 %v1344_v1, %v78_v60  ;;  %v342_v19 = vmul.f32 %v1344_v1, %v79_v3  ;;  %v343_v20 = vmul.f32 %v1344_v1, %v80_v4 }
  0x9b   :  { %v84_v12 = vld [vmem:[%s3416_s0 + $0x230] sm:$0xff]  ;;  %v344_v21 = vmul.f32 %v1344_v1, %v81_v5  ;;  %v345_v23 = vmul.f32 %v1344_v1, %v82_v10  ;;  %v346_v24 = vmul.f32 %v1344_v1, %v83_v11 }
  0x9c   :  { %1108 = vst [vmem:[%s3419_s3 + $0x1c0] sm:$0xff] %v852_v61  ;;  %v604_v22 = vadd.f32 %v1349_v2, %v341_v16  ;;  %v347_v25 = vmul.f32 %v1344_v1, %v84_v12  ;;  %v605_v26 = vadd.f32 %v1349_v2, %v342_v19  ;;  %v606_v27 = vadd.f32 %v1349_v2, %v343_v20 }
  0x9d   :  { %v607_v28 = vadd.f32 %v1349_v2, %v344_v21  ;;  %v608_v32 = vadd.f32 %v1349_v2, %v345_v23  ;;  %v609_v33 = vadd.f32 %v1349_v2, %v346_v24 }
  0x9e   :  { %v860_v31 = vmax.f32 %v604_v22, 0.0  ;;  %v610_v34 = vadd.f32 %v1349_v2, %v347_v25  ;;  %v861_v38 = vmax.f32 %v605_v26, 0.0  ;;  %v862_v39 = vmax.f32 %v606_v27, 0.0 }
  0x9f   :  { %v863_v40 = vmax.f32 %v607_v28, 0.0  ;;  %v864_v45 = vmax.f32 %v608_v32, 0.0  ;;  %v865_v46 = vmax.f32 %v609_v33, 0.0 }
  0xa0   :  { %v866_v47 = vmax.f32 %v610_v34, 0.0 }
  0xa3   :  { %v85_v17 = vld [vmem:[%s3416_s0 + $0x238] sm:$0xff] }
  0xa4   :  { %1109 = vst [vmem:[%s3419_s3 + $0x1c8] sm:$0xff] %v853_v6  ;;  %1110 = vst [vmem:[%s3419_s3 + $0x1d0] sm:$0xff] %v854_v7  ;;  %v348_v29 = vmul.f32 %v1344_v1, %v85_v17 }
  0xa5   :  { %1111 = vst [vmem:[%s3419_s3 + $0x1d8] sm:$0xff] %v855_v8  ;;  %1112 = vst [vmem:[%s3419_s3 + $0x1e0] sm:$0xff] %v856_v13 }
  0xa6   :  { %1113 = vst [vmem:[%s3419_s3 + $0x1e8] sm:$0xff] %v857_v14  ;;  %1114 = vst [vmem:[%s3419_s3 + $0x1f0] sm:$0xff] %v858_v15  ;;  %v611_v41 = vadd.f32 %v1349_v2, %v348_v29 }
  0xa7   :  { %1115 = vst [vmem:[%s3419_s3 + $0x1f8] sm:$0xff] %v859_v18 }
  0xa8   :  { %v867_v50 = vmax.f32 %v611_v41, 0.0 }
  0xae   :  { %v86_v30 = vld [vmem:[%s3416_s0 + $0x240] sm:$0xff]  ;;  %v87_v35 = vld [vmem:[%s3416_s0 + $0x248] sm:$0xff]  ;;  %v88_v36 = vld [vmem:[%s3416_s0 + $0x250] sm:$0xff] }
  0xaf   :  { %v89_v37 = vld [vmem:[%s3416_s0 + $0x258] sm:$0xff]  ;;  %v90_v42 = vld [vmem:[%s3416_s0 + $0x260] sm:$0xff]  ;;  %v91_v43 = vld [vmem:[%s3416_s0 + $0x268] sm:$0xff]  ;;  %v349_v48 = vmul.f32 %v1344_v1, %v86_v30  ;;  %v350_v51 = vmul.f32 %v1344_v1, %v87_v35  ;;  %v351_v52 = vmul.f32 %v1344_v1, %v88_v36 }
  0xb0   :  { %v92_v44 = vld [vmem:[%s3416_s0 + $0x270] sm:$0xff]  ;;  %v352_v53 = vmul.f32 %v1344_v1, %v89_v37  ;;  %v353_v55 = vmul.f32 %v1344_v1, %v90_v42  ;;  %v354_v56 = vmul.f32 %v1344_v1, %v91_v43 }
  0xb1   :  { %1116 = vst [vmem:[%s3419_s3 + $0x200] sm:$0xff] %v860_v31  ;;  %v612_v54 = vadd.f32 %v1349_v2, %v349_v48  ;;  %v355_v57 = vmul.f32 %v1344_v1, %v92_v44  ;;  %v613_v58 = vadd.f32 %v1349_v2, %v350_v51  ;;  %v614_v59 = vadd.f32 %v1349_v2, %v351_v52 }
  0xb2   :  { %v615_v60 = vadd.f32 %v1349_v2, %v352_v53  ;;  %v616_v0 = vadd.f32 %v1349_v2, %v353_v55  ;;  %v617_v3 = vadd.f32 %v1349_v2, %v354_v56 }
  0xb3   :  { %v868_v63 = vmax.f32 %v612_v54, 0.0  ;;  %v618_v4 = vadd.f32 %v1349_v2, %v355_v57  ;;  %v869_v8 = vmax.f32 %v613_v58, 0.0  ;;  %v870_v9 = vmax.f32 %v614_v59, 0.0 }
  0xb4   :  { %v871_v10 = vmax.f32 %v615_v60, 0.0  ;;  %v872_v15 = vmax.f32 %v616_v0, 0.0  ;;  %v873_v16 = vmax.f32 %v617_v3, 0.0 }
  0xb5   :  { %v874_v17 = vmax.f32 %v618_v4, 0.0 }
  0xb8   :  { %v93_v49 = vld [vmem:[%s3416_s0 + $0x278] sm:$0xff] }
  0xb9   :  { %1117 = vst [vmem:[%s3419_s3 + $0x208] sm:$0xff] %v861_v38  ;;  %1118 = vst [vmem:[%s3419_s3 + $0x210] sm:$0xff] %v862_v39  ;;  %v356_v61 = vmul.f32 %v1344_v1, %v93_v49 }
  0xba   :  { %1119 = vst [vmem:[%s3419_s3 + $0x218] sm:$0xff] %v863_v40  ;;  %1120 = vst [vmem:[%s3419_s3 + $0x220] sm:$0xff] %v864_v45 }
  0xbb   :  { %1121 = vst [vmem:[%s3419_s3 + $0x228] sm:$0xff] %v865_v46  ;;  %1122 = vst [vmem:[%s3419_s3 + $0x230] sm:$0xff] %v866_v47  ;;  %v619_v11 = vadd.f32 %v1349_v2, %v356_v61 }
  0xbc   :  { %1123 = vst [vmem:[%s3419_s3 + $0x238] sm:$0xff] %v867_v50 }
  0xbd   :  { %v875_v20 = vmax.f32 %v619_v11, 0.0 }
  0xc3   :  { %v94_v62 = vld [vmem:[%s3416_s0 + $0x280] sm:$0xff]  ;;  %v95_v5 = vld [vmem:[%s3416_s0 + $0x288] sm:$0xff]  ;;  %v96_v6 = vld [vmem:[%s3416_s0 + $0x290] sm:$0xff] }
  0xc4   :  { %v97_v7 = vld [vmem:[%s3416_s0 + $0x298] sm:$0xff]  ;;  %v98_v12 = vld [vmem:[%s3416_s0 + $0x2a0] sm:$0xff]  ;;  %v99_v13 = vld [vmem:[%s3416_s0 + $0x2a8] sm:$0xff]  ;;  %v357_v18 = vmul.f32 %v1344_v1, %v94_v62  ;;  %v358_v21 = vmul.f32 %v1344_v1, %v95_v5  ;;  %v359_v22 = vmul.f32 %v1344_v1, %v96_v6 }
  0xc5   :  { %v100_v14 = vld [vmem:[%s3416_s0 + $0x2b0] sm:$0xff]  ;;  %v360_v23 = vmul.f32 %v1344_v1, %v97_v7  ;;  %v361_v25 = vmul.f32 %v1344_v1, %v98_v12  ;;  %v362_v26 = vmul.f32 %v1344_v1, %v99_v13 }
  0xc6   :  { %1124 = vst [vmem:[%s3419_s3 + $0x240] sm:$0xff] %v868_v63  ;;  %v620_v24 = vadd.f32 %v1349_v2, %v357_v18  ;;  %v363_v27 = vmul.f32 %v1344_v1, %v100_v14  ;;  %v621_v28 = vadd.f32 %v1349_v2, %v358_v21  ;;  %v622_v29 = vadd.f32 %v1349_v2, %v359_v22 }
  0xc7   :  { %v623_v30 = vadd.f32 %v1349_v2, %v360_v23  ;;  %v624_v34 = vadd.f32 %v1349_v2, %v361_v25  ;;  %v625_v35 = vadd.f32 %v1349_v2, %v362_v26 }
  0xc8   :  { %v876_v33 = vmax.f32 %v620_v24, 0.0  ;;  %v626_v36 = vadd.f32 %v1349_v2, %v363_v27  ;;  %v877_v40 = vmax.f32 %v621_v28, 0.0  ;;  %v878_v41 = vmax.f32 %v622_v29, 0.0 }
  0xc9   :  { %v879_v42 = vmax.f32 %v623_v30, 0.0  ;;  %v880_v47 = vmax.f32 %v624_v34, 0.0  ;;  %v881_v48 = vmax.f32 %v625_v35, 0.0 }
  0xca   :  { %v882_v49 = vmax.f32 %v626_v36, 0.0 }
  0xcd   :  { %v101_v19 = vld [vmem:[%s3416_s0 + $0x2b8] sm:$0xff] }
  0xce   :  { %1125 = vst [vmem:[%s3419_s3 + $0x248] sm:$0xff] %v869_v8  ;;  %1126 = vst [vmem:[%s3419_s3 + $0x250] sm:$0xff] %v870_v9  ;;  %v364_v31 = vmul.f32 %v1344_v1, %v101_v19 }
  0xcf   :  { %1127 = vst [vmem:[%s3419_s3 + $0x258] sm:$0xff] %v871_v10  ;;  %1128 = vst [vmem:[%s3419_s3 + $0x260] sm:$0xff] %v872_v15 }
  0xd0   :  { %1129 = vst [vmem:[%s3419_s3 + $0x268] sm:$0xff] %v873_v16  ;;  %1130 = vst [vmem:[%s3419_s3 + $0x270] sm:$0xff] %v874_v17  ;;  %v627_v43 = vadd.f32 %v1349_v2, %v364_v31 }
  0xd1   :  { %1131 = vst [vmem:[%s3419_s3 + $0x278] sm:$0xff] %v875_v20 }
  0xd2   :  { %v883_v52 = vmax.f32 %v627_v43, 0.0 }
  0xd8   :  { %v102_v32 = vld [vmem:[%s3416_s0 + $0x2c0] sm:$0xff]  ;;  %v103_v37 = vld [vmem:[%s3416_s0 + $0x2c8] sm:$0xff]  ;;  %v104_v38 = vld [vmem:[%s3416_s0 + $0x2d0] sm:$0xff] }
  0xd9   :  { %v105_v39 = vld [vmem:[%s3416_s0 + $0x2d8] sm:$0xff]  ;;  %v106_v44 = vld [vmem:[%s3416_s0 + $0x2e0] sm:$0xff]  ;;  %v107_v45 = vld [vmem:[%s3416_s0 + $0x2e8] sm:$0xff]  ;;  %v365_v50 = vmul.f32 %v1344_v1, %v102_v32  ;;  %v366_v53 = vmul.f32 %v1344_v1, %v103_v37  ;;  %v367_v54 = vmul.f32 %v1344_v1, %v104_v38 }
  0xda   :  { %v108_v46 = vld [vmem:[%s3416_s0 + $0x2f0] sm:$0xff]  ;;  %v368_v55 = vmul.f32 %v1344_v1, %v105_v39  ;;  %v369_v57 = vmul.f32 %v1344_v1, %v106_v44  ;;  %v370_v58 = vmul.f32 %v1344_v1, %v107_v45  ;;  %v2170_v44 = vld [vmem:[%s3418_s2] ss:$0 sm:$0xff] }
  0xdb   :  { %1132 = vst [vmem:[%s3419_s3 + $0x280] sm:$0xff] %v876_v33  ;;  %v628_v56 = vadd.f32 %v1349_v2, %v365_v50  ;;  %v371_v59 = vmul.f32 %v1344_v1, %v108_v46  ;;  %v629_v60 = vadd.f32 %v1349_v2, %v366_v53  ;;  %v630_v61 = vadd.f32 %v1349_v2, %v367_v54 }
  0xdc   :  { %v631_v62 = vadd.f32 %v1349_v2, %v368_v55  ;;  %v632_v4 = vadd.f32 %v1349_v2, %v369_v57  ;;  %v633_v5 = vadd.f32 %v1349_v2, %v370_v58 }
  0xdd   :  { %v884_v3 = vmax.f32 %v628_v56, 0.0  ;;  %v634_v6 = vadd.f32 %v1349_v2, %v371_v59  ;;  %v885_v10 = vmax.f32 %v629_v60, 0.0  ;;  %v886_v11 = vmax.f32 %v630_v61, 0.0 }
  0xde   :  { %v887_v12 = vmax.f32 %v631_v62, 0.0  ;;  %v888_v17 = vmax.f32 %v632_v4, 0.0  ;;  %v889_v18 = vmax.f32 %v633_v5, 0.0 }
  0xdf   :  { %v890_v19 = vmax.f32 %v634_v6, 0.0 }
  0xe2   :  { %v109_v51 = vld [vmem:[%s3416_s0 + $0x2f8] sm:$0xff] }
  0xe3   :  { %1133 = vst [vmem:[%s3419_s3 + $0x288] sm:$0xff] %v877_v40  ;;  %1134 = vst [vmem:[%s3419_s3 + $0x290] sm:$0xff] %v878_v41  ;;  %v372_v63 = vmul.f32 %v1344_v1, %v109_v51  ;;  %v2188_v51 = vld [vmem:[%s3417_s1] ss:$0 sm:$0xff] }
  0xe4   :  { %1135 = vst [vmem:[%s3419_s3 + $0x298] sm:$0xff] %v879_v42  ;;  %1136 = vst [vmem:[%s3419_s3 + $0x2a0] sm:$0xff] %v880_v47 }
  0xe5   :  { %1137 = vst [vmem:[%s3419_s3 + $0x2a8] sm:$0xff] %v881_v48  ;;  %1138 = vst [vmem:[%s3419_s3 + $0x2b0] sm:$0xff] %v882_v49  ;;  %v635_v13 = vadd.f32 %v1349_v2, %v372_v63 }
  0xe6   :  { %1139 = vst [vmem:[%s3419_s3 + $0x2b8] sm:$0xff] %v883_v52 }
  0xe7   :  { %v891_v22 = vmax.f32 %v635_v13, 0.0 }
  0xed   :  { %v110_v0 = vld [vmem:[%s3416_s0 + $0x300] sm:$0xff]  ;;  %v111_v7 = vld [vmem:[%s3416_s0 + $0x308] sm:$0xff]  ;;  %v112_v8 = vld [vmem:[%s3416_s0 + $0x310] sm:$0xff] }
  0xee   :  { %v113_v9 = vld [vmem:[%s3416_s0 + $0x318] sm:$0xff]  ;;  %v114_v14 = vld [vmem:[%s3416_s0 + $0x320] sm:$0xff]  ;;  %v115_v15 = vld [vmem:[%s3416_s0 + $0x328] sm:$0xff]  ;;  %v373_v20 = vmul.f32 %v1344_v1, %v110_v0  ;;  %v374_v23 = vmul.f32 %v1344_v1, %v111_v7  ;;  %v375_v24 = vmul.f32 %v1344_v1, %v112_v8 }
  0xef   :  { %v116_v16 = vld [vmem:[%s3416_s0 + $0x330] sm:$0xff]  ;;  %v376_v25 = vmul.f32 %v1344_v1, %v113_v9  ;;  %v377_v27 = vmul.f32 %v1344_v1, %v114_v14  ;;  %v378_v28 = vmul.f32 %v1344_v1, %v115_v15 }
  0xf0   :  { %1140 = vst [vmem:[%s3419_s3 + $0x2c0] sm:$0xff] %v884_v3  ;;  %v636_v26 = vadd.f32 %v1349_v2, %v373_v20  ;;  %v379_v29 = vmul.f32 %v1344_v1, %v116_v16  ;;  %v637_v30 = vadd.f32 %v1349_v2, %v374_v23  ;;  %v638_v31 = vadd.f32 %v1349_v2, %v375_v24 }
  0xf1   :  { %v639_v32 = vadd.f32 %v1349_v2, %v376_v25  ;;  %v640_v36 = vadd.f32 %v1349_v2, %v377_v27  ;;  %v641_v37 = vadd.f32 %v1349_v2, %v378_v28 }
  0xf2   :  { %v892_v35 = vmax.f32 %v636_v26, 0.0  ;;  %v642_v38 = vadd.f32 %v1349_v2, %v379_v29  ;;  %v893_v41 = vmax.f32 %v637_v30, 0.0  ;;  %v894_v42 = vmax.f32 %v638_v31, 0.0 }
  0xf3   :  { %v895_v43 = vmax.f32 %v639_v32, 0.0  ;;  %v896_v48 = vmax.f32 %v640_v36, 0.0  ;;  %v897_v49 = vmax.f32 %v641_v37, 0.0 }
  0xf4   :  { %v898_v50 = vmax.f32 %v642_v38, 0.0 }
  0xf7   :  { %v117_v21 = vld [vmem:[%s3416_s0 + $0x338] sm:$0xff] }
  0xf8   :  { %1141 = vst [vmem:[%s3419_s3 + $0x2c8] sm:$0xff] %v885_v10  ;;  %1142 = vst [vmem:[%s3419_s3 + $0x2d0] sm:$0xff] %v886_v11  ;;  %v380_v33 = vmul.f32 %v1344_v1, %v117_v21 }
  0xf9   :  { %1143 = vst [vmem:[%s3419_s3 + $0x2d8] sm:$0xff] %v887_v12  ;;  %1144 = vst [vmem:[%s3419_s3 + $0x2e0] sm:$0xff] %v888_v17 }
  0xfa   :  { %1145 = vst [vmem:[%s3419_s3 + $0x2e8] sm:$0xff] %v889_v18  ;;  %1146 = vst [vmem:[%s3419_s3 + $0x2f0] sm:$0xff] %v890_v19  ;;  %v643_v2 = vadd.f32 %v2170_v44, %v380_v33 }
  0xfb   :  { %1147 = vst [vmem:[%s3419_s3 + $0x2f8] sm:$0xff] %v891_v22 }
  0xfc   :  { %v899_v54 = vmax.f32 %v643_v2, 0.0 }
 0x102   :  { %v118_v34 = vld [vmem:[%s3416_s0 + $0x340] sm:$0xff]  ;;  %v119_v39 = vld [vmem:[%s3416_s0 + $0x348] sm:$0xff]  ;;  %v120_v40 = vld [vmem:[%s3416_s0 + $0x350] sm:$0xff] }
 0x103   :  { %v121_v1 = vld [vmem:[%s3416_s0 + $0x358] sm:$0xff]  ;;  %v122_v45 = vld [vmem:[%s3416_s0 + $0x360] sm:$0xff]  ;;  %v123_v46 = vld [vmem:[%s3416_s0 + $0x368] sm:$0xff]  ;;  %v381_v52 = vmul.f32 %v2188_v51, %v118_v34  ;;  %v382_v55 = vmul.f32 %v2188_v51, %v119_v39  ;;  %v383_v56 = vmul.f32 %v2188_v51, %v120_v40 }
 0x104   :  { %v124_v47 = vld [vmem:[%s3416_s0 + $0x370] sm:$0xff]  ;;  %v384_v57 = vmul.f32 %v2188_v51, %v121_v1  ;;  %v385_v59 = vmul.f32 %v2188_v51, %v122_v45  ;;  %v386_v60 = vmul.f32 %v2188_v51, %v123_v46 }
 0x105   :  { %1148 = vst [vmem:[%s3419_s3 + $0x300] sm:$0xff] %v892_v35  ;;  %v644_v58 = vadd.f32 %v2170_v44, %v381_v52  ;;  %v387_v61 = vmul.f32 %v2188_v51, %v124_v47  ;;  %v645_v62 = vadd.f32 %v2170_v44, %v382_v55  ;;  %v646_v63 = vadd.f32 %v2170_v44, %v383_v56 }
 0x106   :  { %v647_v0 = vadd.f32 %v2170_v44, %v384_v57  ;;  %v648_v6 = vadd.f32 %v2170_v44, %v385_v59  ;;  %v649_v7 = vadd.f32 %v2170_v44, %v386_v60 }
 0x107   :  { %v900_v5 = vmax.f32 %v644_v58, 0.0  ;;  %v650_v8 = vadd.f32 %v2170_v44, %v387_v61  ;;  %v901_v12 = vmax.f32 %v645_v62, 0.0  ;;  %v902_v13 = vmax.f32 %v646_v63, 0.0 }
 0x108   :  { %v903_v14 = vmax.f32 %v647_v0, 0.0  ;;  %v904_v19 = vmax.f32 %v648_v6, 0.0  ;;  %v905_v20 = vmax.f32 %v649_v7, 0.0 }
 0x109   :  { %v906_v21 = vmax.f32 %v650_v8, 0.0 }
 0x10c   :  { %v125_v53 = vld [vmem:[%s3416_s0 + $0x378] sm:$0xff] }
 0x10d   :  { %1149 = vst [vmem:[%s3419_s3 + $0x308] sm:$0xff] %v893_v41  ;;  %1150 = vst [vmem:[%s3419_s3 + $0x310] sm:$0xff] %v894_v42  ;;  %v388_v3 = vmul.f32 %v2188_v51, %v125_v53 }
 0x10e   :  { %1151 = vst [vmem:[%s3419_s3 + $0x318] sm:$0xff] %v895_v43  ;;  %1152 = vst [vmem:[%s3419_s3 + $0x320] sm:$0xff] %v896_v48 }
 0x10f   :  { %1153 = vst [vmem:[%s3419_s3 + $0x328] sm:$0xff] %v897_v49  ;;  %1154 = vst [vmem:[%s3419_s3 + $0x330] sm:$0xff] %v898_v50  ;;  %v651_v15 = vadd.f32 %v2170_v44, %v388_v3 }
 0x110   :  { %1155 = vst [vmem:[%s3419_s3 + $0x338] sm:$0xff] %v899_v54 }
 0x111   :  { %v907_v24 = vmax.f32 %v651_v15, 0.0 }
 0x117   :  { %v126_v4 = vld [vmem:[%s3416_s0 + $0x380] sm:$0xff]  ;;  %v127_v9 = vld [vmem:[%s3416_s0 + $0x388] sm:$0xff]  ;;  %v128_v10 = vld [vmem:[%s3416_s0 + $0x390] sm:$0xff] }
 0x118   :  { %v129_v11 = vld [vmem:[%s3416_s0 + $0x398] sm:$0xff]  ;;  %v130_v16 = vld [vmem:[%s3416_s0 + $0x3a0] sm:$0xff]  ;;  %v131_v17 = vld [vmem:[%s3416_s0 + $0x3a8] sm:$0xff]  ;;  %v389_v22 = vmul.f32 %v2188_v51, %v126_v4  ;;  %v390_v25 = vmul.f32 %v2188_v51, %v127_v9  ;;  %v391_v26 = vmul.f32 %v2188_v51, %v128_v10 }
 0x119   :  { %v132_v18 = vld [vmem:[%s3416_s0 + $0x3b0] sm:$0xff]  ;;  %v392_v27 = vmul.f32 %v2188_v51, %v129_v11  ;;  %v393_v29 = vmul.f32 %v2188_v51, %v130_v16  ;;  %v394_v30 = vmul.f32 %v2188_v51, %v131_v17 }
 0x11a   :  { %1156 = vst [vmem:[%s3419_s3 + $0x340] sm:$0xff] %v900_v5  ;;  %v652_v28 = vadd.f32 %v2170_v44, %v389_v22  ;;  %v395_v31 = vmul.f32 %v2188_v51, %v132_v18  ;;  %v653_v32 = vadd.f32 %v2170_v44, %v390_v25  ;;  %v654_v33 = vadd.f32 %v2170_v44, %v391_v26 }
 0x11b   :  { %v655_v34 = vadd.f32 %v2170_v44, %v392_v27  ;;  %v656_v38 = vadd.f32 %v2170_v44, %v393_v29  ;;  %v657_v39 = vadd.f32 %v2170_v44, %v394_v30 }
 0x11c   :  { %v908_v37 = vmax.f32 %v652_v28, 0.0  ;;  %v658_v40 = vadd.f32 %v2170_v44, %v395_v31  ;;  %v909_v43 = vmax.f32 %v653_v32, 0.0  ;;  %v910_v2 = vmax.f32 %v654_v33, 0.0 }
 0x11d   :  { %v911_v45 = vmax.f32 %v655_v34, 0.0  ;;  %v912_v50 = vmax.f32 %v656_v38, 0.0  ;;  %v913_v52 = vmax.f32 %v657_v39, 0.0 }
 0x11e   :  { %v914_v53 = vmax.f32 %v658_v40, 0.0 }
 0x121   :  { %v133_v23 = vld [vmem:[%s3416_s0 + $0x3b8] sm:$0xff] }
 0x122   :  { %1157 = vst [vmem:[%s3419_s3 + $0x348] sm:$0xff] %v901_v12  ;;  %1158 = vst [vmem:[%s3419_s3 + $0x350] sm:$0xff] %v902_v13  ;;  %v396_v35 = vmul.f32 %v2188_v51, %v133_v23 }
 0x123   :  { %1159 = vst [vmem:[%s3419_s3 + $0x358] sm:$0xff] %v903_v14  ;;  %1160 = vst [vmem:[%s3419_s3 + $0x360] sm:$0xff] %v904_v19 }
 0x124   :  { %1161 = vst [vmem:[%s3419_s3 + $0x368] sm:$0xff] %v905_v20  ;;  %1162 = vst [vmem:[%s3419_s3 + $0x370] sm:$0xff] %v906_v21  ;;  %v659_v46 = vadd.f32 %v2170_v44, %v396_v35 }
 0x125   :  { %1163 = vst [vmem:[%s3419_s3 + $0x378] sm:$0xff] %v907_v24 }
 0x126   :  { %v915_v56 = vmax.f32 %v659_v46, 0.0 }
 0x12c   :  { %v134_v36 = vld [vmem:[%s3416_s0 + $0x3c0] sm:$0xff]  ;;  %v135_v1 = vld [vmem:[%s3416_s0 + $0x3c8] sm:$0xff]  ;;  %v136_v41 = vld [vmem:[%s3416_s0 + $0x3d0] sm:$0xff] }
 0x12d   :  { %v137_v42 = vld [vmem:[%s3416_s0 + $0x3d8] sm:$0xff]  ;;  %v138_v47 = vld [vmem:[%s3416_s0 + $0x3e0] sm:$0xff]  ;;  %v139_v48 = vld [vmem:[%s3416_s0 + $0x3e8] sm:$0xff]  ;;  %v397_v54 = vmul.f32 %v2188_v51, %v134_v36  ;;  %v398_v57 = vmul.f32 %v2188_v51, %v135_v1  ;;  %v399_v58 = vmul.f32 %v2188_v51, %v136_v41 }
 0x12e   :  { %v140_v49 = vld [vmem:[%s3416_s0 + $0x3f0] sm:$0xff]  ;;  %v400_v59 = vmul.f32 %v2188_v51, %v137_v42  ;;  %v401_v61 = vmul.f32 %v2188_v51, %v138_v47  ;;  %v402_v62 = vmul.f32 %v2188_v51, %v139_v48 }
 0x12f   :  { %1164 = vst [vmem:[%s3419_s3 + $0x380] sm:$0xff] %v908_v37  ;;  %v660_v60 = vadd.f32 %v2170_v44, %v397_v54  ;;  %v403_v63 = vmul.f32 %v2188_v51, %v140_v49  ;;  %v661_v0 = vadd.f32 %v2170_v44, %v398_v57  ;;  %v662_v3 = vadd.f32 %v2170_v44, %v399_v58 }
 0x130   :  { %v663_v4 = vadd.f32 %v2170_v44, %v400_v59  ;;  %v664_v8 = vadd.f32 %v2170_v44, %v401_v61  ;;  %v665_v9 = vadd.f32 %v2170_v44, %v402_v62 }
 0x131   :  { %v916_v7 = vmax.f32 %v660_v60, 0.0  ;;  %v666_v10 = vadd.f32 %v2170_v44, %v403_v63  ;;  %v917_v14 = vmax.f32 %v661_v0, 0.0  ;;  %v918_v15 = vmax.f32 %v662_v3, 0.0 }
 0x132   :  { %v919_v16 = vmax.f32 %v663_v4, 0.0  ;;  %v920_v21 = vmax.f32 %v664_v8, 0.0  ;;  %v921_v22 = vmax.f32 %v665_v9, 0.0 }
 0x133   :  { %v922_v23 = vmax.f32 %v666_v10, 0.0 }
 0x136   :  { %v141_v55 = vld [vmem:[%s3416_s0 + $0x3f8] sm:$0xff] }
 0x137   :  { %1165 = vst [vmem:[%s3419_s3 + $0x388] sm:$0xff] %v909_v43  ;;  %1166 = vst [vmem:[%s3419_s3 + $0x390] sm:$0xff] %v910_v2  ;;  %v404_v5 = vmul.f32 %v2188_v51, %v141_v55 }
 0x138   :  { %1167 = vst [vmem:[%s3419_s3 + $0x398] sm:$0xff] %v911_v45  ;;  %1168 = vst [vmem:[%s3419_s3 + $0x3a0] sm:$0xff] %v912_v50 }
 0x139   :  { %1169 = vst [vmem:[%s3419_s3 + $0x3a8] sm:$0xff] %v913_v52  ;;  %1170 = vst [vmem:[%s3419_s3 + $0x3b0] sm:$0xff] %v914_v53  ;;  %v667_v17 = vadd.f32 %v2170_v44, %v404_v5 }
 0x13a   :  { %1171 = vst [vmem:[%s3419_s3 + $0x3b8] sm:$0xff] %v915_v56 }
 0x13b   :  { %v923_v26 = vmax.f32 %v667_v17, 0.0 }
 0x141   :  { %v142_v6 = vld [vmem:[%s3416_s0 + $0x400] sm:$0xff]  ;;  %v143_v11 = vld [vmem:[%s3416_s0 + $0x408] sm:$0xff]  ;;  %v144_v12 = vld [vmem:[%s3416_s0 + $0x410] sm:$0xff] }
 0x142   :  { %v145_v13 = vld [vmem:[%s3416_s0 + $0x418] sm:$0xff]  ;;  %v146_v18 = vld [vmem:[%s3416_s0 + $0x420] sm:$0xff]  ;;  %v147_v19 = vld [vmem:[%s3416_s0 + $0x428] sm:$0xff]  ;;  %v405_v24 = vmul.f32 %v2188_v51, %v142_v6  ;;  %v406_v27 = vmul.f32 %v2188_v51, %v143_v11  ;;  %v407_v28 = vmul.f32 %v2188_v51, %v144_v12 }
 0x143   :  { %v148_v20 = vld [vmem:[%s3416_s0 + $0x430] sm:$0xff]  ;;  %v408_v29 = vmul.f32 %v2188_v51, %v145_v13  ;;  %v409_v31 = vmul.f32 %v2188_v51, %v146_v18  ;;  %v410_v32 = vmul.f32 %v2188_v51, %v147_v19 }
 0x144   :  { %1172 = vst [vmem:[%s3419_s3 + $0x3c0] sm:$0xff] %v916_v7  ;;  %v668_v30 = vadd.f32 %v2170_v44, %v405_v24  ;;  %v411_v33 = vmul.f32 %v2188_v51, %v148_v20  ;;  %v669_v34 = vadd.f32 %v2170_v44, %v406_v27  ;;  %v670_v35 = vadd.f32 %v2170_v44, %v407_v28 }
 0x145   :  { %v671_v36 = vadd.f32 %v2170_v44, %v408_v29  ;;  %v672_v40 = vadd.f32 %v2170_v44, %v409_v31  ;;  %v673_v1 = vadd.f32 %v2170_v44, %v410_v32 }
 0x146   :  { %v924_v39 = vmax.f32 %v668_v30, 0.0  ;;  %v674_v41 = vadd.f32 %v2170_v44, %v411_v33  ;;  %v925_v45 = vmax.f32 %v669_v34, 0.0  ;;  %v926_v46 = vmax.f32 %v670_v35, 0.0 }
 0x147   :  { %v927_v47 = vmax.f32 %v671_v36, 0.0  ;;  %v928_v53 = vmax.f32 %v672_v40, 0.0  ;;  %v929_v54 = vmax.f32 %v673_v1, 0.0 }
 0x148   :  { %v930_v55 = vmax.f32 %v674_v41, 0.0 }
 0x14b   :  { %v149_v25 = vld [vmem:[%s3416_s0 + $0x438] sm:$0xff] }
 0x14c   :  { %1173 = vst [vmem:[%s3419_s3 + $0x3c8] sm:$0xff] %v917_v14  ;;  %1174 = vst [vmem:[%s3419_s3 + $0x3d0] sm:$0xff] %v918_v15  ;;  %v412_v37 = vmul.f32 %v2188_v51, %v149_v25 }
 0x14d   :  { %1175 = vst [vmem:[%s3419_s3 + $0x3d8] sm:$0xff] %v919_v16  ;;  %1176 = vst [vmem:[%s3419_s3 + $0x3e0] sm:$0xff] %v920_v21 }
 0x14e   :  { %1177 = vst [vmem:[%s3419_s3 + $0x3e8] sm:$0xff] %v921_v22  ;;  %1178 = vst [vmem:[%s3419_s3 + $0x3f0] sm:$0xff] %v922_v23  ;;  %v675_v48 = vadd.f32 %v2170_v44, %v412_v37 }
 0x14f   :  { %1179 = vst [vmem:[%s3419_s3 + $0x3f8] sm:$0xff] %v923_v26 }
 0x150   :  { %v931_v58 = vmax.f32 %v675_v48, 0.0 }
 0x156   :  { %v150_v38 = vld [vmem:[%s3416_s0 + $0x440] sm:$0xff]  ;;  %v151_v42 = vld [vmem:[%s3416_s0 + $0x448] sm:$0xff]  ;;  %v152_v43 = vld [vmem:[%s3416_s0 + $0x450] sm:$0xff] }
 0x157   :  { %v153_v2 = vld [vmem:[%s3416_s0 + $0x458] sm:$0xff]  ;;  %v154_v49 = vld [vmem:[%s3416_s0 + $0x460] sm:$0xff]  ;;  %v155_v50 = vld [vmem:[%s3416_s0 + $0x468] sm:$0xff]  ;;  %v413_v56 = vmul.f32 %v2188_v51, %v150_v38  ;;  %v414_v59 = vmul.f32 %v2188_v51, %v151_v42  ;;  %v415_v60 = vmul.f32 %v2188_v51, %v152_v43 }
 0x158   :  { %v156_v52 = vld [vmem:[%s3416_s0 + $0x470] sm:$0xff]  ;;  %v416_v61 = vmul.f32 %v2188_v51, %v153_v2  ;;  %v417_v63 = vmul.f32 %v2188_v51, %v154_v49  ;;  %v418_v0 = vmul.f32 %v2188_v51, %v155_v50 }
 0x159   :  { %1180 = vst [vmem:[%s3419_s3 + $0x400] sm:$0xff] %v924_v39  ;;  %v676_v62 = vadd.f32 %v2170_v44, %v413_v56  ;;  %v419_v3 = vmul.f32 %v2188_v51, %v156_v52  ;;  %v677_v4 = vadd.f32 %v2170_v44, %v414_v59  ;;  %v678_v5 = vadd.f32 %v2170_v44, %v415_v60 }
 0x15a   :  { %v679_v6 = vadd.f32 %v2170_v44, %v416_v61  ;;  %v680_v10 = vadd.f32 %v2170_v44, %v417_v63  ;;  %v681_v11 = vadd.f32 %v2170_v44, %v418_v0 }
 0x15b   :  { %v932_v9 = vmax.f32 %v676_v62, 0.0  ;;  %v682_v12 = vadd.f32 %v2170_v44, %v419_v3  ;;  %v933_v16 = vmax.f32 %v677_v4, 0.0  ;;  %v934_v17 = vmax.f32 %v678_v5, 0.0 }
 0x15c   :  { %v935_v18 = vmax.f32 %v679_v6, 0.0  ;;  %v936_v23 = vmax.f32 %v680_v10, 0.0  ;;  %v937_v24 = vmax.f32 %v681_v11, 0.0 }
 0x15d   :  { %v938_v25 = vmax.f32 %v682_v12, 0.0 }
 0x160   :  { %v157_v57 = vld [vmem:[%s3416_s0 + $0x478] sm:$0xff] }
 0x161   :  { %1181 = vst [vmem:[%s3419_s3 + $0x408] sm:$0xff] %v925_v45  ;;  %1182 = vst [vmem:[%s3419_s3 + $0x410] sm:$0xff] %v926_v46  ;;  %v420_v7 = vmul.f32 %v2188_v51, %v157_v57 }
 0x162   :  { %1183 = vst [vmem:[%s3419_s3 + $0x418] sm:$0xff] %v927_v47  ;;  %1184 = vst [vmem:[%s3419_s3 + $0x420] sm:$0xff] %v928_v53 }
 0x163   :  { %1185 = vst [vmem:[%s3419_s3 + $0x428] sm:$0xff] %v929_v54  ;;  %1186 = vst [vmem:[%s3419_s3 + $0x430] sm:$0xff] %v930_v55  ;;  %v683_v19 = vadd.f32 %v2170_v44, %v420_v7 }
 0x164   :  { %1187 = vst [vmem:[%s3419_s3 + $0x438] sm:$0xff] %v931_v58 }
 0x165   :  { %v939_v28 = vmax.f32 %v683_v19, 0.0 }
 0x16b   :  { %v158_v8 = vld [vmem:[%s3416_s0 + $0x480] sm:$0xff]  ;;  %v159_v13 = vld [vmem:[%s3416_s0 + $0x488] sm:$0xff]  ;;  %v160_v14 = vld [vmem:[%s3416_s0 + $0x490] sm:$0xff] }
 0x16c   :  { %v161_v15 = vld [vmem:[%s3416_s0 + $0x498] sm:$0xff]  ;;  %v162_v20 = vld [vmem:[%s3416_s0 + $0x4a0] sm:$0xff]  ;;  %v163_v21 = vld [vmem:[%s3416_s0 + $0x4a8] sm:$0xff]  ;;  %v421_v26 = vmul.f32 %v2188_v51, %v158_v8  ;;  %v422_v29 = vmul.f32 %v2188_v51, %v159_v13  ;;  %v423_v30 = vmul.f32 %v2188_v51, %v160_v14 }
 0x16d   :  { %v164_v22 = vld [vmem:[%s3416_s0 + $0x4b0] sm:$0xff]  ;;  %v424_v31 = vmul.f32 %v2188_v51, %v161_v15  ;;  %v425_v33 = vmul.f32 %v2188_v51, %v162_v20  ;;  %v426_v34 = vmul.f32 %v2188_v51, %v163_v21 }
 0x16e   :  { %1188 = vst [vmem:[%s3419_s3 + $0x440] sm:$0xff] %v932_v9  ;;  %v684_v32 = vadd.f32 %v2170_v44, %v421_v26  ;;  %v427_v35 = vmul.f32 %v2188_v51, %v164_v22  ;;  %v685_v36 = vadd.f32 %v2170_v44, %v422_v29  ;;  %v686_v37 = vadd.f32 %v2170_v44, %v423_v30 }
 0x16f   :  { %v687_v38 = vadd.f32 %v2170_v44, %v424_v31  ;;  %v688_v41 = vadd.f32 %v2170_v44, %v425_v33  ;;  %v689_v42 = vadd.f32 %v2170_v44, %v426_v34 }
 0x170   :  { %v940_v1 = vmax.f32 %v684_v32, 0.0  ;;  %v690_v43 = vadd.f32 %v2170_v44, %v427_v35  ;;  %v941_v47 = vmax.f32 %v685_v36, 0.0  ;;  %v942_v48 = vmax.f32 %v686_v37, 0.0 }
 0x171   :  { %v943_v49 = vmax.f32 %v687_v38, 0.0  ;;  %v944_v55 = vmax.f32 %v688_v41, 0.0  ;;  %v945_v56 = vmax.f32 %v689_v42, 0.0 }
 0x172   :  { %v946_v57 = vmax.f32 %v690_v43, 0.0 }
 0x175   :  { %v165_v27 = vld [vmem:[%s3416_s0 + $0x4b8] sm:$0xff] }
 0x176   :  { %1189 = vst [vmem:[%s3419_s3 + $0x448] sm:$0xff] %v933_v16  ;;  %1190 = vst [vmem:[%s3419_s3 + $0x450] sm:$0xff] %v934_v17  ;;  %v428_v39 = vmul.f32 %v2188_v51, %v165_v27 }
 0x177   :  { %1191 = vst [vmem:[%s3419_s3 + $0x458] sm:$0xff] %v935_v18  ;;  %1192 = vst [vmem:[%s3419_s3 + $0x460] sm:$0xff] %v936_v23 }
 0x178   :  { %1193 = vst [vmem:[%s3419_s3 + $0x468] sm:$0xff] %v937_v24  ;;  %1194 = vst [vmem:[%s3419_s3 + $0x470] sm:$0xff] %v938_v25  ;;  %v691_v50 = vadd.f32 %v2170_v44, %v428_v39 }
 0x179   :  { %1195 = vst [vmem:[%s3419_s3 + $0x478] sm:$0xff] %v939_v28 }
 0x17a   :  { %v947_v60 = vmax.f32 %v691_v50, 0.0 }
 0x180   :  { %v166_v40 = vld [vmem:[%s3416_s0 + $0x4c0] sm:$0xff]  ;;  %v167_v2 = vld [vmem:[%s3416_s0 + $0x4c8] sm:$0xff]  ;;  %v168_v45 = vld [vmem:[%s3416_s0 + $0x4d0] sm:$0xff] }
 0x181   :  { %v169_v46 = vld [vmem:[%s3416_s0 + $0x4d8] sm:$0xff]  ;;  %v170_v52 = vld [vmem:[%s3416_s0 + $0x4e0] sm:$0xff]  ;;  %v171_v53 = vld [vmem:[%s3416_s0 + $0x4e8] sm:$0xff]  ;;  %v429_v58 = vmul.f32 %v2188_v51, %v166_v40  ;;  %v430_v61 = vmul.f32 %v2188_v51, %v167_v2  ;;  %v431_v62 = vmul.f32 %v2188_v51, %v168_v45 }
 0x182   :  { %v172_v54 = vld [vmem:[%s3416_s0 + $0x4f0] sm:$0xff]  ;;  %v432_v63 = vmul.f32 %v2188_v51, %v169_v46  ;;  %v433_v3 = vmul.f32 %v2188_v51, %v170_v52  ;;  %v434_v4 = vmul.f32 %v2188_v51, %v171_v53 }
 0x183   :  { %1196 = vst [vmem:[%s3419_s3 + $0x480] sm:$0xff] %v940_v1  ;;  %v692_v0 = vadd.f32 %v2170_v44, %v429_v58  ;;  %v435_v5 = vmul.f32 %v2188_v51, %v172_v54  ;;  %v693_v6 = vadd.f32 %v2170_v44, %v430_v61  ;;  %v694_v7 = vadd.f32 %v2170_v44, %v431_v62 }
 0x184   :  { %v695_v8 = vadd.f32 %v2170_v44, %v432_v63  ;;  %v696_v12 = vadd.f32 %v2170_v44, %v433_v3  ;;  %v697_v13 = vadd.f32 %v2170_v44, %v434_v4 }
 0x185   :  { %v948_v11 = vmax.f32 %v692_v0, 0.0  ;;  %v698_v14 = vadd.f32 %v2170_v44, %v435_v5  ;;  %v949_v18 = vmax.f32 %v693_v6, 0.0  ;;  %v950_v19 = vmax.f32 %v694_v7, 0.0 }
 0x186   :  { %v951_v20 = vmax.f32 %v695_v8, 0.0  ;;  %v952_v25 = vmax.f32 %v696_v12, 0.0  ;;  %v953_v26 = vmax.f32 %v697_v13, 0.0 }
 0x187   :  { %v954_v27 = vmax.f32 %v698_v14, 0.0 }
 0x18a   :  { %v173_v59 = vld [vmem:[%s3416_s0 + $0x4f8] sm:$0xff] }
 0x18b   :  { %1197 = vst [vmem:[%s3419_s3 + $0x488] sm:$0xff] %v941_v47  ;;  %1198 = vst [vmem:[%s3419_s3 + $0x490] sm:$0xff] %v942_v48  ;;  %v436_v9 = vmul.f32 %v2188_v51, %v173_v59 }
 0x18c   :  { %1199 = vst [vmem:[%s3419_s3 + $0x498] sm:$0xff] %v943_v49  ;;  %1200 = vst [vmem:[%s3419_s3 + $0x4a0] sm:$0xff] %v944_v55 }
 0x18d   :  { %1201 = vst [vmem:[%s3419_s3 + $0x4a8] sm:$0xff] %v945_v56  ;;  %1202 = vst [vmem:[%s3419_s3 + $0x4b0] sm:$0xff] %v946_v57  ;;  %v699_v21 = vadd.f32 %v2170_v44, %v436_v9 }
 0x18e   :  { %1203 = vst [vmem:[%s3419_s3 + $0x4b8] sm:$0xff] %v947_v60 }
 0x18f   :  { %v955_v30 = vmax.f32 %v699_v21, 0.0 }
 0x195   :  { %v174_v10 = vld [vmem:[%s3416_s0 + $0x500] sm:$0xff]  ;;  %v175_v15 = vld [vmem:[%s3416_s0 + $0x508] sm:$0xff]  ;;  %v176_v16 = vld [vmem:[%s3416_s0 + $0x510] sm:$0xff] }
 0x196   :  { %v177_v17 = vld [vmem:[%s3416_s0 + $0x518] sm:$0xff]  ;;  %v178_v22 = vld [vmem:[%s3416_s0 + $0x520] sm:$0xff]  ;;  %v179_v23 = vld [vmem:[%s3416_s0 + $0x528] sm:$0xff]  ;;  %v437_v28 = vmul.f32 %v2188_v51, %v174_v10  ;;  %v438_v31 = vmul.f32 %v2188_v51, %v175_v15  ;;  %v439_v32 = vmul.f32 %v2188_v51, %v176_v16 }
 0x197   :  { %v180_v24 = vld [vmem:[%s3416_s0 + $0x530] sm:$0xff]  ;;  %v440_v33 = vmul.f32 %v2188_v51, %v177_v17  ;;  %v441_v35 = vmul.f32 %v2188_v51, %v178_v22  ;;  %v442_v36 = vmul.f32 %v2188_v51, %v179_v23 }
 0x198   :  { %1204 = vst [vmem:[%s3419_s3 + $0x4c0] sm:$0xff] %v948_v11  ;;  %v700_v34 = vadd.f32 %v2170_v44, %v437_v28  ;;  %v443_v37 = vmul.f32 %v2188_v51, %v180_v24  ;;  %v701_v38 = vadd.f32 %v2170_v44, %v438_v31  ;;  %v702_v39 = vadd.f32 %v2170_v44, %v439_v32 }
 0x199   :  { %v703_v40 = vadd.f32 %v2170_v44, %v440_v33  ;;  %v704_v43 = vadd.f32 %v2170_v44, %v441_v35  ;;  %v705_v2 = vadd.f32 %v2170_v44, %v442_v36 }
 0x19a   :  { %v956_v42 = vmax.f32 %v700_v34, 0.0  ;;  %v706_v45 = vadd.f32 %v2170_v44, %v443_v37  ;;  %v957_v49 = vmax.f32 %v701_v38, 0.0  ;;  %v958_v50 = vmax.f32 %v702_v39, 0.0 }
 0x19b   :  { %v959_v52 = vmax.f32 %v703_v40, 0.0  ;;  %v960_v57 = vmax.f32 %v704_v43, 0.0  ;;  %v961_v58 = vmax.f32 %v705_v2, 0.0 }
 0x19c   :  { %v962_v59 = vmax.f32 %v706_v45, 0.0 }
 0x19f   :  { %v181_v29 = vld [vmem:[%s3416_s0 + $0x538] sm:$0xff] }
 0x1a0   :  { %1205 = vst [vmem:[%s3419_s3 + $0x4c8] sm:$0xff] %v949_v18  ;;  %1206 = vst [vmem:[%s3419_s3 + $0x4d0] sm:$0xff] %v950_v19  ;;  %v444_v1 = vmul.f32 %v2188_v51, %v181_v29 }
 0x1a1   :  { %1207 = vst [vmem:[%s3419_s3 + $0x4d8] sm:$0xff] %v951_v20  ;;  %1208 = vst [vmem:[%s3419_s3 + $0x4e0] sm:$0xff] %v952_v25 }
 0x1a2   :  { %1209 = vst [vmem:[%s3419_s3 + $0x4e8] sm:$0xff] %v953_v26  ;;  %1210 = vst [vmem:[%s3419_s3 + $0x4f0] sm:$0xff] %v954_v27  ;;  %v707_v53 = vadd.f32 %v2170_v44, %v444_v1 }
 0x1a3   :  { %1211 = vst [vmem:[%s3419_s3 + $0x4f8] sm:$0xff] %v955_v30 }
 0x1a4   :  { %v963_v62 = vmax.f32 %v707_v53, 0.0 }
 0x1aa   :  { %v182_v41 = vld [vmem:[%s3416_s0 + $0x540] sm:$0xff]  ;;  %v183_v46 = vld [vmem:[%s3416_s0 + $0x548] sm:$0xff]  ;;  %v184_v47 = vld [vmem:[%s3416_s0 + $0x550] sm:$0xff] }
 0x1ab   :  { %v185_v48 = vld [vmem:[%s3416_s0 + $0x558] sm:$0xff]  ;;  %v186_v54 = vld [vmem:[%s3416_s0 + $0x560] sm:$0xff]  ;;  %v187_v55 = vld [vmem:[%s3416_s0 + $0x568] sm:$0xff]  ;;  %v445_v60 = vmul.f32 %v2188_v51, %v182_v41  ;;  %v446_v63 = vmul.f32 %v2188_v51, %v183_v46  ;;  %v447_v0 = vmul.f32 %v2188_v51, %v184_v47 }
 0x1ac   :  { %v188_v56 = vld [vmem:[%s3416_s0 + $0x570] sm:$0xff]  ;;  %v448_v3 = vmul.f32 %v2188_v51, %v185_v48  ;;  %v449_v5 = vmul.f32 %v2188_v51, %v186_v54  ;;  %v450_v6 = vmul.f32 %v2188_v51, %v187_v55 }
 0x1ad   :  { %1212 = vst [vmem:[%s3419_s3 + $0x500] sm:$0xff] %v956_v42  ;;  %v708_v4 = vadd.f32 %v2170_v44, %v445_v60  ;;  %v451_v7 = vmul.f32 %v2188_v51, %v188_v56  ;;  %v709_v8 = vadd.f32 %v2170_v44, %v446_v63  ;;  %v710_v9 = vadd.f32 %v2170_v44, %v447_v0 }
 0x1ae   :  { %v711_v10 = vadd.f32 %v2170_v44, %v448_v3  ;;  %v712_v14 = vadd.f32 %v2170_v44, %v449_v5  ;;  %v713_v15 = vadd.f32 %v2170_v44, %v450_v6 }
 0x1af   :  { %v964_v13 = vmax.f32 %v708_v4, 0.0  ;;  %v714_v16 = vadd.f32 %v2170_v44, %v451_v7  ;;  %v965_v20 = vmax.f32 %v709_v8, 0.0  ;;  %v966_v21 = vmax.f32 %v710_v9, 0.0 }
 0x1b0   :  { %v967_v22 = vmax.f32 %v711_v10, 0.0  ;;  %v968_v27 = vmax.f32 %v712_v14, 0.0  ;;  %v969_v28 = vmax.f32 %v713_v15, 0.0 }
 0x1b1   :  { %v970_v29 = vmax.f32 %v714_v16, 0.0 }
 0x1b4   :  { %v189_v61 = vld [vmem:[%s3416_s0 + $0x578] sm:$0xff] }
 0x1b5   :  { %1213 = vst [vmem:[%s3419_s3 + $0x508] sm:$0xff] %v957_v49  ;;  %1214 = vst [vmem:[%s3419_s3 + $0x510] sm:$0xff] %v958_v50  ;;  %v452_v11 = vmul.f32 %v2188_v51, %v189_v61 }
 0x1b6   :  { %1215 = vst [vmem:[%s3419_s3 + $0x518] sm:$0xff] %v959_v52  ;;  %1216 = vst [vmem:[%s3419_s3 + $0x520] sm:$0xff] %v960_v57 }
 0x1b7   :  { %1217 = vst [vmem:[%s3419_s3 + $0x528] sm:$0xff] %v961_v58  ;;  %1218 = vst [vmem:[%s3419_s3 + $0x530] sm:$0xff] %v962_v59  ;;  %v715_v23 = vadd.f32 %v2170_v44, %v452_v11 }
 0x1b8   :  { %1219 = vst [vmem:[%s3419_s3 + $0x538] sm:$0xff] %v963_v62 }
 0x1b9   :  { %v971_v32 = vmax.f32 %v715_v23, 0.0 }
 0x1bf   :  { %v190_v12 = vld [vmem:[%s3416_s0 + $0x580] sm:$0xff]  ;;  %v191_v17 = vld [vmem:[%s3416_s0 + $0x588] sm:$0xff]  ;;  %v192_v18 = vld [vmem:[%s3416_s0 + $0x590] sm:$0xff] }
 0x1c0   :  { %v193_v19 = vld [vmem:[%s3416_s0 + $0x598] sm:$0xff]  ;;  %v194_v24 = vld [vmem:[%s3416_s0 + $0x5a0] sm:$0xff]  ;;  %v195_v25 = vld [vmem:[%s3416_s0 + $0x5a8] sm:$0xff]  ;;  %v453_v30 = vmul.f32 %v2188_v51, %v190_v12  ;;  %v454_v33 = vmul.f32 %v2188_v51, %v191_v17  ;;  %v455_v34 = vmul.f32 %v2188_v51, %v192_v18 }
 0x1c1   :  { %v196_v26 = vld [vmem:[%s3416_s0 + $0x5b0] sm:$0xff]  ;;  %v456_v35 = vmul.f32 %v2188_v51, %v193_v19  ;;  %v457_v37 = vmul.f32 %v2188_v51, %v194_v24  ;;  %v458_v38 = vmul.f32 %v2188_v51, %v195_v25 }
 0x1c2   :  { %1220 = vst [vmem:[%s3419_s3 + $0x540] sm:$0xff] %v964_v13  ;;  %v716_v36 = vadd.f32 %v2170_v44, %v453_v30  ;;  %v459_v39 = vmul.f32 %v2188_v51, %v196_v26  ;;  %v717_v40 = vadd.f32 %v2170_v44, %v454_v33  ;;  %v718_v1 = vadd.f32 %v2170_v44, %v455_v34 }
 0x1c3   :  { %v719_v41 = vadd.f32 %v2170_v44, %v456_v35  ;;  %v720_v45 = vadd.f32 %v2170_v44, %v457_v37  ;;  %v721_v46 = vadd.f32 %v2170_v44, %v458_v38 }
 0x1c4   :  { %v972_v2 = vmax.f32 %v716_v36, 0.0  ;;  %v722_v47 = vadd.f32 %v2170_v44, %v459_v39  ;;  %v973_v52 = vmax.f32 %v717_v40, 0.0  ;;  %v974_v53 = vmax.f32 %v718_v1, 0.0 }
 0x1c5   :  { %v975_v54 = vmax.f32 %v719_v41, 0.0  ;;  %v976_v59 = vmax.f32 %v720_v45, 0.0  ;;  %v977_v60 = vmax.f32 %v721_v46, 0.0 }
 0x1c6   :  { %v978_v61 = vmax.f32 %v722_v47, 0.0 }
 0x1c9   :  { %v197_v31 = vld [vmem:[%s3416_s0 + $0x5b8] sm:$0xff] }
 0x1ca   :  { %1221 = vst [vmem:[%s3419_s3 + $0x548] sm:$0xff] %v965_v20  ;;  %1222 = vst [vmem:[%s3419_s3 + $0x550] sm:$0xff] %v966_v21  ;;  %v460_v42 = vmul.f32 %v2188_v51, %v197_v31 }
 0x1cb   :  { %1223 = vst [vmem:[%s3419_s3 + $0x558] sm:$0xff] %v967_v22  ;;  %1224 = vst [vmem:[%s3419_s3 + $0x560] sm:$0xff] %v968_v27 }
 0x1cc   :  { %1225 = vst [vmem:[%s3419_s3 + $0x568] sm:$0xff] %v969_v28  ;;  %1226 = vst [vmem:[%s3419_s3 + $0x570] sm:$0xff] %v970_v29  ;;  %v723_v55 = vadd.f32 %v2170_v44, %v460_v42 }
 0x1cd   :  { %1227 = vst [vmem:[%s3419_s3 + $0x578] sm:$0xff] %v971_v32 }
 0x1ce   :  { %v979_v0 = vmax.f32 %v723_v55, 0.0 }
 0x1d4   :  { %v198_v43 = vld [vmem:[%s3416_s0 + $0x5c0] sm:$0xff]  ;;  %v199_v48 = vld [vmem:[%s3416_s0 + $0x5c8] sm:$0xff]  ;;  %v200_v49 = vld [vmem:[%s3416_s0 + $0x5d0] sm:$0xff] }
 0x1d5   :  { %v201_v50 = vld [vmem:[%s3416_s0 + $0x5d8] sm:$0xff]  ;;  %v202_v56 = vld [vmem:[%s3416_s0 + $0x5e0] sm:$0xff]  ;;  %v203_v57 = vld [vmem:[%s3416_s0 + $0x5e8] sm:$0xff]  ;;  %v461_v62 = vmul.f32 %v2188_v51, %v198_v43  ;;  %v462_v3 = vmul.f32 %v2188_v51, %v199_v48  ;;  %v463_v4 = vmul.f32 %v2188_v51, %v200_v49 }
 0x1d6   :  { %v204_v58 = vld [vmem:[%s3416_s0 + $0x5f0] sm:$0xff]  ;;  %v464_v5 = vmul.f32 %v2188_v51, %v201_v50  ;;  %v465_v7 = vmul.f32 %v2188_v51, %v202_v56  ;;  %v466_v8 = vmul.f32 %v2188_v51, %v203_v57 }
 0x1d7   :  { %1228 = vst [vmem:[%s3419_s3 + $0x580] sm:$0xff] %v972_v2  ;;  %v724_v6 = vadd.f32 %v2170_v44, %v461_v62  ;;  %v467_v9 = vmul.f32 %v2188_v51, %v204_v58  ;;  %v725_v10 = vadd.f32 %v2170_v44, %v462_v3  ;;  %v726_v11 = vadd.f32 %v2170_v44, %v463_v4 }
 0x1d8   :  { %v727_v12 = vadd.f32 %v2170_v44, %v464_v5  ;;  %v728_v16 = vadd.f32 %v2170_v44, %v465_v7  ;;  %v729_v17 = vadd.f32 %v2170_v44, %v466_v8 }
 0x1d9   :  { %v980_v15 = vmax.f32 %v724_v6, 0.0  ;;  %v730_v18 = vadd.f32 %v2170_v44, %v467_v9  ;;  %v981_v22 = vmax.f32 %v725_v10, 0.0  ;;  %v982_v23 = vmax.f32 %v726_v11, 0.0 }
 0x1da   :  { %v983_v24 = vmax.f32 %v727_v12, 0.0  ;;  %v984_v29 = vmax.f32 %v728_v16, 0.0  ;;  %v985_v30 = vmax.f32 %v729_v17, 0.0 }
 0x1db   :  { %v986_v31 = vmax.f32 %v730_v18, 0.0 }
 0x1de   :  { %v205_v63 = vld [vmem:[%s3416_s0 + $0x5f8] sm:$0xff] }
 0x1df   :  { %1229 = vst [vmem:[%s3419_s3 + $0x588] sm:$0xff] %v973_v52  ;;  %1230 = vst [vmem:[%s3419_s3 + $0x590] sm:$0xff] %v974_v53  ;;  %v468_v13 = vmul.f32 %v2188_v51, %v205_v63 }
 0x1e0   :  { %1231 = vst [vmem:[%s3419_s3 + $0x598] sm:$0xff] %v975_v54  ;;  %1232 = vst [vmem:[%s3419_s3 + $0x5a0] sm:$0xff] %v976_v59 }
 0x1e1   :  { %1233 = vst [vmem:[%s3419_s3 + $0x5a8] sm:$0xff] %v977_v60  ;;  %1234 = vst [vmem:[%s3419_s3 + $0x5b0] sm:$0xff] %v978_v61  ;;  %v731_v25 = vadd.f32 %v2170_v44, %v468_v13 }
 0x1e2   :  { %1235 = vst [vmem:[%s3419_s3 + $0x5b8] sm:$0xff] %v979_v0 }
 0x1e3   :  { %v987_v34 = vmax.f32 %v731_v25, 0.0 }
 0x1e9   :  { %v206_v14 = vld [vmem:[%s3416_s0 + $0x600] sm:$0xff]  ;;  %v207_v19 = vld [vmem:[%s3416_s0 + $0x608] sm:$0xff]  ;;  %v208_v20 = vld [vmem:[%s3416_s0 + $0x610] sm:$0xff] }
 0x1ea   :  { %v209_v21 = vld [vmem:[%s3416_s0 + $0x618] sm:$0xff]  ;;  %v210_v26 = vld [vmem:[%s3416_s0 + $0x620] sm:$0xff]  ;;  %v211_v27 = vld [vmem:[%s3416_s0 + $0x628] sm:$0xff]  ;;  %v469_v32 = vmul.f32 %v2188_v51, %v206_v14  ;;  %v470_v35 = vmul.f32 %v2188_v51, %v207_v19  ;;  %v471_v36 = vmul.f32 %v2188_v51, %v208_v20 }
 0x1eb   :  { %v212_v28 = vld [vmem:[%s3416_s0 + $0x630] sm:$0xff]  ;;  %v472_v37 = vmul.f32 %v2188_v51, %v209_v21  ;;  %v473_v39 = vmul.f32 %v2188_v51, %v210_v26  ;;  %v474_v40 = vmul.f32 %v2188_v51, %v211_v27  ;;  %v3001_v19 = vld [vmem:[%s3418_s2] ss:$0 sm:$0xff] }
 0x1ec   :  { %1236 = vst [vmem:[%s3419_s3 + $0x5c0] sm:$0xff] %v980_v15  ;;  %v732_v38 = vadd.f32 %v2170_v44, %v469_v32  ;;  %v475_v1 = vmul.f32 %v2188_v51, %v212_v28  ;;  %v733_v41 = vadd.f32 %v2170_v44, %v470_v35  ;;  %v734_v42 = vadd.f32 %v2170_v44, %v471_v36 }
 0x1ed   :  { %v735_v43 = vadd.f32 %v2170_v44, %v472_v37  ;;  %v736_v47 = vadd.f32 %v2170_v44, %v473_v39  ;;  %v737_v48 = vadd.f32 %v2170_v44, %v474_v40 }
 0x1ee   :  { %v988_v46 = vmax.f32 %v732_v38, 0.0  ;;  %v738_v49 = vadd.f32 %v2170_v44, %v475_v1  ;;  %v989_v54 = vmax.f32 %v733_v41, 0.0  ;;  %v990_v55 = vmax.f32 %v734_v42, 0.0 }
 0x1ef   :  { %v991_v56 = vmax.f32 %v735_v43, 0.0  ;;  %v992_v61 = vmax.f32 %v736_v47, 0.0  ;;  %v993_v62 = vmax.f32 %v737_v48, 0.0 }
 0x1f0   :  { %v994_v63 = vmax.f32 %v738_v49, 0.0 }
 0x1f3   :  { %v213_v33 = vld [vmem:[%s3416_s0 + $0x638] sm:$0xff] }
 0x1f4   :  { %1237 = vst [vmem:[%s3419_s3 + $0x5c8] sm:$0xff] %v981_v22  ;;  %1238 = vst [vmem:[%s3419_s3 + $0x5d0] sm:$0xff] %v982_v23  ;;  %v476_v2 = vmul.f32 %v2188_v51, %v213_v33  ;;  %v3030_v33 = vld [vmem:[%s3417_s1] ss:$0 sm:$0xff] }
 0x1f5   :  { %1239 = vst [vmem:[%s3419_s3 + $0x5d8] sm:$0xff] %v983_v24  ;;  %1240 = vst [vmem:[%s3419_s3 + $0x5e0] sm:$0xff] %v984_v29 }
 0x1f6   :  { %1241 = vst [vmem:[%s3419_s3 + $0x5e8] sm:$0xff] %v985_v30  ;;  %1242 = vst [vmem:[%s3419_s3 + $0x5f0] sm:$0xff] %v986_v31  ;;  %v739_v57 = vadd.f32 %v2170_v44, %v476_v2 }
 0x1f7   :  { %1243 = vst [vmem:[%s3419_s3 + $0x5f8] sm:$0xff] %v987_v34 }
 0x1f8   :  { %v995_v4 = vmax.f32 %v739_v57, 0.0 }
 0x1fe   :  { %v214_v45 = vld [vmem:[%s3416_s0 + $0x640] sm:$0xff]  ;;  %v215_v50 = vld [vmem:[%s3416_s0 + $0x648] sm:$0xff]  ;;  %v216_v52 = vld [vmem:[%s3416_s0 + $0x650] sm:$0xff] }
 0x1ff   :  { %v217_v53 = vld [vmem:[%s3416_s0 + $0x658] sm:$0xff]  ;;  %v218_v58 = vld [vmem:[%s3416_s0 + $0x660] sm:$0xff]  ;;  %v219_v59 = vld [vmem:[%s3416_s0 + $0x668] sm:$0xff]  ;;  %v477_v0 = vmul.f32 %v2188_v51, %v214_v45  ;;  %v478_v5 = vmul.f32 %v2188_v51, %v215_v50  ;;  %v479_v6 = vmul.f32 %v2188_v51, %v216_v52 }
 0x200   :  { %v220_v60 = vld [vmem:[%s3416_s0 + $0x670] sm:$0xff]  ;;  %v480_v7 = vmul.f32 %v2188_v51, %v217_v53  ;;  %v481_v9 = vmul.f32 %v2188_v51, %v218_v58  ;;  %v482_v10 = vmul.f32 %v2188_v51, %v219_v59 }
 0x201   :  { %1244 = vst [vmem:[%s3419_s3 + $0x600] sm:$0xff] %v988_v46  ;;  %v740_v8 = vadd.f32 %v2170_v44, %v477_v0  ;;  %v483_v11 = vmul.f32 %v2188_v51, %v220_v60  ;;  %v741_v12 = vadd.f32 %v2170_v44, %v478_v5  ;;  %v742_v13 = vadd.f32 %v2170_v44, %v479_v6 }
 0x202   :  { %v743_v14 = vadd.f32 %v2170_v44, %v480_v7  ;;  %v744_v18 = vadd.f32 %v2170_v44, %v481_v9  ;;  %v745_v20 = vadd.f32 %v3001_v19, %v482_v10 }
 0x203   :  { %v996_v17 = vmax.f32 %v740_v8, 0.0  ;;  %v746_v21 = vadd.f32 %v3001_v19, %v483_v11  ;;  %v997_v23 = vmax.f32 %v741_v12, 0.0  ;;  %v998_v24 = vmax.f32 %v742_v13, 0.0 }
 0x204   :  { %v999_v25 = vmax.f32 %v743_v14, 0.0  ;;  %v1000_v30 = vmax.f32 %v744_v18, 0.0  ;;  %v1001_v31 = vmax.f32 %v745_v20, 0.0 }
 0x205   :  { %v1002_v32 = vmax.f32 %v746_v21, 0.0 }
 0x208   :  { %v221_v3 = vld [vmem:[%s3416_s0 + $0x678] sm:$0xff] }
 0x209   :  { %1245 = vst [vmem:[%s3419_s3 + $0x608] sm:$0xff] %v989_v54  ;;  %1246 = vst [vmem:[%s3419_s3 + $0x610] sm:$0xff] %v990_v55  ;;  %v484_v15 = vmul.f32 %v2188_v51, %v221_v3 }
 0x20a   :  { %1247 = vst [vmem:[%s3419_s3 + $0x618] sm:$0xff] %v991_v56  ;;  %1248 = vst [vmem:[%s3419_s3 + $0x620] sm:$0xff] %v992_v61 }
 0x20b   :  { %1249 = vst [vmem:[%s3419_s3 + $0x628] sm:$0xff] %v993_v62  ;;  %1250 = vst [vmem:[%s3419_s3 + $0x630] sm:$0xff] %v994_v63  ;;  %v747_v26 = vadd.f32 %v3001_v19, %v484_v15 }
 0x20c   :  { %1251 = vst [vmem:[%s3419_s3 + $0x638] sm:$0xff] %v995_v4 }
 0x20d   :  { %v1003_v36 = vmax.f32 %v747_v26, 0.0 }
 0x213   :  { %v222_v16 = vld [vmem:[%s3416_s0 + $0x680] sm:$0xff]  ;;  %v223_v51 = vld [vmem:[%s3416_s0 + $0x688] sm:$0xff]  ;;  %v224_v22 = vld [vmem:[%s3416_s0 + $0x690] sm:$0xff] }
 0x214   :  { %v225_v44 = vld [vmem:[%s3416_s0 + $0x698] sm:$0xff]  ;;  %v226_v27 = vld [vmem:[%s3416_s0 + $0x6a0] sm:$0xff]  ;;  %v227_v28 = vld [vmem:[%s3416_s0 + $0x6a8] sm:$0xff]  ;;  %v485_v34 = vmul.f32 %v3030_v33, %v222_v16  ;;  %v486_v37 = vmul.f32 %v3030_v33, %v223_v51  ;;  %v487_v38 = vmul.f32 %v3030_v33, %v224_v22 }
 0x215   :  { %v228_v29 = vld [vmem:[%s3416_s0 + $0x6b0] sm:$0xff]  ;;  %v488_v39 = vmul.f32 %v3030_v33, %v225_v44  ;;  %v489_v1 = vmul.f32 %v3030_v33, %v226_v27  ;;  %v490_v41 = vmul.f32 %v3030_v33, %v227_v28 }
 0x216   :  { %1252 = vst [vmem:[%s3419_s3 + $0x640] sm:$0xff] %v996_v17  ;;  %v748_v40 = vadd.f32 %v3001_v19, %v485_v34  ;;  %v491_v42 = vmul.f32 %v3030_v33, %v228_v29  ;;  %v749_v43 = vadd.f32 %v3001_v19, %v486_v37  ;;  %v750_v2 = vadd.f32 %v3001_v19, %v487_v38 }
 0x217   :  { %v751_v45 = vadd.f32 %v3001_v19, %v488_v39  ;;  %v752_v49 = vadd.f32 %v3001_v19, %v489_v1  ;;  %v753_v50 = vadd.f32 %v3001_v19, %v490_v41 }
 0x218   :  { %v1004_v48 = vmax.f32 %v748_v40, 0.0  ;;  %v754_v52 = vadd.f32 %v3001_v19, %v491_v42  ;;  %v1005_v56 = vmax.f32 %v749_v43, 0.0  ;;  %v1006_v57 = vmax.f32 %v750_v2, 0.0 }
 0x219   :  { %v1007_v58 = vmax.f32 %v751_v45, 0.0  ;;  %v1008_v63 = vmax.f32 %v752_v49, 0.0  ;;  %v1009_v0 = vmax.f32 %v753_v50, 0.0 }
 0x21a   :  { %v1010_v3 = vmax.f32 %v754_v52, 0.0 }
 0x21d   :  { %v229_v35 = vld [vmem:[%s3416_s0 + $0x6b8] sm:$0xff] }
 0x21e   :  { %1253 = vst [vmem:[%s3419_s3 + $0x648] sm:$0xff] %v997_v23  ;;  %1254 = vst [vmem:[%s3419_s3 + $0x650] sm:$0xff] %v998_v24  ;;  %v492_v46 = vmul.f32 %v3030_v33, %v229_v35 }
 0x21f   :  { %1255 = vst [vmem:[%s3419_s3 + $0x658] sm:$0xff] %v999_v25  ;;  %1256 = vst [vmem:[%s3419_s3 + $0x660] sm:$0xff] %v1000_v30 }
 0x220   :  { %1257 = vst [vmem:[%s3419_s3 + $0x668] sm:$0xff] %v1001_v31  ;;  %1258 = vst [vmem:[%s3419_s3 + $0x670] sm:$0xff] %v1002_v32  ;;  %v755_v59 = vadd.f32 %v3001_v19, %v492_v46 }
 0x221   :  { %1259 = vst [vmem:[%s3419_s3 + $0x678] sm:$0xff] %v1003_v36 }
 0x222   :  { %v1011_v6 = vmax.f32 %v755_v59, 0.0 }
 0x228   :  { %v230_v47 = vld [vmem:[%s3416_s0 + $0x6c0] sm:$0xff]  ;;  %v231_v53 = vld [vmem:[%s3416_s0 + $0x6c8] sm:$0xff]  ;;  %v232_v54 = vld [vmem:[%s3416_s0 + $0x6d0] sm:$0xff] }
 0x229   :  { %v233_v55 = vld [vmem:[%s3416_s0 + $0x6d8] sm:$0xff]  ;;  %v234_v60 = vld [vmem:[%s3416_s0 + $0x6e0] sm:$0xff]  ;;  %v235_v61 = vld [vmem:[%s3416_s0 + $0x6e8] sm:$0xff]  ;;  %v493_v4 = vmul.f32 %v3030_v33, %v230_v47  ;;  %v494_v7 = vmul.f32 %v3030_v33, %v231_v53  ;;  %v495_v8 = vmul.f32 %v3030_v33, %v232_v54 }
 0x22a   :  { %v236_v62 = vld [vmem:[%s3416_s0 + $0x6f0] sm:$0xff]  ;;  %v496_v9 = vmul.f32 %v3030_v33, %v233_v55  ;;  %v497_v11 = vmul.f32 %v3030_v33, %v234_v60  ;;  %v498_v12 = vmul.f32 %v3030_v33, %v235_v61 }
 0x22b   :  { %1260 = vst [vmem:[%s3419_s3 + $0x680] sm:$0xff] %v1004_v48  ;;  %v756_v10 = vadd.f32 %v3001_v19, %v493_v4  ;;  %v499_v13 = vmul.f32 %v3030_v33, %v236_v62  ;;  %v757_v14 = vadd.f32 %v3001_v19, %v494_v7  ;;  %v758_v15 = vadd.f32 %v3001_v19, %v495_v8 }
 0x22c   :  { %v759_v16 = vadd.f32 %v3001_v19, %v496_v9  ;;  %v760_v21 = vadd.f32 %v3001_v19, %v497_v11  ;;  %v761_v51 = vadd.f32 %v3001_v19, %v498_v12 }
 0x22d   :  { %v1012_v20 = vmax.f32 %v756_v10, 0.0  ;;  %v762_v22 = vadd.f32 %v3001_v19, %v499_v13  ;;  %v1013_v25 = vmax.f32 %v757_v14, 0.0  ;;  %v1014_v26 = vmax.f32 %v758_v15, 0.0 }
 0x22e   :  { %v1015_v27 = vmax.f32 %v759_v16, 0.0  ;;  %v1016_v32 = vmax.f32 %v760_v21, 0.0  ;;  %v1017_v34 = vmax.f32 %v761_v51, 0.0 }
 0x22f   :  { %v1018_v35 = vmax.f32 %v762_v22, 0.0 }
 0x232   :  { %v237_v5 = vld [vmem:[%s3416_s0 + $0x6f8] sm:$0xff] }
 0x233   :  { %1261 = vst [vmem:[%s3419_s3 + $0x688] sm:$0xff] %v1005_v56  ;;  %1262 = vst [vmem:[%s3419_s3 + $0x690] sm:$0xff] %v1006_v57  ;;  %v500_v17 = vmul.f32 %v3030_v33, %v237_v5 }
 0x234   :  { %1263 = vst [vmem:[%s3419_s3 + $0x698] sm:$0xff] %v1007_v58  ;;  %1264 = vst [vmem:[%s3419_s3 + $0x6a0] sm:$0xff] %v1008_v63 }
 0x235   :  { %1265 = vst [vmem:[%s3419_s3 + $0x6a8] sm:$0xff] %v1009_v0  ;;  %1266 = vst [vmem:[%s3419_s3 + $0x6b0] sm:$0xff] %v1010_v3  ;;  %v763_v28 = vadd.f32 %v3001_v19, %v500_v17 }
 0x236   :  { %1267 = vst [vmem:[%s3419_s3 + $0x6b8] sm:$0xff] %v1011_v6 }
 0x237   :  { %v1019_v38 = vmax.f32 %v763_v28, 0.0 }
 0x23d   :  { %v238_v18 = vld [vmem:[%s3416_s0 + $0x700] sm:$0xff]  ;;  %v239_v44 = vld [vmem:[%s3416_s0 + $0x708] sm:$0xff]  ;;  %v240_v23 = vld [vmem:[%s3416_s0 + $0x710] sm:$0xff] }
 0x23e   :  { %v241_v24 = vld [vmem:[%s3416_s0 + $0x718] sm:$0xff]  ;;  %v242_v29 = vld [vmem:[%s3416_s0 + $0x720] sm:$0xff]  ;;  %v243_v30 = vld [vmem:[%s3416_s0 + $0x728] sm:$0xff]  ;;  %v501_v36 = vmul.f32 %v3030_v33, %v238_v18  ;;  %v502_v39 = vmul.f32 %v3030_v33, %v239_v44  ;;  %v503_v40 = vmul.f32 %v3030_v33, %v240_v23 }
 0x23f   :  { %v244_v31 = vld [vmem:[%s3416_s0 + $0x730] sm:$0xff]  ;;  %v504_v1 = vmul.f32 %v3030_v33, %v241_v24  ;;  %v505_v42 = vmul.f32 %v3030_v33, %v242_v29  ;;  %v506_v43 = vmul.f32 %v3030_v33, %v243_v30 }
 0x240   :  { %1268 = vst [vmem:[%s3419_s3 + $0x6c0] sm:$0xff] %v1012_v20  ;;  %v764_v41 = vadd.f32 %v3001_v19, %v501_v36  ;;  %v507_v2 = vmul.f32 %v3030_v33, %v244_v31  ;;  %v765_v45 = vadd.f32 %v3001_v19, %v502_v39  ;;  %v766_v46 = vadd.f32 %v3001_v19, %v503_v40 }
 0x241   :  { %v767_v47 = vadd.f32 %v3001_v19, %v504_v1  ;;  %v768_v52 = vadd.f32 %v3001_v19, %v505_v42  ;;  %v769_v53 = vadd.f32 %v3001_v19, %v506_v43 }
 0x242   :  { %v1020_v50 = vmax.f32 %v764_v41, 0.0  ;;  %v770_v54 = vadd.f32 %v3001_v19, %v507_v2  ;;  %v1021_v58 = vmax.f32 %v765_v45, 0.0  ;;  %v1022_v59 = vmax.f32 %v766_v46, 0.0 }
 0x243   :  { %v1023_v60 = vmax.f32 %v767_v47, 0.0  ;;  %v1024_v3 = vmax.f32 %v768_v52, 0.0  ;;  %v1025_v4 = vmax.f32 %v769_v53, 0.0 }
 0x244   :  { %v1026_v5 = vmax.f32 %v770_v54, 0.0 }
 0x247   :  { %v245_v37 = vld [vmem:[%s3416_s0 + $0x738] sm:$0xff] }
 0x248   :  { %1269 = vst [vmem:[%s3419_s3 + $0x6c8] sm:$0xff] %v1013_v25  ;;  %1270 = vst [vmem:[%s3419_s3 + $0x6d0] sm:$0xff] %v1014_v26  ;;  %v508_v48 = vmul.f32 %v3030_v33, %v245_v37 }
 0x249   :  { %1271 = vst [vmem:[%s3419_s3 + $0x6d8] sm:$0xff] %v1015_v27  ;;  %1272 = vst [vmem:[%s3419_s3 + $0x6e0] sm:$0xff] %v1016_v32 }
 0x24a   :  { %1273 = vst [vmem:[%s3419_s3 + $0x6e8] sm:$0xff] %v1017_v34  ;;  %1274 = vst [vmem:[%s3419_s3 + $0x6f0] sm:$0xff] %v1018_v35  ;;  %v771_v61 = vadd.f32 %v3001_v19, %v508_v48 }
 0x24b   :  { %1275 = vst [vmem:[%s3419_s3 + $0x6f8] sm:$0xff] %v1019_v38 }
 0x24c   :  { %v1027_v8 = vmax.f32 %v771_v61, 0.0 }
 0x252   :  { %v246_v49 = vld [vmem:[%s3416_s0 + $0x740] sm:$0xff]  ;;  %v247_v55 = vld [vmem:[%s3416_s0 + $0x748] sm:$0xff]  ;;  %v248_v56 = vld [vmem:[%s3416_s0 + $0x750] sm:$0xff] }
 0x253   :  { %v249_v57 = vld [vmem:[%s3416_s0 + $0x758] sm:$0xff]  ;;  %v250_v62 = vld [vmem:[%s3416_s0 + $0x760] sm:$0xff]  ;;  %v251_v63 = vld [vmem:[%s3416_s0 + $0x768] sm:$0xff]  ;;  %v509_v6 = vmul.f32 %v3030_v33, %v246_v49  ;;  %v510_v9 = vmul.f32 %v3030_v33, %v247_v55  ;;  %v511_v10 = vmul.f32 %v3030_v33, %v248_v56 }
 0x254   :  { %v252_v0 = vld [vmem:[%s3416_s0 + $0x770] sm:$0xff]  ;;  %v512_v11 = vmul.f32 %v3030_v33, %v249_v57  ;;  %v513_v13 = vmul.f32 %v3030_v33, %v250_v62  ;;  %v514_v14 = vmul.f32 %v3030_v33, %v251_v63 }
 0x255   :  { %1276 = vst [vmem:[%s3419_s3 + $0x700] sm:$0xff] %v1020_v50  ;;  %v772_v12 = vadd.f32 %v3001_v19, %v509_v6  ;;  %v515_v15 = vmul.f32 %v3030_v33, %v252_v0  ;;  %v773_v16 = vadd.f32 %v3001_v19, %v510_v9  ;;  %v774_v17 = vadd.f32 %v3001_v19, %v511_v10 }
 0x256   :  { %v775_v18 = vadd.f32 %v3001_v19, %v512_v11  ;;  %v776_v22 = vadd.f32 %v3001_v19, %v513_v13  ;;  %v777_v44 = vadd.f32 %v3001_v19, %v514_v14 }
 0x257   :  { %v1028_v51 = vmax.f32 %v772_v12, 0.0  ;;  %v778_v23 = vadd.f32 %v3001_v19, %v515_v15  ;;  %v1029_v27 = vmax.f32 %v773_v16, 0.0  ;;  %v1030_v28 = vmax.f32 %v774_v17, 0.0 }
 0x258   :  { %v1031_v29 = vmax.f32 %v775_v18, 0.0  ;;  %v1032_v35 = vmax.f32 %v776_v22, 0.0  ;;  %v1033_v36 = vmax.f32 %v777_v44, 0.0 }
 0x259   :  { %v1034_v37 = vmax.f32 %v778_v23, 0.0 }
 0x25c   :  { %v253_v7 = vld [vmem:[%s3416_s0 + $0x778] sm:$0xff] }
 0x25d   :  { %1277 = vst [vmem:[%s3419_s3 + $0x708] sm:$0xff] %v1021_v58  ;;  %1278 = vst [vmem:[%s3419_s3 + $0x710] sm:$0xff] %v1022_v59  ;;  %v516_v20 = vmul.f32 %v3030_v33, %v253_v7 }
 0x25e   :  { %1279 = vst [vmem:[%s3419_s3 + $0x718] sm:$0xff] %v1023_v60  ;;  %1280 = vst [vmem:[%s3419_s3 + $0x720] sm:$0xff] %v1024_v3 }
 0x25f   :  { %1281 = vst [vmem:[%s3419_s3 + $0x728] sm:$0xff] %v1025_v4  ;;  %1282 = vst [vmem:[%s3419_s3 + $0x730] sm:$0xff] %v1026_v5  ;;  %v779_v30 = vadd.f32 %v3001_v19, %v516_v20 }
 0x260   :  { %1283 = vst [vmem:[%s3419_s3 + $0x738] sm:$0xff] %v1027_v8 }
 0x261   :  { %v1035_v40 = vmax.f32 %v779_v30, 0.0 }
 0x267   :  { %v254_v21 = vld [vmem:[%s3416_s0 + $0x780] sm:$0xff]  ;;  %v255_v24 = vld [vmem:[%s3416_s0 + $0x788] sm:$0xff]  ;;  %v256_v25 = vld [vmem:[%s3416_s0 + $0x790] sm:$0xff] }
 0x268   :  { %v257_v26 = vld [vmem:[%s3416_s0 + $0x798] sm:$0xff]  ;;  %v258_v31 = vld [vmem:[%s3416_s0 + $0x7a0] sm:$0xff]  ;;  %v259_v32 = vld [vmem:[%s3416_s0 + $0x7a8] sm:$0xff]  ;;  %v517_v38 = vmul.f32 %v3030_v33, %v254_v21  ;;  %v518_v1 = vmul.f32 %v3030_v33, %v255_v24  ;;  %v519_v41 = vmul.f32 %v3030_v33, %v256_v25 }
 0x269   :  { %v260_v34 = vld [vmem:[%s3416_s0 + $0x7b0] sm:$0xff]  ;;  %v520_v42 = vmul.f32 %v3030_v33, %v257_v26  ;;  %v521_v2 = vmul.f32 %v3030_v33, %v258_v31  ;;  %v522_v45 = vmul.f32 %v3030_v33, %v259_v32 }
 0x26a   :  { %1284 = vst [vmem:[%s3419_s3 + $0x740] sm:$0xff] %v1028_v51  ;;  %v780_v43 = vadd.f32 %v3001_v19, %v517_v38  ;;  %v523_v46 = vmul.f32 %v3030_v33, %v260_v34  ;;  %v781_v47 = vadd.f32 %v3001_v19, %v518_v1  ;;  %v782_v48 = vadd.f32 %v3001_v19, %v519_v41 }
 0x26b   :  { %v783_v49 = vadd.f32 %v3001_v19, %v520_v42  ;;  %v784_v54 = vadd.f32 %v3001_v19, %v521_v2  ;;  %v785_v55 = vadd.f32 %v3001_v19, %v522_v45 }
 0x26c   :  { %v1036_v53 = vmax.f32 %v780_v43, 0.0  ;;  %v786_v56 = vadd.f32 %v3001_v19, %v523_v46  ;;  %v1037_v60 = vmax.f32 %v781_v47, 0.0  ;;  %v1038_v61 = vmax.f32 %v782_v48, 0.0 }
 0x26d   :  { %v1039_v62 = vmax.f32 %v783_v49, 0.0  ;;  %v1040_v5 = vmax.f32 %v784_v54, 0.0  ;;  %v1041_v6 = vmax.f32 %v785_v55, 0.0 }
 0x26e   :  { %v1042_v7 = vmax.f32 %v786_v56, 0.0 }
 0x271   :  { %v261_v39 = vld [vmem:[%s3416_s0 + $0x7b8] sm:$0xff] }
 0x272   :  { %1285 = vst [vmem:[%s3419_s3 + $0x748] sm:$0xff] %v1029_v27  ;;  %1286 = vst [vmem:[%s3419_s3 + $0x750] sm:$0xff] %v1030_v28  ;;  %v524_v50 = vmul.f32 %v3030_v33, %v261_v39 }
 0x273   :  { %1287 = vst [vmem:[%s3419_s3 + $0x758] sm:$0xff] %v1031_v29  ;;  %1288 = vst [vmem:[%s3419_s3 + $0x760] sm:$0xff] %v1032_v35 }
 0x274   :  { %1289 = vst [vmem:[%s3419_s3 + $0x768] sm:$0xff] %v1033_v36  ;;  %1290 = vst [vmem:[%s3419_s3 + $0x770] sm:$0xff] %v1034_v37  ;;  %v787_v63 = vadd.f32 %v3001_v19, %v524_v50 }
 0x275   :  { %1291 = vst [vmem:[%s3419_s3 + $0x778] sm:$0xff] %v1035_v40 }
 0x276   :  { %v1043_v10 = vmax.f32 %v787_v63, 0.0 }
 0x27c   :  { %v262_v52 = vld [vmem:[%s3416_s0 + $0x7c0] sm:$0xff]  ;;  %v263_v57 = vld [vmem:[%s3416_s0 + $0x7c8] sm:$0xff]  ;;  %v264_v58 = vld [vmem:[%s3416_s0 + $0x7d0] sm:$0xff] }
 0x27d   :  { %v265_v59 = vld [vmem:[%s3416_s0 + $0x7d8] sm:$0xff]  ;;  %v266_v0 = vld [vmem:[%s3416_s0 + $0x7e0] sm:$0xff]  ;;  %v267_v3 = vld [vmem:[%s3416_s0 + $0x7e8] sm:$0xff]  ;;  %v525_v8 = vmul.f32 %v3030_v33, %v262_v52  ;;  %v526_v11 = vmul.f32 %v3030_v33, %v263_v57  ;;  %v527_v12 = vmul.f32 %v3030_v33, %v264_v58 }
 0x27e   :  { %v268_v4 = vld [vmem:[%s3416_s0 + $0x7f0] sm:$0xff]  ;;  %v528_v13 = vmul.f32 %v3030_v33, %v265_v59  ;;  %v529_v15 = vmul.f32 %v3030_v33, %v266_v0  ;;  %v530_v16 = vmul.f32 %v3030_v33, %v267_v3 }
 0x27f   :  { %1292 = vst [vmem:[%s3419_s3 + $0x780] sm:$0xff] %v1036_v53  ;;  %v788_v14 = vadd.f32 %v3001_v19, %v525_v8  ;;  %v531_v17 = vmul.f32 %v3030_v33, %v268_v4  ;;  %v789_v18 = vadd.f32 %v3001_v19, %v526_v11  ;;  %v790_v20 = vadd.f32 %v3001_v19, %v527_v12 }
 0x280   :  { %v791_v21 = vadd.f32 %v3001_v19, %v528_v13  ;;  %v792_v44 = vadd.f32 %v3001_v19, %v529_v15  ;;  %v793_v23 = vadd.f32 %v3001_v19, %v530_v16 }
 0x281   :  { %v1044_v22 = vmax.f32 %v788_v14, 0.0  ;;  %v794_v24 = vadd.f32 %v3001_v19, %v531_v17  ;;  %v1045_v25 = vmax.f32 %v789_v18, 0.0  ;;  %v1046_v26 = vmax.f32 %v790_v20, 0.0 }
 0x282   :  { %v1047_v27 = vmax.f32 %v791_v21, 0.0  ;;  %v1048_v29 = vmax.f32 %v792_v44, 0.0  ;;  %v1049_v30 = vmax.f32 %v793_v23, 0.0 }
 0x283   :  { %v1050_v31 = vmax.f32 %v794_v24, 0.0 }
 0x286   :  { %v269_v9 = vld [vmem:[%s3416_s0 + $0x7f8] sm:$0xff] }
 0x287   :  { %1293 = vst [vmem:[%s3419_s3 + $0x788] sm:$0xff] %v1037_v60  ;;  %1294 = vst [vmem:[%s3419_s3 + $0x790] sm:$0xff] %v1038_v61  ;;  %v532_v51 = vmul.f32 %v3030_v33, %v269_v9 }
 0x288   :  { %1295 = vst [vmem:[%s3419_s3 + $0x798] sm:$0xff] %v1039_v62  ;;  %1296 = vst [vmem:[%s3419_s3 + $0x7a0] sm:$0xff] %v1040_v5 }
 0x289   :  { %1297 = vst [vmem:[%s3419_s3 + $0x7a8] sm:$0xff] %v1041_v6  ;;  %1298 = vst [vmem:[%s3419_s3 + $0x7b0] sm:$0xff] %v1042_v7  ;;  %v795_v28 = vadd.f32 %v3001_v19, %v532_v51 }
 0x28a   :  { %1299 = vst [vmem:[%s3419_s3 + $0x7b8] sm:$0xff] %v1043_v10  ;;  %1300 = vst [vmem:[%s3419_s3 + $0x7c0] sm:$0xff] %v1044_v22 }
 0x28b   :  { %1301 = vst [vmem:[%s3419_s3 + $0x7c8] sm:$0xff] %v1045_v25  ;;  %1302 = vst [vmem:[%s3419_s3 + $0x7d0] sm:$0xff] %v1046_v26  ;;  %v1051_v19 = vmax.f32 %v795_v28, 0.0 }
 0x28c   :  { %1303 = vst [vmem:[%s3419_s3 + $0x7d8] sm:$0xff] %v1047_v27  ;;  %1304 = vst [vmem:[%s3419_s3 + $0x7e0] sm:$0xff] %v1048_v29 }
 0x28d   :  { %1305 = vst [vmem:[%s3419_s3 + $0x7e8] sm:$0xff] %v1049_v30  ;;  %1306 = vst [vmem:[%s3419_s3 + $0x7f0] sm:$0xff] %v1050_v31 }
 0x28e   :  { %1307 = vst [vmem:[%s3419_s3 + $0x7f8] sm:$0xff] %v1051_v19 }

// kernel: up_conv_forward.2
= control target key start
LH: loop header
LB: loop body
LE: loop exit
PB: predicated region body
PF: predicated region fallthrough
CT: control target
= control target key end

     0   :  { %s12675_s12 = smov 0   ;;  %s16707_s0 = inlined_call_operand.vmem [shape: bf16[2,18,18,128], index: 0, kind: input, shape index: {}]   ;;  %s16708_s1 = inlined_call_operand.vmem [shape: bf16[16,128,128], index: 1, kind: input, shape index: {}]   ;;  %s16709_s2 = inlined_call_operand.vmem [shape: f32[8,256,128], index: 2, kind: output, shape index: {0}]   ;;  %s16710_s3 = inlined_call_operand.vmem [shape: f32[2,2,128], index: 3, kind: output, shape index: {1}]  }
   0x1 LB: > { %s12681_s13 = sadd.s32 4294967295, %s12653_s12   ;;  %p10099_p0 = scmp.ge.s32.totalorder %s12653_s12, 1  ;;  %s12653_s12 = sphi %s12675_s12, %s14_s12  }
   0x2   : > { %p140_p1 = scmp.lt.s32.totalorder %s12653_s12, 3 }
   0x4   : > { %p141_p2 = pnand %p10099_p0, %p140_p1 }
   0x6   : > { %144 = sbr.rel (%p141_p2) target bundleno = 1026 (0x402), region = 28 }
   0xb   : > { %v12453_v0 = vld [vmem:[%s16708_s1 + $0x78] sm:$0xff]   ;;  %p169_p3 = scmp.lt.s32.totalorder %s12681_s13, 1  ;;  %v12455_v2 = vld [vmem:[%s16708_s1 + $0x70] sm:$0xff]   ;;  %v12457_v4 = vld [vmem:[%s16708_s1 + $0x68] sm:$0xff]   ;;  %vm250_vm0 = vsmask.f32 3328 }
   0xc   : > { %v12454_v1 = vld [vmem:[%s16708_s1 + $0x38] sm:$0xff]   ;;  %11676 = vmatprep.subr.bf16.mxu0 %v12453_v0  ;;  %v12456_v3 = vld [vmem:[%s16708_s1 + $0x30] sm:$0xff]   ;;  %v12458_v5 = vld [vmem:[%s16708_s1 + $0x28] sm:$0xff]   ;;  %vm251_vm1 = vsmask.f32 7440  ;;  %vm3026_vm3 = vcmask 1042432  }
   0xd   : > { %11724 = vmatprep.subr.bf16.mxu1 %v12454_v1  ;;  %11677 = vmatpush3.bf16.msra.mxu0 %v12453_v0  ;;  %s12705_s26 = scalar_select %p169_p3, %s12681_s13, 1  ;;  %v12459_v6 = vld [vmem:[%s16708_s1 + $0x60] sm:$0xff]   ;;  %v12461_v8 = vld [vmem:[%s16708_s1 + $0x58] sm:$0xff]   ;;  %v12463_v10 = vld [vmem:[%s16708_s1 + $0x50] sm:$0xff]   ;;  %vm3027_vm4 = vcmask 1046532  }
   0xe   : > { %11725 = vmatpush3.bf16.msra.mxu1 %v12454_v1  ;;  %11678 = vmatprep.subr.bf16.mxu0 %v12455_v2  ;;  %v12460_v7 = vld [vmem:[%s16708_s1 + $0x20] sm:$0xff]   ;;  %v12462_v9 = vld [vmem:[%s16708_s1 + $0x18] sm:$0xff]   ;;  %v12464_v11 = vld [vmem:[%s16708_s1 + $0x10] sm:$0xff]   ;;  %s10101_s20 = sshll.u32 %s12681_s13, 2 }
   0xf   : > { %11726 = vmatprep.subr.bf16.mxu1 %v12456_v3  ;;  %s12444_s4 = smul.u32 216, %s12705_s26  ;;  %v12465_v17 = vld [vmem:[%s16708_s1 + $0x48] sm:$0xff]   ;;  %vm12753_vm2 = vmor %vm250_vm0, %vm251_vm1  ;;  %v12467_v45 = vld [vmem:[%s16708_s1 + $0x40] sm:$0xff]   ;;  %p14110_p4 = scmp.lt.s32.totalorder %s10101_s20, 7 }
  0x10   : > { %v12466_v31 = vld [vmem:[%s16708_s1 + $0x8] sm:$0xff]   ;;  %v12468_v50 = vld [vmem:[%s16708_s1] sm:$0xff]   ;;  %v12471_v1 = vld [vmem:[%s16708_s1 + $0xb8] sm:$0xff]  }
  0x11   : > { %11679 = vmatpush3.bf16.msra.mxu0 %v12455_v2  ;;  %s12723_s11 = scalar_lea.vmem %s16707_s0, %s12444_s4  ;;  %vm13224_vm5 = vmor %vm3026_vm3, %vm3027_vm4  ;;  %s17283_s20 = smov (!%p14110_p4, %s10101_s20), 7 }
  0x12   : > { %11727 = vmatpush3.bf16.msra.mxu1 %v12456_v3  ;;  %11680 = vmatprep.subr.bf16.mxu0 %v12457_v4  ;;  %v186_v12 = vld [vmem:[%s12723_s11] sm:$0xf]  ;;  %v187_v13 = vld [vmem:[%s12723_s11 + $0x4] sm:$0xf]  ;;  %v234_v14 = vld [vmem:[%s12723_s11 + $0x8] sm:$0x1] }
  0x13   : > { %11728 = vmatprep.subr.bf16.mxu1 %v12458_v5  ;;  %v254_v15 = vshrl.u32 %v186_v12, 16  ;;  %v257_v16 = vshll.u32 %v186_v12, 16  ;;  %v263_v18 = vshll.u32 %v187_v13, 16  ;;  %v267_v19 = vshrl.u32 %v187_v13, 16  ;;  %v12738_v22 = vld [vmem:[%s12723_s11 + $0xc] sm:$0xf] }
  0x14   : > { %v273_v20 = vshll.u32 %v234_v14, 16  ;;  %v10145_v21 = vcombine.low %v186_v12, %v187_v13  ;;  %v12741_v25 = vld [vmem:[%s12723_s11 + $0x10] sm:$0xf]  ;;  %v235_v26 = vld [vmem:[%s12723_s11 + $0x14] sm:$0x1]  ;;  %v278_v30 = vshrl.u32 %v12738_v22, 16 }
  0x15   : > { %11681 = vmatpush3.bf16.msra.mxu0 %v12457_v4  ;;  %v256_v23 = vrot.slane %v254_v15, 4  ;;  %v259_v24 = vrot.slane %v257_v16, 5  ;;  %v265_v27 = vrot.slane %v263_v18, 5  ;;  %v269_v28 = vrot.slane %v267_v19, 4  ;;  %v12758_v44 = vld [vmem:[%s12723_s11 + $0x18] sm:$0xf] }
  0x16   : > { %11729 = vmatpush3.bf16.msra.mxu1 %v12458_v5  ;;  %11682 = vmatprep.subr.bf16.mxu0 %v12459_v6  ;;  %v275_v29 = vrot.slane %v273_v20, 5  ;;  %v281_v33 = vshll.u32 %v12738_v22, 16  ;;  %v287_v34 = vshll.u32 %v12741_v25, 16  ;;  %v291_v35 = vshrl.u32 %v12741_v25, 16  ;;  %v12766_v49 = vld [vmem:[%s12723_s11 + $0x1c] sm:$0xf] }
  0x17   : > { %11730 = vmatprep.subr.bf16.mxu1 %v12460_v7  ;;  %v260_v32 = vor.u32 %v259_v24, %v256_v23  ;;  %11740 = vmatprep.mubr.bf16.mxu1 %v10145_v21  ;;  %v270_v37 = vor.u32 %v269_v28, %v265_v27  ;;  %v280_v38 = vrot.slane %v278_v30, 4  ;;  %v297_v39 = vshll.u32 %v235_v26, 16  ;;  %v236_v54 = vld [vmem:[%s12723_s11 + $0x20] sm:$0x1]  ;;  %v12776_v56 = vld [vmem:[%s12723_s11 + $0x24] sm:$0xf] }
  0x18   : > { %v283_v41 = vrot.slane %v281_v33, 5  ;;  %v289_v42 = vrot.slane %v287_v34, 5  ;;  %v293_v43 = vrot.slane %v291_v35, 4  ;;  %v10146_v48 = vcombine.low %v12738_v22, %v12741_v25  ;;  %v12784_v61 = vld [vmem:[%s12723_s11 + $0x28] sm:$0xf]  ;;  %v12475_v23 = vld [vmem:[%s16708_s1 + $0xb0] sm:$0xff]  }
  0x19   : > { %11683 = vmatpush3.bf16.msra.mxu0 %v12459_v6  ;;  %v261_v40 = vrot.slane %v260_v32, 4  ;;  %v271_v46 = vrot.slane %v270_v37, 4  ;;  %v299_v47 = vrot.slane %v297_v39, 5  ;;  %v302_v55 = vshrl.u32 %v12758_v44, 16  ;;  %v237_v3 = vld [vmem:[%s12723_s11 + $0x2c] sm:$0x1] }
  0x1a   : > { %11731 = vmatpush3.bf16.msra.mxu1 %v12460_v7  ;;  %11684 = vmatprep.subr.bf16.mxu0 %v12461_v8  ;;  %v284_v52 = vor.u32 %v283_v41, %v280_v38  ;;  %v294_v53 = vor.u32 %v293_v43, %v289_v42  ;;  %v305_v58 = vshll.u32 %v12758_v44, 16  ;;  %v311_v59 = vshll.u32 %v12766_v49, 16  ;;  %v12815_v30 = vld [vmem:[%s12723_s11 + $0x34] sm:$0xf]  ;;  %v238_v34 = vld [vmem:[%s12723_s11 + $0x38] sm:$0x1] }
  0x1b   : > { %11732 = vmatprep.subr.bf16.mxu1 %v12462_v9  ;;  %v266_v51 = vsel %vm12753_vm2, %v261_v40, %v265_v27  ;;  %v276_v57 = vsel %vm12753_vm2, %v271_v46, %v275_v29  ;;  %v315_v60 = vshrl.u32 %v12766_v49, 16  ;;  %v304_v2 = vrot.slane %v302_v55, 4  ;;  %v12476_v29 = vld [vmem:[%s16708_s1 + $0xf0] sm:$0xff]   ;;  %v12825_v41 = vld [vmem:[%s12723_s11 + $0x3c] sm:$0xf]  ;;  %v12479_v46 = vld [vmem:[%s16708_s1 + $0xa8] sm:$0xff]  }
  0x1c   : > { %v10121_v62 = vcombine.low %v266_v51, %v276_v57  ;;  %v285_v63 = vrot.slane %v284_v52, 4  ;;  %v295_v0 = vrot.slane %v294_v53, 4  ;;  %v307_v4 = vrot.slane %v305_v58, 5  ;;  %v12838_v52 = vld [vmem:[%s12723_s11 + $0x40] sm:$0xf]  ;;  %s11291_s13 = sshll.u32 %s17283_s20, 8 }
  0x1d   : > { %11685 = vmatpush3.bf16.msra.mxu0 %v12461_v8  ;;  %v313_v5 = vrot.slane %v311_v59, 5  ;;  %v317_v6 = vrot.slane %v315_v60, 4  ;;  %v321_v7 = vshll.u32 %v236_v54, 16  ;;  %v326_v12 = vshrl.u32 %v12776_v56, 16  ;;  %v12480_v54 = vld [vmem:[%s16708_s1 + $0xe8] sm:$0xff]   ;;  %s14196_s24 = scalar_lea.vmem %s16709_s2, %s11291_s13 }
  0x1e   : > { %11733 = vmatpush3.bf16.msra.mxu1 %v12462_v9  ;;  %11686 = vmatprep.subr.bf16.mxu0 %v12463_v10  ;;  %v290_v8 = vsel %vm12753_vm2, %v285_v63, %v289_v42  ;;  %v300_v9 = vsel %vm12753_vm2, %v295_v0, %v299_v47  ;;  %v308_v14 = vor.u32 %v307_v4, %v304_v2  ;;  %v329_v19 = vshll.u32 %v12776_v56, 16  ;;  %v239_v60 = vld [vmem:[%s12723_s11 + $0x44] sm:$0x1]  ;;  %v12851_v2 = vld [vmem:[%s12723_s11 + $0x48] sm:$0xf] }
  0x1f   : > { %11734 = vmatprep.subr.bf16.mxu1 %v12464_v11  ;;  %11692 = vmatprep.mubr.bf16.mxu0 %v10121_v62  ;;  %v10122_v13 = vcombine.low %v290_v8, %v300_v9  ;;  %v318_v15 = vor.u32 %v317_v6, %v313_v5  ;;  %v323_v16 = vrot.slane %v321_v7, 5  ;;  %v328_v18 = vrot.slane %v326_v12, 4  ;;  %v12855_v7 = vld [vmem:[%s12723_s11 + $0x4c] sm:$0xf]  ;;  %v12483_v8 = vld [vmem:[%s16708_s1 + $0xa0] sm:$0xff]  }
  0x20   : > { %v335_v20 = vshll.u32 %v12784_v61, 16  ;;  %v339_v21 = vshrl.u32 %v12784_v61, 16  ;;  %v309_v24 = vrot.slane %v308_v14, 4  ;;  %v345_v27 = vshll.u32 %v237_v3, 16  ;;  %v12484_v14 = vld [vmem:[%s16708_s1 + $0xe0] sm:$0xff]  }
  0x21   : > { %11687 = vmatpush3.bf16.msra.mxu0 %v12463_v10  ;;  %v12472_v10 = vld [vmem:[%s16708_s1 + $0xf8] sm:$0xff]   ;;  %v319_v26 = vrot.slane %v318_v15, 4  ;;  %v10148_v28 = vcombine.low %v12776_v56, %v12784_v61  ;;  %v369_v22 = vshll.u32 %v238_v34, 16  ;;  %v374_v53 = vshrl.u32 %v12825_v41, 16 }
  0x22   : > { %11735 = vmatpush3.bf16.msra.mxu1 %v12464_v11  ;;  %11688 = vmatprep.subr.bf16.mxu0 %v12465_v17  ;;  %v10147_v11 = vcombine.low %v12758_v44, %v12766_v49  ;;  %v337_v32 = vrot.slane %v335_v20, 5  ;;  %v341_v33 = vrot.slane %v339_v21, 4  ;;  %v314_v37 = vsel %vm12753_vm2, %v309_v24, %v313_v5  ;;  %v12487_v56 = vld [vmem:[%s16708_s1 + $0x98] sm:$0xff]  }
  0x23   : > { %11736 = vmatprep.subr.bf16.mxu1 %v12466_v31  ;;  %v324_v38 = vsel %vm12753_vm2, %v319_v26, %v323_v16  ;;  %v347_v39 = vrot.slane %v345_v27, 5  ;;  %v359_v49 = vshll.u32 %v12815_v30, 16  ;;  %v371_v59 = vrot.slane %v369_v22, 5  ;;  %v12488_v34 = vld [vmem:[%s16708_s1 + $0xd8] sm:$0xff]   ;;  %v12902_v22 = vld [vmem:[%s12723_s11 + $0x64] sm:$0xf] }
  0x24   : > { %v10123_v42 = vcombine.low %v314_v37, %v324_v38  ;;  %v342_v44 = vor.u32 %v341_v33, %v337_v32  ;;  %v376_v0 = vrot.slane %v374_v53, 4  ;;  %v383_v6 = vshll.u32 %v12838_v52, 16  ;;  %v12885_v33 = vld [vmem:[%s12723_s11 + $0x58] sm:$0xf]  ;;  %v12491_v53 = vld [vmem:[%s16708_s1 + $0x90] sm:$0xff]  }
  0x25   : > { %11689 = vmatpush3.bf16.msra.mxu0 %v12465_v17  ;;  %v12801_v17 = vld [vmem:[%s12723_s11 + $0x30] sm:$0xf]  ;;  %v361_v57 = vrot.slane %v359_v49, 5  ;;  %v10150_v12 = vcombine.low %v12825_v41, %v12838_v52  ;;  %v401_v24 = vshll.u32 %v12851_v2, 16 }
  0x26   : > { %11737 = vmatpush3.bf16.msra.mxu1 %v12466_v31  ;;  %11690 = vmatprep.subr.bf16.mxu0 %v12467_v45  ;;  %v331_v31 = vrot.slane %v329_v19, 5  ;;  %v350_v35 = vshrl.u32 %v12801_v17, 16  ;;  %v353_v40 = vshll.u32 %v12801_v17, 16  ;;  %v10149_v51 = vcombine.low %v12801_v17, %v12815_v30  ;;  %v12871_v19 = vld [vmem:[%s12723_s11 + $0x54] sm:$0xf] }
  0x27   : > { %11738 = vmatprep.subr.bf16.mxu1 %v12468_v50  ;;  %v385_v17 = vrot.slane %v383_v6, 5  ;;  %v425_v49 = vshll.u32 %v12871_v19, 16  ;;  %v12495_v6 = vld [vmem:[%s16708_s1 + $0x88] sm:$0xff]  }
  0x28   : > { %v332_v43 = vor.u32 %v331_v31, %v328_v18  ;;  %v355_v47 = vrot.slane %v353_v40, 5  ;;  %v398_v18 = vshrl.u32 %v12851_v2, 16 }
  0x29   : > { %11691 = vmatpush3.bf16.msra.mxu0 %v12467_v45  ;;  %v352_v45 = vrot.slane %v350_v35, 4 }
  0x2a   : > { %11739 = vmatpush3.bf16.msra.mxu1 %v12468_v50  ;;  %11772 = vmatprep.subr.bf16.mxu0 %v12471_v1  ;;  %v363_v50 = vshrl.u32 %v12815_v30, 16  ;;  %v333_v25 = vrot.slane %v332_v43, 4  ;;  %v400_v27 = vrot.slane %v398_v18, 4  ;;  %v411_v30 = vshrl.u32 %v12855_v7, 16  ;;  %v241_v43 = vld [vmem:[%s12723_s11 + $0x5c] sm:$0x1] }
  0x2b   : > { %11820 = vmatprep.subr.bf16.mxu1 %v12472_v10  ;;  %v356_v55 = vor.u32 %v355_v47, %v352_v45  ;;  %v12897_v45 = vld [vmem:[%s12723_s11 + $0x60] sm:$0xf]  ;;  %v243_v18 = vld [vmem:[%s12723_s11 + $0x74] sm:$0x1] }
  0x2c   : > { %11693 = vmatmul.mubr.bf16.vlgmr.msra.gmra.mxu0 %v10122_v13  ;;  %v365_v58 = vrot.slane %v363_v50, 4  ;;  %v338_v62 = vsel %vm12753_vm2, %v333_v25, %v337_v32  ;;  %v240_v13 = vld [vmem:[%s12723_s11 + $0x50] sm:$0x1]  ;;  %v403_v32 = vrot.slane %v401_v24, 5  ;;  %v413_v37 = vrot.slane %v411_v30, 4 }
  0x2d   : > { %11741 = vmatmul.mubr.bf16.vlgmr.msra.gmra.mxu1 %v10146_v48  ;;  %11773 = vmatpush3.bf16.msra.mxu0 %v12471_v1  ;;  %v343_v48 = vrot.slane %v342_v44, 4  ;;  %v377_v1 = vshll.u32 %v12825_v41, 16  ;;  %v357_v4 = vrot.slane %v356_v55, 4  ;;  %v417_v38 = vshll.u32 %v240_v13, 16  ;;  %v12933_v13 = vld [vmem:[%s12723_s11 + $0x70] sm:$0xf] }
  0x2e   : > { %11821 = vmatpush3.bf16.msra.mxu1 %v12472_v10  ;;  %11744 = vmatprep.mubr.bf16.mxu1 %v10147_v11  ;;  %v366_v5 = vor.u32 %v365_v58, %v361_v57  ;;  %v387_v10 = vshrl.u32 %v12838_v52, 16  ;;  %v393_v11 = vshll.u32 %v239_v60, 16  ;;  %v422_v44 = vshrl.u32 %v12871_v19, 16  ;;  %v12940_v24 = vld [vmem:[%s12723_s11 + $0x78] sm:$0xf] }
  0x2f   : > { %11696 = vmatprep.mubr.bf16.mxu0 %v10123_v42  ;;  %11774 = vmatprep.subr.bf16.mxu0 %v12475_v23  ;;  %v348_v63 = vsel %vm12753_vm2, %v343_v48, %v347_v39  ;;  %v379_v9 = vrot.slane %v377_v1, 5  ;;  %v362_v15 = vsel %vm12753_vm2, %v357_v4, %v361_v57  ;;  %v10151_v39 = vcombine.low %v12851_v2, %v12855_v7 }
  0x30   : > { %11822 = vmatprep.subr.bf16.mxu1 %v12476_v29  ;;  %v10124_v3 = vcombine.low %v338_v62, %v348_v63  ;;  %v367_v16 = vrot.slane %v366_v5, 4  ;;  %v389_v21 = vrot.slane %v387_v10, 4  ;;  %v404_v42 = vor.u32 %v403_v32, %v400_v27  ;;  %v12499_v32 = vld [vmem:[%s16708_s1 + $0x80] sm:$0xff]  }
  0x31   : > { %11775 = vmatpush3.bf16.msra.mxu0 %v12475_v23  ;;  %v380_v20 = vor.u32 %v379_v9, %v376_v0  ;;  %v395_v23 = vrot.slane %v393_v11, 5  ;;  %v419_v47 = vrot.slane %v417_v38, 5  ;;  %v431_v50 = vshll.u32 %v12885_v33, 16  ;;  %v12500_v38 = vld [vmem:[%s16708_s1 + $0xc0] sm:$0xff]  }
  0x32   : > { %11823 = vmatpush3.bf16.msra.mxu1 %v12476_v29  ;;  %11776 = vmatprep.subr.bf16.mxu0 %v12479_v46  ;;  %v372_v26 = vsel %vm12753_vm2, %v367_v16, %v371_v59  ;;  %v407_v29 = vshll.u32 %v12855_v7, 16  ;;  %v390_v31 = vor.u32 %v389_v21, %v385_v17  ;;  %v405_v48 = vrot.slane %v404_v42, 4  ;;  %v12492_v59 = vld [vmem:[%s16708_s1 + $0xd0] sm:$0xff]   ;;  %v12496_v7 = vld [vmem:[%s16708_s1 + $0xc8] sm:$0xff]  }
  0x33   : > { %11824 = vmatprep.subr.bf16.mxu1 %v12480_v54  ;;  %v10125_v61 = vcombine.low %v362_v15, %v372_v26  ;;  %v435_v52 = vshrl.u32 %v12885_v33, 16  ;;  %v427_v57 = vrot.slane %v425_v49, 5  ;;  %v433_v58 = vrot.slane %v431_v50, 5  ;;  %v12966_v50 = vld [vmem:[%s16708_s1 + $0x178] sm:$0xff]  }
  0x34   : > { %11697 = vmatmul.mubr.bf16.gmra.mxu0 %v10124_v3  ;;  %v409_v35 = vrot.slane %v407_v29, 5  ;;  %v391_v41 = vrot.slane %v390_v31, 4  ;;  %v441_v63 = vshll.u32 %v241_v43, 16  ;;  %v10152_v0 = vcombine.low %v12871_v19, %v12885_v33  ;;  %v242_v3 = vld [vmem:[%s12723_s11 + $0x68] sm:$0x1] }
  0x35   : > { %11745 = vmatmul.mubr.bf16.gmra.mxu1 %v10148_v28  ;;  %11777 = vmatpush3.bf16.msra.mxu0 %v12479_v46  ;;  %v381_v28 = vrot.slane %v380_v20, 4  ;;  %v437_v62 = vrot.slane %v435_v52, 4  ;;  %v446_v4 = vshrl.u32 %v12897_v45, 16  ;;  %v449_v5 = vshll.u32 %v12897_v45, 16  ;;  %v207_v43 = vld [vmem:[%s12723_s11 + $0x7c] sm:$0xf] }
  0x36   : > { %11748 = vmatprep.mubr.bf16.mxu1 %v10149_v51  ;;  %11825 = vmatpush3.bf16.msra.mxu1 %v12480_v54  ;;  %v414_v46 = vor.u32 %v413_v37, %v409_v35  ;;  %v396_v25 = vsel %vm12753_vm2, %v391_v41, %v395_v23  ;;  %v424_v51 = vrot.slane %v422_v44, 4  ;;  %v410_v60 = vsel %vm12753_vm2, %v405_v48, %v409_v35  ;;  %v12970_v52 = vld [vmem:[%s12723_s11 + $0x84] sm:$0xf] }
  0x37   : > { %11778 = vmatprep.subr.bf16.mxu0 %v12483_v8  ;;  %11826 = vmatprep.subr.bf16.mxu1 %v12484_v14  ;;  %v386_v40 = vsel %vm12753_vm2, %v381_v28, %v385_v17  ;;  %v438_v9 = vor.u32 %v437_v62, %v433_v58  ;;  %v443_v10 = vrot.slane %v441_v63, 5  ;;  %v455_v11 = vshll.u32 %v12902_v22, 16 }
  0x38   : > { %11700 = vmatprep.mubr.bf16.mxu0 %v10125_v61  ;;  %v10126_v54 = vcombine.low %v386_v40, %v396_v25  ;;  %v415_v55 = vrot.slane %v414_v46, 4  ;;  %v428_v2 = vor.u32 %v427_v57, %v424_v51  ;;  %v448_v15 = vrot.slane %v446_v4, 4 }
  0x39   : > { %11779 = vmatpush3.bf16.msra.mxu0 %v12483_v8  ;;  %v451_v16 = vrot.slane %v449_v5, 5  ;;  %v459_v17 = vshrl.u32 %v12902_v22, 16  ;;  %v439_v19 = vrot.slane %v438_v9, 4  ;;  %v457_v20 = vrot.slane %v455_v11, 5  ;;  %v245_v11 = vld [vmem:[%s12723_s11 + $0x8c] sm:$0x1] }
  0x3a   : > { %11827 = vmatpush3.bf16.msra.mxu1 %v12484_v14  ;;  %11780 = vmatprep.subr.bf16.mxu0 %v12487_v56  ;;  %v420_v1 = vsel %vm12753_vm2, %v415_v55, %v419_v47  ;;  %v429_v14 = vrot.slane %v428_v2, 4  ;;  %v465_v21 = vshll.u32 %v242_v3, 16  ;;  %v10153_v23 = vcombine.low %v12897_v45, %v12902_v22  ;;  %v244_v47 = vld [vmem:[%s12723_s11 + $0x80] sm:$0x1] }
  0x3b   : > { %11828 = vmatprep.subr.bf16.mxu1 %v12488_v34  ;;  %v10127_v8 = vcombine.low %v410_v60, %v420_v1  ;;  %v452_v27 = vor.u32 %v451_v16, %v448_v15  ;;  %v461_v29 = vrot.slane %v459_v17, 4  ;;  %v479_v31 = vshll.u32 %v12933_v13, 16 }
  0x3c   : > { %11701 = vmatmul.mubr.bf16.gmra.mxu0 %v10126_v54  ;;  %v434_v26 = vsel %vm12753_vm2, %v429_v14, %v433_v58  ;;  %v467_v61 = vrot.slane %v465_v21, 5  ;;  %v483_v41 = vshrl.u32 %v12933_v13, 16  ;;  %v489_v42 = vshll.u32 %v243_v18, 16  ;;  %v12975_v58 = vld [vmem:[%s12723_s11 + $0x88] sm:$0xf] }
  0x3d   : > { %11749 = vmatmul.mubr.bf16.gmra.mxu1 %v10150_v12  ;;  %11781 = vmatpush3.bf16.msra.mxu0 %v12487_v56  ;;  %v12930_v12 = vld [vmem:[%s12723_s11 + $0x6c] sm:$0xf]  ;;  %v444_v56 = vsel %vm12753_vm2, %v439_v19, %v443_v10  ;;  %v462_v35 = vor.u32 %v461_v29, %v457_v20  ;;  %v481_v40 = vrot.slane %v479_v31, 5  ;;  %v494_v49 = vshrl.u32 %v12940_v24, 16  ;;  %v210_v18 = vld [vmem:[%s12723_s11 + $0x90] sm:$0xf] }
  0x3e   : > { %11752 = vmatprep.mubr.bf16.mxu1 %v10151_v39  ;;  %11829 = vmatpush3.bf16.msra.mxu1 %v12488_v34  ;;  %v470_v30 = vshrl.u32 %v12930_v12, 16  ;;  %v473_v28 = vshll.u32 %v12930_v12, 16  ;;  %v10128_v33 = vcombine.low %v434_v26, %v444_v56  ;;  %v453_v34 = vrot.slane %v452_v27, 4  ;;  %v246_v56 = vld [vmem:[%s12723_s11 + $0x98] sm:$0x1] }
  0x3f   : > { %11782 = vmatprep.subr.bf16.mxu0 %v12491_v53  ;;  %11830 = vmatprep.subr.bf16.mxu1 %v12492_v59  ;;  %v463_v45 = vrot.slane %v462_v35, 4  ;;  %v10154_v46 = vcombine.low %v12930_v12, %v12933_v13  ;;  %v485_v25 = vrot.slane %v483_v41, 4  ;;  %v491_v48 = vrot.slane %v489_v42, 5 }
  0x40   : > { %11704 = vmatprep.mubr.bf16.mxu0 %v10127_v8  ;;  %v472_v37 = vrot.slane %v470_v30, 4  ;;  %v475_v39 = vrot.slane %v473_v28, 5  ;;  %v458_v44 = vsel %vm12753_vm2, %v453_v34, %v457_v20  ;;  %v497_v51 = vshll.u32 %v12940_v24, 16  ;;  %v213_v34 = vld [vmem:[%s12723_s11 + $0xa0] sm:$0xf] }
  0x41   : > { %11783 = vmatpush3.bf16.msra.mxu0 %v12491_v53  ;;  %v468_v53 = vsel %vm12753_vm2, %v463_v45, %v467_v61  ;;  %v496_v54 = vrot.slane %v494_v49, 4  ;;  %v503_v55 = vshll.u32 %v207_v43, 16  ;;  %v507_v57 = vshrl.u32 %v207_v43, 16  ;;  %v13002_v61 = vld [vmem:[%s12723_s11 + $0x9c] sm:$0xf] }
  0x42   : > { %11784 = vmatprep.subr.bf16.mxu0 %v12495_v6  ;;  %11831 = vmatpush3.bf16.msra.mxu1 %v12492_v59  ;;  %v476_v22 = vor.u32 %v475_v39, %v472_v37  ;;  %v12980_v59 = vld [vmem:[%s16708_s1 + $0x138] sm:$0xff]   ;;  %v10129_v60 = vcombine.low %v458_v44, %v468_v53  ;;  %v486_v63 = vor.u32 %v485_v25, %v481_v40  ;;  %v513_v3 = vshll.u32 %v244_v47, 16 }
  0x43   : > { %11832 = vmatprep.subr.bf16.mxu1 %v12496_v7  ;;  %v505_v1 = vrot.slane %v503_v55, 5  ;;  %v509_v2 = vrot.slane %v507_v57, 4  ;;  %v10155_v4 = vcombine.low %v12940_v24, %v207_v43  ;;  %v518_v8 = vshrl.u32 %v12970_v52, 16  ;;  %v211_v24 = vld [vmem:[%s12723_s11 + $0x94] sm:$0xf] }
  0x44   : > { %11705 = vmatmul.mubr.bf16.gmra.mxu0 %v10128_v33  ;;  %v477_v62 = vrot.slane %v476_v22, 4  ;;  %v515_v10 = vrot.slane %v513_v3, 5  ;;  %v521_v12 = vshll.u32 %v12970_v52, 16  ;;  %v527_v13 = vshll.u32 %v12975_v58, 16  ;;  %v214_v57 = vld [vmem:[%s12723_s11 + $0xa8] sm:$0xf] }
  0x45   : > { %11753 = vmatmul.mubr.bf16.gmra.mxu1 %v10152_v0  ;;  %11785 = vmatpush3.bf16.msra.mxu0 %v12495_v6  ;;  %v499_v0 = vrot.slane %v497_v51, 5  ;;  %v487_v6 = vrot.slane %v486_v63, 4  ;;  %v510_v9 = vor.u32 %v509_v2, %v505_v1  ;;  %v520_v16 = vrot.slane %v518_v8, 4  ;;  %v248_v8 = vld [vmem:[%s12723_s11 + $0xb0] sm:$0x1] }
  0x46   : > { %11756 = vmatprep.mubr.bf16.mxu1 %v10153_v23  ;;  %11833 = vmatpush3.bf16.msra.mxu1 %v12496_v7  ;;  %v482_v5 = vsel %vm12753_vm2, %v477_v62, %v481_v40  ;;  %v531_v17 = vshrl.u32 %v12975_v58, 16  ;;  %v523_v21 = vrot.slane %v521_v12, 5  ;;  %v529_v23 = vrot.slane %v527_v13, 5 }
  0x47   : > { %11786 = vmatprep.subr.bf16.mxu0 %v12499_v32  ;;  %11834 = vmatprep.subr.bf16.mxu1 %v12500_v38  ;;  %v500_v7 = vor.u32 %v499_v0, %v496_v54  ;;  %v492_v14 = vsel %vm12753_vm2, %v487_v6, %v491_v48  ;;  %v511_v20 = vrot.slane %v510_v9, 4  ;;  %v537_v29 = vshll.u32 %v245_v11, 16  ;;  %v247_v48 = vld [vmem:[%s12723_s11 + $0xa4] sm:$0x1] }
  0x48   : > { %11708 = vmatprep.mubr.bf16.mxu0 %v10129_v60  ;;  %v10130_v19 = vcombine.low %v482_v5, %v492_v14  ;;  %v533_v27 = vrot.slane %v531_v17, 4  ;;  %v10156_v30 = vcombine.low %v12970_v52, %v12975_v58  ;;  %v524_v31 = vor.u32 %v523_v21, %v520_v16 }
  0x49   : > { %11787 = vmatpush3.bf16.msra.mxu0 %v12499_v32  ;;  %v501_v15 = vrot.slane %v500_v7, 4  ;;  %v516_v28 = vsel %vm12753_vm2, %v511_v20, %v515_v10  ;;  %v542_v32 = vshrl.u32 %v210_v18, 16  ;;  %v545_v33 = vshll.u32 %v210_v18, 16  ;;  %v13021_v10 = vld [vmem:[%s12723_s11 + $0xb4] sm:$0xf] }
  0x4a   : > { %11868 = vmatprep.subr.bf16.mxu0 %v12966_v50  ;;  %11835 = vmatpush3.bf16.msra.mxu1 %v12500_v38  ;;  %v534_v37 = vor.u32 %v533_v27, %v529_v23  ;;  %v539_v38 = vrot.slane %v537_v29, 5  ;;  %v551_v39 = vshll.u32 %v211_v24, 16  ;;  %v525_v40 = vrot.slane %v524_v31, 4  ;;  %v249_v31 = vld [vmem:[%s12723_s11 + $0xbc] sm:$0x1] }
  0x4b   : > { %11916 = vmatprep.subr.bf16.mxu1 %v12980_v59  ;;  %v506_v26 = vsel %vm12753_vm2, %v501_v15, %v505_v1  ;;  %v544_v41 = vrot.slane %v542_v32, 4  ;;  %v547_v42 = vrot.slane %v545_v33, 5  ;;  %v555_v43 = vshrl.u32 %v211_v24, 16  ;;  %v217_v15 = vld [vmem:[%s12723_s11 + $0xb8] sm:$0xf] }
  0x4c   : > { %11709 = vmatmul.mubr.bf16.gmra.mxu0 %v10130_v19  ;;  %v10131_v35 = vcombine.low %v506_v26, %v516_v28  ;;  %v535_v44 = vrot.slane %v534_v37, 4  ;;  %v553_v45 = vrot.slane %v551_v39, 5  ;;  %v10157_v47 = vcombine.low %v210_v18, %v211_v24 }
  0x4d   : > { %11757 = vmatmul.mubr.bf16.gmra.mxu1 %v10154_v46  ;;  %v561_v46 = vshll.u32 %v246_v56, 16  ;;  %v530_v49 = vsel %vm12753_vm2, %v525_v40, %v529_v23  ;;  %v548_v22 = vor.u32 %v547_v42, %v544_v41  ;;  %v557_v25 = vrot.slane %v555_v43, 4  ;;  %v10242_v43 = vld [vmem:[%s12723_s11 + $0x10] sm:$0xf] }
  0x4e   : > { %11760 = vmatprep.mubr.bf16.mxu1 %v10155_v4  ;;  %11712 = vmatprep.mubr.bf16.mxu0 %v10131_v35  ;;  %v566_v51 = vshrl.u32 %v13002_v61, 16  ;;  %v540_v52 = vsel %vm12753_vm2, %v535_v44, %v539_v38  ;;  %v569_v54 = vshll.u32 %v13002_v61, 16  ;;  %v575_v55 = vshll.u32 %v213_v34, 16  ;;  %v215_v4 = vld [vmem:[%s12723_s11 + $0xac] sm:$0xf] }
  0x4f   : > { %v563_v53 = vrot.slane %v561_v46, 5  ;;  %v10132_v58 = vcombine.low %v530_v49, %v540_v52  ;;  %v549_v60 = vrot.slane %v548_v22, 4  ;;  %v558_v62 = vor.u32 %v557_v25, %v553_v45  ;;  %v10241_v38 = vld [vmem:[%s12723_s11 + $0xc] sm:$0xf] }
  0x50   : > { %v568_v63 = vrot.slane %v566_v51, 4  ;;  %v571_v0 = vrot.slane %v569_v54, 5  ;;  %v577_v1 = vrot.slane %v575_v55, 5  ;;  %v579_v2 = vshrl.u32 %v213_v34, 16  ;;  %v10243_v51 = vld [vmem:[%s12723_s11 + $0x14] sm:$0x1] }
  0x51   : > { %v585_v3 = vshll.u32 %v247_v48, 16  ;;  %v554_v5 = vsel %vm12753_vm2, %v549_v60, %v553_v45  ;;  %v559_v6 = vrot.slane %v558_v62, 4  ;;  %v10158_v7 = vcombine.low %v13002_v61, %v213_v34 }
  0x52   : > { %v590_v9 = vshrl.u32 %v214_v57, 16  ;;  %v572_v11 = vor.u32 %v571_v0, %v568_v63  ;;  %v581_v12 = vrot.slane %v579_v2, 4  ;;  %v593_v14 = vshll.u32 %v214_v57, 16 }
  0x53   : > { %v587_v13 = vrot.slane %v585_v3, 5  ;;  %v564_v16 = vsel %vm12753_vm2, %v559_v6, %v563_v53  ;;  %v599_v18 = vshll.u32 %v215_v4, 16  ;;  %v603_v19 = vshrl.u32 %v215_v4, 16  ;;  %v10247_v6 = vld [vmem:[%s12723_s11 + $0x24] sm:$0xf] }
  0x54   : > { %11713 = vmatmul.mubr.bf16.gmra.mxu0 %v10132_v58  ;;  %v592_v17 = vrot.slane %v590_v9, 4  ;;  %v10133_v20 = vcombine.low %v554_v5, %v564_v16  ;;  %v573_v21 = vrot.slane %v572_v11, 4  ;;  %v582_v23 = vor.u32 %v581_v12, %v577_v1  ;;  %v10245_v58 = vld [vmem:[%s12723_s11 + $0x1c] sm:$0xf]  ;;  %v10246_v5 = vld [vmem:[%s12723_s11 + $0x20] sm:$0x1] }
  0x55   : > { %11761 = vmatmul.mubr.bf16.gmra.mxu1 %v10156_v30  ;;  %v595_v24 = vrot.slane %v593_v14, 5  ;;  %v601_v26 = vrot.slane %v599_v18, 5  ;;  %v605_v27 = vrot.slane %v603_v19, 4  ;;  %v609_v29 = vshll.u32 %v248_v8, 16  ;;  %v12501_v16 = vld [vmem:[%s12723_s11 + $0xc] sm:$0xff]  }
  0x56   : > { %11764 = vmatprep.mubr.bf16.mxu1 %v10157_v47  ;;  %v10159_v30 = vcombine.low %v214_v57, %v215_v4  ;;  %11716 = vmatprep.mubr.bf16.mxu0 %v10133_v20  ;;  %v578_v56 = vsel %vm12753_vm2, %v573_v21, %v577_v1  ;;  %v583_v61 = vrot.slane %v582_v23, 4  ;;  %v614_v32 = vshrl.u32 %v13021_v10, 16  ;;  %v10244_v57 = vld [vmem:[%s12723_s11 + $0x18] sm:$0xf] }
  0x57   : > { %v596_v28 = vor.u32 %v595_v24, %v592_v17  ;;  %v606_v33 = vor.u32 %v605_v27, %v601_v26  ;;  %v611_v34 = vrot.slane %v609_v29, 5  ;;  %v617_v35 = vshll.u32 %v13021_v10, 16  ;;  %v10249_v27 = vld [vmem:[%s12723_s11 + $0x2c] sm:$0x1] }
  0x58   : > { %v623_v37 = vshll.u32 %v217_v15, 16  ;;  %v588_v39 = vsel %vm12753_vm2, %v583_v61, %v587_v13  ;;  %v616_v41 = vrot.slane %v614_v32, 4  ;;  %v627_v42 = vshrl.u32 %v217_v15, 16 }
  0x59   : > { %v597_v40 = vrot.slane %v596_v28, 4  ;;  %v10134_v44 = vcombine.low %v578_v56, %v588_v39  ;;  %v607_v45 = vrot.slane %v606_v33, 4  ;;  %v619_v46 = vrot.slane %v617_v35, 5 }
  0x5a   : > { %v625_v47 = vrot.slane %v623_v37, 5  ;;  %v629_v22 = vrot.slane %v627_v42, 4  ;;  %v633_v25 = vshll.u32 %v249_v31, 16  ;;  %v10160_v48 = vcombine.low %v13021_v10, %v217_v15  ;;  %v12502_v42 = vld [vmem:[%s12723_s11 + $0x18] sm:$0xff]  }
  0x5b   : > { %v602_v49 = vsel %vm12753_vm2, %v597_v40, %v601_v26  ;;  %v612_v52 = vsel %vm12753_vm2, %v607_v45, %v611_v34  ;;  %v620_v53 = vor.u32 %v619_v46, %v616_v41  ;;  %v1668_v54 = vshrl.u32 %v10241_v38, 16  ;;  %v10248_v26 = vld [vmem:[%s12723_s11 + $0x28] sm:$0xf]  ;;  %v10250_v34 = vld [vmem:[%s12723_s11 + $0x30] sm:$0xf] }
  0x5c   : > { %11717 = vmatmul.mubr.bf16.gmra.mxu0 %v10134_v44  ;;  %v1671_v55 = vshll.u32 %v10241_v38, 16  ;;  %v10135_v60 = vcombine.low %v602_v49, %v612_v52  ;;  %v630_v62 = vor.u32 %v629_v22, %v625_v47  ;;  %v635_v63 = vrot.slane %v633_v25, 5  ;;  %v10251_v40 = vld [vmem:[%s12723_s11 + $0x34] sm:$0xf]  ;;  %v10252_v46 = vld [vmem:[%s12723_s11 + $0x38] sm:$0x1] }
  0x5d   : > { %11765 = vmatmul.mubr.bf16.gmra.mxu1 %v10158_v7  ;;  %v1677_v0 = vshll.u32 %v10242_v43, 16  ;;  %v621_v1 = vrot.slane %v620_v53, 4  ;;  %v1670_v2 = vrot.slane %v1668_v54, 4  ;;  %v1681_v4 = vshrl.u32 %v10242_v43, 16  ;;  %v12505_v22 = vld [vmem:[%s12723_s11 + $0x24] sm:$0xff]  }
  0x5e   : > { %11768 = vmatprep.mubr.bf16.mxu1 %v10159_v30  ;;  %v1673_v3 = vrot.slane %v1671_v55, 5  ;;  %11720 = vmatprep.mubr.bf16.mxu0 %v10135_v60  ;;  %v631_v7 = vrot.slane %v630_v62, 4  ;;  %v1687_v9 = vshll.u32 %v10243_v51, 16  ;;  %v1692_v10 = vshrl.u32 %v10244_v57, 16  ;;  %v10253_v55 = vld [vmem:[%s12723_s11 + $0x3c] sm:$0xf] }
  0x5f   : > { %v1679_v8 = vrot.slane %v1677_v0, 5  ;;  %v626_v11 = vsel %vm12753_vm2, %v621_v1, %v625_v47  ;;  %v1683_v13 = vrot.slane %v1681_v4, 4  ;;  %v1695_v14 = vshll.u32 %v10244_v57, 16 }
  0x60   : > { %v1674_v12 = vor.u32 %v1673_v3, %v1670_v2  ;;  %v636_v15 = vsel %vm12753_vm2, %v631_v7, %v635_v63  ;;  %v1689_v17 = vrot.slane %v1687_v9, 5  ;;  %v1694_v18 = vrot.slane %v1692_v10, 4  ;;  %v12507_v3 = vld [vmem:[%s16708_s1 + $0x170] sm:$0xff]   ;;  %v10254_v9 = vld [vmem:[%s12723_s11 + $0x40] sm:$0xf] }
  0x61   : > { %v1701_v19 = vshll.u32 %v10245_v58, 16  ;;  %v10136_v20 = vcombine.low %v626_v11, %v636_v15  ;;  %v1684_v23 = vor.u32 %v1683_v13, %v1679_v8  ;;  %v1697_v24 = vrot.slane %v1695_v14, 5  ;;  %v10255_v14 = vld [vmem:[%s12723_s11 + $0x44] sm:$0x1]  ;;  %v10256_v15 = vld [vmem:[%s12723_s11 + $0x48] sm:$0xf] }
  0x62   : > { %v1675_v21 = vrot.slane %v1674_v12, 4  ;;  %v1705_v30 = vshrl.u32 %v10245_v58, 16  ;;  %v1711_v56 = vshll.u32 %v10246_v5, 16  ;;  %v1716_v61 = vshrl.u32 %v10247_v6, 16 }
  0x63   : > { %v1703_v29 = vrot.slane %v1701_v19, 5  ;;  %v1685_v31 = vrot.slane %v1684_v23, 4  ;;  %v1698_v32 = vor.u32 %v1697_v24, %v1694_v18  ;;  %v1719_v33 = vshll.u32 %v10247_v6, 16  ;;  %v12506_v23 = vld [vmem:[%s12723_s11 + $0x30] sm:$0xff]  }
  0x64   : > { %11721 = vmatmul.mubr.bf16.gmra.mxu0 %v10136_v20  ;;  %v1680_v28 = vsel %vm12753_vm2, %v1675_v21, %v1679_v8  ;;  %v1707_v35 = vrot.slane %v1705_v30, 4  ;;  %v1713_v37 = vrot.slane %v1711_v56, 5  ;;  %v1718_v38 = vrot.slane %v1716_v61, 4  ;;  %v12508_v8 = vld [vmem:[%s16708_s1 + $0x130] sm:$0xff]   ;;  %v12511_v20 = vld [vmem:[%s16708_s1 + $0x168] sm:$0xff]   ;;  %v12509_v56 = vld [vmem:[%s12723_s11 + $0x3c] sm:$0xff]  }
  0x65   : > { %11769 = vmatmul.mubr.bf16.gmra.mxu1 %v10160_v48  ;;  %11788 = vmatprep.mubr.bf16.mxu0 %v12501_v16  ;;  %v1725_v39 = vshll.u32 %v10248_v26, 16  ;;  %v1690_v41 = vsel %vm12753_vm2, %v1685_v31, %v1689_v17  ;;  %v1699_v43 = vrot.slane %v1698_v32, 4  ;;  %v1721_v44 = vrot.slane %v1719_v33, 5  ;;  %v10258_v31 = vld [vmem:[%s12723_s11 + $0x50] sm:$0x1]  ;;  %v12512_v32 = vld [vmem:[%s16708_s1 + $0x128] sm:$0xff]  }
  0x66   : > { %v1729_v45 = vshrl.u32 %v10248_v26, 16  ;;  %v10305_v47 = vcombine.low %v1680_v28, %v1690_v41  ;;  %v1708_v49 = vor.u32 %v1707_v35, %v1703_v29  ;;  %v1735_v48 = vshll.u32 %v10249_v27, 16  ;;  %v10257_v27 = vld [vmem:[%s12723_s11 + $0x4c] sm:$0xf] }
  0x67   : > { %v1727_v25 = vrot.slane %v1725_v39, 5  ;;  %v1704_v51 = vsel %vm12753_vm2, %v1699_v43, %v1703_v29  ;;  %v1722_v52 = vor.u32 %v1721_v44, %v1718_v38  ;;  %v1740_v54 = vshrl.u32 %v10250_v34, 16  ;;  %v10259_v38 = vld [vmem:[%s12723_s11 + $0x54] sm:$0xf]  ;;  %v10260_v43 = vld [vmem:[%s12723_s11 + $0x58] sm:$0xf] }
  0x68   : > { %v1731_v53 = vrot.slane %v1729_v45, 4  ;;  %11836 = vmatprep.mubr.bf16.mxu1 %v10305_v47  ;;  %v1709_v57 = vrot.slane %v1708_v49, 4  ;;  %v1737_v58 = vrot.slane %v1735_v48, 5  ;;  %v1743_v60 = vshll.u32 %v10250_v34, 16 }
  0x69   : > { %v1749_v62 = vshll.u32 %v10251_v40, 16  ;;  %v1723_v63 = vrot.slane %v1722_v52, 4  ;;  %v1742_v1 = vrot.slane %v1740_v54, 4  ;;  %v1753_v2 = vshrl.u32 %v10251_v40, 16 }
  0x6a   : > { %v1732_v0 = vor.u32 %v1731_v53, %v1727_v25  ;;  %v1714_v4 = vsel %vm12753_vm2, %v1709_v57, %v1713_v37  ;;  %v1745_v5 = vrot.slane %v1743_v60, 5  ;;  %v1759_v7 = vshll.u32 %v10252_v46, 16  ;;  %v10261_v60 = vld [vmem:[%s12723_s11 + $0x5c] sm:$0x1] }
  0x6b   : > { %v1751_v6 = vrot.slane %v1749_v62, 5  ;;  %v10306_v10 = vcombine.low %v1704_v51, %v1714_v4  ;;  %v1728_v11 = vsel %vm12753_vm2, %v1723_v63, %v1727_v25  ;;  %v1755_v13 = vrot.slane %v1753_v2, 4  ;;  %v12516_v51 = vld [vmem:[%s16708_s1 + $0x120] sm:$0xff]   ;;  %v12510_v2 = vld [vmem:[%s12723_s11 + $0x48] sm:$0xff]  }
  0x6c   : > { %11789 = vmatmul.mubr.bf16.vlgmr.msra.gmra.mxu0 %v12502_v42  ;;  %v1733_v12 = vrot.slane %v1732_v0, 4  ;;  %v1746_v16 = vor.u32 %v1745_v5, %v1742_v1  ;;  %v1761_v17 = vrot.slane %v1759_v7, 5  ;;  %v1764_v18 = vshrl.u32 %v10253_v55, 16  ;;  %v10262_v0 = vld [vmem:[%s12723_s11 + $0x60] sm:$0xf]  ;;  %v12519_v7 = vld [vmem:[%s16708_s1 + $0x158] sm:$0xff]  }
  0x6d   : > { %11869 = vmatpush3.bf16.msra.mxu0 %v12966_v50  ;;  %11792 = vmatprep.mubr.bf16.mxu0 %v12505_v22  ;;  %v1767_v19 = vshll.u32 %v10253_v55, 16  ;;  %v1756_v24 = vor.u32 %v1755_v13, %v1751_v6  ;;  %v1773_v26 = vshll.u32 %v10254_v9, 16  ;;  %v1777_v50 = vshrl.u32 %v10254_v9, 16  ;;  %v12520_v13 = vld [vmem:[%s16708_s1 + $0x118] sm:$0xff]  }
  0x6e   : > { %11837 = vmatmul.mubr.bf16.vlgmr.msra.gmra.mxu1 %v10306_v10  ;;  %v1738_v21 = vsel %vm12753_vm2, %v1733_v12, %v1737_v58  ;;  %11870 = vmatprep.subr.bf16.mxu0 %v12507_v3  ;;  %v1747_v30 = vrot.slane %v1746_v16, 4  ;;  %v1766_v61 = vrot.slane %v1764_v18, 4  ;;  %v1783_v37 = vshll.u32 %v10255_v14, 16  ;;  %v12513_v10 = vld [vmem:[%s12723_s11 + $0x54] sm:$0xff]  }
  0x6f   : > { %11917 = vmatpush3.bf16.msra.mxu1 %v12980_v59  ;;  %v10307_v29 = vcombine.low %v1728_v11, %v1738_v21  ;;  %v1769_v28 = vrot.slane %v1767_v19, 5  ;;  %v1757_v33 = vrot.slane %v1756_v24, 4  ;;  %v1775_v34 = vrot.slane %v1773_v26, 5  ;;  %v12515_v59 = vld [vmem:[%s16708_s1 + $0x160] sm:$0xff]   ;;  %v12523_v18 = vld [vmem:[%s16708_s1 + $0x150] sm:$0xff]  }
  0x70   : > { %11918 = vmatprep.subr.bf16.mxu1 %v12508_v8  ;;  %v1779_v35 = vrot.slane %v1777_v50, 4  ;;  %v1752_v39 = vsel %vm12753_vm2, %v1747_v30, %v1751_v6  ;;  %v1788_v41 = vshrl.u32 %v10256_v15, 16  ;;  %v1791_v42 = vshll.u32 %v10256_v15, 16  ;;  %v10263_v6 = vld [vmem:[%s12723_s11 + $0x64] sm:$0xf] }
  0x71   : > { %11840 = vmatprep.mubr.bf16.mxu1 %v10307_v29  ;;  %11871 = vmatpush3.bf16.msra.mxu0 %v12507_v3  ;;  %v1770_v40 = vor.u32 %v1769_v28, %v1766_v61  ;;  %v1762_v44 = vsel %vm12753_vm2, %v1757_v33, %v1761_v17  ;;  %v1785_v46 = vrot.slane %v1783_v37, 5  ;;  %v1797_v47 = vshll.u32 %v10257_v27, 16  ;;  %v10264_v21 = vld [vmem:[%s12723_s11 + $0x68] sm:$0x1]  ;;  %v10265_v26 = vld [vmem:[%s12723_s11 + $0x6c] sm:$0xf] }
  0x72   : > { %v1780_v45 = vor.u32 %v1779_v35, %v1775_v34  ;;  %11872 = vmatprep.subr.bf16.mxu0 %v12511_v20  ;;  %v10308_v49 = vcombine.low %v1752_v39, %v1762_v44  ;;  %v1790_v25 = vrot.slane %v1788_v41, 4  ;;  %v1793_v48 = vrot.slane %v1791_v42, 5  ;;  %v10267_v33 = vld [vmem:[%s12723_s11 + $0x74] sm:$0x1] }
  0x73   : > { %11919 = vmatpush3.bf16.msra.mxu1 %v12508_v8  ;;  %v1771_v22 = vrot.slane %v1770_v40, 4  ;;  %v1799_v53 = vrot.slane %v1797_v47, 5  ;;  %v1801_v54 = vshrl.u32 %v10257_v27, 16  ;;  %v1807_v55 = vshll.u32 %v10258_v31, 16 }
  0x74   : > { %11793 = vmatmul.mubr.bf16.gmra.mxu0 %v12506_v23  ;;  %v1781_v52 = vrot.slane %v1780_v45, 4  ;;  %11920 = vmatprep.subr.bf16.mxu1 %v12512_v32  ;;  %v1794_v58 = vor.u32 %v1793_v48, %v1790_v25  ;;  %v1812_v62 = vshrl.u32 %v10259_v38, 16  ;;  %v1815_v63 = vshll.u32 %v10259_v38, 16  ;;  %v12514_v45 = vld [vmem:[%s12723_s11 + $0x60] sm:$0xff]   ;;  %v12517_v48 = vld [vmem:[%s12723_s11 + $0x6c] sm:$0xff]  }
  0x75   : > { %11796 = vmatprep.mubr.bf16.mxu0 %v12509_v56  ;;  %v1776_v57 = vsel %vm12753_vm2, %v1771_v22, %v1775_v34  ;;  %11873 = vmatpush3.bf16.msra.mxu0 %v12511_v20  ;;  %v1803_v3 = vrot.slane %v1801_v54, 4  ;;  %v1809_v4 = vrot.slane %v1807_v55, 5  ;;  %v1821_v5 = vshll.u32 %v10260_v43, 16  ;;  %v10266_v56 = vld [vmem:[%s12723_s11 + $0x70] sm:$0xf] }
  0x76   : > { %11841 = vmatmul.mubr.bf16.gmra.mxu1 %v10308_v49  ;;  %v1786_v1 = vsel %vm12753_vm2, %v1781_v52, %v1785_v46  ;;  %11874 = vmatprep.subr.bf16.mxu0 %v12515_v59  ;;  %v1795_v9 = vrot.slane %v1794_v58, 4  ;;  %v1814_v11 = vrot.slane %v1812_v62, 4  ;;  %v1817_v12 = vrot.slane %v1815_v63, 5  ;;  %v12524_v34 = vld [vmem:[%s16708_s1 + $0x110] sm:$0xff]   ;;  %v12528_v62 = vld [vmem:[%s16708_s1 + $0x108] sm:$0xff]  }
  0x77   : > { %v10309_v8 = vcombine.low %v1776_v57, %v1786_v1  ;;  %11921 = vmatpush3.bf16.msra.mxu1 %v12512_v32  ;;  %v1804_v14 = vor.u32 %v1803_v3, %v1799_v53  ;;  %v1823_v15 = vrot.slane %v1821_v5, 5  ;;  %v1825_v16 = vshrl.u32 %v10260_v43, 16  ;;  %v12527_v43 = vld [vmem:[%s16708_s1 + $0x148] sm:$0xff]   ;;  %v10270_v3 = vld [vmem:[%s12723_s11 + $0x80] sm:$0x1] }
  0x78   : > { %v1831_v17 = vshll.u32 %v10261_v60, 16  ;;  %11922 = vmatprep.subr.bf16.mxu1 %v12516_v51  ;;  %v1800_v19 = vsel %vm12753_vm2, %v1795_v9, %v1799_v53  ;;  %v1818_v20 = vor.u32 %v1817_v12, %v1814_v11  ;;  %v1836_v23 = vshrl.u32 %v10262_v0, 16  ;;  %v10268_v53 = vld [vmem:[%s12723_s11 + $0x78] sm:$0xf]  ;;  %v10269_v60 = vld [vmem:[%s12723_s11 + $0x7c] sm:$0xf] }
  0x79   : > { %11844 = vmatprep.mubr.bf16.mxu1 %v10309_v8  ;;  %v1839_v24 = vshll.u32 %v10262_v0, 16  ;;  %11875 = vmatpush3.bf16.msra.mxu0 %v12515_v59  ;;  %v1805_v50 = vrot.slane %v1804_v14, 4  ;;  %v1827_v27 = vrot.slane %v1825_v16, 4  ;;  %v1845_v30 = vshll.u32 %v10263_v6, 16  ;;  %v12531_v8 = vld [vmem:[%s16708_s1 + $0x140] sm:$0xff]  }
  0x7a   : > { %v1833_v29 = vrot.slane %v1831_v17, 5  ;;  %11876 = vmatprep.subr.bf16.mxu0 %v12519_v7  ;;  %v1819_v61 = vrot.slane %v1818_v20, 4  ;;  %v1838_v28 = vrot.slane %v1836_v23, 4  ;;  %v1849_v32 = vshrl.u32 %v10263_v6, 16 }
  0x7b   : > { %v1841_v31 = vrot.slane %v1839_v24, 5  ;;  %11923 = vmatpush3.bf16.msra.mxu1 %v12516_v51  ;;  %v1810_v35 = vsel %vm12753_vm2, %v1805_v50, %v1809_v4  ;;  %v1828_v37 = vor.u32 %v1827_v27, %v1823_v15  ;;  %v1847_v38 = vrot.slane %v1845_v30, 5  ;;  %v10274_v50 = vld [vmem:[%s12723_s11 + $0x90] sm:$0xf]  ;;  %v12518_v30 = vld [vmem:[%s12723_s11 + $0x78] sm:$0xff]  }
  0x7c   : > { %11797 = vmatmul.mubr.bf16.gmra.mxu0 %v12510_v2  ;;  %v1855_v59 = vshll.u32 %v10264_v21, 16  ;;  %11924 = vmatprep.subr.bf16.mxu1 %v12520_v13  ;;  %v10310_v39 = vcombine.low %v1800_v19, %v1810_v35  ;;  %v1824_v40 = vsel %vm12753_vm2, %v1819_v61, %v1823_v15  ;;  %v1851_v42 = vrot.slane %v1849_v32, 4  ;;  %v12532_v19 = vld [vmem:[%s16708_s1 + $0x100] sm:$0xff]  }
  0x7d   : > { %11800 = vmatprep.mubr.bf16.mxu0 %v12513_v10  ;;  %v1842_v41 = vor.u32 %v1841_v31, %v1838_v28  ;;  %11877 = vmatpush3.bf16.msra.mxu0 %v12519_v7  ;;  %v1829_v44 = vrot.slane %v1828_v37, 4  ;;  %v1860_v47 = vshrl.u32 %v10265_v26, 16  ;;  %v1863_v49 = vshll.u32 %v10265_v26, 16  ;;  %v10273_v26 = vld [vmem:[%s12723_s11 + $0x8c] sm:$0x1]  ;;  %v13168_v31 = vld [vmem:[%s16708_s1 + $0x1b8] sm:$0xff]  }
  0x7e   : > { %v1857_v46 = vrot.slane %v1855_v59, 5  ;;  %11878 = vmatprep.subr.bf16.mxu0 %v12523_v18  ;;  %11845 = vmatmul.mubr.bf16.gmra.mxu1 %v10310_v39  ;;  %v1852_v25 = vor.u32 %v1851_v42, %v1847_v38  ;;  %v1869_v51 = vshll.u32 %v10266_v56, 16  ;;  %v1873_v52 = vshrl.u32 %v10266_v56, 16  ;;  %v10275_v28 = vld [vmem:[%s12723_s11 + $0x94] sm:$0xf] }
  0x7f   : > { %v1843_v22 = vrot.slane %v1842_v41, 4  ;;  %v1834_v54 = vsel %vm12753_vm2, %v1829_v44, %v1833_v29  ;;  %v1862_v55 = vrot.slane %v1860_v47, 4  ;;  %v1865_v57 = vrot.slane %v1863_v49, 5  ;;  %11925 = vmatpush3.bf16.msra.mxu1 %v12520_v13  ;;  %v10271_v13 = vld [vmem:[%s12723_s11 + $0x84] sm:$0xf] }
  0x80   : > { %v1879_v58 = vshll.u32 %v10267_v33, 16  ;;  %v10311_v63 = vcombine.low %v1824_v40, %v1834_v54  ;;  %v1853_v1 = vrot.slane %v1852_v25, 4  ;;  %v1871_v2 = vrot.slane %v1869_v51, 5  ;;  %11926 = vmatprep.subr.bf16.mxu1 %v12524_v34  ;;  %v10277_v54 = vld [vmem:[%s12723_s11 + $0x9c] sm:$0xf] }
  0x81   : > { %v1848_v0 = vsel %vm12753_vm2, %v1843_v22, %v1847_v38  ;;  %11879 = vmatpush3.bf16.msra.mxu0 %v12523_v18  ;;  %v1866_v4 = vor.u32 %v1865_v57, %v1862_v55  ;;  %v1875_v5 = vrot.slane %v1873_v52, 4  ;;  %v1884_v7 = vshrl.u32 %v10268_v53, 16  ;;  %v10272_v18 = vld [vmem:[%s12723_s11 + $0x88] sm:$0xf]  ;;  %v10276_v22 = vld [vmem:[%s12723_s11 + $0x98] sm:$0x1] }
  0x82   : > { %v1881_v6 = vrot.slane %v1879_v58, 5  ;;  %11880 = vmatprep.subr.bf16.mxu0 %v12527_v43  ;;  %11848 = vmatprep.mubr.bf16.mxu1 %v10311_v63  ;;  %v1858_v9 = vsel %vm12753_vm2, %v1853_v1, %v1857_v46  ;;  %v1887_v10 = vshll.u32 %v10268_v53, 16  ;;  %v1893_v11 = vshll.u32 %v10269_v60, 16  ;;  %v12521_v38 = vld [vmem:[%s12723_s11 + $0x84] sm:$0xff]   ;;  %v10278_v55 = vld [vmem:[%s12723_s11 + $0xa0] sm:$0xf] }
  0x83   : > { %v1897_v12 = vshrl.u32 %v10269_v60, 16  ;;  %v10312_v14 = vcombine.low %v1848_v0, %v1858_v9  ;;  %v1867_v15 = vrot.slane %v1866_v4, 4  ;;  %v1876_v16 = vor.u32 %v1875_v5, %v1871_v2  ;;  %11927 = vmatpush3.bf16.msra.mxu1 %v12524_v34  ;;  %v12522_v9 = vld [vmem:[%s12723_s11 + $0x90] sm:$0xff]  }
  0x84   : > { %11801 = vmatmul.mubr.bf16.gmra.mxu0 %v12514_v45  ;;  %v1886_v17 = vrot.slane %v1884_v7, 4  ;;  %v1889_v20 = vrot.slane %v1887_v10, 5  ;;  %v1895_v21 = vrot.slane %v1893_v11, 5  ;;  %v1903_v24 = vshll.u32 %v10270_v3, 16  ;;  %11928 = vmatprep.subr.bf16.mxu1 %v12528_v62  ;;  %v13176_v45 = vld [vmem:[%s16708_s1 + $0x1f8] sm:$0xff]  }
  0x85   : > { %11804 = vmatprep.mubr.bf16.mxu0 %v12517_v48  ;;  %v1899_v23 = vrot.slane %v1897_v12, 4  ;;  %11881 = vmatpush3.bf16.msra.mxu0 %v12527_v43  ;;  %v1872_v27 = vsel %vm12753_vm2, %v1867_v15, %v1871_v2  ;;  %v1877_v29 = vrot.slane %v1876_v16, 4  ;;  %v1908_v56 = vshrl.u32 %v10271_v13, 16  ;;  %v10279_v3 = vld [vmem:[%s12723_s11 + $0xa4] sm:$0x1] }
  0x86   : > { %v1911_v61 = vshll.u32 %v10271_v13, 16  ;;  %11882 = vmatprep.subr.bf16.mxu0 %v12531_v8  ;;  %11849 = vmatmul.mubr.bf16.gmra.mxu1 %v10312_v14  ;;  %v1890_v32 = vor.u32 %v1889_v20, %v1886_v17  ;;  %v1905_v34 = vrot.slane %v1903_v24, 5  ;;  %v1917_v35 = vshll.u32 %v10272_v18, 16  ;;  %v10281_v14 = vld [vmem:[%s12723_s11 + $0xac] sm:$0xf]  ;;  %v12525_v17 = vld [vmem:[%s12723_s11 + $0x9c] sm:$0xff]  }
  0x87   : > { %v1900_v33 = vor.u32 %v1899_v23, %v1895_v21  ;;  %v1882_v37 = vsel %vm12753_vm2, %v1877_v29, %v1881_v6  ;;  %v1910_v59 = vrot.slane %v1908_v56, 4  ;;  %v1921_v40 = vshrl.u32 %v10272_v18, 16  ;;  %11929 = vmatpush3.bf16.msra.mxu1 %v12528_v62 }
  0x88   : > { %v1913_v39 = vrot.slane %v1911_v61, 5  ;;  %v10313_v41 = vcombine.low %v1872_v27, %v1882_v37  ;;  %v1891_v42 = vrot.slane %v1890_v32, 4  ;;  %v1919_v44 = vrot.slane %v1917_v35, 5  ;;  %11930 = vmatprep.subr.bf16.mxu1 %v12532_v19 }
  0x89   : > { %v1901_v43 = vrot.slane %v1900_v33, 4  ;;  %11883 = vmatpush3.bf16.msra.mxu0 %v12531_v8  ;;  %v1923_v47 = vrot.slane %v1921_v40, 4  ;;  %v1927_v49 = vshll.u32 %v10273_v26, 16  ;;  %v1932_v25 = vshrl.u32 %v10274_v50, 16  ;;  %v10280_v8 = vld [vmem:[%s12723_s11 + $0xa8] sm:$0xf] }
  0x8a   : > { %v1914_v46 = vor.u32 %v1913_v39, %v1910_v59  ;;  %11964 = vmatprep.subr.bf16.mxu0 %v13168_v31  ;;  %11852 = vmatprep.mubr.bf16.mxu1 %v10313_v41  ;;  %v1896_v48 = vsel %vm12753_vm2, %v1891_v42, %v1895_v21  ;;  %v1935_v52 = vshll.u32 %v10274_v50, 16  ;;  %v1941_v53 = vshll.u32 %v10275_v28, 16  ;;  %v10282_v26 = vld [vmem:[%s12723_s11 + $0xb0] sm:$0x1]  ;;  %v10284_v42 = vld [vmem:[%s12723_s11 + $0xb8] sm:$0xf] }
  0x8b   : > { %v1906_v51 = vsel %vm12753_vm2, %v1901_v43, %v1905_v34  ;;  %v1924_v60 = vor.u32 %v1923_v47, %v1919_v44  ;;  %v1929_v62 = vrot.slane %v1927_v49, 5  ;;  %11931 = vmatpush3.bf16.msra.mxu1 %v12532_v19  ;;  %v1934_v63 = vrot.slane %v1932_v25, 4  ;;  %v10285_v49 = vld [vmem:[%s12723_s11 + $0xbc] sm:$0x1] }
  0x8c   : > { %11805 = vmatmul.mubr.bf16.gmra.mxu0 %v12518_v30  ;;  %v10314_v57 = vcombine.low %v1896_v48, %v1906_v51  ;;  %v1915_v58 = vrot.slane %v1914_v46, 4  ;;  %v1937_v0 = vrot.slane %v1935_v52, 5  ;;  %v1943_v1 = vrot.slane %v1941_v53, 5  ;;  %12012 = vmatprep.subr.bf16.mxu1 %v13176_v45  ;;  %v12526_v53 = vld [vmem:[%s12723_s11 + $0xa8] sm:$0xff]  }
  0x8d   : > { %11808 = vmatprep.mubr.bf16.mxu0 %v12521_v38  ;;  %v1945_v2 = vshrl.u32 %v10275_v28, 16  ;;  %v1925_v5 = vrot.slane %v1924_v60, 4  ;;  %v1951_v6 = vshll.u32 %v10276_v22, 16  ;;  %v1956_v7 = vshrl.u32 %v10277_v54, 16  ;;  %v10283_v38 = vld [vmem:[%s12723_s11 + $0xb4] sm:$0xf] }
  0x8e   : > { %v1920_v4 = vsel %vm12753_vm2, %v1915_v58, %v1919_v44  ;;  %11853 = vmatmul.mubr.bf16.gmra.mxu1 %v10314_v57  ;;  %v1938_v10 = vor.u32 %v1937_v0, %v1934_v63  ;;  %v1959_v12 = vshll.u32 %v10277_v54, 16  ;;  %v1965_v13 = vshll.u32 %v10278_v55, 16  ;;  %v10286_v58 = vld [vmem:[%s12723_s11 + $0xc0] sm:$0xf]  ;;  %v12529_v0 = vld [vmem:[%s12723_s11 + $0xb4] sm:$0xff]  }
  0x8f   : > { %v1947_v11 = vrot.slane %v1945_v2, 4  ;;  %v1930_v15 = vsel %vm12753_vm2, %v1925_v5, %v1929_v62  ;;  %v1953_v16 = vrot.slane %v1951_v6, 5  ;;  %v1958_v18 = vrot.slane %v1956_v7, 4  ;;  %v10287_v2 = vld [vmem:[%s12723_s11 + $0xc4] sm:$0xf] }
  0x90   : > { %v1969_v19 = vshrl.u32 %v10278_v55, 16  ;;  %v10315_v20 = vcombine.low %v1920_v4, %v1930_v15  ;;  %v1939_v21 = vrot.slane %v1938_v10, 4  ;;  %v1961_v24 = vrot.slane %v1959_v12, 5  ;;  %v10288_v7 = vld [vmem:[%s12723_s11 + $0xc8] sm:$0x1] }
  0x91   : > { %v1948_v23 = vor.u32 %v1947_v11, %v1943_v1  ;;  %v1967_v50 = vrot.slane %v1965_v13, 5  ;;  %v1975_v29 = vshll.u32 %v10279_v3, 16  ;;  %v1980_v30 = vshrl.u32 %v10280_v8, 16 }
  0x92   : > { %v1971_v27 = vrot.slane %v1969_v19, 4  ;;  %11856 = vmatprep.mubr.bf16.mxu1 %v10315_v20  ;;  %v1944_v56 = vsel %vm12753_vm2, %v1939_v21, %v1943_v1  ;;  %v1962_v28 = vor.u32 %v1961_v24, %v1958_v18  ;;  %v1983_v32 = vshll.u32 %v10280_v8, 16 }
  0x93   : > { %v1949_v61 = vrot.slane %v1948_v23, 4  ;;  %v1977_v34 = vrot.slane %v1975_v29, 5  ;;  %v1982_v35 = vrot.slane %v1980_v30, 4  ;;  %v1989_v37 = vshll.u32 %v10281_v14, 16  ;;  %v2962_v30 = vld [vmem:[%s12723_s11] sm:$0xe] }
  0x94   : > { %11809 = vmatmul.mubr.bf16.gmra.mxu0 %v12522_v9  ;;  %v1972_v33 = vor.u32 %v1971_v27, %v1967_v50  ;;  %v1963_v39 = vrot.slane %v1962_v28, 4  ;;  %v1985_v40 = vrot.slane %v1983_v32, 5  ;;  %v1993_v41 = vshrl.u32 %v10281_v14, 16  ;;  %v12530_v28 = vld [vmem:[%s12723_s11 + $0xc0] sm:$0xff]  }
  0x95   : > { %v1954_v59 = vsel %vm12753_vm2, %v1949_v61, %v1953_v16  ;;  %11812 = vmatprep.mubr.bf16.mxu0 %v12525_v17  ;;  %v1991_v46 = vrot.slane %v1989_v37, 5  ;;  %v1999_v47 = vshll.u32 %v10282_v26, 16  ;;  %v2004_v51 = vshrl.u32 %v10283_v38, 16  ;;  %v2514_v26 = vld [vmem:[%s12723_s11 + $0x4] sm:$0xf] }
  0x96   : > { %v10316_v43 = vcombine.low %v1944_v56, %v1954_v59  ;;  %v1973_v44 = vrot.slane %v1972_v33, 4  ;;  %v1968_v22 = vsel %vm12753_vm2, %v1963_v39, %v1967_v50  ;;  %v1986_v25 = vor.u32 %v1985_v40, %v1982_v35  ;;  %v2513_v33 = vld [vmem:[%s12723_s11] sm:$0xf] }
  0x97   : > { %v1995_v48 = vrot.slane %v1993_v41, 4  ;;  %v2001_v54 = vrot.slane %v1999_v47, 5  ;;  %v2007_v55 = vshll.u32 %v10283_v38, 16  ;;  %v2013_v57 = vshll.u32 %v10284_v42, 16  ;;  %v2515_v38 = vld [vmem:[%s12723_s11 + $0x8] sm:$0x1] }
  0x98   : > { %11857 = vmatmul.mubr.bf16.gmra.mxu1 %v10316_v43  ;;  %v1978_v52 = vsel %vm12753_vm2, %v1973_v44, %v1977_v34  ;;  %v1987_v62 = vrot.slane %v1986_v25, 4  ;;  %v2006_v1 = vrot.slane %v2004_v51, 4  ;;  %v2017_v5 = vshrl.u32 %v10284_v42, 16  ;;  %v2516_v25 = vld [vmem:[%s12723_s11 + $0xc] sm:$0xf] }
  0x99   : > { %v10317_v60 = vcombine.low %v1968_v22, %v1978_v52  ;;  %v1996_v63 = vor.u32 %v1995_v48, %v1991_v46  ;;  %v2009_v3 = vrot.slane %v2007_v55, 5  ;;  %v2015_v4 = vrot.slane %v2013_v57, 5  ;;  %v2963_v22 = vld [vmem:[%s12723_s11 + $0xc] sm:$0xe] }
  0x9a   : > { %v2023_v6 = vshll.u32 %v10285_v49, 16  ;;  %v1992_v8 = vsel %vm12753_vm2, %v1987_v62, %v1991_v46  ;;  %v2028_v10 = vshrl.u32 %v10286_v58, 16  ;;  %v2031_v11 = vshll.u32 %v10286_v58, 16 }
  0x9b   : > { %11860 = vmatprep.mubr.bf16.mxu1 %v10317_v60  ;;  %v1997_v9 = vrot.slane %v1996_v63, 4  ;;  %v2010_v12 = vor.u32 %v2009_v3, %v2006_v1  ;;  %v2019_v13 = vrot.slane %v2017_v5, 4  ;;  %v2037_v15 = vshll.u32 %v10287_v2, 16  ;;  %v2518_v5 = vld [vmem:[%s12723_s11 + $0x14] sm:$0x1] }
  0x9c   : > { %11813 = vmatmul.mubr.bf16.gmra.mxu0 %v12526_v53  ;;  %v2025_v14 = vrot.slane %v2023_v6, 5  ;;  %v2030_v17 = vrot.slane %v2028_v10, 4  ;;  %v2033_v18 = vrot.slane %v2031_v11, 5  ;;  %v2041_v19 = vshrl.u32 %v10287_v2, 16 }
  0x9d   : > { %v2002_v16 = vsel %vm12753_vm2, %v1997_v9, %v2001_v54  ;;  %11816 = vmatprep.mubr.bf16.mxu0 %v12529_v0  ;;  %v2011_v21 = vrot.slane %v2010_v12, 4  ;;  %v2020_v23 = vor.u32 %v2019_v13, %v2015_v4  ;;  %v2039_v24 = vrot.slane %v2037_v15, 5  ;;  %v2517_v54 = vld [vmem:[%s12723_s11 + $0x10] sm:$0xf]  ;;  %v2964_v15 = vld [vmem:[%s12723_s11 + $0x18] sm:$0xe] }
  0x9e   : > { %v10318_v20 = vcombine.low %v1992_v8, %v2002_v16  ;;  %v2034_v50 = vor.u32 %v2033_v18, %v2030_v17  ;;  %v2043_v27 = vrot.slane %v2041_v19, 4  ;;  %v2047_v29 = vshll.u32 %v10288_v7, 16 }
  0x9f   : > { %v2016_v56 = vsel %vm12753_vm2, %v2011_v21, %v2015_v4  ;;  %v2021_v61 = vrot.slane %v2020_v23, 4  ;;  %v10345_v32 = vrot.slane %v2962_v30, 9  ;;  %v16719_v59 = vmov 0 }
  0xa0   : > { %11861 = vmatmul.mubr.bf16.gmra.mxu1 %v10318_v20  ;;  %v2035_v34 = vrot.slane %v2034_v50, 4  ;;  %v2044_v35 = vor.u32 %v2043_v27, %v2039_v24  ;;  %v2049_v37 = vrot.slane %v2047_v29, 5  ;;  %v16720_v59 = vsel %vm13224_vm5, 4294967295, %v16719_v59  ;;  %v12535_v50 = vld [vmem:[%s16708_s1 + $0x1b0] sm:$0xff]  }
  0xa1   : > { %16721 = vst [vmem:[#allocation2_spill] sm:$0xff] %v16720_v59  ;;  %v3031_v39 = vrot.slane %v2514_v26, 5  ;;  %v2026_v40 = vsel %vm12753_vm2, %v2021_v61, %v2025_v14  ;;  %v3034_v41 = vrot.slane %v2515_v38, 5  ;;  %v2562_v42 = vshrl.u32 %v2513_v33, 16  ;;  %v2521_v61 = vld [vmem:[%s12723_s11 + $0x20] sm:$0x1] }
  0xa2   : > { %v2565_v43 = vshll.u32 %v2513_v33, 16  ;;  %v10319_v44 = vcombine.low %v2016_v56, %v2026_v40  ;;  %v2040_v46 = vsel %vm12753_vm2, %v2035_v34, %v2039_v24  ;;  %v2045_v47 = vrot.slane %v2044_v35, 4  ;;  %v2520_v56 = vld [vmem:[%s12723_s11 + $0x1c] sm:$0xf] }
  0xa3   : > { %v3032_v49 = vsel %vm13224_vm5, %v10345_v32, %v3031_v39  ;;  %v3033_v48 = vrot.slane %v3031_v39, 4  ;;  %v2564_v51 = vrot.slane %v2562_v42, 4  ;;  %v2571_v53 = vshll.u32 %v2514_v26, 16 }
  0xa4   : > { %11817 = vmatmul.mubr.bf16.gmra.mxu0 %v12530_v28  ;;  %v2567_v52 = vrot.slane %v2565_v43, 5  ;;  %11864 = vmatprep.mubr.bf16.mxu1 %v10319_v44  ;;  %v2050_v55 = vsel %vm12753_vm2, %v2045_v47, %v2049_v37  ;;  %v2575_v57 = vshrl.u32 %v2514_v26, 16  ;;  %v2581_v58 = vshll.u32 %v2515_v38, 16  ;;  %v2519_v26 = vld [vmem:[%s12723_s11 + $0x18] sm:$0xf] }
  0xa5   : > { %v10346_v60 = vrot.slane %v2963_v22, 9  ;;  %v10320_v62 = vcombine.low %v2040_v46, %v2050_v55  ;;  %v3035_v63 = vsel %vm13224_vm5, %v3033_v48, %v3034_v41  ;;  %v2573_v1 = vrot.slane %v2571_v53, 5  ;;  %v2965_v37 = vld [vmem:[%s12723_s11 + $0x24] sm:$0xe] }
  0xa6   : > { %v2568_v0 = vor.u32 %v2567_v52, %v2564_v51  ;;  %v10377_v2 = vcombine.low %v3032_v49, %v3035_v63  ;;  %v2577_v3 = vrot.slane %v2575_v57, 4  ;;  %v2583_v4 = vrot.slane %v2581_v58, 5 }
  0xa7   : > { %v3038_v6 = vrot.slane %v2517_v54, 5  ;;  %v3041_v8 = vrot.slane %v2518_v5, 5  ;;  %v2586_v9 = vshrl.u32 %v2516_v25, 16  ;;  %v2589_v10 = vshll.u32 %v2516_v25, 16 }
  0xa8   : > { %11865 = vmatmul.mubr.bf16.gmra.mxu1 %v10320_v62  ;;  %v2569_v7 = vrot.slane %v2568_v0, 4  ;;  %11884 = vmatprep.mubr.bf16.mxu0 %v10377_v2  ;;  %v2578_v11 = vor.u32 %v2577_v3, %v2573_v1  ;;  %v2595_v14 = vshll.u32 %v2517_v54, 16  ;;  %v2599_v19 = vshrl.u32 %v2517_v54, 16  ;;  %v2522_v54 = vld [vmem:[%s12723_s11 + $0x24] sm:$0xf] }
  0xa9   : > { %v3039_v12 = vsel %vm13224_vm5, %v10346_v60, %v3038_v6  ;;  %v3040_v13 = vrot.slane %v3038_v6, 4  ;;  %v2588_v17 = vrot.slane %v2586_v9, 4  ;;  %v2591_v18 = vrot.slane %v2589_v10, 5  ;;  %v2523_v60 = vld [vmem:[%s12723_s11 + $0x28] sm:$0xf]  ;;  %v12539_v10 = vld [vmem:[%s16708_s1 + $0x1a0] sm:$0xff]  }
  0xaa   : > { %v2574_v16 = vsel %vm12753_vm2, %v2569_v7, %v2573_v1  ;;  %v2579_v20 = vrot.slane %v2578_v11, 4  ;;  %v2597_v23 = vrot.slane %v2595_v14, 5  ;;  %v2605_v24 = vshll.u32 %v2518_v5, 16  ;;  %v2524_v2 = vld [vmem:[%s12723_s11 + $0x2c] sm:$0x1] }
  0xab   : > { %v3042_v21 = vsel %vm13224_vm5, %v3040_v13, %v3041_v8  ;;  %v2592_v29 = vor.u32 %v2591_v18, %v2588_v17  ;;  %v2601_v30 = vrot.slane %v2599_v19, 4  ;;  %v10347_v28 = vrot.slane %v2964_v15, 9  ;;  %v2966_v9 = vld [vmem:[%s12723_s11 + $0x30] sm:$0xe] }
  0xac   : > { %v10378_v27 = vcombine.low %v3039_v12, %v3042_v21  ;;  %v2584_v32 = vsel %vm12753_vm2, %v2579_v20, %v2583_v4  ;;  %v2607_v33 = vrot.slane %v2605_v24, 5  ;;  %v3045_v34 = vrot.slane %v2520_v56, 5  ;;  %v12536_v4 = vld [vmem:[%s16708_s1 + $0x1f0] sm:$0xff]  }
  0xad   : > { %v3048_v35 = vrot.slane %v2521_v61, 5  ;;  %v10401_v38 = vcombine.low %v2574_v16, %v2584_v32  ;;  %v2593_v39 = vrot.slane %v2592_v29, 4  ;;  %v2602_v40 = vor.u32 %v2601_v30, %v2597_v23  ;;  %v2525_v15 = vld [vmem:[%s12723_s11 + $0x30] sm:$0xf]  ;;  %v12538_v16 = vld [vmem:[%s16708_s1 + $0x1e8] sm:$0xff]  }
  0xae   : > { %11885 = vmatmul.mubr.bf16.vlgmr.msra.gmra.mxu0 %v10378_v27  ;;  %v2610_v41 = vshrl.u32 %v2519_v26, 16  ;;  %v3046_v42 = vsel %vm13224_vm5, %v10347_v28, %v3045_v34  ;;  %v3047_v43 = vrot.slane %v3045_v34, 4  ;;  %v2613_v44 = vshll.u32 %v2519_v26, 16  ;;  %v2526_v30 = vld [vmem:[%s12723_s11 + $0x34] sm:$0xf]  ;;  %v12541_v34 = vld [vmem:[%s16708_s1 + $0x198] sm:$0xff]  }
  0xaf   : > { %11965 = vmatpush3.bf16.msra.mxu0 %v13168_v31  ;;  %v2619_v46 = vshll.u32 %v2520_v56, 16  ;;  %11932 = vmatprep.mubr.bf16.mxu1 %v10401_v38  ;;  %v2598_v47 = vsel %vm12753_vm2, %v2593_v39, %v2597_v23  ;;  %v2603_v49 = vrot.slane %v2602_v40, 4  ;;  %v2623_v25 = vshrl.u32 %v2520_v56, 16  ;;  %v12537_v31 = vld [vmem:[%s16708_s1 + $0x1a8] sm:$0xff]   ;;  %v2527_v28 = vld [vmem:[%s12723_s11 + $0x38] sm:$0x1] }
  0xb0   : > { %v2612_v22 = vrot.slane %v2610_v41, 4  ;;  %11966 = vmatprep.subr.bf16.mxu0 %v12535_v50  ;;  %v3049_v48 = vsel %vm13224_vm5, %v3047_v43, %v3048_v35  ;;  %v2615_v51 = vrot.slane %v2613_v44, 5  ;;  %v2629_v53 = vshll.u32 %v2521_v61, 16  ;;  %v2967_v44 = vld [vmem:[%s12723_s11 + $0x3c] sm:$0xe] }
  0xb1   : > { %v2621_v52 = vrot.slane %v2619_v46, 5  ;;  %v2608_v55 = vsel %vm12753_vm2, %v2603_v49, %v2607_v33  ;;  %v10379_v57 = vcombine.low %v3046_v42, %v3049_v48  ;;  %v2625_v58 = vrot.slane %v2623_v25, 4  ;;  %v12540_v46 = vld [vmem:[%s16708_s1 + $0x1e0] sm:$0xff]  }
  0xb2   : > { %v10348_v62 = vrot.slane %v2965_v37, 9  ;;  %v10402_v63 = vcombine.low %v2598_v47, %v2608_v55  ;;  %v2616_v0 = vor.u32 %v2615_v51, %v2612_v22  ;;  %v2631_v1 = vrot.slane %v2629_v53, 5  ;;  %v2528_v53 = vld [vmem:[%s12723_s11 + $0x3c] sm:$0xf]  ;;  %v12543_v55 = vld [vmem:[%s16708_s1 + $0x190] sm:$0xff]  }
  0xb3   : > { %v3052_v3 = vrot.slane %v2523_v60, 5  ;;  %11967 = vmatpush3.bf16.msra.mxu0 %v12535_v50  ;;  %11888 = vmatprep.mubr.bf16.mxu0 %v10379_v57  ;;  %v2626_v5 = vor.u32 %v2625_v58, %v2621_v52  ;;  %v3055_v6 = vrot.slane %v2524_v2, 5  ;;  %v2634_v7 = vshrl.u32 %v2522_v54, 16 }
  0xb4   : > { %v2637_v8 = vshll.u32 %v2522_v54, 16  ;;  %11968 = vmatprep.subr.bf16.mxu0 %v12537_v31  ;;  %11933 = vmatmul.mubr.bf16.vlgmr.msra.gmra.mxu1 %v10402_v63  ;;  %v2617_v11 = vrot.slane %v2616_v0, 4  ;;  %v2643_v14 = vshll.u32 %v2523_v60, 16  ;;  %v2647_v20 = vshrl.u32 %v2523_v60, 16  ;;  %v12542_v54 = vld [vmem:[%s16708_s1 + $0x1d8] sm:$0xff]  }
  0xb5   : > { %v3053_v12 = vsel %vm13224_vm5, %v10348_v62, %v3052_v3  ;;  %v3054_v13 = vrot.slane %v3052_v3, 4  ;;  %12013 = vmatpush3.bf16.msra.mxu1 %v13176_v45  ;;  %v2627_v17 = vrot.slane %v2626_v5, 4  ;;  %v2636_v18 = vrot.slane %v2634_v7, 4  ;;  %v2529_v62 = vld [vmem:[%s12723_s11 + $0x40] sm:$0xf] }
  0xb6   : > { %v2639_v19 = vrot.slane %v2637_v8, 5  ;;  %v2622_v21 = vsel %vm12753_vm2, %v2617_v11, %v2621_v52  ;;  %v2645_v24 = vrot.slane %v2643_v14, 5  ;;  %v2653_v26 = vshll.u32 %v2524_v2, 16  ;;  %12014 = vmatprep.subr.bf16.mxu1 %v12536_v4  ;;  %v2530_v63 = vld [vmem:[%s12723_s11 + $0x44] sm:$0x1] }
  0xb7   : > { %v3056_v23 = vsel %vm13224_vm5, %v3054_v13, %v3055_v6  ;;  %11969 = vmatpush3.bf16.msra.mxu0 %v12537_v31  ;;  %v2632_v50 = vsel %vm12753_vm2, %v2627_v17, %v2631_v1  ;;  %v2649_v29 = vrot.slane %v2647_v20, 4  ;;  %v10349_v32 = vrot.slane %v2966_v9, 9  ;;  %v12545_v13 = vld [vmem:[%s16708_s1 + $0x188] sm:$0xff]  }
  0xb8   : > { %v10380_v27 = vcombine.low %v3053_v12, %v3056_v23  ;;  %v2640_v45 = vor.u32 %v2639_v19, %v2636_v18  ;;  %11970 = vmatprep.subr.bf16.mxu0 %v12539_v10  ;;  %v10403_v56 = vcombine.low %v2622_v21, %v2632_v50  ;;  %v2655_v61 = vrot.slane %v2653_v26, 5  ;;  %v2968_v18 = vld [vmem:[%s12723_s11 + $0x48] sm:$0xe]  ;;  %v12544_v26 = vld [vmem:[%s16708_s1 + $0x1d0] sm:$0xff]  }
  0xb9   : > { %v3059_v33 = vrot.slane %v2526_v30, 5  ;;  %v2650_v37 = vor.u32 %v2649_v29, %v2645_v24  ;;  %12015 = vmatpush3.bf16.msra.mxu1 %v12536_v4  ;;  %v3062_v38 = vrot.slane %v2527_v28, 5  ;;  %v2658_v39 = vshrl.u32 %v2525_v15, 16 }
  0xba   : > { %11889 = vmatmul.mubr.bf16.gmra.mxu0 %v10380_v27  ;;  %v2641_v35 = vrot.slane %v2640_v45, 4  ;;  %11936 = vmatprep.mubr.bf16.mxu1 %v10403_v56  ;;  %v2661_v42 = vshll.u32 %v2525_v15, 16  ;;  %v2667_v43 = vshll.u32 %v2526_v30, 16  ;;  %v2671_v25 = vshrl.u32 %v2526_v30, 16  ;;  %v2532_v30 = vld [vmem:[%s12723_s11 + $0x4c] sm:$0xf] }
  0xbb   : > { %v3060_v40 = vsel %vm13224_vm5, %v10349_v32, %v3059_v33  ;;  %v3061_v41 = vrot.slane %v3059_v33, 4  ;;  %12016 = vmatprep.subr.bf16.mxu1 %v12538_v16  ;;  %v2651_v49 = vrot.slane %v2650_v37, 4  ;;  %v2660_v22 = vrot.slane %v2658_v39, 4  ;;  %11971 = vmatpush3.bf16.msra.mxu0 %v12539_v10 }
  0xbc   : > { %v2646_v47 = vsel %vm12753_vm2, %v2641_v35, %v2645_v24  ;;  %v2663_v48 = vrot.slane %v2661_v42, 5  ;;  %v2669_v51 = vrot.slane %v2667_v43, 5  ;;  %v2677_v52 = vshll.u32 %v2527_v28, 16  ;;  %11972 = vmatprep.subr.bf16.mxu0 %v12541_v34  ;;  %v2531_v24 = vld [vmem:[%s12723_s11 + $0x48] sm:$0xf] }
  0xbd   : > { %v3063_v31 = vsel %vm13224_vm5, %v3061_v41, %v3062_v38  ;;  %v2656_v57 = vsel %vm12753_vm2, %v2651_v49, %v2655_v61  ;;  %v2673_v60 = vrot.slane %v2671_v25, 4  ;;  %v10350_v0 = vrot.slane %v2967_v44, 9  ;;  %12017 = vmatpush3.bf16.msra.mxu1 %v12538_v16  ;;  %v2533_v28 = vld [vmem:[%s12723_s11 + $0x50] sm:$0x1] }
  0xbe   : > { %v10381_v58 = vcombine.low %v3060_v40, %v3063_v31  ;;  %v10404_v1 = vcombine.low %v2646_v47, %v2656_v57  ;;  %v2664_v2 = vor.u32 %v2663_v48, %v2660_v22  ;;  %v2679_v3 = vrot.slane %v2677_v52, 5  ;;  %12018 = vmatprep.subr.bf16.mxu1 %v12540_v46  ;;  %v2969_v40 = vld [vmem:[%s12723_s11 + $0x54] sm:$0xe]  ;;  %v12546_v47 = vld [vmem:[%s16708_s1 + $0x1c8] sm:$0xff]   ;;  %v2535_v48 = vld [vmem:[%s12723_s11 + $0x58] sm:$0xf] }
  0xbf   : > { %v3066_v4 = vrot.slane %v2529_v62, 5  ;;  %v2674_v5 = vor.u32 %v2673_v60, %v2669_v51  ;;  %v3069_v6 = vrot.slane %v2530_v63, 5  ;;  %v2682_v7 = vshrl.u32 %v2528_v53, 16  ;;  %11973 = vmatpush3.bf16.msra.mxu0 %v12541_v34  ;;  %v12547_v34 = vld [vmem:[%s16708_s1 + $0x180] sm:$0xff]  }
  0xc0   : > { %11892 = vmatprep.mubr.bf16.mxu0 %v10381_v58  ;;  %v2685_v8 = vshll.u32 %v2528_v53, 16  ;;  %11937 = vmatmul.mubr.bf16.gmra.mxu1 %v10404_v1  ;;  %v2665_v9 = vrot.slane %v2664_v2, 4  ;;  %v2691_v12 = vshll.u32 %v2529_v62, 16  ;;  %v2695_v17 = vshrl.u32 %v2529_v62, 16  ;;  %v2536_v2 = vld [vmem:[%s12723_s11 + $0x5c] sm:$0x1] }
  0xc1   : > { %v3067_v10 = vsel %vm13224_vm5, %v10350_v0, %v3066_v4  ;;  %v3068_v11 = vrot.slane %v3066_v4, 4  ;;  %11974 = vmatprep.subr.bf16.mxu0 %v12543_v55  ;;  %v2675_v14 = vrot.slane %v2674_v5, 4  ;;  %v2684_v15 = vrot.slane %v2682_v7, 4  ;;  %12019 = vmatpush3.bf16.msra.mxu1 %v12540_v46  ;;  %v2534_v46 = vld [vmem:[%s12723_s11 + $0x54] sm:$0xf]  ;;  %v12548_v4 = vld [vmem:[%s16708_s1 + $0x1c0] sm:$0xff]  }
  0xc2   : > { %v2687_v16 = vrot.slane %v2685_v8, 5  ;;  %v2670_v19 = vsel %vm12753_vm2, %v2665_v9, %v2669_v51  ;;  %v2693_v21 = vrot.slane %v2691_v12, 5  ;;  %v2701_v23 = vshll.u32 %v2530_v63, 16  ;;  %12020 = vmatprep.subr.bf16.mxu1 %v12542_v54 }
  0xc3   : > { %v3070_v20 = vsel %vm13224_vm5, %v3068_v11, %v3069_v6  ;;  %v2680_v50 = vsel %vm12753_vm2, %v2675_v14, %v2679_v3  ;;  %v2697_v29 = vrot.slane %v2695_v17, 4  ;;  %11975 = vmatpush3.bf16.msra.mxu0 %v12543_v55  ;;  %v10351_v32 = vrot.slane %v2968_v18, 9  ;;  %v13355_v55 = vld [vmem:[%s16708_s1 + $0x278] sm:$0xff]   ;;  %v2970_v18 = vld [vmem:[%s12723_s11 + $0x60] sm:$0xe] }
  0xc4   : > { %v10382_v27 = vcombine.low %v3067_v10, %v3070_v20  ;;  %v2688_v45 = vor.u32 %v2687_v16, %v2684_v15  ;;  %v10405_v56 = vcombine.low %v2670_v19, %v2680_v50  ;;  %v2703_v61 = vrot.slane %v2701_v23, 5  ;;  %11976 = vmatprep.subr.bf16.mxu0 %v12545_v13 }
  0xc5   : > { %v3073_v33 = vrot.slane %v2532_v30, 5  ;;  %v2698_v37 = vor.u32 %v2697_v29, %v2693_v21  ;;  %v3076_v38 = vrot.slane %v2533_v28, 5  ;;  %v2706_v39 = vshrl.u32 %v2531_v24, 16  ;;  %12021 = vmatpush3.bf16.msra.mxu1 %v12542_v54 }
  0xc6   : > { %11893 = vmatmul.mubr.bf16.gmra.mxu0 %v10382_v27  ;;  %v2689_v35 = vrot.slane %v2688_v45, 4  ;;  %11940 = vmatprep.mubr.bf16.mxu1 %v10405_v56  ;;  %v2709_v43 = vshll.u32 %v2531_v24, 16  ;;  %v2715_v44 = vshll.u32 %v2532_v30, 16  ;;  %v2719_v31 = vshrl.u32 %v2532_v30, 16  ;;  %v2538_v24 = vld [vmem:[%s12723_s11 + $0x64] sm:$0xf] }
  0xc7   : > { %v3074_v41 = vsel %vm13224_vm5, %v10351_v32, %v3073_v33  ;;  %v3075_v42 = vrot.slane %v3073_v33, 4  ;;  %12022 = vmatprep.subr.bf16.mxu1 %v12544_v26  ;;  %v2699_v22 = vrot.slane %v2698_v37, 4  ;;  %v2708_v25 = vrot.slane %v2706_v39, 4  ;;  %11977 = vmatpush3.bf16.msra.mxu0 %v12545_v13  ;;  %v13369_v13 = vld [vmem:[%s16708_s1 + $0x238] sm:$0xff]   ;;  %v2539_v30 = vld [vmem:[%s12723_s11 + $0x68] sm:$0x1] }
  0xc8   : > { %v2694_v49 = vsel %vm12753_vm2, %v2689_v35, %v2693_v21  ;;  %v2711_v52 = vrot.slane %v2709_v43, 5  ;;  %v2717_v53 = vrot.slane %v2715_v44, 5  ;;  %v2725_v54 = vshll.u32 %v2533_v28, 16  ;;  %11978 = vmatprep.subr.bf16.mxu0 %v12547_v34  ;;  %v2971_v33 = vld [vmem:[%s12723_s11 + $0x6c] sm:$0xe] }
  0xc9   : > { %v3077_v51 = vsel %vm13224_vm5, %v3075_v42, %v3076_v38  ;;  %v2704_v57 = vsel %vm12753_vm2, %v2699_v22, %v2703_v61  ;;  %v2721_v60 = vrot.slane %v2719_v31, 4  ;;  %v10352_v62 = vrot.slane %v2969_v40, 9  ;;  %12023 = vmatpush3.bf16.msra.mxu1 %v12544_v26  ;;  %v2537_v26 = vld [vmem:[%s12723_s11 + $0x60] sm:$0xf] }
  0xca   : > { %v10383_v58 = vcombine.low %v3074_v41, %v3077_v51  ;;  %v10406_v63 = vcombine.low %v2694_v49, %v2704_v57  ;;  %v2712_v0 = vor.u32 %v2711_v52, %v2708_v25  ;;  %v2727_v1 = vrot.slane %v2725_v54, 5  ;;  %12024 = vmatprep.subr.bf16.mxu1 %v12546_v47  ;;  %v2541_v54 = vld [vmem:[%s12723_s11 + $0x70] sm:$0xf] }
  0xcb   : > { %v3080_v3 = vrot.slane %v2535_v48, 5  ;;  %v2722_v5 = vor.u32 %v2721_v60, %v2717_v53  ;;  %v3083_v6 = vrot.slane %v2536_v2, 5  ;;  %v2730_v7 = vshrl.u32 %v2534_v46, 16  ;;  %11979 = vmatpush3.bf16.msra.mxu0 %v12547_v34 }
  0xcc   : > { %11896 = vmatprep.mubr.bf16.mxu0 %v10383_v58  ;;  %v2733_v8 = vshll.u32 %v2534_v46, 16  ;;  %11941 = vmatmul.mubr.bf16.gmra.mxu1 %v10406_v63  ;;  %v2713_v9 = vrot.slane %v2712_v0, 4  ;;  %v2739_v12 = vshll.u32 %v2535_v48, 16  ;;  %v2743_v17 = vshrl.u32 %v2535_v48, 16  ;;  %v2540_v48 = vld [vmem:[%s12723_s11 + $0x6c] sm:$0xf] }
  0xcd   : > { %v3081_v10 = vsel %vm13224_vm5, %v10352_v62, %v3080_v3  ;;  %v3082_v11 = vrot.slane %v3080_v3, 4  ;;  %12060 = vmatprep.subr.bf16.mxu0 %v13355_v55  ;;  %v2723_v14 = vrot.slane %v2722_v5, 4  ;;  %v2732_v15 = vrot.slane %v2730_v7, 4  ;;  %12025 = vmatpush3.bf16.msra.mxu1 %v12546_v47  ;;  %v2542_v63 = vld [vmem:[%s12723_s11 + $0x74] sm:$0x1] }
  0xce   : > { %v2735_v16 = vrot.slane %v2733_v8, 5  ;;  %v2718_v19 = vsel %vm12753_vm2, %v2713_v9, %v2717_v53  ;;  %v2741_v21 = vrot.slane %v2739_v12, 5  ;;  %v2749_v23 = vshll.u32 %v2536_v2, 16  ;;  %12026 = vmatprep.subr.bf16.mxu1 %v12548_v4  ;;  %v2972_v5 = vld [vmem:[%s12723_s11 + $0x78] sm:$0xe] }
  0xcf   : > { %v3084_v20 = vsel %vm13224_vm5, %v3082_v11, %v3083_v6  ;;  %v2728_v50 = vsel %vm12753_vm2, %v2723_v14, %v2727_v1  ;;  %v2745_v29 = vrot.slane %v2743_v17, 4  ;;  %v10353_v28 = vrot.slane %v2970_v18, 9 }
  0xd0   : > { %v10384_v27 = vcombine.low %v3081_v10, %v3084_v20  ;;  %v2736_v45 = vor.u32 %v2735_v16, %v2732_v15  ;;  %v10407_v56 = vcombine.low %v2718_v19, %v2728_v50  ;;  %v2751_v61 = vrot.slane %v2749_v23, 5  ;;  %v2543_v10 = vld [vmem:[%s12723_s11 + $0x78] sm:$0xf] }
  0xd1   : > { %v3087_v32 = vrot.slane %v2538_v24, 5  ;;  %v2746_v35 = vor.u32 %v2745_v29, %v2741_v21  ;;  %v3090_v37 = vrot.slane %v2539_v30, 5  ;;  %v2754_v38 = vshrl.u32 %v2537_v26, 16  ;;  %12027 = vmatpush3.bf16.msra.mxu1 %v12548_v4 }
  0xd2   : > { %11897 = vmatmul.mubr.bf16.gmra.mxu0 %v10384_v27  ;;  %v2737_v34 = vrot.slane %v2736_v45, 4  ;;  %11944 = vmatprep.mubr.bf16.mxu1 %v10407_v56  ;;  %v2757_v41 = vshll.u32 %v2537_v26, 16  ;;  %v2763_v42 = vshll.u32 %v2538_v24, 16  ;;  %v2767_v47 = vshrl.u32 %v2538_v24, 16  ;;  %v2544_v26 = vld [vmem:[%s12723_s11 + $0x7c] sm:$0xf] }
  0xd3   : > { %v3088_v39 = vsel %vm13224_vm5, %v10353_v28, %v3087_v32  ;;  %v3089_v40 = vrot.slane %v3087_v32, 4  ;;  %12108 = vmatprep.subr.bf16.mxu1 %v13369_v13  ;;  %v2747_v44 = vrot.slane %v2746_v35, 4  ;;  %v2756_v46 = vrot.slane %v2754_v38, 4  ;;  %v2545_v45 = vld [vmem:[%s12723_s11 + $0x80] sm:$0x1] }
  0xd4   : > { %v2742_v43 = vsel %vm12753_vm2, %v2737_v34, %v2741_v21  ;;  %v2759_v22 = vrot.slane %v2757_v41, 5  ;;  %v2765_v25 = vrot.slane %v2763_v42, 5  ;;  %v2773_v31 = vshll.u32 %v2539_v30, 16  ;;  %v2973_v38 = vld [vmem:[%s12723_s11 + $0x84] sm:$0xe] }
  0xd5   : > { %v3091_v49 = vsel %vm13224_vm5, %v3089_v40, %v3090_v37  ;;  %v2752_v51 = vsel %vm12753_vm2, %v2747_v44, %v2751_v61  ;;  %v2769_v53 = vrot.slane %v2767_v47, 4  ;;  %v10354_v57 = vrot.slane %v2971_v33, 9 }
  0xd6   : > { %v10385_v52 = vcombine.low %v3088_v39, %v3091_v49  ;;  %v10408_v58 = vcombine.low %v2742_v43, %v2752_v51  ;;  %v2760_v60 = vor.u32 %v2759_v22, %v2756_v46  ;;  %v2775_v62 = vrot.slane %v2773_v31, 5  ;;  %v2546_v49 = vld [vmem:[%s12723_s11 + $0x84] sm:$0xf]  ;;  %v2548_v51 = vld [vmem:[%s12723_s11 + $0x8c] sm:$0x1] }
  0xd7   : > { %v3094_v0 = vrot.slane %v2541_v54, 5  ;;  %v2770_v1 = vor.u32 %v2769_v53, %v2765_v25  ;;  %v3097_v2 = vrot.slane %v2542_v63, 5  ;;  %v2778_v3 = vshrl.u32 %v2540_v48, 16 }
  0xd8   : > { %11900 = vmatprep.mubr.bf16.mxu0 %v10385_v52  ;;  %v2781_v4 = vshll.u32 %v2540_v48, 16  ;;  %11945 = vmatmul.mubr.bf16.gmra.mxu1 %v10408_v58  ;;  %v2761_v6 = vrot.slane %v2760_v60, 4  ;;  %v2787_v9 = vshll.u32 %v2541_v54, 16  ;;  %v2791_v15 = vshrl.u32 %v2541_v54, 16  ;;  %v2547_v48 = vld [vmem:[%s12723_s11 + $0x88] sm:$0xf] }
  0xd9   : > { %v3095_v7 = vsel %vm13224_vm5, %v10354_v57, %v3094_v0  ;;  %v3096_v8 = vrot.slane %v3094_v0, 4  ;;  %v2771_v11 = vrot.slane %v2770_v1, 4  ;;  %v2780_v12 = vrot.slane %v2778_v3, 4 }
  0xda   : > { %v2783_v14 = vrot.slane %v2781_v4, 5  ;;  %v2766_v16 = vsel %vm12753_vm2, %v2761_v6, %v2765_v25  ;;  %v2789_v18 = vrot.slane %v2787_v9, 5  ;;  %v2797_v19 = vshll.u32 %v2542_v63, 16  ;;  %v2974_v9 = vld [vmem:[%s12723_s11 + $0x90] sm:$0xe] }
  0xdb   : > { %v3098_v17 = vsel %vm13224_vm5, %v3096_v8, %v3097_v2  ;;  %v2776_v20 = vsel %vm12753_vm2, %v2771_v11, %v2775_v62  ;;  %v2793_v24 = vrot.slane %v2791_v15, 4  ;;  %v10355_v29 = vrot.slane %v2972_v5, 9 }
  0xdc   : > { %v10386_v21 = vcombine.low %v3095_v7, %v3098_v17  ;;  %v2784_v23 = vor.u32 %v2783_v14, %v2780_v12  ;;  %v10409_v50 = vcombine.low %v2766_v16, %v2776_v20  ;;  %v2799_v27 = vrot.slane %v2797_v19, 5  ;;  %v2549_v16 = vld [vmem:[%s12723_s11 + $0x90] sm:$0xf] }
  0xdd   : > { %v3101_v30 = vrot.slane %v2544_v26, 5  ;;  %v2794_v61 = vor.u32 %v2793_v24, %v2789_v18  ;;  %v3104_v28 = vrot.slane %v2545_v45, 5  ;;  %v2802_v32 = vshrl.u32 %v2543_v10, 16 }
  0xde   : > { %11901 = vmatmul.mubr.bf16.gmra.mxu0 %v10386_v21  ;;  %v2785_v56 = vrot.slane %v2784_v23, 4  ;;  %11948 = vmatprep.mubr.bf16.mxu1 %v10409_v50  ;;  %v2805_v35 = vshll.u32 %v2543_v10, 16  ;;  %v2811_v37 = vshll.u32 %v2544_v26, 16  ;;  %v2815_v42 = vshrl.u32 %v2544_v26, 16  ;;  %v2550_v23 = vld [vmem:[%s12723_s11 + $0x94] sm:$0xf] }
  0xdf   : > { %v3102_v33 = vsel %vm13224_vm5, %v10355_v29, %v3101_v30  ;;  %v3103_v34 = vrot.slane %v3101_v30, 4  ;;  %v2795_v40 = vrot.slane %v2794_v61, 4  ;;  %v2804_v41 = vrot.slane %v2802_v32, 4 }
  0xe0   : > { %v2790_v39 = vsel %vm12753_vm2, %v2785_v56, %v2789_v18  ;;  %v2807_v44 = vrot.slane %v2805_v35, 5  ;;  %v2813_v46 = vrot.slane %v2811_v37, 5  ;;  %v2821_v47 = vshll.u32 %v2545_v45, 16 }
  0xe1   : > { %v3105_v43 = vsel %vm13224_vm5, %v3103_v34, %v3104_v28  ;;  %v2800_v22 = vsel %vm12753_vm2, %v2795_v40, %v2799_v27  ;;  %v2817_v31 = vrot.slane %v2815_v42, 4  ;;  %v10356_v52 = vrot.slane %v2973_v38, 9  ;;  %v2551_v27 = vld [vmem:[%s12723_s11 + $0x98] sm:$0x1]  ;;  %v2552_v40 = vld [vmem:[%s12723_s11 + $0x9c] sm:$0xf] }
  0xe2   : > { %v10387_v25 = vcombine.low %v3102_v33, %v3105_v43  ;;  %v10410_v53 = vcombine.low %v2790_v39, %v2800_v22  ;;  %v2808_v54 = vor.u32 %v2807_v44, %v2804_v41  ;;  %v2823_v57 = vrot.slane %v2821_v47, 5  ;;  %v2975_v33 = vld [vmem:[%s12723_s11 + $0x9c] sm:$0xe]  ;;  %v2553_v47 = vld [vmem:[%s12723_s11 + $0xa0] sm:$0xf] }
  0xe3   : > { %v3108_v58 = vrot.slane %v2547_v48, 5  ;;  %v2818_v60 = vor.u32 %v2817_v31, %v2813_v46  ;;  %v3111_v62 = vrot.slane %v2548_v51, 5  ;;  %v2826_v63 = vshrl.u32 %v2546_v49, 16 }
  0xe4   : > { %11904 = vmatprep.mubr.bf16.mxu0 %v10387_v25  ;;  %v2829_v0 = vshll.u32 %v2546_v49, 16  ;;  %11949 = vmatmul.mubr.bf16.gmra.mxu1 %v10410_v53  ;;  %v2809_v1 = vrot.slane %v2808_v54, 4  ;;  %v2835_v4 = vshll.u32 %v2547_v48, 16  ;;  %v2839_v8 = vshrl.u32 %v2547_v48, 16 }
  0xe5   : > { %v3109_v2 = vsel %vm13224_vm5, %v10356_v52, %v3108_v58  ;;  %v3110_v3 = vrot.slane %v3108_v58, 4  ;;  %v2819_v5 = vrot.slane %v2818_v60, 4  ;;  %v2828_v6 = vrot.slane %v2826_v63, 4 }
  0xe6   : > { %v2831_v7 = vrot.slane %v2829_v0, 5  ;;  %v2814_v11 = vsel %vm12753_vm2, %v2809_v1, %v2813_v46  ;;  %v2837_v14 = vrot.slane %v2835_v4, 5  ;;  %v2845_v15 = vshll.u32 %v2548_v51, 16  ;;  %v2554_v0 = vld [vmem:[%s12723_s11 + $0xa4] sm:$0x1] }
  0xe7   : > { %v3112_v12 = vsel %vm13224_vm5, %v3110_v3, %v3111_v62  ;;  %v2824_v18 = vsel %vm12753_vm2, %v2819_v5, %v2823_v57  ;;  %v2841_v21 = vrot.slane %v2839_v8, 4  ;;  %v10357_v45 = vrot.slane %v2974_v9, 9 }
  0xe8   : > { %v10388_v19 = vcombine.low %v3109_v2, %v3112_v12  ;;  %v2832_v20 = vor.u32 %v2831_v7, %v2828_v6  ;;  %v10411_v26 = vcombine.low %v2814_v11, %v2824_v18  ;;  %v2847_v50 = vrot.slane %v2845_v15, 5 }
  0xe9   : > { %v3115_v29 = vrot.slane %v2550_v23, 5  ;;  %v2842_v61 = vor.u32 %v2841_v21, %v2837_v14  ;;  %v3118_v28 = vrot.slane %v2551_v27, 5  ;;  %v2850_v32 = vshrl.u32 %v2549_v16, 16 }
  0xea   : > { %11905 = vmatmul.mubr.bf16.gmra.mxu0 %v10388_v19  ;;  %v2833_v56 = vrot.slane %v2832_v20, 4  ;;  %11952 = vmatprep.mubr.bf16.mxu1 %v10411_v26  ;;  %v2853_v38 = vshll.u32 %v2549_v16, 16  ;;  %v2859_v39 = vshll.u32 %v2550_v23, 16  ;;  %v2863_v46 = vshrl.u32 %v2550_v23, 16  ;;  %v2976_v20 = vld [vmem:[%s12723_s11 + $0xa8] sm:$0xe] }
  0xeb   : > { %v3116_v35 = vsel %vm13224_vm5, %v10357_v45, %v3115_v29  ;;  %v3117_v37 = vrot.slane %v3115_v29, 4  ;;  %v2843_v43 = vrot.slane %v2842_v61, 4  ;;  %v2852_v44 = vrot.slane %v2850_v32, 4  ;;  %v2556_v45 = vld [vmem:[%s12723_s11 + $0xac] sm:$0xf] }
  0xec   : > { %v13421_v10 = vpop.f32.mrf.mxu0  ;;  %v2838_v42 = vsel %vm12753_vm2, %v2833_v56, %v2837_v14  ;;  %v2855_v25 = vrot.slane %v2853_v38, 5  ;;  %v2861_v31 = vrot.slane %v2859_v39, 5  ;;  %v2869_v48 = vshll.u32 %v2551_v27, 16  ;;  %v2555_v29 = vld [vmem:[%s12723_s11 + $0xa8] sm:$0xf] }
  0xed   : > { %v13428_v17 = vpop.f32.mrf.mxu1  ;;  %v3119_v22 = vsel %vm13224_vm5, %v3117_v37, %v3118_v28  ;;  %v2848_v52 = vsel %vm12753_vm2, %v2843_v43, %v2847_v50  ;;  %v2865_v54 = vrot.slane %v2863_v46, 4  ;;  %v10358_v57 = vrot.slane %v2975_v33, 9  ;;  %v2977_v43 = vld [vmem:[%s12723_s11 + $0xb4] sm:$0xe] }
  0xee   : > { %v13433_v24 = vpop.f32.mrf.mxu0  ;;  %v10389_v53 = vcombine.low %v3116_v35, %v3119_v22  ;;  %v10412_v60 = vcombine.low %v2838_v42, %v2848_v52  ;;  %v2856_v62 = vor.u32 %v2855_v25, %v2852_v44  ;;  %v2871_v63 = vrot.slane %v2869_v48, 5  ;;  %v2557_v35 = vld [vmem:[%s12723_s11 + $0xb0] sm:$0x1] }
  0xef   : > { %v13436_v30 = vpop.f32.mrf.mxu1  ;;  %v3122_v1 = vrot.slane %v2553_v47, 5  ;;  %v2866_v3 = vor.u32 %v2865_v54, %v2861_v31  ;;  %v3125_v4 = vrot.slane %v2554_v0, 5  ;;  %v2874_v5 = vshrl.u32 %v2552_v40, 16 }
  0xf0   : > { %v13439_v34 = vpop.f32.mrf.mxu0  ;;  %11908 = vmatprep.mubr.bf16.mxu0 %v10389_v53  ;;  %v2877_v6 = vshll.u32 %v2552_v40, 16  ;;  %11953 = vmatmul.mubr.bf16.gmra.mxu1 %v10412_v60  ;;  %v2857_v8 = vrot.slane %v2856_v62, 4  ;;  %v2883_v12 = vshll.u32 %v2553_v47, 16  ;;  %v2887_v19 = vshrl.u32 %v2553_v47, 16 }
  0xf1   : > { %v13444_v41 = vpop.f32.mrf.mxu1  ;;  %v3123_v9 = vsel %vm13224_vm5, %v10358_v57, %v3122_v1  ;;  %v3124_v11 = vrot.slane %v3122_v1, 4  ;;  %v2867_v15 = vrot.slane %v2866_v3, 4  ;;  %v2876_v16 = vrot.slane %v2874_v5, 4 }
  0xf2   : > { %v13449_v49 = vpop.f32.mrf.mxu0  ;;  %v2879_v18 = vrot.slane %v2877_v6, 5  ;;  %v2862_v23 = vsel %vm12753_vm2, %v2857_v8, %v2861_v31  ;;  %v2885_v50 = vrot.slane %v2883_v12, 5  ;;  %v2893_v27 = vshll.u32 %v2554_v0, 16  ;;  %v2558_v6 = vld [vmem:[%s12723_s11 + $0xb4] sm:$0xf] }
  0xf3   : > { %v13453_v51 = vpop.f32.mrf.mxu1  ;;  %v3126_v26 = vsel %vm13224_vm5, %v3124_v11, %v3125_v4  ;;  %v2872_v61 = vsel %vm12753_vm2, %v2867_v15, %v2871_v63  ;;  %v2889_v33 = vrot.slane %v2887_v19, 4  ;;  %v10359_v40 = vrot.slane %v2976_v20, 9  ;;  %v2559_v15 = vld [vmem:[%s12723_s11 + $0xb8] sm:$0xf] }
  0xf4   : > { %v13457_v58 = vpop.f32.mrf.mxu0  ;;  %v10390_v28 = vcombine.low %v3123_v9, %v3126_v26  ;;  %v2880_v32 = vor.u32 %v2879_v18, %v2876_v16  ;;  %v10413_v38 = vcombine.low %v2862_v23, %v2872_v61  ;;  %v2895_v39 = vrot.slane %v2893_v27, 5  ;;  %v2560_v26 = vld [vmem:[%s12723_s11 + $0xbc] sm:$0x1] }
  0xf5   : > { %v13460_v2 = vpop.f32.mrf.mxu1  ;;  %v3129_v42 = vrot.slane %v2556_v45, 5  ;;  %v2890_v47 = vor.u32 %v2889_v33, %v2885_v50  ;;  %v3132_v22 = vrot.slane %v2557_v35, 5  ;;  %v2898_v25 = vshrl.u32 %v2555_v29, 16 }
  0xf6   : > { %v13462_v7 = vpop.f32.mrf.mxu0  ;;  %11909 = vmatmul.mubr.bf16.gmra.mxu0 %v10390_v28  ;;  %v2881_v46 = vrot.slane %v2880_v32, 4  ;;  %11956 = vmatprep.mubr.bf16.mxu1 %v10413_v38  ;;  %v2901_v52 = vshll.u32 %v2555_v29, 16  ;;  %v2907_v53 = vshll.u32 %v2556_v45, 16  ;;  %v2911_v63 = vshrl.u32 %v2556_v45, 16  ;;  %v10425_v32 = vld [vmem:[%s12723_s11 + $0xc] sm:$0xf] }
  0xf7   : > { %v13466_v14 = vpop.f32.mrf.mxu1  ;;  %v3130_v31 = vsel %vm13224_vm5, %v10359_v40, %v3129_v42  ;;  %v3131_v48 = vrot.slane %v3129_v42, 4  ;;  %v2891_v60 = vrot.slane %v2890_v47, 4  ;;  %v2900_v62 = vrot.slane %v2898_v25, 4  ;;  %v10426_v42 = vld [vmem:[%s12723_s11 + $0x10] sm:$0xf] }
  0xf8   : > { %v13469_v21 = vpop.f32.mrf.mxu0  ;;  %v2886_v57 = vsel %vm12753_vm2, %v2881_v46, %v2885_v50  ;;  %v2903_v3 = vrot.slane %v2901_v52, 5  ;;  %v2909_v4 = vrot.slane %v2907_v53, 5  ;;  %v2917_v5 = vshll.u32 %v2557_v35, 16 }
  0xf9   : > { %v13477_v56 = vpop.f32.mrf.mxu1  ;;  %v3133_v1 = vsel %vm13224_vm5, %v3131_v48, %v3132_v22  ;;  %v2896_v9 = vsel %vm12753_vm2, %v2891_v60, %v2895_v39  ;;  %v2913_v12 = vrot.slane %v2911_v63, 4  ;;  %v10360_v16 = vrot.slane %v2977_v43, 9 }
  0xfa   : > { %v13482_v37 = vpop.f32.mrf.mxu0  ;;  %v10391_v11 = vcombine.low %v3130_v31, %v3133_v1  ;;  %v10414_v19 = vcombine.low %v2886_v57, %v2896_v9  ;;  %v2904_v20 = vor.u32 %v2903_v3, %v2900_v62  ;;  %v2919_v23 = vrot.slane %v2917_v5, 5  ;;  %v10427_v31 = vld [vmem:[%s12723_s11 + $0x14] sm:$0x1] }
  0xfb   : > { %v13485_v44 = vpop.f32.mrf.mxu1  ;;  %v3136_v50 = vrot.slane %v2559_v15, 5  ;;  %v2914_v45 = vor.u32 %v2913_v12, %v2909_v4  ;;  %v3139_v29 = vrot.slane %v2560_v26, 5  ;;  %v2922_v61 = vshrl.u32 %v2558_v6, 16 }
  0xfc   : > { %v13493_v0 = vpop.f32.mrf.mxu0  ;;  %11912 = vmatprep.mubr.bf16.mxu0 %v10391_v11  ;;  %v2925_v28 = vshll.u32 %v2558_v6, 16  ;;  %11957 = vmatmul.mubr.bf16.gmra.mxu1 %v10414_v19  ;;  %v2905_v35 = vrot.slane %v2904_v20, 4  ;;  %v2931_v40 = vshll.u32 %v2559_v15, 16  ;;  %v2935_v25 = vshrl.u32 %v2559_v15, 16  ;;  %v10513_v6 = vld [vmem:[%s12723_s11 + $0xc] sm:$0xe] }
  0xfd   : > { %v13489_v54 = vpop.f32.mrf.mxu1  ;;  %v3137_v38 = vsel %vm13224_vm5, %v10360_v16, %v3136_v50  ;;  %v3138_v39 = vrot.slane %v3136_v50, 4  ;;  %v2915_v46 = vrot.slane %v2914_v45, 4  ;;  %v2924_v47 = vrot.slane %v2922_v61, 4 }
  0xfe   : > { %v13503_v18 = vpop.f32.mrf.mxu0  ;;  %v2927_v22 = vrot.slane %v2925_v28, 5  ;;  %v2910_v52 = vsel %vm12753_vm2, %v2905_v35, %v2909_v4  ;;  %v2933_v57 = vrot.slane %v2931_v40, 5  ;;  %v2941_v60 = vshll.u32 %v2560_v26, 16  ;;  %v10428_v35 = vld [vmem:[%s12723_s11 + $0x18] sm:$0xf] }
  0xff   : > { %v13498_v8 = vpop.f32.mrf.mxu1  ;;  %v3140_v53 = vsel %vm13224_vm5, %v3138_v39, %v3139_v29  ;;  %v2920_v63 = vsel %vm12753_vm2, %v2915_v46, %v2919_v23  ;;  %v2937_v5 = vrot.slane %v2935_v25, 4  ;;  %v3753_v4 = vshrl.u32 %v10425_v32, 16 }
 0x100   : > { %v13509_v33 = vpop.f32.mrf.mxu0  ;;  %v10392_v1 = vcombine.low %v3137_v38, %v3140_v53  ;;  %v2928_v3 = vor.u32 %v2927_v22, %v2924_v47  ;;  %v10415_v11 = vcombine.low %v2910_v52, %v2920_v63  ;;  %v2943_v12 = vrot.slane %v2941_v60, 5  ;;  %v10429_v53 = vld [vmem:[%s12723_s11 + $0x1c] sm:$0xf] }
 0x101   : > { %v13506_v27 = vpop.f32.mrf.mxu1  ;;  %v3756_v15 = vshll.u32 %v10425_v32, 16  ;;  %v2938_v20 = vor.u32 %v2937_v5, %v2933_v57  ;;  %v3762_v26 = vshll.u32 %v10426_v42, 16  ;;  %v3766_v50 = vshrl.u32 %v10426_v42, 16  ;;  %v10430_v5 = vld [vmem:[%s12723_s11 + $0x20] sm:$0x1] }
 0x102   : > { %v13517_v48 = vpop.f32.mrf.mxu0  ;;  %11913 = vmatmul.mubr.bf16.gmra.mxu0 %v10392_v1  ;;  %v2929_v19 = vrot.slane %v2928_v3, 4  ;;  %11960 = vmatprep.mubr.bf16.mxu1 %v10415_v11  ;;  %v3755_v23 = vrot.slane %v3753_v4, 4  ;;  %v3772_v61 = vshll.u32 %v10427_v31, 16  ;;  %v10529_v28 = vrot.slane %v10513_v6, 9  ;;  %v10514_v11 = vld [vmem:[%s12723_s11 + $0x18] sm:$0xe] }
 0x103   : > { %v13514_v43 = vpop.f32.mrf.mxu1  ;;  %v3758_v29 = vrot.slane %v3756_v15, 5  ;;  %v2939_v39 = vrot.slane %v2938_v20, 4  ;;  %v3764_v40 = vrot.slane %v3762_v26, 5  ;;  %v3768_v46 = vrot.slane %v3766_v50, 4 }
 0x104   : > { %v13528_v9 = vpop.f32.mrf.mxu0  ;;  %v2934_v32 = vsel %vm12753_vm2, %v2929_v19, %v2933_v57  ;;  %v4524_v25 = vrot.slane %v10426_v42, 5  ;;  %v4527_v52 = vrot.slane %v10427_v31, 5  ;;  %v3774_v3 = vrot.slane %v3772_v61, 5 }
 0x105   : > { %v13523_v62 = vpop.f32.mrf.mxu1  ;;  %v3759_v22 = vor.u32 %v3758_v29, %v3755_v23  ;;  %v2944_v63 = vsel %vm12753_vm2, %v2939_v39, %v2943_v12  ;;  %v3769_v1 = vor.u32 %v3768_v46, %v3764_v40  ;;  %v3777_v6 = vshrl.u32 %v10428_v35, 16 }
 0x106   : > { %v13532_v45 = vpop.f32.mrf.mxu0  ;;  %v10416_v4 = vcombine.low %v2934_v32, %v2944_v63  ;;  %v4525_v19 = vsel %vm13224_vm5, %v10529_v28, %v4524_v25  ;;  %v4526_v42 = vrot.slane %v4524_v25, 4  ;;  %v3780_v50 = vshll.u32 %v10428_v35, 16  ;;  %v10431_v35 = vld [vmem:[%s12723_s11 + $0x24] sm:$0xf] }
 0x107   : > { %v13530_v16 = vpop.f32.mrf.mxu1  ;;  %v3760_v15 = vrot.slane %v3759_v22, 4  ;;  %v3770_v20 = vrot.slane %v3769_v1, 4  ;;  %v3779_v26 = vrot.slane %v3777_v6, 4  ;;  %v3786_v12 = vshll.u32 %v10429_v53, 16 }
 0x108   : > { %v13539_v47 = vpop.f32.mrf.mxu0  ;;  %11961 = vmatmul.mubr.bf16.gmra.mxu1 %v10416_v4  ;;  %v4528_v29 = vsel %vm13224_vm5, %v4526_v42, %v4527_v52  ;;  %v3790_v61 = vshrl.u32 %v10429_v53, 16  ;;  %v3796_v32 = vshll.u32 %v10430_v5, 16  ;;  %v3782_v22 = vrot.slane %v3780_v50, 5 }
 0x109   : > { %v13535_v38 = vpop.f32.mrf.mxu1  ;;  %v3765_v23 = vsel %vm12753_vm2, %v3760_v15, %v3764_v40  ;;  %v3775_v28 = vsel %vm12753_vm2, %v3770_v20, %v3774_v3  ;;  %v10561_v46 = vcombine.low %v4525_v19, %v4528_v29  ;;  %v3788_v25 = vrot.slane %v3786_v12, 5  ;;  %v10432_v20 = vld [vmem:[%s12723_s11 + $0x28] sm:$0xf] }
 0x10a   : > { %v13548_v57 = vpop.f32.mrf.mxu0  ;;  %v10489_v1 = vcombine.low %v3765_v23, %v3775_v28  ;;  %v13567_v40 = vadd.f32 %v13428_v17, %v13421_v10  ;;  %v3792_v52 = vrot.slane %v3790_v61, 4  ;;  %v10530_v6 = vrot.slane %v10514_v11, 9  ;;  %v13583_v17 = vld [vmem:[%s12723_s11 + $0x2c] sm:$0x1] }
 0x10b   : > { %v13542_v60 = vpop.f32.mrf.mxu1  ;;  %12028 = vmatprep.mubr.bf16.mxu1 %v10561_v46  ;;  %v3783_v3 = vor.u32 %v3782_v22, %v3779_v26  ;;  %v3798_v15 = vrot.slane %v3796_v32, 5  ;;  %v4531_v19 = vrot.slane %v10429_v53, 5  ;;  %v4534_v42 = vrot.slane %v10430_v5, 5  ;;  %v10515_v26 = vld [vmem:[%s12723_s11 + $0x24] sm:$0xe]  ;;  %v12552_v46 = vld [vmem:[%s16708_s1 + $0x230] sm:$0xff]  }
 0x10c   : > { %v13563_v63 = vpop.f32.mrf.mxu0  ;;  %16722 = vst [vmem:[#allocation3_spill] sm:$0xff] %v13567_v40  ;;  %11980 = vmatprep.mubr.bf16.mxu0 %v10489_v1  ;;  %v3793_v12 = vor.u32 %v3792_v52, %v3788_v25  ;;  %v13576_v23 = vadd.f32 %v13436_v30, %v13433_v24  ;;  %v13580_v10 = vadd.f32 %v13444_v41, %v13439_v34  ;;  %v3801_v11 = vshrl.u32 %v10431_v35, 16  ;;  %v13608_v40 = vld [vmem:[%s12723_s11 + $0x34] sm:$0xf] }
 0x10d   : > { %v13552_v31 = vpop.f32.mrf.mxu1  ;;  %v3784_v53 = vrot.slane %v3783_v3, 4  ;;  %v4532_v5 = vsel %vm13224_vm5, %v10530_v6, %v4531_v19  ;;  %v4533_v61 = vrot.slane %v4531_v19, 4  ;;  %v3804_v32 = vshll.u32 %v10431_v35, 16 }
 0x10e   : > { %v13572_v50 = vpop.f32.mrf.mxu0  ;;  %16723 = vst [vmem:[#allocation4_spill] sm:$0xff] %v13576_v23  ;;  %16724 = vst [vmem:[#allocation5_spill] sm:$0xff] %v13580_v10  ;;  %v3794_v24 = vrot.slane %v3793_v12, 4  ;;  %v3803_v30 = vrot.slane %v3801_v11, 4  ;;  %v3810_v34 = vshll.u32 %v10432_v20, 16  ;;  %v3814_v41 = vshrl.u32 %v10432_v20, 16 }
 0x10f   : > { %v13558_v39 = vpop.f32.mrf.mxu1  ;;  %v3789_v1 = vsel %vm12753_vm2, %v3784_v53, %v3788_v25  ;;  %v4535_v35 = vsel %vm13224_vm5, %v4533_v61, %v4534_v42  ;;  %v3806_v52 = vrot.slane %v3804_v32, 5  ;;  %v3820_v6 = vshll.u32 %v13583_v17, 16  ;;  %v10434_v23 = vld [vmem:[%s12723_s11 + $0x30] sm:$0xf] }
 0x110   : > { %v13590_v28 = vpop.f32.mrf.mxu0  ;;  %v3799_v19 = vsel %vm12753_vm2, %v3794_v24, %v3798_v15  ;;  %v10562_v12 = vcombine.low %v4532_v5, %v4535_v35  ;;  %v3812_v11 = vrot.slane %v3810_v34, 5  ;;  %v3816_v10 = vrot.slane %v3814_v41, 4  ;;  %v12551_v32 = vld [vmem:[%s16708_s1 + $0x270] sm:$0xff]  }
 0x111   : > { %v13569_v4 = vpop.f32.mrf.mxu1  ;;  %v10490_v25 = vcombine.low %v3789_v1, %v3799_v19  ;;  %v3807_v53 = vor.u32 %v3806_v52, %v3803_v30  ;;  %v3822_v42 = vrot.slane %v3820_v6, 5  ;;  %v10531_v61 = vrot.slane %v10515_v26, 9  ;;  %v13626_v30 = vld [vmem:[%s12723_s11 + $0x38] sm:$0x1]  ;;  %v10516_v6 = vld [vmem:[%s12723_s11 + $0x30] sm:$0xe] }
 0x112   : > { %v13602_v3 = vpop.f32.mrf.mxu0  ;;  %12029 = vmatmul.mubr.bf16.vlgmr.msra.gmra.mxu1 %v10562_v12  ;;  %v3817_v15 = vor.u32 %v3816_v10, %v3812_v11  ;;  %v4538_v5 = vrot.slane %v10432_v20, 5  ;;  %v4541_v24 = vrot.slane %v13583_v17, 5  ;;  %v13620_v34 = vadd.f32 %v13460_v2, %v13457_v58 }
 0x113   : > { %v13586_v29 = vpop.f32.mrf.mxu1  ;;  %16726 = vst [vmem:[#allocation7_spill] sm:$0xff] %v13602_v3  ;;  %11981 = vmatmul.mubr.bf16.vlgmr.msra.gmra.mxu0 %v10490_v25  ;;  %12109 = vmatpush3.bf16.msra.mxu1 %v13369_v13  ;;  %v3808_v26 = vrot.slane %v3807_v53, 4  ;;  %v3825_v1 = vshrl.u32 %v10434_v23, 16  ;;  %v3828_v35 = vshll.u32 %v10434_v23, 16  ;;  %v3834_v10 = vshll.u32 %v13608_v40, 16  ;;  %v12554_v13 = vld [vmem:[%s16708_s1 + $0x228] sm:$0xff]  }
 0x114   : > { %16725 = vst [vmem:[#allocation6_spill] sm:$0xff] %v13586_v29  ;;  %v13615_v3 = vpop.f32.mrf.mxu0  ;;  %16728 = vst [vmem:[#allocation9_spill] sm:$0xff] %v13620_v34  ;;  %12061 = vmatpush3.bf16.msra.mxu0 %v13355_v55  ;;  %v3818_v17 = vrot.slane %v3817_v15, 4  ;;  %v4539_v58 = vsel %vm13224_vm5, %v10531_v61, %v4538_v5  ;;  %v4540_v2 = vrot.slane %v4538_v5, 4  ;;  %v3838_v52 = vshrl.u32 %v13608_v40, 16  ;;  %12110 = vmatprep.subr.bf16.mxu1 %v12552_v46  ;;  %v12553_v53 = vld [vmem:[%s16708_s1 + $0x268] sm:$0xff]  }
 0x115   : > { %v13595_v22 = vpop.f32.mrf.mxu1  ;;  %v3813_v19 = vsel %vm12753_vm2, %v3808_v26, %v3812_v11  ;;  %v3827_v12 = vrot.slane %v3825_v1, 4  ;;  %v3830_v55 = vrot.slane %v3828_v35, 5  ;;  %v3836_v25 = vrot.slane %v3834_v10, 5  ;;  %12062 = vmatprep.subr.bf16.mxu0 %v12551_v32 }
 0x116   : > { %v13629_v20 = vpop.f32.mrf.mxu0  ;;  %v3823_v15 = vsel %vm12753_vm2, %v3818_v17, %v3822_v42  ;;  %v4542_v5 = vsel %vm13224_vm5, %v4540_v2, %v4541_v24  ;;  %v3840_v34 = vrot.slane %v3838_v52, 4  ;;  %v3844_v11 = vshll.u32 %v13626_v30, 16  ;;  %v10438_v2 = vld [vmem:[%s12723_s11 + $0x40] sm:$0xf] }
 0x117   : > { %v13610_v29 = vpop.f32.mrf.mxu1  ;;  %v10491_v1 = vcombine.low %v3813_v19, %v3823_v15  ;;  %v10563_v35 = vcombine.low %v4539_v58, %v4542_v5  ;;  %v3831_v10 = vor.u32 %v3830_v55, %v3827_v12  ;;  %12111 = vmatpush3.bf16.msra.mxu1 %v12552_v46  ;;  %v4545_v17 = vrot.slane %v13608_v40, 5  ;;  %v12556_v58 = vld [vmem:[%s16708_s1 + $0x220] sm:$0xff]   ;;  %v10517_v15 = vld [vmem:[%s12723_s11 + $0x3c] sm:$0xe] }
 0x118   : > { %16727 = vst [vmem:[#allocation8_spill] sm:$0xff] %v13610_v29  ;;  %v13646_v61 = vpop.f32.mrf.mxu0  ;;  %v3846_v42 = vrot.slane %v3844_v11, 5  ;;  %v4548_v24 = vrot.slane %v13626_v30, 5  ;;  %12063 = vmatpush3.bf16.msra.mxu0 %v12551_v32  ;;  %12112 = vmatprep.subr.bf16.mxu1 %v12554_v13  ;;  %v13668_v46 = vadd.f32 %v13453_v51, %v13449_v49  ;;  %v13672_v40 = vadd.f32 %v13466_v14, %v13462_v7  ;;  %v13679_v30 = vld [vmem:[%s12723_s11 + $0x44] sm:$0x1] }
 0x119   : > { %v13622_v41 = vpop.f32.mrf.mxu1  ;;  %16731 = vst [vmem:[#allocation12_spill] sm:$0xff] %v13646_v61  ;;  %v3841_v61 = vor.u32 %v3840_v34, %v3836_v25  ;;  %11984 = vmatprep.mubr.bf16.mxu0 %v10491_v1  ;;  %12032 = vmatprep.mubr.bf16.mxu1 %v10563_v35  ;;  %v3832_v34 = vrot.slane %v3831_v10, 4  ;;  %v13676_v32 = vadd.f32 %v13477_v56, %v13469_v21  ;;  %v4547_v19 = vrot.slane %v4545_v17, 4  ;;  %v10440_v1 = vld [vmem:[%s12723_s11 + $0x48] sm:$0xf] }
 0x11a   : > { %16729 = vst [vmem:[#allocation10_spill] sm:$0xff] %v13622_v41  ;;  %v10437_v41 = vld [vmem:[%s12723_s11 + $0x3c] sm:$0xf]  ;;  %v13656_v29 = vpop.f32.mrf.mxu0  ;;  %16732 = vst [vmem:[#allocation13_spill] sm:$0xff] %v13668_v46  ;;  %12064 = vmatprep.subr.bf16.mxu0 %v12553_v53  ;;  %v3858_v56 = vshll.u32 %v10438_v2, 16  ;;  %v3862_v55 = vshrl.u32 %v10438_v2, 16 }
 0x11b   : > { %v13639_v23 = vpop.f32.mrf.mxu1  ;;  %16733 = vst [vmem:[#allocation14_spill] sm:$0xff] %v13672_v40  ;;  %16734 = vst [vmem:[#allocation15_spill] sm:$0xff] %v13676_v32  ;;  %v3842_v49 = vrot.slane %v3841_v61, 4  ;;  %v3849_v12 = vshrl.u32 %v10437_v41, 16  ;;  %v3837_v14 = vsel %vm12753_vm2, %v3832_v34, %v3836_v25  ;;  %v3852_v21 = vshll.u32 %v10437_v41, 16  ;;  %12113 = vmatpush3.bf16.msra.mxu1 %v12554_v13  ;;  %v13694_v61 = vld [vmem:[%s16708_s1 + $0x258] sm:$0xff]  }
 0x11c   : > { %16730 = vst [vmem:[#allocation11_spill] sm:$0xff] %v13639_v23  ;;  %v10532_v23 = vrot.slane %v10516_v6, 9  ;;  %v12555_v6 = vld [vmem:[%s16708_s1 + $0x260] sm:$0xff]   ;;  %v13701_v5 = vpop.f32.mrf.mxu0  ;;  %v4549_v41 = vsel %vm13224_vm5, %v4547_v19, %v4548_v24  ;;  %v3868_v13 = vshll.u32 %v13679_v30, 16  ;;  %v13710_v35 = vld [vmem:[%s12723_s11 + $0x4c] sm:$0xf]  ;;  %12065 = vmatpush3.bf16.msra.mxu0 %v12553_v53  ;;  %12114 = vmatprep.subr.bf16.mxu1 %v12556_v58 }
 0x11d   : > { %v13653_v26 = vpop.f32.mrf.mxu1  ;;  %v3847_v25 = vsel %vm12753_vm2, %v3842_v49, %v3846_v42  ;;  %v3851_v11 = vrot.slane %v3849_v12, 4  ;;  %v3854_v32 = vrot.slane %v3852_v21, 5  ;;  %v3860_v40 = vrot.slane %v3858_v56, 5  ;;  %12066 = vmatprep.subr.bf16.mxu0 %v12555_v6 }
 0x11e   : > { %v4546_v51 = vsel %vm13224_vm5, %v10532_v23, %v4545_v17  ;;  %v13699_v23 = vld [vmem:[%s16708_s1 + $0x218] sm:$0xff]   ;;  %v10492_v17 = vcombine.low %v3837_v14, %v3847_v25  ;;  %v13714_v42 = vpop.f32.mrf.mxu0  ;;  %v3864_v49 = vrot.slane %v3862_v55, 4  ;;  %v3870_v24 = vrot.slane %v3868_v13, 5  ;;  %v13724_v14 = vld [vmem:[%s12723_s11 + $0x50] sm:$0x1] }
 0x11f   : > { %v13664_v52 = vpop.f32.mrf.mxu1  ;;  %v10564_v34 = vcombine.low %v4546_v51, %v4549_v41  ;;  %v10533_v19 = vrot.slane %v10517_v15, 9  ;;  %v4552_v12 = vrot.slane %v10438_v2, 5  ;;  %v3855_v53 = vor.u32 %v3854_v32, %v3851_v11  ;;  %12115 = vmatpush3.bf16.msra.mxu1 %v12556_v58  ;;  %v12559_v32 = vld [vmem:[%s16708_s1 + $0x250] sm:$0xff]   ;;  %v10518_v11 = vld [vmem:[%s12723_s11 + $0x48] sm:$0xe] }
 0x120   : > { %11985 = vmatmul.mubr.bf16.gmra.mxu0 %v10492_v17  ;;  %v13721_v51 = vadd.f32 %v13489_v54, %v13493_v0  ;;  %v3873_v21 = vshrl.u32 %v10440_v1, 16  ;;  %v13726_v56 = vpop.f32.mrf.mxu0  ;;  %v3865_v55 = vor.u32 %v3864_v49, %v3860_v40  ;;  %v3876_v25 = vshll.u32 %v10440_v1, 16  ;;  %12116 = vmatprep.subr.bf16.mxu1 %v13699_v23  ;;  %v12560_v49 = vld [vmem:[%s16708_s1 + $0x210] sm:$0xff]  }
 0x121   : > { %v13686_v7 = vpop.f32.mrf.mxu1  ;;  %12033 = vmatmul.mubr.bf16.gmra.mxu1 %v10564_v34  ;;  %v4553_v2 = vsel %vm13224_vm5, %v10533_v19, %v4552_v12  ;;  %v4554_v15 = vrot.slane %v4552_v12, 4  ;;  %12067 = vmatpush3.bf16.msra.mxu0 %v12555_v6  ;;  %v3882_v0 = vshll.u32 %v13710_v35, 16  ;;  %v3886_v41 = vshrl.u32 %v13710_v35, 16 }
 0x122   : > { %16735 = vst [vmem:[#allocation16_spill] sm:$0xff] %v13686_v7  ;;  %v4555_v7 = vrot.slane %v13679_v30, 5  ;;  %16737 = vst [vmem:[#allocation18_spill] sm:$0xff] %v13721_v51  ;;  %v3856_v30 = vrot.slane %v3855_v53, 4  ;;  %v3875_v54 = vrot.slane %v3873_v21, 4  ;;  %12068 = vmatprep.subr.bf16.mxu0 %v13694_v61  ;;  %v13738_v13 = vpop.f32.mrf.mxu0  ;;  %v3866_v58 = vrot.slane %v3865_v55, 4 }
 0x123   : > { %v13712_v10 = vpop.f32.mrf.mxu1  ;;  %16738 = vst [vmem:[#allocation19_spill] sm:$0xff] %v13738_v13  ;;  %v3878_v17 = vrot.slane %v3876_v25, 5  ;;  %v3892_v34 = vshll.u32 %v13724_v14, 16  ;;  %v3884_v53 = vrot.slane %v3882_v0, 5  ;;  %v3888_v21 = vrot.slane %v3886_v41, 4  ;;  %v13754_v55 = vld [vmem:[%s16708_s1 + $0x248] sm:$0xff]   ;;  %12117 = vmatpush3.bf16.msra.mxu1 %v13699_v23 }
 0x124   : > { %16736 = vst [vmem:[#allocation17_spill] sm:$0xff] %v13712_v10  ;;  %v4556_v1 = vsel %vm13224_vm5, %v4554_v15, %v4555_v7  ;;  %v3861_v19 = vsel %vm12753_vm2, %v3856_v30, %v3860_v40  ;;  %v10443_v51 = vld [vmem:[%s12723_s11 + $0x54] sm:$0xf]  ;;  %v13759_v7 = vld [vmem:[%s16708_s1 + $0x208] sm:$0xff]   ;;  %v13761_v15 = vpop.f32.mrf.mxu0  ;;  %v3871_v25 = vsel %vm12753_vm2, %v3866_v58, %v3870_v24  ;;  %v10534_v30 = vrot.slane %v10518_v11, 9  ;;  %12118 = vmatprep.subr.bf16.mxu1 %v12560_v49 }
 0x125   : > { %v13716_v46 = vpop.f32.mrf.mxu1  ;;  %v10565_v12 = vcombine.low %v4553_v2, %v4556_v1  ;;  %v3879_v40 = vor.u32 %v3878_v17, %v3875_v54  ;;  %v3894_v2 = vrot.slane %v3892_v34, 5  ;;  %v10444_v0 = vld [vmem:[%s12723_s11 + $0x58] sm:$0xf]  ;;  %12069 = vmatpush3.bf16.msra.mxu0 %v13694_v61  ;;  %v10493_v41 = vcombine.low %v3861_v19, %v3871_v25  ;;  %v12563_v19 = vld [vmem:[%s16708_s1 + $0x240] sm:$0xff]  }
 0x126   : > { %v3889_v1 = vor.u32 %v3888_v21, %v3884_v53  ;;  %v4562_v10 = vrot.slane %v13724_v14, 5  ;;  %12070 = vmatprep.subr.bf16.mxu0 %v12559_v32  ;;  %v13770_v13 = vpop.f32.mrf.mxu0  ;;  %v13776_v54 = vadd.f32 %v13485_v44, %v13482_v37  ;;  %v13780_v23 = vadd.f32 %v13498_v8, %v13503_v18  ;;  %v10445_v14 = vld [vmem:[%s12723_s11 + $0x5c] sm:$0x1]  ;;  %v10446_v25 = vld [vmem:[%s12723_s11 + $0x60] sm:$0xf] }
 0x127   : > { %v13740_v6 = vpop.f32.mrf.mxu1  ;;  %12036 = vmatprep.mubr.bf16.mxu1 %v10565_v12  ;;  %v3880_v61 = vrot.slane %v3879_v40, 4  ;;  %11988 = vmatprep.mubr.bf16.mxu0 %v10493_v41  ;;  %v3897_v37 = vshrl.u32 %v10443_v51, 16  ;;  %v3900_v18 = vshll.u32 %v10443_v51, 16  ;;  %v3906_v34 = vshll.u32 %v10444_v0, 16 }
 0x128   : > { %16739 = vst [vmem:[#allocation20_spill] sm:$0xff] %v13740_v6  ;;  %v4559_v6 = vrot.slane %v13710_v35, 5  ;;  %16740 = vst [vmem:[#allocation21_spill] sm:$0xff] %v13776_v54  ;;  %v13784_v35 = vadd.f32 %v13506_v27, %v13509_v33  ;;  %v3890_v11 = vrot.slane %v3889_v1, 4  ;;  %v13789_v44 = vpop.f32.mrf.mxu0  ;;  %v3910_v27 = vshrl.u32 %v10444_v0, 16  ;;  %12119 = vmatpush3.bf16.msra.mxu1 %v12560_v49 }
 0x129   : > { %v13772_v24 = vpop.f32.mrf.mxu1  ;;  %16741 = vst [vmem:[#allocation22_spill] sm:$0xff] %v13780_v23  ;;  %v3885_v8 = vsel %vm12753_vm2, %v3880_v61, %v3884_v53  ;;  %v10519_v33 = vld [vmem:[%s12723_s11 + $0x54] sm:$0xe]  ;;  %12071 = vmatpush3.bf16.msra.mxu0 %v12559_v32  ;;  %v3899_v53 = vrot.slane %v3897_v37, 4  ;;  %v3916_v21 = vshll.u32 %v10445_v14, 16  ;;  %12120 = vmatprep.subr.bf16.mxu1 %v13759_v7  ;;  %v3902_v1 = vrot.slane %v3900_v18, 5 }
 0x12a   : > { %16742 = vst [vmem:[#allocation23_spill] sm:$0xff] %v13784_v35  ;;  %v4560_v58 = vsel %vm13224_vm5, %v10534_v30, %v4559_v6  ;;  %v4561_v17 = vrot.slane %v4559_v6, 4  ;;  %v12564_v6 = vld [vmem:[%s16708_s1 + $0x200] sm:$0xff]   ;;  %v3895_v12 = vsel %vm12753_vm2, %v3890_v11, %v3894_v2  ;;  %12072 = vmatprep.subr.bf16.mxu0 %v13754_v55  ;;  %v13810_v49 = vpop.f32.mrf.mxu0  ;;  %v3908_v2 = vrot.slane %v3906_v34, 5  ;;  %v13815_v61 = vld [vmem:[%s12723_s11 + $0x68] sm:$0x1] }
 0x12b   : > { %v13806_v32 = vld [vmem:[%s12723_s11 + $0x64] sm:$0xf]  ;;  %v13812_v40 = vpop.f32.mrf.mxu1  ;;  %v10494_v30 = vcombine.low %v3885_v8, %v3895_v12  ;;  %v3918_v11 = vrot.slane %v3916_v21, 5  ;;  %v4566_v37 = vrot.slane %v10444_v0, 5  ;;  %v3903_v23 = vor.u32 %v3902_v1, %v3899_v53  ;;  %v10520_v53 = vld [vmem:[%s12723_s11 + $0x60] sm:$0xe] }
 0x12c   : > { %v4563_v51 = vsel %vm13224_vm5, %v4561_v17, %v4562_v10  ;;  %16743 = vst [vmem:[#allocation24_spill] sm:$0xff] %v13812_v40  ;;  %v3912_v10 = vrot.slane %v3910_v27, 4  ;;  %v10535_v17 = vrot.slane %v10519_v33, 9  ;;  %v13817_v35 = vpop.f32.mrf.mxu0  ;;  %v4569_v54 = vrot.slane %v10445_v14, 5  ;;  %12121 = vmatpush3.bf16.msra.mxu1 %v13759_v7  ;;  %v12567_v14 = vld [vmem:[%s16708_s1 + $0x2b8] sm:$0xff]  }
 0x12d   : > { %v10566_v41 = vcombine.low %v4560_v58, %v4563_v51  ;;  %11989 = vmatmul.mubr.bf16.gmra.mxu0 %v10494_v30  ;;  %v13821_v40 = vadd.f32 %v13523_v62, %v13528_v9  ;;  %v3921_v58 = vshrl.u32 %v10446_v25, 16  ;;  %v4568_v34 = vrot.slane %v4566_v37, 4  ;;  %12122 = vmatprep.subr.bf16.mxu1 %v12564_v6 }
 0x12e   : > { %v3913_v8 = vor.u32 %v3912_v10, %v3908_v2  ;;  %v4567_v18 = vsel %vm13224_vm5, %v10535_v17, %v4566_v37  ;;  %v3924_v27 = vshll.u32 %v10446_v25, 16  ;;  %12073 = vmatpush3.bf16.msra.mxu0 %v13754_v55  ;;  %v13827_v0 = vpop.f32.mrf.mxu1  ;;  %v13832_v33 = vpop.f32.mrf.mxu0  ;;  %v3904_v62 = vrot.slane %v3903_v23, 4  ;;  %v13845_v23 = vld [vmem:[%s16708_s1 + $0x2f8] sm:$0xff]  }
 0x12f   : > { %12037 = vmatmul.mubr.bf16.gmra.mxu1 %v10566_v41  ;;  %16744 = vst [vmem:[#allocation25_spill] sm:$0xff] %v13821_v40  ;;  %v3923_v9 = vrot.slane %v3921_v58, 4  ;;  %v3930_v12 = vshll.u32 %v13806_v32, 16  ;;  %v3934_v51 = vshrl.u32 %v13806_v32, 16  ;;  %12074 = vmatprep.subr.bf16.mxu0 %v12563_v19  ;;  %v4570_v7 = vsel %vm13224_vm5, %v4568_v34, %v4569_v54  ;;  %v10449_v58 = vld [vmem:[%s12723_s11 + $0x6c] sm:$0xf] }
 0x130   : > { %v3914_v55 = vrot.slane %v3913_v8, 4  ;;  %v3926_v21 = vrot.slane %v3924_v27, 5  ;;  %v3940_v25 = vshll.u32 %v13815_v61, 16  ;;  %v13840_v30 = vpop.f32.mrf.mxu1  ;;  %v13847_v41 = vpop.f32.mrf.mxu0  ;;  %v3909_v1 = vsel %vm12753_vm2, %v3904_v62, %v3908_v2  ;;  %v13853_v54 = vld [vmem:[%s12723_s11 + $0x70] sm:$0xf]  ;;  %12123 = vmatpush3.bf16.msra.mxu1 %v12564_v6 }
 0x131   : > { %16745 = vst [vmem:[#allocation26_spill] sm:$0xff] %v13840_v30  ;;  %16746 = vst [vmem:[#allocation27_spill] sm:$0xff] %v13847_v41  ;;  %v10567_v10 = vcombine.low %v4567_v18, %v4570_v7  ;;  %v3932_v17 = vrot.slane %v3930_v12, 5  ;;  %v3936_v37 = vrot.slane %v3934_v51, 4  ;;  %v10536_v40 = vrot.slane %v10520_v53, 9  ;;  %12204 = vmatprep.subr.bf16.mxu1 %v13845_v23 }
 0x132   : > { %v3919_v8 = vsel %vm12753_vm2, %v3914_v55, %v3918_v11  ;;  %v3927_v34 = vor.u32 %v3926_v21, %v3923_v9  ;;  %v3942_v27 = vrot.slane %v3940_v25, 5  ;;  %12075 = vmatpush3.bf16.msra.mxu0 %v12563_v19  ;;  %v13857_v30 = vpop.f32.mrf.mxu1  ;;  %v13859_v41 = vpop.f32.mrf.mxu0  ;;  %v4573_v62 = vrot.slane %v13806_v32, 5  ;;  %v10451_v51 = vld [vmem:[%s12723_s11 + $0x74] sm:$0x1]  ;;  %v10521_v55 = vld [vmem:[%s12723_s11 + $0x6c] sm:$0xe] }
 0x133   : > { %v10495_v2 = vcombine.low %v3909_v1, %v3919_v8  ;;  %12040 = vmatprep.mubr.bf16.mxu1 %v10567_v10  ;;  %v3937_v18 = vor.u32 %v3936_v37, %v3932_v17  ;;  %v4576_v12 = vrot.slane %v13815_v61, 5  ;;  %12156 = vmatprep.subr.bf16.mxu0 %v12567_v14  ;;  %v13865_v11 = vadd.f32 %v13514_v43, %v13517_v48  ;;  %v10452_v37 = vld [vmem:[%s12723_s11 + $0x78] sm:$0xf] }
 0x134   : > { %v3928_v9 = vrot.slane %v3927_v34, 4  ;;  %v13869_v19 = vadd.f32 %v13530_v16, %v13532_v45  ;;  %v13873_v6 = vadd.f32 %v13535_v38, %v13539_v47  ;;  %v13877_v32 = vpop.f32.mrf.mxu1  ;;  %v13879_v61 = vpop.f32.mrf.mxu0  ;;  %v4574_v48 = vsel %vm13224_vm5, %v10536_v40, %v4573_v62 }
 0x135   : > { %16747 = vst [vmem:[#allocation28_spill] sm:$0xff] %v13865_v11  ;;  %11992 = vmatprep.mubr.bf16.mxu0 %v10495_v2  ;;  %v3938_v43 = vrot.slane %v3937_v18, 4  ;;  %v4575_v16 = vrot.slane %v4573_v62, 4  ;;  %v3945_v45 = vshrl.u32 %v10449_v58, 16  ;;  %v3948_v47 = vshll.u32 %v10449_v58, 16 }
 0x136   : > { %16748 = vst [vmem:[#allocation29_spill] sm:$0xff] %v13869_v19  ;;  %16749 = vst [vmem:[#allocation30_spill] sm:$0xff] %v13873_v6  ;;  %v3933_v38 = vsel %vm12753_vm2, %v3928_v9, %v3932_v17  ;;  %v3954_v14 = vshll.u32 %v13853_v54, 16  ;;  %v3958_v53 = vshrl.u32 %v13853_v54, 16  ;;  %v13888_v7 = vpop.f32.mrf.mxu1  ;;  %v13890_v21 = vpop.f32.mrf.mxu0  ;;  %v3964_v10 = vshll.u32 %v10451_v51, 16 }
 0x137   : > { %v3943_v25 = vsel %vm12753_vm2, %v3938_v43, %v3942_v27  ;;  %v4577_v40 = vsel %vm13224_vm5, %v4575_v16, %v4576_v12  ;;  %v3947_v1 = vrot.slane %v3945_v45, 4  ;;  %v13898_v17 = vld [vmem:[%s12723_s11 + $0x7c] sm:$0xf]  ;;  %v3950_v34 = vrot.slane %v3948_v47, 5 }
 0x138   : > { %v10496_v58 = vcombine.low %v3933_v38, %v3943_v25  ;;  %v10568_v8 = vcombine.low %v4574_v48, %v4577_v40  ;;  %v3956_v2 = vrot.slane %v3954_v14, 5  ;;  %v13900_v18 = vpop.f32.mrf.mxu1  ;;  %v13902_v62 = vpop.f32.mrf.mxu0  ;;  %v3960_v9 = vrot.slane %v3958_v53, 4  ;;  %v10454_v48 = vld [vmem:[%s12723_s11 + $0x80] sm:$0x1] }
 0x139   : > { %v3966_v6 = vrot.slane %v3964_v10, 5  ;;  %v10537_v27 = vrot.slane %v10521_v55, 9  ;;  %v4580_v43 = vrot.slane %v13853_v54, 5  ;;  %v3951_v12 = vor.u32 %v3950_v34, %v3947_v1 }
 0x13a   : > { %11993 = vmatmul.mubr.bf16.gmra.mxu0 %v10496_v58  ;;  %12041 = vmatmul.mubr.bf16.gmra.mxu1 %v10568_v8  ;;  %v4583_v16 = vrot.slane %v10451_v51, 5  ;;  %v13907_v45 = vadd.f32 %v13552_v31, %v13563_v63  ;;  %v3969_v38 = vshrl.u32 %v10452_v37, 16  ;;  %v13910_v47 = vpop.f32.mrf.mxu1  ;;  %v13912_v14 = vpop.f32.mrf.mxu0  ;;  %v3961_v53 = vor.u32 %v3960_v9, %v3956_v2  ;;  %v10522_v63 = vld [vmem:[%s12723_s11 + $0x78] sm:$0xe] }
 0x13b   : > { %v4581_v55 = vsel %vm13224_vm5, %v10537_v27, %v4580_v43  ;;  %v4582_v54 = vrot.slane %v4580_v43, 4  ;;  %v3972_v25 = vshll.u32 %v10452_v37, 16  ;;  %v3952_v40 = vrot.slane %v3951_v12, 4 }
 0x13c   : > { %16750 = vst [vmem:[#allocation31_spill] sm:$0xff] %v13907_v45  ;;  %v3971_v1 = vrot.slane %v3969_v38, 4  ;;  %v3978_v51 = vshll.u32 %v13898_v17, 16  ;;  %v3982_v31 = vshrl.u32 %v13898_v17, 16  ;;  %v13919_v10 = vpop.f32.mrf.mxu1  ;;  %v13921_v58 = vpop.f32.mrf.mxu0  ;;  %v3962_v8 = vrot.slane %v3961_v53, 4 }
 0x13d   : > { %16751 = vst [vmem:[#allocation32_spill] sm:$0xff] %v13919_v10  ;;  %16752 = vst [vmem:[#allocation33_spill] sm:$0xff] %v13921_v58  ;;  %v4584_v34 = vsel %vm13224_vm5, %v4582_v54, %v4583_v16  ;;  %v3974_v9 = vrot.slane %v3972_v25, 5  ;;  %v3988_v27 = vshll.u32 %v10454_v48, 16  ;;  %v3957_v37 = vsel %vm12753_vm2, %v3952_v40, %v3956_v2  ;;  %v10455_v45 = vld [vmem:[%s12723_s11 + $0x84] sm:$0xf] }
 0x13e   : > { %v10569_v43 = vcombine.low %v4581_v55, %v4584_v34  ;;  %v3980_v12 = vrot.slane %v3978_v51, 5  ;;  %v3984_v38 = vrot.slane %v3982_v31, 4  ;;  %v13928_v19 = vpop.f32.mrf.mxu0  ;;  %v3967_v11 = vsel %vm12753_vm2, %v3962_v8, %v3966_v6  ;;  %v13932_v16 = vpop.f32.mrf.mxu1  ;;  %v10456_v40 = vld [vmem:[%s12723_s11 + $0x88] sm:$0xf]  ;;  %v10523_v34 = vld [vmem:[%s12723_s11 + $0x84] sm:$0xe] }
 0x13f   : > { %v3975_v53 = vor.u32 %v3974_v9, %v3971_v1  ;;  %v3990_v58 = vrot.slane %v3988_v27, 5  ;;  %v10538_v10 = vrot.slane %v10522_v63, 9  ;;  %v10497_v54 = vcombine.low %v3957_v37, %v3967_v11  ;;  %v10457_v63 = vld [vmem:[%s12723_s11 + $0x8c] sm:$0x1]  ;;  %v10458_v27 = vld [vmem:[%s12723_s11 + $0x90] sm:$0xf] }
 0x140   : > { %12044 = vmatprep.mubr.bf16.mxu1 %v10569_v43  ;;  %v3985_v25 = vor.u32 %v3984_v38, %v3980_v12  ;;  %v4587_v2 = vrot.slane %v13898_v17, 5  ;;  %v4590_v55 = vrot.slane %v10454_v48, 5  ;;  %v13936_v51 = vpop.f32.mrf.mxu0  ;;  %v13940_v31 = vadd.f32 %v13542_v60, %v13548_v57  ;;  %v13951_v17 = vpop.f32.mrf.mxu1 }
 0x141   : > { %v3976_v6 = vrot.slane %v3975_v53, 4  ;;  %v13944_v1 = vadd.f32 %v13558_v39, %v13572_v50  ;;  %v13948_v11 = vadd.f32 %v13569_v4, %v13590_v28  ;;  %11996 = vmatprep.mubr.bf16.mxu0 %v10497_v54  ;;  %v3993_v8 = vshrl.u32 %v10455_v45, 16  ;;  %v13968_v54 = vld [vmem:[%s12723_s11 + $0x94] sm:$0xf] }
 0x142   : > { %16753 = vst [vmem:[#allocation34_spill] sm:$0xff] %v13940_v31  ;;  %v3986_v48 = vrot.slane %v3985_v25, 4  ;;  %v4588_v60 = vsel %vm13224_vm5, %v10538_v10, %v4587_v2  ;;  %v4589_v57 = vrot.slane %v4587_v2, 4  ;;  %v13956_v9 = vpop.f32.mrf.mxu0  ;;  %v3996_v50 = vshll.u32 %v10455_v45, 16  ;;  %v13961_v37 = vpop.f32.mrf.mxu1 }
 0x143   : > { %16754 = vst [vmem:[#allocation35_spill] sm:$0xff] %v13944_v1  ;;  %16755 = vst [vmem:[#allocation36_spill] sm:$0xff] %v13948_v11  ;;  %v3981_v39 = vsel %vm12753_vm2, %v3976_v6, %v3980_v12  ;;  %v4002_v4 = vshll.u32 %v10456_v40, 16  ;;  %v4006_v28 = vshrl.u32 %v10456_v40, 16  ;;  %v3995_v38 = vrot.slane %v3993_v8, 4 }
 0x144   : > { %16756 = vst [vmem:[#allocation37_spill] sm:$0xff] %v13961_v37  ;;  %v3991_v43 = vsel %vm12753_vm2, %v3986_v48, %v3990_v58  ;;  %v4591_v10 = vsel %vm13224_vm5, %v4589_v57, %v4590_v55  ;;  %v4012_v53 = vshll.u32 %v10457_v63, 16  ;;  %v13970_v25 = vpop.f32.mrf.mxu0  ;;  %v3998_v2 = vrot.slane %v3996_v50, 5  ;;  %v13972_v11 = vpop.f32.mrf.mxu1 }
 0x145   : > { %v10498_v12 = vcombine.low %v3981_v39, %v3991_v43  ;;  %v10570_v45 = vcombine.low %v4588_v60, %v4591_v10  ;;  %v4004_v6 = vrot.slane %v4002_v4, 5  ;;  %v4008_v1 = vrot.slane %v4006_v28, 4  ;;  %v10460_v60 = vld [vmem:[%s12723_s11 + $0x98] sm:$0x1] }
 0x146   : > { %v4014_v31 = vrot.slane %v4012_v53, 5  ;;  %v10539_v37 = vrot.slane %v10523_v34, 9  ;;  %v4594_v58 = vrot.slane %v10456_v40, 5  ;;  %v13974_v48 = vpop.f32.mrf.mxu0  ;;  %v3999_v55 = vor.u32 %v3998_v2, %v3995_v38  ;;  %v13981_v50 = vpop.f32.mrf.mxu1 }
 0x147   : > { %16757 = vst [vmem:[#allocation38_spill] sm:$0xff] %v13974_v48  ;;  %11997 = vmatmul.mubr.bf16.gmra.mxu0 %v10498_v12  ;;  %12045 = vmatmul.mubr.bf16.gmra.mxu1 %v10570_v45  ;;  %v4597_v57 = vrot.slane %v10457_v63, 5  ;;  %v13978_v8 = vadd.f32 %v13595_v22, %v13615_v3  ;;  %v4017_v39 = vshrl.u32 %v10458_v27, 16  ;;  %16759 = vst [vmem:[#allocation40_spill] sm:$0xff] %v13981_v50  ;;  %v4020_v28 = vshll.u32 %v10458_v27, 16 }
 0x148   : > { %v4009_v4 = vor.u32 %v4008_v1, %v4004_v6  ;;  %v4595_v40 = vsel %vm13224_vm5, %v10539_v37, %v4594_v58  ;;  %v4596_v34 = vrot.slane %v4594_v58, 4  ;;  %v13985_v43 = vpop.f32.mrf.mxu0  ;;  %v4000_v10 = vrot.slane %v3999_v55, 4  ;;  %v10524_v3 = vld [vmem:[%s12723_s11 + $0x90] sm:$0xe]  ;;  %v13990_v53 = vpop.f32.mrf.mxu1  ;;  %v10461_v37 = vld [vmem:[%s12723_s11 + $0x9c] sm:$0xf] }
 0x149   : > { %16758 = vst [vmem:[#allocation39_spill] sm:$0xff] %v13978_v8  ;;  %16760 = vst [vmem:[#allocation41_spill] sm:$0xff] %v13985_v43  ;;  %v4019_v38 = vrot.slane %v4017_v39, 4  ;;  %v4026_v63 = vshll.u32 %v13968_v54, 16  ;;  %v4030_v22 = vshrl.u32 %v13968_v54, 16  ;;  %v4022_v45 = vrot.slane %v4020_v28, 5 }
 0x14a   : > { %16761 = vst [vmem:[#allocation42_spill] sm:$0xff] %v13990_v53  ;;  %v4010_v12 = vrot.slane %v4009_v4, 4  ;;  %v4598_v1 = vsel %vm13224_vm5, %v4596_v34, %v4597_v57  ;;  %v4036_v2 = vshll.u32 %v10460_v60, 16  ;;  %v13995_v58 = vpop.f32.mrf.mxu0  ;;  %v4005_v27 = vsel %vm12753_vm2, %v4000_v10, %v4004_v6  ;;  %v13999_v43 = vpop.f32.mrf.mxu1  ;;  %v10462_v10 = vld [vmem:[%s12723_s11 + $0xa0] sm:$0xf] }
 0x14b   : > { %16762 = vst [vmem:[#allocation43_spill] sm:$0xff] %v13995_v58  ;;  %v10571_v55 = vcombine.low %v4595_v40, %v4598_v1  ;;  %v4028_v39 = vrot.slane %v4026_v63, 5  ;;  %v4032_v8 = vrot.slane %v4030_v22, 4  ;;  %16763 = vst [vmem:[#allocation44_spill] sm:$0xff] %v13999_v43  ;;  %v4023_v53 = vor.u32 %v4022_v45, %v4019_v38  ;;  %v16766_v22 = vld [vmem:[#allocation7_spill] sm:$0xff]  ;;  %v16767_v1 = vld [vmem:[#allocation6_spill] sm:$0xff] }
 0x14c   : > { %v4015_v4 = vsel %vm12753_vm2, %v4010_v12, %v4014_v31  ;;  %v4038_v57 = vrot.slane %v4036_v2, 5  ;;  %v10540_v34 = vrot.slane %v10524_v3, 9  ;;  %v14003_v28 = vpop.f32.mrf.mxu0  ;;  %v4601_v6 = vrot.slane %v13968_v54, 5  ;;  %v14007_v63 = vpop.f32.mrf.mxu1  ;;  %v16769_v38 = vld [vmem:[#allocation8_spill] sm:$0xff]  ;;  %v16772_v45 = vld [vmem:[#allocation10_spill] sm:$0xff] }
 0x14d   : > { %16764 = vst [vmem:[#allocation45_spill] sm:$0xff] %v14003_v28  ;;  %v10499_v48 = vcombine.low %v4005_v27, %v4015_v4  ;;  %12048 = vmatprep.mubr.bf16.mxu1 %v10571_v55  ;;  %v4033_v58 = vor.u32 %v4032_v8, %v4028_v39  ;;  %v4604_v40 = vrot.slane %v10460_v60, 5  ;;  %16765 = vst [vmem:[#allocation46_spill] sm:$0xff] %v14007_v63  ;;  %v4024_v31 = vrot.slane %v4023_v53, 4  ;;  %v16771_v12 = vld [vmem:[#allocation12_spill] sm:$0xff] }
 0x14e   : > { %v14011_v43 = vadd.f32 %v16767_v1, %v16766_v22  ;;  %v14015_v3 = vadd.f32 %v16769_v38, %v13629_v20  ;;  %v14019_v8 = vadd.f32 %v16772_v45, %v16771_v12  ;;  %v10463_v2 = vld [vmem:[%s12723_s11 + $0xa4] sm:$0x1]  ;;  %v14022_v54 = vpop.f32.mrf.mxu0  ;;  %v4602_v27 = vsel %vm13224_vm5, %v10540_v34, %v4601_v6  ;;  %v10525_v53 = vld [vmem:[%s12723_s11 + $0x9c] sm:$0xe]  ;;  %v14027_v22 = vpop.f32.mrf.mxu1  ;;  %v10464_v45 = vld [vmem:[%s12723_s11 + $0xa8] sm:$0xf] }
 0x14f   : > { %16774 = vst [vmem:[#allocation12_spill] sm:$0xff] %v14022_v54  ;;  %12000 = vmatprep.mubr.bf16.mxu0 %v10499_v48  ;;  %v4034_v60 = vrot.slane %v4033_v58, 4  ;;  %v4603_v55 = vrot.slane %v4601_v6, 4  ;;  %v4041_v4 = vshrl.u32 %v10461_v37, 16  ;;  %16775 = vst [vmem:[#allocation10_spill] sm:$0xff] %v14027_v22  ;;  %v4029_v20 = vsel %vm12753_vm2, %v4024_v31, %v4028_v39 }
 0x150   : > { %16768 = vst [vmem:[#allocation7_spill] sm:$0xff] %v14011_v43  ;;  %16770 = vst [vmem:[#allocation6_spill] sm:$0xff] %v14015_v3  ;;  %v4044_v1 = vshll.u32 %v10461_v37, 16  ;;  %v4050_v38 = vshll.u32 %v10462_v10, 16  ;;  %v4054_v12 = vshrl.u32 %v10462_v10, 16  ;;  %v4060_v6 = vshll.u32 %v10463_v2, 16  ;;  %v14038_v3 = vpop.f32.mrf.mxu1 }
 0x151   : > { %16773 = vst [vmem:[#allocation8_spill] sm:$0xff] %v14019_v8  ;;  %v14032_v8 = vpop.f32.mrf.mxu0  ;;  %v4039_v48 = vsel %vm12753_vm2, %v4034_v60, %v4038_v57  ;;  %v4605_v58 = vsel %vm13224_vm5, %v4603_v55, %v4604_v40  ;;  %v4043_v34 = vrot.slane %v4041_v4, 4  ;;  %v4608_v63 = vrot.slane %v10462_v10, 5  ;;  %v10465_v50 = vld [vmem:[%s12723_s11 + $0xac] sm:$0xf] }
 0x152   : > { %16776 = vst [vmem:[#allocation47_spill] sm:$0xff] %v14032_v8  ;;  %v10500_v43 = vcombine.low %v4029_v20, %v4039_v48  ;;  %v10572_v39 = vcombine.low %v4602_v27, %v4605_v58  ;;  %v4046_v37 = vrot.slane %v4044_v1, 5  ;;  %v4052_v31 = vrot.slane %v4050_v38, 5  ;;  %v14043_v57 = vpop.f32.mrf.mxu1  ;;  %v10466_v27 = vld [vmem:[%s12723_s11 + $0xb0] sm:$0x1] }
 0x153   : > { %v14040_v54 = vpop.f32.mrf.mxu0  ;;  %v4056_v22 = vrot.slane %v4054_v12, 4  ;;  %v4062_v28 = vrot.slane %v4060_v6, 5  ;;  %v10541_v8 = vrot.slane %v10525_v53, 9  ;;  %v4611_v60 = vrot.slane %v10463_v2, 5 }
 0x154   : > { %12001 = vmatmul.mubr.bf16.gmra.mxu0 %v10500_v43  ;;  %12049 = vmatmul.mubr.bf16.gmra.mxu1 %v10572_v39  ;;  %v4047_v40 = vor.u32 %v4046_v37, %v4043_v34  ;;  %v14047_v55 = vadd.f32 %v13653_v26, %v13701_v5  ;;  %v4065_v4 = vshrl.u32 %v10464_v45, 16  ;;  %v4610_v53 = vrot.slane %v4608_v63, 4  ;;  %v14054_v43 = vpop.f32.mrf.mxu1  ;;  %v10526_v34 = vld [vmem:[%s12723_s11 + $0xa8] sm:$0xe]  ;;  %v10467_v37 = vld [vmem:[%s12723_s11 + $0xb4] sm:$0xf] }
 0x155   : > { %v14050_v20 = vpop.f32.mrf.mxu0  ;;  %v4057_v1 = vor.u32 %v4056_v22, %v4052_v31  ;;  %v4609_v10 = vsel %vm13224_vm5, %v10541_v8, %v4608_v63  ;;  %v4068_v38 = vshll.u32 %v10464_v45, 16  ;;  %16779 = vst [vmem:[#allocation50_spill] sm:$0xff] %v14054_v43  ;;  %v4074_v2 = vshll.u32 %v10465_v50, 16 }
 0x156   : > { %16777 = vst [vmem:[#allocation48_spill] sm:$0xff] %v14047_v55  ;;  %16778 = vst [vmem:[#allocation49_spill] sm:$0xff] %v14050_v20  ;;  %v4048_v12 = vrot.slane %v4047_v40, 4  ;;  %v4067_v48 = vrot.slane %v4065_v4, 4  ;;  %v4078_v58 = vshrl.u32 %v10465_v50, 16  ;;  %v4612_v6 = vsel %vm13224_vm5, %v4610_v53, %v4611_v60 }
 0x157   : > { %v14057_v26 = vpop.f32.mrf.mxu0  ;;  %v4058_v5 = vrot.slane %v4057_v1, 4  ;;  %v4070_v39 = vrot.slane %v4068_v38, 5  ;;  %v4084_v22 = vshll.u32 %v10466_v27, 16  ;;  %v10573_v8 = vcombine.low %v4609_v10, %v4612_v6  ;;  %v10468_v10 = vld [vmem:[%s12723_s11 + $0xb8] sm:$0xf] }
 0x158   : > { %16780 = vst [vmem:[#allocation51_spill] sm:$0xff] %v14057_v26  ;;  %v4053_v63 = vsel %vm12753_vm2, %v4048_v12, %v4052_v31  ;;  %v4076_v45 = vrot.slane %v4074_v2, 5  ;;  %v4080_v40 = vrot.slane %v4078_v58, 4  ;;  %v14064_v4 = vpop.f32.mrf.mxu1  ;;  %v10542_v53 = vrot.slane %v10526_v34, 9  ;;  %v16781_v58 = vld [vmem:[#allocation11_spill] sm:$0xff]  ;;  %v16783_v34 = vld [vmem:[#allocation16_spill] sm:$0xff] }
 0x159   : > { %v14066_v55 = vpop.f32.mrf.mxu0  ;;  %v4063_v1 = vsel %vm12753_vm2, %v4058_v5, %v4062_v28  ;;  %v4071_v26 = vor.u32 %v4070_v39, %v4067_v48  ;;  %v4086_v60 = vrot.slane %v4084_v22, 5  ;;  %12052 = vmatprep.mubr.bf16.mxu1 %v10573_v8  ;;  %v4615_v43 = vrot.slane %v10465_v50, 5  ;;  %v10469_v50 = vld [vmem:[%s12723_s11 + $0xbc] sm:$0x1] }
 0x15a   : > { %v10501_v38 = vcombine.low %v4053_v63, %v4063_v1  ;;  %v4081_v20 = vor.u32 %v4080_v40, %v4076_v45  ;;  %v4618_v31 = vrot.slane %v10466_v27, 5  ;;  %v14071_v12 = vpop.f32.mrf.mxu1  ;;  %v14077_v6 = vadd.f32 %v16781_v58, %v13656_v29  ;;  %v10527_v29 = vld [vmem:[%s12723_s11 + $0xb4] sm:$0xe] }
 0x15b   : > { %v14073_v2 = vpop.f32.mrf.mxu0  ;;  %v4072_v28 = vrot.slane %v4071_v26, 4  ;;  %v14081_v48 = vadd.f32 %v13664_v52, %v13714_v42  ;;  %v14085_v5 = vadd.f32 %v16783_v34, %v13726_v56  ;;  %v4616_v39 = vsel %vm13224_vm5, %v10542_v53, %v4615_v43 }
 0x15c   : > { %12004 = vmatprep.mubr.bf16.mxu0 %v10501_v38  ;;  %v4082_v27 = vrot.slane %v4081_v20, 4  ;;  %v4617_v22 = vrot.slane %v4615_v43, 4  ;;  %v4089_v63 = vshrl.u32 %v10467_v37, 16  ;;  %v14092_v26 = vpop.f32.mrf.mxu1  ;;  %v4092_v42 = vshll.u32 %v10467_v37, 16  ;;  %v10470_v38 = vld [vmem:[%s12723_s11 + $0xc0] sm:$0xf] }
 0x15d   : > { %16782 = vst [vmem:[#allocation11_spill] sm:$0xff] %v14081_v48  ;;  %16784 = vst [vmem:[#allocation16_spill] sm:$0xff] %v14085_v5  ;;  %v14094_v8 = vpop.f32.mrf.mxu0  ;;  %v4077_v52 = vsel %vm12753_vm2, %v4072_v28, %v4076_v45  ;;  %v4098_v56 = vshll.u32 %v10468_v10, 16  ;;  %v4102_v20 = vshrl.u32 %v10468_v10, 16  ;;  %v4108_v53 = vshll.u32 %v10469_v50, 16 }
 0x15e   : > { %16785 = vst [vmem:[#allocation52_spill] sm:$0xff] %v14094_v8  ;;  %v4087_v40 = vsel %vm12753_vm2, %v4082_v27, %v4086_v60  ;;  %v4619_v43 = vsel %vm13224_vm5, %v4617_v22, %v4618_v31  ;;  %v4091_v1 = vrot.slane %v4089_v63, 4  ;;  %v14103_v58 = vpop.f32.mrf.mxu1  ;;  %v4094_v45 = vrot.slane %v4092_v42, 5  ;;  %v10471_v28 = vld [vmem:[%s12723_s11 + $0xc4] sm:$0xf] }
 0x15f   : > { %v14105_v34 = vpop.f32.mrf.mxu0  ;;  %v10502_v5 = vcombine.low %v4077_v52, %v4087_v40  ;;  %v10574_v48 = vcombine.low %v4616_v39, %v4619_v43  ;;  %v4100_v37 = vrot.slane %v4098_v56, 5  ;;  %v4104_v60 = vrot.slane %v4102_v20, 4  ;;  %v10472_v56 = vld [vmem:[%s12723_s11 + $0xc8] sm:$0x1] }
 0x160   : > { %16786 = vst [vmem:[#allocation53_spill] sm:$0xff] %v14105_v34  ;;  %v4110_v31 = vrot.slane %v4108_v53, 5  ;;  %v10543_v27 = vrot.slane %v10527_v29, 9  ;;  %v4622_v22 = vrot.slane %v10468_v10, 5  ;;  %v14114_v63 = vpop.f32.mrf.mxu1  ;;  %v4095_v39 = vor.u32 %v4094_v45, %v4091_v1  ;;  %v16798_v34 = vld [vmem:[#allocation17_spill] sm:$0xff] }
 0x161   : > { %16788 = vst [vmem:[#allocation54_spill] sm:$0xff] %v14114_v63  ;;  %v14116_v8 = vpop.f32.mrf.mxu0  ;;  %12005 = vmatmul.mubr.bf16.gmra.mxu0 %v10502_v5  ;;  %12053 = vmatmul.mubr.bf16.gmra.mxu1 %v10574_v48  ;;  %v4625_v52 = vrot.slane %v10469_v50, 5  ;;  %v14120_v42 = vadd.f32 %v13716_v46, %v13761_v15  ;;  %v4113_v40 = vshrl.u32 %v10470_v38, 16  ;;  %v4105_v43 = vor.u32 %v4104_v60, %v4100_v37  ;;  %v10528_v46 = vld [vmem:[%s12723_s11 + $0xc0] sm:$0xe] }
 0x162   : > { %16789 = vst [vmem:[#allocation55_spill] sm:$0xff] %v14116_v8  ;;  %v4623_v29 = vsel %vm13224_vm5, %v10543_v27, %v4622_v22  ;;  %v4624_v10 = vrot.slane %v4622_v22, 4  ;;  %v4116_v20 = vshll.u32 %v10470_v38, 16  ;;  %v14125_v53 = vpop.f32.mrf.mxu1  ;;  %v4096_v48 = vrot.slane %v4095_v39, 4 }
 0x163   : > { %16790 = vst [vmem:[#allocation56_spill] sm:$0xff] %v14120_v42  ;;  %16791 = vst [vmem:[#allocation57_spill] sm:$0xff] %v14125_v53  ;;  %v14127_v8 = vpop.f32.mrf.mxu0  ;;  %v4115_v5 = vrot.slane %v4113_v40, 4  ;;  %v4122_v50 = vshll.u32 %v10471_v28, 16  ;;  %v4126_v1 = vshrl.u32 %v10471_v28, 16  ;;  %v4106_v15 = vrot.slane %v4105_v43, 4 }
 0x164   : > { %16792 = vst [vmem:[#allocation58_spill] sm:$0xff] %v14127_v8  ;;  %v4626_v45 = vsel %vm13224_vm5, %v4624_v10, %v4625_v52  ;;  %v4118_v60 = vrot.slane %v4116_v20, 5  ;;  %v4132_v27 = vshll.u32 %v10472_v56, 16  ;;  %v14132_v22 = vpop.f32.mrf.mxu1  ;;  %v4101_v42 = vsel %vm12753_vm2, %v4096_v48, %v4100_v37 }
 0x165   : > { %16793 = vst [vmem:[#allocation59_spill] sm:$0xff] %v14132_v22  ;;  %v14134_v38 = vpop.f32.mrf.mxu0  ;;  %v10575_v8 = vcombine.low %v4623_v29, %v4626_v45  ;;  %v4124_v39 = vrot.slane %v4122_v50, 5  ;;  %v4128_v40 = vrot.slane %v4126_v1, 4  ;;  %v4111_v52 = vsel %vm12753_vm2, %v4106_v15, %v4110_v31  ;;  %v10617_v22 = vld [vmem:[%s12723_s11 + $0xc] sm:$0xf] }
 0x166   : > { %16794 = vst [vmem:[#allocation60_spill] sm:$0xff] %v14134_v38  ;;  %v4119_v43 = vor.u32 %v4118_v60, %v4115_v5  ;;  %v4134_v10 = vrot.slane %v4132_v27, 5  ;;  %v10544_v20 = vrot.slane %v10528_v46, 9  ;;  %v14147_v38 = vpop.f32.mrf.mxu1  ;;  %v10503_v37 = vcombine.low %v4101_v42, %v4111_v52  ;;  %v10618_v1 = vld [vmem:[%s12723_s11 + $0x10] sm:$0xf]  ;;  %v16797_v45 = vld [vmem:[#allocation19_spill] sm:$0xff] }
 0x167   : > { %16795 = vst [vmem:[#allocation61_spill] sm:$0xff] %v14147_v38  ;;  %v14149_v53 = vpop.f32.mrf.mxu0  ;;  %12056 = vmatprep.mubr.bf16.mxu1 %v10575_v8  ;;  %v4129_v29 = vor.u32 %v4128_v40, %v4124_v39  ;;  %v4629_v48 = vrot.slane %v10471_v28, 5  ;;  %v4632_v50 = vrot.slane %v10472_v56, 5  ;;  %v14154_v63 = vadd.f32 %v16798_v34, %v16797_v45  ;;  %v16800_v5 = vld [vmem:[#allocation20_spill] sm:$0xff]  ;;  %v14172_v40 = vld [vmem:[%s12723_s11 + $0x18] sm:$0xf] }
 0x168   : > { %16796 = vst [vmem:[#allocation62_spill] sm:$0xff] %v14149_v53  ;;  %v4120_v31 = vrot.slane %v4119_v43, 4  ;;  %v14158_v46 = vadd.f32 %v16800_v5, %v13770_v13  ;;  %v14162_v42 = vadd.f32 %v13772_v24, %v13789_v44  ;;  %v10665_v8 = vld [vmem:[%s12723_s11 + $0x14] sm:$0x1]  ;;  %v14165_v15 = vpop.f32.mrf.mxu1  ;;  %12008 = vmatprep.mubr.bf16.mxu0 %v10503_v37  ;;  %v5163_v27 = vshrl.u32 %v10617_v22, 16 }
 0x169   : > { %16799 = vst [vmem:[#allocation19_spill] sm:$0xff] %v14154_v63  ;;  %16803 = vst [vmem:[#allocation63_spill] sm:$0xff] %v14165_v15  ;;  %v14167_v28 = vpop.f32.mrf.mxu0  ;;  %v4130_v56 = vrot.slane %v4129_v29, 4  ;;  %v4630_v34 = vsel %vm13224_vm5, %v10544_v20, %v4629_v48  ;;  %v4631_v60 = vrot.slane %v4629_v48, 4  ;;  %v5166_v24 = vshll.u32 %v10617_v22, 16  ;;  %v16807_v63 = vld [vmem:[#allocation3_spill] sm:$0xff] }
 0x16a   : > { %16801 = vst [vmem:[#allocation17_spill] sm:$0xff] %v14158_v46  ;;  %16802 = vst [vmem:[#allocation20_spill] sm:$0xff] %v14162_v42  ;;  %v4125_v13 = vsel %vm12753_vm2, %v4120_v31, %v4124_v39  ;;  %v5172_v44 = vshll.u32 %v10618_v1, 16  ;;  %v5176_v52 = vshrl.u32 %v10618_v1, 16  ;;  %v14178_v43 = vld [vmem:[%s12723_s11 + $0x1c] sm:$0xf]  ;;  %v14180_v45 = vpop.f32.mrf.mxu1  ;;  %v10721_v38 = vcombine.low %v10617_v22, %v10618_v1 }
 0x16b   : > { %16804 = vst [vmem:[#allocation64_spill] sm:$0xff] %v14167_v28  ;;  %16805 = vst [vmem:[#allocation65_spill] sm:$0xff] %v14180_v45  ;;  %v14182_v37 = vpop.f32.mrf.mxu0  ;;  %v4135_v20 = vsel %vm12753_vm2, %v4130_v56, %v4134_v10  ;;  %v4633_v29 = vsel %vm13224_vm5, %v4631_v60, %v4632_v50  ;;  %v5165_v48 = vrot.slane %v5163_v27, 4  ;;  %v5182_v5 = vshll.u32 %v10665_v8, 16  ;;  %v10666_v53 = vld [vmem:[%s12723_s11 + $0x20] sm:$0x1] }
 0x16c   : > { %16806 = vst [vmem:[#allocation66_spill] sm:$0xff] %v14182_v37  ;;  %v10504_v39 = vcombine.low %v4125_v13, %v4135_v20  ;;  %v10576_v31 = vcombine.low %v4630_v34, %v4633_v29  ;;  %v5168_v28 = vrot.slane %v5166_v24, 5  ;;  %v5174_v42 = vrot.slane %v5172_v44, 5  ;;  %v14191_v37 = vpop.f32.mrf.mxu1  ;;  %v16808_v44 = vld [vmem:[#allocation24_spill] sm:$0xff]  ;;  %v14213_v29 = vld [vmem:[%s12723_s11 + $0x24] sm:$0xf] }
 0x16d   : > { %v5178_v46 = vrot.slane %v5176_v52, 4  ;;  %v5184_v15 = vrot.slane %v5182_v5, 5  ;;  %v1589_v45 = vadd.f32 %v13817_v35, %v16807_v63  ;;  %v5187_v50 = vshrl.u32 %v14172_v40, 16  ;;  %v16809_v5 = vld [vmem:[#allocation4_spill] sm:$0xff] }
 0x16e   : > { %12009 = vmatmul.mubr.bf16.gmra.mxu0 %v10504_v39  ;;  %12057 = vmatmul.mubr.bf16.gmra.mxu1 %v10576_v31  ;;  %v5169_v10 = vor.u32 %v5168_v28, %v5165_v48  ;;  %v5190_v8 = vshll.u32 %v14172_v40, 16  ;;  %v5196_v22 = vshll.u32 %v14178_v43, 16  ;;  %v14201_v1 = vpop.f32.mrf.mxu0  ;;  %v5200_v28 = vshrl.u32 %v14178_v43, 16  ;;  %v14227_v31 = vld [vmem:[%s16708_s1 + $0x2f0] sm:$0xff]  }
 0x16f   : > { %v5179_v35 = vor.u32 %v5178_v46, %v5174_v42  ;;  %12124 = vmatprep.mubr.bf16.mxu1 %v10721_v38  ;;  %v2343_v63 = vadd.f32 %v13827_v0, %v1589_v45  ;;  %v5206_v56 = vshll.u32 %v10666_v53, 16  ;;  %v5189_v60 = vrot.slane %v5187_v50, 4  ;;  %v14215_v0 = vpop.f32.mrf.mxu1 }
 0x170   : > { %v5170_v34 = vrot.slane %v5169_v10, 4  ;;  %v5192_v27 = vrot.slane %v5190_v8, 5  ;;  %v5198_v13 = vrot.slane %v5196_v22, 5  ;;  %v14205_v24 = vpop.f32.mrf.mxu0  ;;  %v14209_v52 = vadd.f32 %v16808_v44, %v13810_v49  ;;  %v10622_v49 = vld [vmem:[%s12723_s11 + $0x28] sm:$0xf] }
 0x171   : > { %v5180_v20 = vrot.slane %v5179_v35, 4  ;;  %2375 = vst [vmem:[%s14196_s24 + $0x10] sm:$0xff] %v2343_v63  ;;  %v5202_v46 = vrot.slane %v5200_v28, 4  ;;  %v5208_v38 = vrot.slane %v5206_v56, 5  ;;  %v10722_v48 = vcombine.low %v14172_v40, %v14178_v43  ;;  %v16811_v22 = vld [vmem:[#allocation27_spill] sm:$0xff]  ;;  %v16812_v40 = vld [vmem:[#allocation13_spill] sm:$0xff] }
 0x172   : > { %v5175_v53 = vsel %vm12753_vm2, %v5170_v34, %v5174_v42  ;;  %v5193_v45 = vor.u32 %v5192_v27, %v5189_v60  ;;  %v1587_v39 = vadd.f32 %v13832_v33, %v16809_v5  ;;  %v14229_v10 = vpop.f32.mrf.mxu0  ;;  %v16810_v42 = vld [vmem:[#allocation5_spill] sm:$0xff]  ;;  %v1588_v33 = vadd.f32 %v13859_v41, %v16812_v40  ;;  %v16813_v56 = vld [vmem:[#allocation26_spill] sm:$0xff] }
 0x173   : > { %v5185_v50 = vsel %vm12753_vm2, %v5180_v20, %v5184_v15  ;;  %v5203_v8 = vor.u32 %v5202_v46, %v5198_v13  ;;  %v1590_v35 = vadd.f32 %v16811_v22, %v16810_v42  ;;  %v5211_v60 = vshrl.u32 %v14213_v29, 16 }
 0x174   : > { %v10697_v43 = vcombine.low %v5175_v53, %v5185_v50  ;;  %v5194_v28 = vrot.slane %v5193_v45, 4  ;;  %v2341_v34 = vadd.f32 %v16813_v56, %v1587_v39  ;;  %v2342_v15 = vadd.f32 %v13877_v32, %v1588_v33  ;;  %v14244_v46 = vpop.f32.mrf.mxu1  ;;  %v10667_v45 = vld [vmem:[%s12723_s11 + $0x2c] sm:$0x1]  ;;  %v14251_v39 = vld [vmem:[%s12723_s11 + $0x30] sm:$0xf]  ;;  %v14253_v32 = vpop.f32.mrf.mxu0 }
 0x175   : > { %v5204_v27 = vrot.slane %v5203_v8, 4  ;;  %v14240_v44 = vadd.f32 %v13857_v30, %v1590_v35  ;;  %v5214_v20 = vshll.u32 %v14213_v29, 16  ;;  %v2445_v41 = vmul.f32 %v2343_v63, %v2343_v63 }
 0x176   : > { %12076 = vmatprep.mubr.bf16.mxu0 %v10697_v43  ;;  %v5199_v53 = vsel %vm12753_vm2, %v5194_v28, %v5198_v13  ;;  %12125 = vmatmul.mubr.bf16.vlgmr.msra.gmra.mxu1 %v10722_v48  ;;  %2373 = vst [vmem:[%s14196_s24] sm:$0xff] %v2341_v34  ;;  %v5213_v5 = vrot.slane %v5211_v60, 4  ;;  %v5220_v30 = vshll.u32 %v10622_v49, 16  ;;  %v2443_v8 = vmul.f32 %v2341_v34, %v2341_v34  ;;  %v10624_v48 = vld [vmem:[%s12723_s11 + $0x34] sm:$0xf]  ;;  %v14262_v22 = vpop.f32.mrf.mxu1  ;;  %v12576_v60 = vld [vmem:[%s16708_s1 + $0x2e8] sm:$0xff]  }
 0x177   : > { %v5209_v50 = vsel %vm12753_vm2, %v5204_v27, %v5208_v38  ;;  %12205 = vmatpush3.bf16.msra.mxu1 %v13845_v23  ;;  %2376 = vst [vmem:[%s14196_s24 + $0x18] sm:$0xff] %v14240_v44  ;;  %2374 = vst [vmem:[%s14196_s24 + $0x8] sm:$0xff] %v2342_v15  ;;  %v2405_v42 = vadd.f32 %v2342_v15, %v2341_v34  ;;  %v2444_v13 = vmul.f32 %v2342_v15, %v2342_v15  ;;  %v12571_v38 = vld [vmem:[%s16708_s1 + $0x2b0] sm:$0xff]  }
 0x178   : > { %v10698_v35 = vcombine.low %v5199_v53, %v5209_v50  ;;  %v5216_v40 = vrot.slane %v5214_v20, 5  ;;  %v5222_v33 = vrot.slane %v5220_v30, 5  ;;  %v5224_v43 = vshrl.u32 %v10622_v49, 16  ;;  %12206 = vmatprep.subr.bf16.mxu1 %v14227_v31  ;;  %v14272_v27 = vpop.f32.mrf.mxu1  ;;  %v16814_v53 = vld [vmem:[#allocation9_spill] sm:$0xff] }
 0x179   : > { %v2406_v23 = vadd.f32 %v2405_v42, %v2343_v63  ;;  %v2475_v28 = vadd.f32 %v2444_v13, %v2443_v8  ;;  %v5230_v56 = vshll.u32 %v10667_v45, 16  ;;  %v10723_v34 = vcombine.low %v14213_v29, %v10622_v49  ;;  %v10668_v50 = vld [vmem:[%s12723_s11 + $0x38] sm:$0x1] }
 0x17a   : > { %12077 = vmatmul.mubr.bf16.vlgmr.msra.gmra.mxu0 %v10698_v35  ;;  %v5217_v15 = vor.u32 %v5216_v40, %v5213_v5  ;;  %v5226_v20 = vrot.slane %v5224_v43, 4  ;;  %v1593_v30 = vadd.f32 %v13879_v61, %v16814_v53  ;;  %v5235_v59 = vshrl.u32 %v14251_v39, 16  ;;  %v14278_v63 = vpop.f32.mrf.mxu0  ;;  %v12645_v29 = vld [vmem:[%s16708_s1 + $0x2b8] sm:$0xff]   ;;  %v12575_v40 = vld [vmem:[%s16708_s1 + $0x2a8] sm:$0xff]   ;;  %v12580_v53 = vld [vmem:[%s16708_s1 + $0x2e0] sm:$0xff]  }
 0x17b   : > { %12157 = vmatpush3.bf16.msra.mxu0 %v12645_v29  ;;  %v2476_v49 = vadd.f32 %v2475_v28, %v2445_v41  ;;  %v5232_v45 = vrot.slane %v5230_v56, 5  ;;  %12128 = vmatprep.mubr.bf16.mxu1 %v10723_v34  ;;  %v5238_v8 = vshll.u32 %v14251_v39, 16  ;;  %v5244_v5 = vshll.u32 %v10624_v48, 16 }
 0x17c   : > { %v5218_v42 = vrot.slane %v5217_v15, 4  ;;  %v5227_v13 = vor.u32 %v5226_v20, %v5222_v33  ;;  %v14285_v61 = vadd.f32 %v13888_v7, %v1593_v30  ;;  %v5237_v35 = vrot.slane %v5235_v59, 4  ;;  %12158 = vmatprep.subr.bf16.mxu0 %v12571_v38  ;;  %12207 = vmatpush3.bf16.msra.mxu1 %v14227_v31  ;;  %v14291_v41 = vpop.f32.mrf.mxu0  ;;  %v14295_v15 = vpop.f32.mrf.mxu1 }
 0x17d   : > { %16815 = vst [vmem:[#allocation3_spill] sm:$0xff] %v14291_v41  ;;  %v5240_v43 = vrot.slane %v5238_v8, 5  ;;  %v14293_v28 = vrot.slane %v5244_v5, 5  ;;  %v5248_v56 = vshrl.u32 %v10624_v48, 16  ;;  %v5254_v34 = vshll.u32 %v10668_v50, 16  ;;  %12208 = vmatprep.subr.bf16.mxu1 %v12576_v60  ;;  %v16817_v5 = vld [vmem:[#allocation14_spill] sm:$0xff] }
 0x17e   : > { %v2446_v59 = vmul.f32 %v14240_v44, %v14240_v44  ;;  %v5223_v7 = vsel %vm12753_vm2, %v5218_v42, %v5222_v33  ;;  %v5228_v31 = vrot.slane %v5227_v13, 4  ;;  %2379 = vst [vmem:[%s14196_s24 + $0x30] sm:$0xff] %v14285_v61  ;;  %v10724_v20 = vcombine.low %v14251_v39, %v10624_v48  ;;  %v14307_v30 = vpop.f32.mrf.mxu0  ;;  %v14312_v33 = vld [vmem:[%s12723_s11 + $0x3c] sm:$0xf]  ;;  %v12579_v42 = vld [vmem:[%s16708_s1 + $0x2a0] sm:$0xff]  }
 0x17f   : > { %16816 = vst [vmem:[#allocation24_spill] sm:$0xff] %v14307_v30  ;;  %v5241_v50 = vor.u32 %v5240_v43, %v5237_v35  ;;  %v5250_v29 = vrot.slane %v5248_v56, 4  ;;  %v5256_v8 = vrot.slane %v5254_v34, 5  ;;  %12159 = vmatpush3.bf16.msra.mxu0 %v12571_v38  ;;  %v1591_v41 = vadd.f32 %v13890_v21, %v16817_v5  ;;  %v16818_v35 = vld [vmem:[#allocation15_spill] sm:$0xff]  ;;  %v10626_v38 = vld [vmem:[%s12723_s11 + $0x40] sm:$0xf] }
 0x180   : > { %v5233_v39 = vsel %vm12753_vm2, %v5228_v31, %v5232_v45  ;;  %12129 = vmatmul.mubr.bf16.gmra.mxu1 %v10724_v20  ;;  %v2407_v48 = vadd.f32 %v2406_v23, %v14240_v44  ;;  %v2477_v13 = vadd.f32 %v2476_v49, %v2446_v59  ;;  %v1594_v43 = vadd.f32 %v13902_v62, %v16818_v35  ;;  %v12584_v45 = vld [vmem:[%s16708_s1 + $0x2d8] sm:$0xff]   ;;  %v14328_v31 = vpop.f32.mrf.mxu1 }
 0x181   : > { %v10699_v56 = vcombine.low %v5223_v7, %v5233_v39  ;;  %v5242_v34 = vrot.slane %v5241_v50, 4  ;;  %v5251_v21 = vor.u32 %v5250_v29, %v14293_v28  ;;  %v2345_v5 = vadd.f32 %v13900_v18, %v1591_v41  ;;  %12160 = vmatprep.subr.bf16.mxu0 %v12575_v40  ;;  %12209 = vmatpush3.bf16.msra.mxu1 %v12576_v60  ;;  %v16819_v62 = vld [vmem:[#allocation21_spill] sm:$0xff]  ;;  %v14337_v60 = vpop.f32.mrf.mxu0  ;;  %v16821_v50 = vld [vmem:[#allocation32_spill] sm:$0xff]  ;;  %v10669_v39 = vld [vmem:[%s12723_s11 + $0x44] sm:$0x1] }
 0x182   : > { %v14331_v44 = vadd.f32 %v13910_v47, %v1594_v43  ;;  %v1592_v23 = vadd.f32 %v13912_v14, %v16819_v62  ;;  %v5259_v49 = vshrl.u32 %v14312_v33, 16  ;;  %v5262_v18 = vshll.u32 %v14312_v33, 16  ;;  %12210 = vmatprep.subr.bf16.mxu1 %v12580_v53  ;;  %16820 = vst [vmem:[#allocation4_spill] sm:$0xff] %v14337_v60  ;;  %v14343_v14 = vpop.f32.mrf.mxu1  ;;  %v12588_v60 = vld [vmem:[%s16708_s1 + $0x2d0] sm:$0xff]  }
 0x183   : > { %12080 = vmatprep.mubr.bf16.mxu0 %v10699_v56  ;;  %v5247_v41 = vsel %vm12753_vm2, %v5242_v34, %v14293_v28  ;;  %v5252_v59 = vrot.slane %v5251_v21, 4  ;;  %2377 = vst [vmem:[%s14196_s24 + $0x20] sm:$0xff] %v2345_v5  ;;  %v2408_v47 = vadd.f32 %v2407_v48, %v2345_v5  ;;  %v2447_v7 = vmul.f32 %v2345_v5, %v2345_v5  ;;  %v12583_v48 = vld [vmem:[%s16708_s1 + $0x298] sm:$0xff]   ;;  %v10627_v21 = vld [vmem:[%s12723_s11 + $0x48] sm:$0xf] }
 0x184   : > { %12161 = vmatpush3.bf16.msra.mxu0 %v12575_v40  ;;  %v2449_v20 = vmul.f32 %v14285_v61, %v14285_v61  ;;  %2380 = vst [vmem:[%s14196_s24 + $0x38] sm:$0xff] %v14331_v44  ;;  %v2346_v29 = vadd.f32 %v16821_v50, %v1592_v23  ;;  %v5261_v35 = vrot.slane %v5259_v49, 4  ;;  %v5264_v28 = vrot.slane %v5262_v18, 5  ;;  %v10628_v5 = vld [vmem:[%s12723_s11 + $0x4c] sm:$0xf]  ;;  %v14358_v62 = vpop.f32.mrf.mxu1 }
 0x185   : > { %12162 = vmatprep.subr.bf16.mxu0 %v12579_v42  ;;  %v5257_v40 = vsel %vm12753_vm2, %v5252_v59, %v5256_v8  ;;  %v2478_v43 = vadd.f32 %v2477_v13, %v2447_v7  ;;  %v5268_v56 = vshll.u32 %v10626_v38, 16  ;;  %v5272_v34 = vshrl.u32 %v10626_v38, 16  ;;  %12211 = vmatpush3.bf16.msra.mxu1 %v12580_v53 }
 0x186   : > { %v10700_v23 = vcombine.low %v5247_v41, %v5257_v40  ;;  %2378 = vst [vmem:[%s14196_s24 + $0x28] sm:$0xff] %v2346_v29  ;;  %v2409_v49 = vadd.f32 %v2408_v47, %v2346_v29  ;;  %v2448_v18 = vmul.f32 %v2346_v29, %v2346_v29  ;;  %v5265_v50 = vor.u32 %v5264_v28, %v5261_v35  ;;  %v14364_v30 = vpop.f32.mrf.mxu0  ;;  %v16823_v29 = vld [vmem:[#allocation18_spill] sm:$0xff]  ;;  %v16824_v35 = vld [vmem:[#allocation33_spill] sm:$0xff]  ;;  %v12587_v40 = vld [vmem:[%s16708_s1 + $0x290] sm:$0xff]  }
 0x187   : > { %12212 = vmatprep.subr.bf16.mxu1 %v12584_v45  ;;  %16822 = vst [vmem:[#allocation5_spill] sm:$0xff] %v14364_v30  ;;  %v5270_v8 = vrot.slane %v5268_v56, 5  ;;  %v5274_v13 = vrot.slane %v5272_v34, 4  ;;  %v5278_v59 = vshll.u32 %v10669_v39, 16  ;;  %v10725_v53 = vcombine.low %v14312_v33, %v10626_v38  ;;  %v10670_v33 = vld [vmem:[%s12723_s11 + $0x50] sm:$0x1] }
 0x188   : > { %12163 = vmatpush3.bf16.msra.mxu0 %v12579_v42  ;;  %v2410_v41 = vadd.f32 %v2409_v49, %v14285_v61  ;;  %v2479_v47 = vadd.f32 %v2478_v43, %v2448_v18  ;;  %v5266_v7 = vrot.slane %v5265_v50, 4  ;;  %v1597_v28 = vadd.f32 %v16824_v35, %v16823_v29  ;;  %v14373_v56 = vpop.f32.mrf.mxu0  ;;  %v14376_v61 = vpop.f32.mrf.mxu1  ;;  %v14386_v50 = vld [vmem:[%s16708_s1 + $0x288] sm:$0xff]  }
 0x189   : > { %12081 = vmatmul.mubr.bf16.gmra.mxu0 %v10700_v23  ;;  %12164 = vmatprep.subr.bf16.mxu0 %v12583_v48  ;;  %16825 = vst [vmem:[#allocation27_spill] sm:$0xff] %v14373_v56  ;;  %v5275_v34 = vor.u32 %v5274_v13, %v5270_v8  ;;  %v5280_v39 = vrot.slane %v5278_v59, 5  ;;  %v5283_v42 = vshrl.u32 %v10627_v21, 16  ;;  %v5286_v38 = vshll.u32 %v10627_v21, 16 }
 0x18a   : > { %12132 = vmatprep.mubr.bf16.mxu1 %v10725_v53  ;;  %12213 = vmatpush3.bf16.msra.mxu1 %v12584_v45  ;;  %v2480_v43 = vadd.f32 %v2479_v47, %v2449_v20  ;;  %v5271_v23 = vsel %vm12753_vm2, %v5266_v7, %v5270_v8  ;;  %v14381_v49 = vadd.f32 %v13932_v16, %v1597_v28  ;;  %v5292_v18 = vshll.u32 %v10628_v5, 16  ;;  %v12592_v45 = vld [vmem:[%s16708_s1 + $0x2c8] sm:$0xff]   ;;  %v14391_v13 = vpop.f32.mrf.mxu0 }
 0x18b   : > { %12214 = vmatprep.subr.bf16.mxu1 %v12588_v60  ;;  %16826 = vst [vmem:[#allocation13_spill] sm:$0xff] %v14391_v13  ;;  %v5276_v20 = vrot.slane %v5275_v34, 4  ;;  %v5285_v8 = vrot.slane %v5283_v42, 4  ;;  %v5288_v59 = vrot.slane %v5286_v38, 5  ;;  %v5296_v16 = vshrl.u32 %v10628_v5, 16  ;;  %v16827_v34 = vld [vmem:[#allocation22_spill] sm:$0xff] }
 0x18c   : > { %12165 = vmatpush3.bf16.msra.mxu0 %v12583_v48  ;;  %v2450_v53 = vmul.f32 %v14331_v44, %v14331_v44  ;;  %2383 = vst [vmem:[%s14196_s24 + $0x50] sm:$0xff] %v14381_v49  ;;  %v5294_v47 = vrot.slane %v5292_v18, 5  ;;  %v5302_v7 = vshll.u32 %v10670_v33, 16  ;;  %v10726_v29 = vcombine.low %v10627_v21, %v10628_v5  ;;  %v14402_v38 = vld [vmem:[%s12723_s11 + $0x54] sm:$0xf]  ;;  %v14407_v56 = vpop.f32.mrf.mxu1  ;;  %v14413_v33 = vpop.f32.mrf.mxu0 }
 0x18d   : > { %12166 = vmatprep.subr.bf16.mxu0 %v12587_v40  ;;  %v5281_v35 = vsel %vm12753_vm2, %v5276_v20, %v5280_v39  ;;  %v5289_v28 = vor.u32 %v5288_v59, %v5285_v8  ;;  %v5298_v13 = vrot.slane %v5296_v16, 4  ;;  %v1595_v42 = vadd.f32 %v13928_v19, %v16827_v34  ;;  %v14405_v48 = vld [vmem:[%s12723_s11 + $0x58] sm:$0xf]  ;;  %v12596_v39 = vld [vmem:[%s16708_s1 + $0x2c0] sm:$0xff]   ;;  %v16828_v8 = vld [vmem:[#allocation23_spill] sm:$0xff] }
 0x18e   : > { %12215 = vmatpush3.bf16.msra.mxu1 %v12588_v60  ;;  %v10701_v30 = vcombine.low %v5271_v23, %v5281_v35  ;;  %v5304_v18 = vrot.slane %v5302_v7, 5  ;;  %v2411_v21 = vadd.f32 %v2410_v41, %v14331_v44  ;;  %v2481_v5 = vadd.f32 %v2480_v43, %v2450_v53  ;;  %v14418_v59 = vpop.f32.mrf.mxu1  ;;  %v16829_v44 = vld [vmem:[#allocation28_spill] sm:$0xff]  ;;  %v10671_v53 = vld [vmem:[%s12723_s11 + $0x5c] sm:$0x1] }
 0x18f   : > { %12133 = vmatmul.mubr.bf16.gmra.mxu1 %v10726_v29  ;;  %12216 = vmatprep.subr.bf16.mxu1 %v12592_v45  ;;  %v5290_v19 = vrot.slane %v5289_v28, 4  ;;  %v5299_v20 = vor.u32 %v5298_v13, %v5294_v47  ;;  %v2349_v60 = vadd.f32 %v13951_v17, %v1595_v42  ;;  %v1598_v23 = vadd.f32 %v13936_v51, %v16828_v8  ;;  %v12595_v51 = vld [vmem:[%s16708_s1 + $0x280] sm:$0xff]   ;;  %v16830_v29 = vld [vmem:[#allocation37_spill] sm:$0xff] }
 0x190   : > { %12167 = vmatpush3.bf16.msra.mxu0 %v12587_v40  ;;  %12084 = vmatprep.mubr.bf16.mxu0 %v10701_v30  ;;  %v1596_v41 = vadd.f32 %v13956_v9, %v16829_v44  ;;  %v5307_v43 = vshrl.u32 %v14402_v38, 16  ;;  %v5310_v16 = vshll.u32 %v14402_v38, 16  ;;  %v5316_v13 = vshll.u32 %v14405_v48, 16  ;;  %v14433_v7 = vpop.f32.mrf.mxu1  ;;  %v14440_v8 = vld [vmem:[%s12723_s11 + $0x60] sm:$0xf] }
 0x191   : > { %12168 = vmatprep.subr.bf16.mxu0 %v14386_v50  ;;  %v5295_v17 = vsel %vm12753_vm2, %v5290_v19, %v5294_v47  ;;  %v5300_v30 = vrot.slane %v5299_v20, 4  ;;  %2381 = vst [vmem:[%s14196_s24 + $0x40] sm:$0xff] %v2349_v60  ;;  %v2412_v40 = vadd.f32 %v2411_v21, %v2349_v60  ;;  %v2451_v9 = vmul.f32 %v2349_v60, %v2349_v60  ;;  %v12600_v47 = vld [vmem:[%s16708_s1 + $0x338] sm:$0xff]   ;;  %v10632_v60 = vld [vmem:[%s12723_s11 + $0x64] sm:$0xf] }
 0x192   : > { %12217 = vmatpush3.bf16.msra.mxu1 %v12592_v45  ;;  %v14436_v35 = vadd.f32 %v16830_v29, %v1598_v23  ;;  %v2350_v28 = vadd.f32 %v13972_v11, %v1596_v41  ;;  %v5309_v34 = vrot.slane %v5307_v43, 4  ;;  %v5312_v42 = vrot.slane %v5310_v16, 5  ;;  %v14445_v21 = vpop.f32.mrf.mxu0  ;;  %v14455_v23 = vld [vmem:[%s16708_s1 + $0x378] sm:$0xff]  }
 0x193   : > { %12218 = vmatprep.subr.bf16.mxu1 %v12596_v39  ;;  %16831 = vst [vmem:[#allocation26_spill] sm:$0xff] %v14445_v21  ;;  %v5305_v45 = vsel %vm12753_vm2, %v5300_v30, %v5304_v18  ;;  %v2482_v19 = vadd.f32 %v2481_v5, %v2451_v9  ;;  %v5318_v20 = vrot.slane %v5316_v13, 5  ;;  %v5320_v11 = vshrl.u32 %v14405_v48, 16  ;;  %v14466_v9 = vpop.f32.mrf.mxu1 }
 0x194   : > { %12169 = vmatpush3.bf16.msra.mxu0 %v14386_v50  ;;  %v2453_v44 = vmul.f32 %v14381_v49, %v14381_v49  ;;  %v10702_v41 = vcombine.low %v5295_v17, %v5305_v45  ;;  %2384 = vst [vmem:[%s14196_s24 + $0x58] sm:$0xff] %v14436_v35  ;;  %2382 = vst [vmem:[%s14196_s24 + $0x48] sm:$0xff] %v2350_v28  ;;  %v2413_v18 = vadd.f32 %v2412_v40, %v2350_v28  ;;  %v14462_v43 = vpop.f32.mrf.mxu0  ;;  %v16834_v45 = vld [vmem:[#allocation25_spill] sm:$0xff] }
 0x195   : > { %v2452_v5 = vmul.f32 %v2350_v28, %v2350_v28  ;;  %12170 = vmatprep.subr.bf16.mxu0 %v12595_v51  ;;  %16832 = vst [vmem:[#allocation9_spill] sm:$0xff] %v14462_v43  ;;  %v5313_v16 = vor.u32 %v5312_v42, %v5309_v34  ;;  %v5322_v13 = vrot.slane %v5320_v11, 4  ;;  %v5326_v50 = vshll.u32 %v10671_v53, 16  ;;  %16833 = vst [vmem:[#allocation14_spill] sm:$0xff] %v14466_v9 }
 0x196   : > { %v10727_v30 = vcombine.low %v14402_v38, %v14405_v48  ;;  %12219 = vmatpush3.bf16.msra.mxu1 %v12596_v39  ;;  %12085 = vmatmul.mubr.bf16.gmra.mxu0 %v10702_v41  ;;  %v2414_v17 = vadd.f32 %v2413_v18, %v14381_v49  ;;  %v1601_v40 = vadd.f32 %v13970_v25, %v16834_v45  ;;  %v5331_v28 = vshrl.u32 %v14440_v8, 16  ;;  %v14472_v34 = vpop.f32.mrf.mxu0  ;;  %v10672_v38 = vld [vmem:[%s12723_s11 + $0x68] sm:$0x1]  ;;  %v16836_v39 = vld [vmem:[#allocation40_spill] sm:$0xff] }
 0x197   : > { %v2483_v29 = vadd.f32 %v2482_v19, %v2452_v5  ;;  %12300 = vmatprep.subr.bf16.mxu1 %v12600_v47  ;;  %16835 = vst [vmem:[#allocation15_spill] sm:$0xff] %v14472_v34  ;;  %v5314_v42 = vrot.slane %v5313_v16, 4  ;;  %v5323_v53 = vor.u32 %v5322_v13, %v5318_v20  ;;  %v5328_v11 = vrot.slane %v5326_v50, 5  ;;  %v14483_v13 = vld [vmem:[%s12723_s11 + $0x6c] sm:$0xf] }
 0x198   : > { %12136 = vmatprep.mubr.bf16.mxu1 %v10727_v30  ;;  %v5334_v48 = vshll.u32 %v14440_v8, 16  ;;  %12171 = vmatpush3.bf16.msra.mxu0 %v12595_v51  ;;  %v14477_v19 = vadd.f32 %v16836_v39, %v1601_v40  ;;  %v5333_v25 = vrot.slane %v5331_v28, 4  ;;  %v5340_v41 = vshll.u32 %v10632_v60, 16  ;;  %v14485_v50 = vpop.f32.mrf.mxu1  ;;  %v14492_v45 = vpop.f32.mrf.mxu0  ;;  %v10634_v39 = vld [vmem:[%s12723_s11 + $0x70] sm:$0xf] }
 0x199   : > { %v2484_v49 = vadd.f32 %v2483_v29, %v2453_v44  ;;  %12252 = vmatprep.subr.bf16.mxu0 %v14455_v23  ;;  %v5319_v47 = vsel %vm12753_vm2, %v5314_v42, %v5318_v20  ;;  %v5324_v18 = vrot.slane %v5323_v53, 4  ;;  %v5344_v16 = vshrl.u32 %v10632_v60, 16  ;;  %16837 = vst [vmem:[#allocation21_spill] sm:$0xff] %v14485_v50  ;;  %16838 = vst [vmem:[#allocation32_spill] sm:$0xff] %v14492_v45  ;;  %v16839_v42 = vld [vmem:[#allocation29_spill] sm:$0xff]  ;;  %v16840_v53 = vld [vmem:[#allocation38_spill] sm:$0xff] }
 0x19a   : > { %v5336_v5 = vrot.slane %v5334_v48, 5  ;;  %v2454_v51 = vmul.f32 %v14436_v35, %v14436_v35  ;;  %2387 = vst [vmem:[%s14196_s24 + $0x70] sm:$0xff] %v14477_v19  ;;  %v5342_v44 = vrot.slane %v5340_v41, 5  ;;  %v5350_v30 = vshll.u32 %v10672_v38, 16  ;;  %v14499_v34 = vpop.f32.mrf.mxu1  ;;  %v16842_v45 = vld [vmem:[#allocation42_spill] sm:$0xff] }
 0x19b   : > { %v10728_v29 = vcombine.low %v14440_v8, %v10632_v60  ;;  %v5329_v20 = vsel %vm12753_vm2, %v5324_v18, %v5328_v11  ;;  %v5346_v28 = vrot.slane %v5344_v16, 4  ;;  %v1599_v48 = vadd.f32 %v16840_v53, %v16839_v42  ;;  %16841 = vst [vmem:[#allocation18_spill] sm:$0xff] %v14499_v34  ;;  %v16843_v11 = vld [vmem:[#allocation30_spill] sm:$0xff]  ;;  %v16847_v42 = vld [vmem:[#allocation43_spill] sm:$0xff] }
 0x19c   : > { %v5337_v40 = vor.u32 %v5336_v5, %v5333_v25  ;;  %v10703_v43 = vcombine.low %v5319_v47, %v5329_v20  ;;  %v5352_v50 = vrot.slane %v5350_v30, 5  ;;  %v2415_v38 = vadd.f32 %v2414_v17, %v14436_v35  ;;  %v16844_v25 = vld [vmem:[#allocation41_spill] sm:$0xff]  ;;  %v14505_v5 = vpop.f32.mrf.mxu1  ;;  %v16846_v16 = vld [vmem:[#allocation34_spill] sm:$0xff] }
 0x19d   : > { %12137 = vmatmul.mubr.bf16.gmra.mxu1 %v10728_v29  ;;  %v2485_v8 = vadd.f32 %v2484_v49, %v2454_v51  ;;  %v5347_v41 = vor.u32 %v5346_v28, %v5342_v44  ;;  %v2353_v21 = vadd.f32 %v16842_v45, %v1599_v48  ;;  %v1602_v18 = vadd.f32 %v16844_v25, %v16843_v11  ;;  %v16850_v28 = vld [vmem:[#allocation46_spill] sm:$0xff]  ;;  %v10673_v48 = vld [vmem:[%s12723_s11 + $0x74] sm:$0x1] }
 0x19e   : > { %v5338_v60 = vrot.slane %v5337_v40, 4  ;;  %16845 = vst [vmem:[#allocation33_spill] sm:$0xff] %v14505_v5  ;;  %12088 = vmatprep.mubr.bf16.mxu0 %v10703_v43  ;;  %v1600_v47 = vadd.f32 %v16847_v42, %v16846_v16  ;;  %v5355_v30 = vshrl.u32 %v14483_v13, 16  ;;  %v5358_v29 = vshll.u32 %v14483_v13, 16  ;;  %v14511_v17 = vpop.f32.mrf.mxu0  ;;  %v16849_v43 = vld [vmem:[#allocation44_spill] sm:$0xff] }
 0x19f   : > { %v5364_v35 = vshll.u32 %v10634_v39, 16  ;;  %16848 = vst [vmem:[#allocation22_spill] sm:$0xff] %v14511_v17  ;;  %v5348_v51 = vrot.slane %v5347_v41, 4  ;;  %2385 = vst [vmem:[%s14196_s24 + $0x60] sm:$0xff] %v2353_v21  ;;  %v2416_v45 = vadd.f32 %v2415_v38, %v2353_v21  ;;  %v2455_v20 = vmul.f32 %v2353_v21, %v2353_v21  ;;  %v10635_v38 = vld [vmem:[%s12723_s11 + $0x78] sm:$0xf]  ;;  %v14524_v17 = vpop.f32.mrf.mxu1 }
 0x1a0   : > { %v5343_v49 = vsel %vm12753_vm2, %v5338_v60, %v5342_v44  ;;  %v2356_v40 = vadd.f32 %v16849_v43, %v1602_v18  ;;  %v2354_v53 = vadd.f32 %v16850_v28, %v1600_v47  ;;  %v5357_v11 = vrot.slane %v5355_v30, 4  ;;  %v14519_v16 = vpop.f32.mrf.mxu0  ;;  %16852 = vst [vmem:[#allocation28_spill] sm:$0xff] %v14524_v17  ;;  %v16855_v17 = vld [vmem:[#allocation45_spill] sm:$0xff] }
 0x1a1   : > { %v5360_v25 = vrot.slane %v5358_v29, 5  ;;  %16851 = vst [vmem:[#allocation23_spill] sm:$0xff] %v14519_v16  ;;  %v5353_v42 = vsel %vm12753_vm2, %v5348_v51, %v5352_v50  ;;  %v2486_v44 = vadd.f32 %v2485_v8, %v2455_v20  ;;  %v5366_v60 = vrot.slane %v5364_v35, 5  ;;  %v10636_v29 = vld [vmem:[%s12723_s11 + $0x7c] sm:$0xf]  ;;  %v16854_v16 = vld [vmem:[#allocation31_spill] sm:$0xff] }
 0x1a2   : > { %v5368_v41 = vshrl.u32 %v10634_v39, 16  ;;  %v2457_v21 = vmul.f32 %v14477_v19, %v14477_v19  ;;  %v10704_v18 = vcombine.low %v5343_v49, %v5353_v42  ;;  %2388 = vst [vmem:[%s14196_s24 + $0x78] sm:$0xff] %v2356_v40  ;;  %2386 = vst [vmem:[%s14196_s24 + $0x68] sm:$0xff] %v2354_v53  ;;  %v2417_v47 = vadd.f32 %v2416_v45, %v2354_v53  ;;  %v14531_v43 = vpop.f32.mrf.mxu0 }
 0x1a3   : > { %v2456_v30 = vmul.f32 %v2354_v53, %v2354_v53  ;;  %16853 = vst [vmem:[#allocation37_spill] sm:$0xff] %v14531_v43  ;;  %v5361_v28 = vor.u32 %v5360_v25, %v5357_v11  ;;  %v5374_v8 = vshll.u32 %v10673_v48, 16  ;;  %v10729_v35 = vcombine.low %v14483_v13, %v10634_v39  ;;  %v10674_v43 = vld [vmem:[%s12723_s11 + $0x80] sm:$0x1] }
 0x1a4   : > { %v5370_v50 = vrot.slane %v5368_v41, 4  ;;  %12089 = vmatmul.mubr.bf16.gmra.mxu0 %v10704_v18  ;;  %v2418_v51 = vadd.f32 %v2417_v47, %v14477_v19  ;;  %v1605_v49 = vadd.f32 %v16855_v17, %v16854_v16  ;;  %v5379_v42 = vshrl.u32 %v10635_v38, 16  ;;  %v14538_v48 = vpop.f32.mrf.mxu1  ;;  %v16857_v39 = vld [vmem:[#allocation10_spill] sm:$0xff]  ;;  %v14543_v41 = vpop.f32.mrf.mxu0 }
 0x1a5   : > { %v2487_v20 = vadd.f32 %v2486_v44, %v2456_v30  ;;  %v5362_v5 = vrot.slane %v5361_v28, 4  ;;  %v5376_v53 = vrot.slane %v5374_v8, 5  ;;  %12140 = vmatprep.mubr.bf16.mxu1 %v10729_v35  ;;  %v5382_v11 = vshll.u32 %v10635_v38, 16  ;;  %16856 = vst [vmem:[#allocation25_spill] sm:$0xff] %v14538_v48  ;;  %16858 = vst [vmem:[#allocation40_spill] sm:$0xff] %v14543_v41 }
 0x1a6   : > { %v5371_v45 = vor.u32 %v5370_v50, %v5366_v60  ;;  %v14541_v25 = vadd.f32 %v16857_v39, %v1605_v49  ;;  %v5381_v19 = vrot.slane %v5379_v42, 4  ;;  %v5388_v44 = vshll.u32 %v10636_v29, 16  ;;  %v14548_v30 = vld [vmem:[%s12723_s11 + $0x84] sm:$0xf]  ;;  %v14551_v28 = vld [vmem:[%s12723_s11 + $0x88] sm:$0xf]  ;;  %v14553_v50 = vpop.f32.mrf.mxu1 }
 0x1a7   : > { %v2488_v13 = vadd.f32 %v2487_v20, %v2457_v21  ;;  %v5367_v17 = vsel %vm12753_vm2, %v5362_v5, %v5366_v60  ;;  %v5384_v18 = vrot.slane %v5382_v11, 5  ;;  %v5392_v47 = vshrl.u32 %v10636_v29, 16  ;;  %16859 = vst [vmem:[#allocation29_spill] sm:$0xff] %v14553_v50  ;;  %v16860_v60 = vld [vmem:[#allocation35_spill] sm:$0xff] }
 0x1a8   : > { %v5372_v16 = vrot.slane %v5371_v45, 4  ;;  %v2458_v21 = vmul.f32 %v2356_v40, %v2356_v40  ;;  %2391 = vst [vmem:[%s14196_s24 + $0x90] sm:$0xff] %v14541_v25  ;;  %v5390_v8 = vrot.slane %v5388_v44, 5  ;;  %v5398_v35 = vshll.u32 %v10674_v43, 16  ;;  %v16861_v45 = vld [vmem:[#allocation12_spill] sm:$0xff]  ;;  %v14561_v39 = vpop.f32.mrf.mxu1 }
 0x1a9   : > { %v10730_v20 = vcombine.low %v10635_v38, %v10636_v29  ;;  %v5385_v42 = vor.u32 %v5384_v18, %v5381_v19  ;;  %v5394_v5 = vrot.slane %v5392_v47, 4  ;;  %v1603_v11 = vadd.f32 %v16861_v45, %v16860_v60  ;;  %v16863_v19 = vld [vmem:[#allocation47_spill] sm:$0xff] }
 0x1aa   : > { %v5377_v49 = vsel %vm12753_vm2, %v5372_v16, %v5376_v53  ;;  %v5400_v48 = vrot.slane %v5398_v35, 5  ;;  %v2419_v50 = vadd.f32 %v2418_v51, %v2356_v40  ;;  %v2489_v34 = vadd.f32 %v2488_v13, %v2458_v21  ;;  %v14563_v9 = vpop.f32.mrf.mxu0  ;;  %v16862_v53 = vld [vmem:[#allocation36_spill] sm:$0xff]  ;;  %v16864_v16 = vld [vmem:[#allocation7_spill] sm:$0xff]  ;;  %v14578_v35 = vpop.f32.mrf.mxu1 }
 0x1ab   : > { %v10705_v41 = vcombine.low %v5367_v17, %v5377_v49  ;;  %12141 = vmatmul.mubr.bf16.gmra.mxu1 %v10730_v20  ;;  %v5386_v43 = vrot.slane %v5385_v42, 4  ;;  %v5395_v38 = vor.u32 %v5394_v5, %v5390_v8  ;;  %v2357_v29 = vadd.f32 %v14038_v3, %v1603_v11  ;;  %v16865_v20 = vld [vmem:[#allocation50_spill] sm:$0xff]  ;;  %v10675_v42 = vld [vmem:[%s12723_s11 + $0x8c] sm:$0x1] }
 0x1ac   : > { %v1606_v44 = vadd.f32 %v16863_v19, %v16862_v53  ;;  %v1604_v18 = vadd.f32 %v14040_v54, %v16864_v16  ;;  %v5403_v17 = vshrl.u32 %v14548_v30, 16  ;;  %v5406_v47 = vshll.u32 %v14548_v30, 16  ;;  %v14573_v51 = vpop.f32.mrf.mxu0 }
 0x1ad   : > { %12092 = vmatprep.mubr.bf16.mxu0 %v10705_v41  ;;  %v5412_v40 = vshll.u32 %v14551_v28, 16  ;;  %v5391_v13 = vsel %vm12753_vm2, %v5386_v43, %v5390_v8  ;;  %v5396_v3 = vrot.slane %v5395_v38, 4  ;;  %2389 = vst [vmem:[%s14196_s24 + $0x80] sm:$0xff] %v2357_v29  ;;  %v2420_v21 = vadd.f32 %v2419_v50, %v2357_v29  ;;  %v10639_v38 = vld [vmem:[%s12723_s11 + $0x90] sm:$0xf] }
 0x1ae   : > { %v2459_v41 = vmul.f32 %v2357_v29, %v2357_v29  ;;  %v2360_v54 = vadd.f32 %v14043_v57, %v1606_v44  ;;  %v2358_v49 = vadd.f32 %v16865_v20, %v1604_v18  ;;  %v5405_v5 = vrot.slane %v5403_v17, 4  ;;  %v14583_v45 = vpop.f32.mrf.mxu0  ;;  %v10640_v44 = vld [vmem:[%s12723_s11 + $0x94] sm:$0xf] }
 0x1af   : > { %v5408_v60 = vrot.slane %v5406_v47, 5  ;;  %16866 = vst [vmem:[#allocation38_spill] sm:$0xff] %v14583_v45  ;;  %v5401_v8 = vsel %vm12753_vm2, %v5396_v3, %v5400_v48  ;;  %v5414_v11 = vrot.slane %v5412_v40, 5  ;;  %v5416_v43 = vshrl.u32 %v14551_v28, 16 }
 0x1b0   : > { %v2490_v50 = vadd.f32 %v2489_v34, %v2459_v41  ;;  %v2461_v57 = vmul.f32 %v14541_v25, %v14541_v25  ;;  %v10706_v29 = vcombine.low %v5391_v13, %v5401_v8  ;;  %2392 = vst [vmem:[%s14196_s24 + $0x98] sm:$0xff] %v2360_v54  ;;  %2390 = vst [vmem:[%s14196_s24 + $0x88] sm:$0xff] %v2358_v49  ;;  %v5422_v17 = vshll.u32 %v10675_v42, 16  ;;  %v10676_v34 = vld [vmem:[%s12723_s11 + $0x98] sm:$0x1]  ;;  %v14597_v47 = vpop.f32.mrf.mxu1  ;;  %v16867_v41 = vld [vmem:[#allocation39_spill] sm:$0xff] }
 0x1b1   : > { %v2421_v53 = vadd.f32 %v2420_v21, %v2358_v49  ;;  %v2460_v19 = vmul.f32 %v2358_v49, %v2358_v49  ;;  %v5409_v16 = vor.u32 %v5408_v60, %v5405_v5  ;;  %v5418_v18 = vrot.slane %v5416_v43, 4  ;;  %v16868_v13 = vld [vmem:[#allocation49_spill] sm:$0xff]  ;;  %v14602_v21 = vpop.f32.mrf.mxu0 }
 0x1b2   : > { %v10731_v48 = vcombine.low %v14548_v30, %v14551_v28  ;;  %12093 = vmatmul.mubr.bf16.gmra.mxu0 %v10706_v29  ;;  %v1609_v20 = vadd.f32 %v16868_v13, %v16867_v41  ;;  %v5427_v8 = vshrl.u32 %v10639_v38, 16  ;;  %16869 = vst [vmem:[#allocation42_spill] sm:$0xff] %v14602_v21  ;;  %v5424_v42 = vrot.slane %v5422_v17, 5  ;;  %v14604_v28 = vpop.f32.mrf.mxu1 }
 0x1b3   : > { %v2422_v40 = vadd.f32 %v2421_v53, %v14541_v25  ;;  %v2491_v3 = vadd.f32 %v2490_v50, %v2460_v19  ;;  %v5410_v49 = vrot.slane %v5409_v16, 4  ;;  %v5419_v5 = vor.u32 %v5418_v18, %v5414_v11  ;;  %16870 = vst [vmem:[#allocation30_spill] sm:$0xff] %v14604_v28  ;;  %v14612_v18 = vld [vmem:[%s12723_s11 + $0x9c] sm:$0xf] }
 0x1b4   : > { %12144 = vmatprep.mubr.bf16.mxu1 %v10731_v48  ;;  %v5430_v30 = vshll.u32 %v10639_v38, 16  ;;  %v14607_v43 = vadd.f32 %v14064_v4, %v1609_v20  ;;  %v5429_v25 = vrot.slane %v5427_v8, 4  ;;  %v5436_v50 = vshll.u32 %v10640_v44, 16  ;;  %v14614_v17 = vpop.f32.mrf.mxu1  ;;  %v16872_v8 = vld [vmem:[#allocation6_spill] sm:$0xff] }
 0x1b5   : > { %v2492_v60 = vadd.f32 %v2491_v3, %v2461_v57  ;;  %v5415_v29 = vsel %vm12753_vm2, %v5410_v49, %v5414_v11  ;;  %v5420_v53 = vrot.slane %v5419_v5, 4  ;;  %v5440_v16 = vshrl.u32 %v10640_v44, 16  ;;  %16871 = vst [vmem:[#allocation41_spill] sm:$0xff] %v14614_v17  ;;  %v16873_v49 = vld [vmem:[#allocation51_spill] sm:$0xff] }
 0x1b6   : > { %v5432_v19 = vrot.slane %v5430_v30, 5  ;;  %v2462_v48 = vmul.f32 %v2360_v54, %v2360_v54  ;;  %2395 = vst [vmem:[%s14196_s24 + $0xb0] sm:$0xff] %v14607_v43  ;;  %v5438_v57 = vrot.slane %v5436_v50, 5  ;;  %v5446_v3 = vshll.u32 %v10676_v34, 16  ;;  %v14618_v41 = vpop.f32.mrf.mxu0  ;;  %v10642_v30 = vld [vmem:[%s12723_s11 + $0xa0] sm:$0xf] }
 0x1b7   : > { %v10732_v4 = vcombine.low %v10639_v38, %v10640_v44  ;;  %v5425_v13 = vsel %vm12753_vm2, %v5420_v53, %v5424_v42  ;;  %v5442_v20 = vrot.slane %v5440_v16, 4  ;;  %v1607_v5 = vadd.f32 %v16873_v49, %v16872_v8  ;;  %v16874_v42 = vld [vmem:[#allocation8_spill] sm:$0xff]  ;;  %v14630_v53 = vpop.f32.mrf.mxu1 }
 0x1b8   : > { %v5433_v11 = vor.u32 %v5432_v19, %v5429_v25  ;;  %v10707_v21 = vcombine.low %v5415_v29, %v5425_v13  ;;  %v5448_v45 = vrot.slane %v5446_v3, 5  ;;  %v2423_v17 = vadd.f32 %v2422_v40, %v2360_v54  ;;  %v14625_v50 = vpop.f32.mrf.mxu0 }
 0x1b9   : > { %12145 = vmatmul.mubr.bf16.gmra.mxu1 %v10732_v4  ;;  %v2493_v28 = vadd.f32 %v2492_v60, %v2462_v48  ;;  %v5443_v44 = vor.u32 %v5442_v20, %v5438_v57  ;;  %v2361_v34 = vadd.f32 %v14071_v12, %v1607_v5  ;;  %v1610_v25 = vadd.f32 %v14066_v55, %v16874_v42 }
 0x1ba   : > { %v5434_v38 = vrot.slane %v5433_v11, 4  ;;  %12096 = vmatprep.mubr.bf16.mxu0 %v10707_v21  ;;  %v1608_v29 = vadd.f32 %v14073_v2, %v14077_v6  ;;  %v5451_v19 = vshrl.u32 %v14612_v18, 16  ;;  %v5454_v54 = vshll.u32 %v14612_v18, 16  ;;  %v10677_v2 = vld [vmem:[%s12723_s11 + $0xa4] sm:$0x1]  ;;  %v14642_v4 = vpop.f32.mrf.mxu0 }
 0x1bb   : > { %v5460_v40 = vshll.u32 %v10642_v30, 16  ;;  %v5444_v16 = vrot.slane %v5443_v44, 4  ;;  %2393 = vst [vmem:[%s14196_s24 + $0xa0] sm:$0xff] %v2361_v34  ;;  %v2424_v12 = vadd.f32 %v2423_v17, %v2361_v34  ;;  %v2463_v55 = vmul.f32 %v2361_v34, %v2361_v34  ;;  %v10643_v17 = vld [vmem:[%s12723_s11 + $0xa8] sm:$0xf] }
 0x1bc   : > { %v5439_v60 = vsel %vm12753_vm2, %v5434_v38, %v5438_v57  ;;  %v2364_v21 = vadd.f32 %v14092_v26, %v1610_v25  ;;  %v2362_v48 = vadd.f32 %v14103_v58, %v1608_v29  ;;  %v5453_v6 = vrot.slane %v5451_v19, 4  ;;  %v14647_v8 = vpop.f32.mrf.mxu1  ;;  %v16875_v19 = vld [vmem:[#allocation48_spill] sm:$0xff] }
 0x1bd   : > { %v5456_v3 = vrot.slane %v5454_v54, 5  ;;  %v5449_v13 = vsel %vm12753_vm2, %v5444_v16, %v5448_v45  ;;  %v2494_v57 = vadd.f32 %v2493_v28, %v2463_v55  ;;  %v5462_v11 = vrot.slane %v5460_v40, 5  ;;  %v10644_v28 = vld [vmem:[%s12723_s11 + $0xac] sm:$0xf]  ;;  %v16876_v54 = vld [vmem:[#allocation52_spill] sm:$0xff]  ;;  %v14660_v16 = vpop.f32.mrf.mxu0 }
 0x1be   : > { %v5464_v20 = vshrl.u32 %v10642_v30, 16  ;;  %v2465_v26 = vmul.f32 %v14607_v43, %v14607_v43  ;;  %v10708_v49 = vcombine.low %v5439_v60, %v5449_v13  ;;  %2396 = vst [vmem:[%s14196_s24 + $0xb8] sm:$0xff] %v2364_v21  ;;  %2394 = vst [vmem:[%s14196_s24 + $0xa8] sm:$0xff] %v2362_v48  ;;  %v2425_v58 = vadd.f32 %v2424_v12, %v2362_v48  ;;  %v14655_v42 = vpop.f32.mrf.mxu1 }
 0x1bf   : > { %v2464_v5 = vmul.f32 %v2362_v48, %v2362_v48  ;;  %v5457_v38 = vor.u32 %v5456_v3, %v5453_v6  ;;  %v5470_v34 = vshll.u32 %v10677_v2, 16  ;;  %v10733_v45 = vcombine.low %v14612_v18, %v10642_v30  ;;  %16877 = vst [vmem:[#allocation34_spill] sm:$0xff] %v14660_v16  ;;  %v10678_v2 = vld [vmem:[%s12723_s11 + $0xb0] sm:$0x1]  ;;  %v16879_v3 = vld [vmem:[#allocation54_spill] sm:$0xff] }
 0x1c0   : > { %v5466_v44 = vrot.slane %v5464_v20, 4  ;;  %12097 = vmatmul.mubr.bf16.gmra.mxu0 %v10708_v49  ;;  %v2426_v25 = vadd.f32 %v2425_v58, %v14607_v43  ;;  %v1613_v40 = vadd.f32 %v16876_v54, %v16875_v19  ;;  %v5475_v60 = vshrl.u32 %v10643_v17, 16  ;;  %v14663_v30 = vpop.f32.mrf.mxu1 }
 0x1c1   : > { %v2495_v29 = vadd.f32 %v2494_v57, %v2464_v5  ;;  %v5458_v12 = vrot.slane %v5457_v38, 4  ;;  %v5472_v48 = vrot.slane %v5470_v34, 5  ;;  %12148 = vmatprep.mubr.bf16.mxu1 %v10733_v45  ;;  %v5478_v18 = vshll.u32 %v10643_v17, 16  ;;  %16878 = vst [vmem:[#allocation43_spill] sm:$0xff] %v14663_v30 }
 0x1c2   : > { %v5467_v55 = vor.u32 %v5466_v44, %v5462_v11  ;;  %v14666_v13 = vadd.f32 %v16879_v3, %v1613_v40  ;;  %v5477_v43 = vrot.slane %v5475_v60, 4  ;;  %v5484_v57 = vshll.u32 %v10644_v28, 16  ;;  %v16881_v40 = vld [vmem:[#allocation11_spill] sm:$0xff]  ;;  %v16882_v60 = vld [vmem:[#allocation53_spill] sm:$0xff] }
 0x1c3   : > { %v2496_v6 = vadd.f32 %v2495_v29, %v2465_v26  ;;  %v5463_v20 = vsel %vm12753_vm2, %v5458_v12, %v5462_v11  ;;  %v5480_v58 = vrot.slane %v5478_v18, 5  ;;  %v5488_v5 = vshrl.u32 %v10644_v28, 16  ;;  %v14672_v26 = vpop.f32.mrf.mxu0  ;;  %v10645_v11 = vld [vmem:[%s12723_s11 + $0xb4] sm:$0xf]  ;;  %v10646_v12 = vld [vmem:[%s12723_s11 + $0xb8] sm:$0xf] }
 0x1c4   : > { %v5468_v49 = vrot.slane %v5467_v55, 4  ;;  %v2466_v38 = vmul.f32 %v2364_v21, %v2364_v21  ;;  %2399 = vst [vmem:[%s14196_s24 + $0xd0] sm:$0xff] %v14666_v13  ;;  %v5486_v44 = vrot.slane %v5484_v57, 5  ;;  %v5494_v34 = vshll.u32 %v10678_v2, 16  ;;  %16880 = vst [vmem:[#allocation44_spill] sm:$0xff] %v14672_v26  ;;  %v14680_v55 = vpop.f32.mrf.mxu1  ;;  %v16884_v26 = vld [vmem:[#allocation57_spill] sm:$0xff] }
 0x1c5   : > { %v10734_v45 = vcombine.low %v10643_v17, %v10644_v28  ;;  %v5481_v19 = vor.u32 %v5480_v58, %v5477_v43  ;;  %v5490_v54 = vrot.slane %v5488_v5, 4  ;;  %v1611_v3 = vadd.f32 %v16882_v60, %v16881_v40  ;;  %16883 = vst [vmem:[#allocation46_spill] sm:$0xff] %v14680_v55  ;;  %v16886_v43 = vld [vmem:[#allocation55_spill] sm:$0xff]  ;;  %v16888_v5 = vld [vmem:[#allocation58_spill] sm:$0xff] }
 0x1c6   : > { %v5473_v29 = vsel %vm12753_vm2, %v5468_v49, %v5472_v48  ;;  %v5496_v16 = vrot.slane %v5494_v34, 5  ;;  %v2427_v2 = vadd.f32 %v2426_v25, %v2364_v21  ;;  %v2497_v17 = vadd.f32 %v2496_v6, %v2466_v38  ;;  %v16885_v48 = vld [vmem:[#allocation16_spill] sm:$0xff]  ;;  %v16887_v58 = vld [vmem:[#allocation19_spill] sm:$0xff]  ;;  %v14687_v34 = vpop.f32.mrf.mxu0 }
 0x1c7   : > { %v10709_v18 = vcombine.low %v5463_v20, %v5473_v29  ;;  %12149 = vmatmul.mubr.bf16.gmra.mxu1 %v10734_v45  ;;  %v5482_v28 = vrot.slane %v5481_v19, 4  ;;  %v5491_v57 = vor.u32 %v5490_v54, %v5486_v44  ;;  %v2365_v30 = vadd.f32 %v16884_v26, %v1611_v3  ;;  %16889 = vst [vmem:[#allocation31_spill] sm:$0xff] %v14687_v34  ;;  %v16890_v26 = vld [vmem:[#allocation59_spill] sm:$0xff]  ;;  %v16891_v19 = vld [vmem:[#allocation61_spill] sm:$0xff] }
 0x1c8   : > { %v1614_v49 = vadd.f32 %v16886_v43, %v16885_v48  ;;  %v1612_v40 = vadd.f32 %v16888_v5, %v16887_v58  ;;  %v5499_v60 = vshrl.u32 %v10645_v11, 16  ;;  %v5502_v55 = vshll.u32 %v10645_v11, 16  ;;  %v14692_v45 = vpop.f32.mrf.mxu1  ;;  %v10679_v3 = vld [vmem:[%s12723_s11 + $0xbc] sm:$0x1] }
 0x1c9   : > { %12100 = vmatprep.mubr.bf16.mxu0 %v10709_v18  ;;  %v5508_v20 = vshll.u32 %v10646_v12, 16  ;;  %v5487_v21 = vsel %vm12753_vm2, %v5482_v28, %v5486_v44  ;;  %v5492_v25 = vrot.slane %v5491_v57, 4  ;;  %2397 = vst [vmem:[%s14196_s24 + $0xc0] sm:$0xff] %v2365_v30  ;;  %v2428_v6 = vadd.f32 %v2427_v2, %v2365_v30  ;;  %v10647_v2 = vld [vmem:[%s12723_s11 + $0xc0] sm:$0xf] }
 0x1ca   : > { %v2467_v38 = vmul.f32 %v2365_v30, %v2365_v30  ;;  %v2368_v29 = vadd.f32 %v16890_v26, %v1614_v49  ;;  %v2366_v54 = vadd.f32 %v16891_v19, %v1612_v40  ;;  %v5501_v18 = vrot.slane %v5499_v60, 4  ;;  %v14700_v57 = vpop.f32.mrf.mxu1  ;;  %v14706_v60 = vpop.f32.mrf.mxu0 }
 0x1cb   : > { %v5504_v48 = vrot.slane %v5502_v55, 5  ;;  %v5497_v43 = vsel %vm12753_vm2, %v5492_v25, %v5496_v16  ;;  %v5510_v44 = vrot.slane %v5508_v20, 5  ;;  %v5512_v28 = vshrl.u32 %v10646_v12, 16  ;;  %16892 = vst [vmem:[#allocation45_spill] sm:$0xff] %v14700_v57  ;;  %16893 = vst [vmem:[#allocation10_spill] sm:$0xff] %v14706_v60  ;;  %v16895_v57 = vld [vmem:[#allocation56_spill] sm:$0xff] }
 0x1cc   : > { %v2498_v58 = vadd.f32 %v2497_v17, %v2467_v38  ;;  %v2469_v30 = vmul.f32 %v14666_v13, %v14666_v13  ;;  %v10710_v5 = vcombine.low %v5487_v21, %v5497_v43  ;;  %2400 = vst [vmem:[%s14196_s24 + $0xd8] sm:$0xff] %v2368_v29  ;;  %2398 = vst [vmem:[%s14196_s24 + $0xc8] sm:$0xff] %v2366_v54  ;;  %v5518_v17 = vshll.u32 %v10679_v3, 16  ;;  %v10648_v20 = vld [vmem:[%s12723_s11 + $0xc4] sm:$0xf]  ;;  %v14709_v38 = vpop.f32.mrf.mxu1  ;;  %v16896_v21 = vld [vmem:[#allocation60_spill] sm:$0xff] }
 0x1cd   : > { %v2429_v49 = vadd.f32 %v2428_v6, %v2366_v54  ;;  %v2468_v40 = vmul.f32 %v2366_v54, %v2366_v54  ;;  %v5505_v55 = vor.u32 %v5504_v48, %v5501_v18  ;;  %v5514_v16 = vrot.slane %v5512_v28, 4  ;;  %16894 = vst [vmem:[#allocation35_spill] sm:$0xff] %v14709_v38  ;;  %v10680_v18 = vld [vmem:[%s12723_s11 + $0xc8] sm:$0x1]  ;;  %v10818_v38 = vld [vmem:[%s12723_s11 + $0x1c] sm:$0xf] }
 0x1ce   : > { %v10735_v25 = vcombine.low %v10645_v11, %v10646_v12  ;;  %12101 = vmatmul.mubr.bf16.gmra.mxu0 %v10710_v5  ;;  %v1617_v43 = vadd.f32 %v16896_v21, %v16895_v57  ;;  %v5523_v34 = vshrl.u32 %v10647_v2, 16  ;;  %v5520_v60 = vrot.slane %v5518_v17, 5  ;;  %v14715_v3 = vpop.f32.mrf.mxu1  ;;  %v16898_v12 = vld [vmem:[#allocation63_spill] sm:$0xff] }
 0x1cf   : > { %v2430_v26 = vadd.f32 %v2429_v49, %v14666_v13  ;;  %v2499_v19 = vadd.f32 %v2498_v58, %v2468_v40  ;;  %v5506_v6 = vrot.slane %v5505_v55, 4  ;;  %v5515_v54 = vor.u32 %v5514_v16, %v5510_v44  ;;  %16897 = vst [vmem:[#allocation12_spill] sm:$0xff] %v14715_v3  ;;  %v14720_v58 = vpop.f32.mrf.mxu0 }
 0x1d0   : > { %12152 = vmatprep.mubr.bf16.mxu1 %v10735_v25  ;;  %v5526_v48 = vshll.u32 %v10647_v2, 16  ;;  %v14718_v28 = vadd.f32 %v16898_v12, %v1617_v43  ;;  %v5525_v5 = vrot.slane %v5523_v34, 4  ;;  %v5532_v13 = vshll.u32 %v10648_v20, 16  ;;  %16899 = vst [vmem:[#allocation36_spill] sm:$0xff] %v14720_v58  ;;  %v16900_v43 = vld [vmem:[#allocation17_spill] sm:$0xff]  ;;  %v16901_v12 = vld [vmem:[#allocation62_spill] sm:$0xff] }
 0x1d1   : > { %v2500_v11 = vadd.f32 %v2499_v19, %v2469_v30  ;;  %v5511_v57 = vsel %vm12753_vm2, %v5506_v6, %v5510_v44  ;;  %v5516_v49 = vrot.slane %v5515_v54, 4  ;;  %v5536_v55 = vshrl.u32 %v10648_v20, 16  ;;  %v10817_v58 = vld [vmem:[%s12723_s11 + $0x18] sm:$0xf] }
 0x1d2   : > { %v5528_v40 = vrot.slane %v5526_v48, 5  ;;  %v2470_v16 = vmul.f32 %v2368_v29, %v2368_v29  ;;  %2403 = vst [vmem:[%s14196_s24 + $0xf0] sm:$0xff] %v14718_v28  ;;  %v5534_v17 = vrot.slane %v5532_v13, 5  ;;  %v5542_v30 = vshll.u32 %v10680_v18, 16  ;;  %v14732_v44 = vpop.f32.mrf.mxu1 }
 0x1d3   : > { %v10736_v25 = vcombine.low %v10647_v2, %v10648_v20  ;;  %v5521_v34 = vsel %vm12753_vm2, %v5516_v49, %v5520_v60  ;;  %v5538_v21 = vrot.slane %v5536_v55, 4  ;;  %v1615_v3 = vadd.f32 %v16901_v12, %v16900_v43  ;;  %v14734_v18 = vpop.f32.mrf.mxu0  ;;  %v16902_v60 = vld [vmem:[#allocation65_spill] sm:$0xff]  ;;  %v16903_v49 = vld [vmem:[#allocation20_spill] sm:$0xff]  ;;  %v10819_v12 = vld [vmem:[%s12723_s11 + $0x20] sm:$0x1] }
 0x1d4   : > { %v5529_v19 = vor.u32 %v5528_v40, %v5525_v5  ;;  %v10711_v6 = vcombine.low %v5511_v57, %v5521_v34  ;;  %v5544_v54 = vrot.slane %v5542_v30, 5  ;;  %v2431_v48 = vadd.f32 %v2430_v26, %v2368_v29  ;;  %v16904_v40 = vld [vmem:[#allocation64_spill] sm:$0xff]  ;;  %v14739_v43 = vpop.f32.mrf.mxu1  ;;  %v16906_v57 = vld [vmem:[#allocation66_spill] sm:$0xff] }
 0x1d5   : > { %12153 = vmatmul.mubr.bf16.gmra.mxu1 %v10736_v25  ;;  %v2501_v13 = vadd.f32 %v2500_v11, %v2470_v16  ;;  %v5539_v20 = vor.u32 %v5538_v21, %v5534_v17  ;;  %v2369_v5 = vadd.f32 %v16902_v60, %v1615_v3  ;;  %v1618_v55 = vadd.f32 %v16904_v40, %v16903_v49  ;;  %v14743_v11 = vpop.f32.mrf.mxu0  ;;  %v10820_v40 = vld [vmem:[%s12723_s11 + $0x24] sm:$0xf] }
 0x1d6   : > { %v5530_v2 = vrot.slane %v5529_v19, 4  ;;  %16905 = vst [vmem:[#allocation47_spill] sm:$0xff] %v14739_v43  ;;  %12104 = vmatprep.mubr.bf16.mxu0 %v10711_v6  ;;  %v1616_v30 = vadd.f32 %v16906_v57, %v14209_v52  ;;  %v6577_v25 = vshrl.u32 %v10817_v58, 16  ;;  %v6580_v29 = vshll.u32 %v10817_v58, 16  ;;  %v14753_v49 = vpop.f32.mrf.mxu1 }
 0x1d7   : > { %v6586_v26 = vshll.u32 %v10818_v38, 16  ;;  %v5540_v3 = vrot.slane %v5539_v20, 4  ;;  %2401 = vst [vmem:[%s14196_s24 + $0xe0] sm:$0xff] %v2369_v5  ;;  %v2432_v34 = vadd.f32 %v2431_v48, %v2369_v5  ;;  %v2471_v19 = vmul.f32 %v2369_v5, %v2369_v5  ;;  %v14751_v60 = vpop.f32.mrf.mxu0  ;;  %16907 = vst [vmem:[#allocation7_spill] sm:$0xff] %v14753_v49  ;;  %v12597_v48 = vld [vmem:[%s12723_s11 + $0x18] sm:$0xff]  }
 0x1d8   : > { %v5535_v16 = vsel %vm12753_vm2, %v5530_v2, %v5534_v17  ;;  %v2372_v21 = vadd.f32 %v14191_v37, %v1618_v55  ;;  %v2370_v52 = vadd.f32 %v14215_v0, %v1616_v30  ;;  %v6579_v58 = vrot.slane %v6577_v25, 4  ;;  %v10821_v30 = vld [vmem:[%s12723_s11 + $0x28] sm:$0xf] }
 0x1d9   : > { %v6582_v6 = vrot.slane %v6580_v29, 5  ;;  %v5545_v17 = vsel %vm12753_vm2, %v5540_v3, %v5544_v54  ;;  %v2502_v2 = vadd.f32 %v2501_v13, %v2471_v19  ;;  %v6588_v20 = vrot.slane %v6586_v26, 5  ;;  %v14765_v3 = vpop.f32.mrf.mxu0  ;;  %v14767_v19 = vpop.f32.mrf.mxu1 }
 0x1da   : > { %v6590_v5 = vshrl.u32 %v10818_v38, 16  ;;  %v2473_v37 = vmul.f32 %v14718_v28, %v14718_v28  ;;  %v10712_v0 = vcombine.low %v5535_v16, %v5545_v17  ;;  %2404 = vst [vmem:[%s14196_s24 + $0xf8] sm:$0xff] %v2372_v21  ;;  %2402 = vst [vmem:[%s14196_s24 + $0xe8] sm:$0xff] %v2370_v52  ;;  %v2433_v55 = vadd.f32 %v2432_v34, %v2370_v52  ;;  %v10822_v17 = vld [vmem:[%s12723_s11 + $0x2c] sm:$0x1] }
 0x1db   : > { %v2472_v57 = vmul.f32 %v2370_v52, %v2370_v52  ;;  %v2474_v25 = vmul.f32 %v2372_v21, %v2372_v21  ;;  %v6583_v29 = vor.u32 %v6582_v6, %v6579_v58  ;;  %v6596_v43 = vshll.u32 %v10819_v12, 16  ;;  %16908 = vst [vmem:[#allocation50_spill] sm:$0xff] %v14765_v3  ;;  %16909 = vst [vmem:[#allocation39_spill] sm:$0xff] %v14767_v19  ;;  %v10823_v19 = vld [vmem:[%s12723_s11 + $0x30] sm:$0xf] }
 0x1dc   : > { %v6592_v49 = vrot.slane %v6590_v5, 4  ;;  %12105 = vmatmul.mubr.bf16.gmra.mxu0 %v10712_v0  ;;  %v2434_v54 = vadd.f32 %v2433_v55, %v14718_v28  ;;  %v6601_v38 = vshrl.u32 %v10820_v40, 16  ;;  %v6604_v26 = vshll.u32 %v10820_v40, 16 }
 0x1dd   : > { %v2503_v13 = vadd.f32 %v2502_v2, %v2472_v57  ;;  %12172 = vmatprep.mubr.bf16.mxu0 %v12597_v48  ;;  %v6584_v16 = vrot.slane %v6583_v29, 4  ;;  %v6598_v52 = vrot.slane %v6596_v43, 5  ;;  %v6610_v58 = vshll.u32 %v10821_v30, 16  ;;  %v12598_v29 = vld [vmem:[%s12723_s11 + $0x24] sm:$0xff]  }
 0x1de   : > { %v6593_v34 = vor.u32 %v6592_v49, %v6588_v20  ;;  %v2435_v6 = vadd.f32 %v2434_v54, %v2372_v21  ;;  %v6603_v5 = vrot.slane %v6601_v38, 4  ;;  %v6606_v28 = vrot.slane %v6604_v26, 5 }
 0x1df   : > { %v2504_v12 = vadd.f32 %v2503_v13, %v2473_v37  ;;  %v6589_v2 = vsel %vm12753_vm2, %v6584_v16, %v6588_v20  ;;  %v6612_v0 = vrot.slane %v6610_v58, 5  ;;  %v6614_v55 = vshrl.u32 %v10821_v30, 16  ;;  %v12601_v20 = vld [vmem:[%s12723_s11 + $0x30] sm:$0xff]  }
 0x1e0   : > { %v6594_v40 = vrot.slane %v6593_v34, 4  ;;  %v2436_v48 = vrot.slane %v2435_v6, 4  ;;  %v6607_v49 = vor.u32 %v6606_v28, %v6603_v5  ;;  %v6620_v43 = vshll.u32 %v10822_v17, 16  ;;  %v14774_v3 = vpop.f32.mrf.mxu0  ;;  %v10824_v16 = vld [vmem:[%s12723_s11 + $0x34] sm:$0xf] }
 0x1e1   : > { %v2505_v57 = vadd.f32 %v2504_v12, %v2474_v25  ;;  %v14776_v21 = vpop.f32.mrf.mxu1  ;;  %v6616_v54 = vrot.slane %v6614_v55, 4  ;;  %v12603_v25 = vld [vmem:[%s16708_s1 + $0x370] sm:$0xff]   ;;  %v14791_v58 = vadd.f32 %v14244_v46, %v14201_v1  ;;  %v10825_v5 = vld [vmem:[%s12723_s11 + $0x38] sm:$0x1]  ;;  %v6628_v55 = vshll.u32 %v10823_v19, 16 }
 0x1e2   : > { %v6599_v37 = vsel %vm12753_vm2, %v6594_v40, %v6598_v52  ;;  %v2437_v13 = vadd.f32 %v2436_v48, %v2435_v6  ;;  %v6608_v26 = vrot.slane %v6607_v49, 4  ;;  %v14785_v34 = vpop.f32.mrf.mxu0  ;;  %v6622_v12 = vrot.slane %v6620_v43, 5 }
 0x1e3   : > { %v2506_v38 = vrot.slane %v2505_v57, 4  ;;  %v10881_v30 = vcombine.low %v6589_v2, %v6599_v37  ;;  %v14787_v17 = vpop.f32.mrf.mxu1  ;;  %v6617_v52 = vor.u32 %v6616_v54, %v6612_v0  ;;  %v6625_v6 = vshrl.u32 %v10823_v19, 16  ;;  %v10826_v54 = vld [vmem:[%s12723_s11 + $0x3c] sm:$0xf] }
 0x1e4   : > { %v2438_v28 = vrot.slane %v2437_v13, 2  ;;  %12173 = vmatmul.mubr.bf16.vlgmr.msra.gmra.mxu0 %v12598_v29  ;;  %v6613_v40 = vsel %vm12753_vm2, %v6608_v26, %v6612_v0  ;;  %v6634_v1 = vshll.u32 %v10824_v16, 16  ;;  %v6638_v46 = vshrl.u32 %v10824_v16, 16  ;;  %v14797_v43 = vpop.f32.mrf.mxu0 }
 0x1e5   : > { %v2507_v2 = vadd.f32 %v2506_v38, %v2505_v57  ;;  %12220 = vmatprep.mubr.bf16.mxu1 %v10881_v30  ;;  %v6618_v48 = vrot.slane %v6617_v52, 4  ;;  %12253 = vmatpush3.bf16.msra.mxu0 %v14455_v23  ;;  %v6627_v49 = vrot.slane %v6625_v6, 4  ;;  %v14799_v37 = vpop.f32.mrf.mxu1  ;;  %v14803_v29 = vadd.f32 %v14262_v22, %v14205_v24  ;;  %v12607_v23 = vld [vmem:[%s16708_s1 + $0x368] sm:$0xff]   ;;  %v10827_v22 = vld [vmem:[%s12723_s11 + $0x40] sm:$0xf] }
 0x1e6   : > { %12176 = vmatprep.mubr.bf16.mxu0 %v12601_v20  ;;  %16910 = vst [vmem:[#allocation49_spill] sm:$0xff] %v14799_v37  ;;  %v6630_v0 = vrot.slane %v6628_v55, 5  ;;  %v6644_v19 = vshll.u32 %v10825_v5, 16  ;;  %12254 = vmatprep.subr.bf16.mxu0 %v12603_v25  ;;  %v14813_v38 = vadd.f32 %v14272_v27, %v14229_v10  ;;  %v6636_v30 = vrot.slane %v6634_v1, 5  ;;  %v12602_v6 = vld [vmem:[%s12723_s11 + $0x3c] sm:$0xff]   ;;  %v12604_v55 = vld [vmem:[%s16708_s1 + $0x330] sm:$0xff]  }
 0x1e7   : > { %v2508_v57 = vrot.slane %v2507_v2, 2  ;;  %v6623_v20 = vsel %vm12753_vm2, %v6618_v48, %v6622_v12  ;;  %v6640_v24 = vrot.slane %v6638_v46, 4  ;;  %v14816_v26 = vadd.f32 %v2438_v28, %v2437_v13  ;;  %v10828_v37 = vld [vmem:[%s12723_s11 + $0x44] sm:$0x1]  ;;  %v12605_v1 = vld [vmem:[%s12723_s11 + $0x48] sm:$0xff]   ;;  %v14826_v46 = vpop.f32.mrf.mxu0  ;;  %v14828_v13 = vpop.f32.mrf.mxu1 }
 0x1e8   : > { %v10882_v52 = vcombine.low %v6613_v40, %v6623_v20  ;;  %v6631_v5 = vor.u32 %v6630_v0, %v6627_v49  ;;  %v6646_v48 = vrot.slane %v6644_v19, 5  ;;  %v6649_v10 = vshrl.u32 %v10826_v54, 16  ;;  %16913 = vst [vmem:[#allocation8_spill] sm:$0xff] %v14826_v46  ;;  %16914 = vst [vmem:[#allocation48_spill] sm:$0xff] %v14828_v13 }
 0x1e9   : > { %16911 = vst [vmem:[#allocation6_spill] sm:$0xff] %v14816_v26  ;;  %v14818_v16 = vadd.f32 %v2508_v57, %v2507_v2  ;;  %v6641_v12 = vor.u32 %v6640_v24, %v6636_v30  ;;  %v6652_v27 = vshll.u32 %v10826_v54, 16  ;;  %12255 = vmatpush3.bf16.msra.mxu0 %v12603_v25  ;;  %v14832_v28 = vadd.f32 %v14295_v15, %v14253_v32  ;;  %v12611_v25 = vld [vmem:[%s16708_s1 + $0x360] sm:$0xff]   ;;  %v12646_v57 = vld [vmem:[%s16708_s1 + $0x338] sm:$0xff]   ;;  %v10829_v24 = vld [vmem:[%s12723_s11 + $0x48] sm:$0xf] }
 0x1ea   : > { %12221 = vmatmul.mubr.bf16.vlgmr.msra.gmra.mxu1 %v10882_v52  ;;  %v6632_v2 = vrot.slane %v6631_v5, 4  ;;  %v14836_v40 = vadd.f32 %v14328_v31, %v14278_v63  ;;  %v6658_v49 = vshll.u32 %v10827_v22, 16  ;;  %12256 = vmatprep.subr.bf16.mxu0 %v12607_v23  ;;  %v6651_v32 = vrot.slane %v6649_v10, 4  ;;  %v12608_v52 = vld [vmem:[%s16708_s1 + $0x328] sm:$0xff]   ;;  %v16918_v5 = vld [vmem:[#allocation24_spill] sm:$0xff] }
 0x1eb   : > { %16912 = vst [vmem:[#allocation51_spill] sm:$0xff] %v14818_v16  ;;  %12301 = vmatpush3.bf16.msra.mxu1 %v12646_v57  ;;  %v6642_v0 = vrot.slane %v6641_v12, 4  ;;  %v6654_v15 = vrot.slane %v6652_v27, 5  ;;  %v6662_v19 = vshrl.u32 %v10827_v22, 16  ;;  %v6668_v20 = vshll.u32 %v10828_v37, 16  ;;  %v16917_v57 = vld [vmem:[#allocation3_spill] sm:$0xff] }
 0x1ec   : > { %v6637_v31 = vsel %vm12753_vm2, %v6632_v2, %v6636_v30  ;;  %12177 = vmatmul.mubr.bf16.gmra.mxu0 %v12602_v6  ;;  %v6660_v54 = vrot.slane %v6658_v49, 5  ;;  %12302 = vmatprep.subr.bf16.mxu1 %v12604_v55  ;;  %v10830_v27 = vld [vmem:[%s12723_s11 + $0x4c] sm:$0xf]  ;;  %v10831_v30 = vld [vmem:[%s12723_s11 + $0x50] sm:$0x1]  ;;  %v14862_v63 = vadd.f32 %v14343_v14, %v16917_v57 }
 0x1ed   : > { %v6647_v22 = vsel %vm12753_vm2, %v6642_v0, %v6646_v48  ;;  %v6655_v12 = vor.u32 %v6654_v15, %v6651_v32  ;;  %v6664_v10 = vrot.slane %v6662_v19, 4  ;;  %12180 = vmatprep.mubr.bf16.mxu0 %v12605_v1  ;;  %12257 = vmatpush3.bf16.msra.mxu0 %v12607_v23  ;;  %v14856_v37 = vpop.f32.mrf.mxu0  ;;  %v6670_v49 = vrot.slane %v6668_v20, 5  ;;  %v10832_v0 = vld [vmem:[%s12723_s11 + $0x54] sm:$0xf]  ;;  %v12615_v23 = vld [vmem:[%s16708_s1 + $0x358] sm:$0xff]  }
 0x1ee   : > { %16915 = vst [vmem:[#allocation52_spill] sm:$0xff] %v14856_v37  ;;  %v10883_v2 = vcombine.low %v6637_v31, %v6647_v22  ;;  %v14866_v48 = vadd.f32 %v14358_v62, %v16918_v5  ;;  %12258 = vmatprep.subr.bf16.mxu0 %v12611_v25  ;;  %v6673_v15 = vshrl.u32 %v10829_v24, 16  ;;  %v6676_v19 = vshll.u32 %v10829_v24, 16  ;;  %v10833_v31 = vld [vmem:[%s12723_s11 + $0x58] sm:$0xf]  ;;  %v16921_v62 = vld [vmem:[#allocation4_spill] sm:$0xff] }
 0x1ef   : > { %v14858_v6 = vpop.f32.mrf.mxu1  ;;  %v6656_v1 = vrot.slane %v6655_v12, 4  ;;  %v6665_v32 = vor.u32 %v6664_v10, %v6660_v54  ;;  %12303 = vmatpush3.bf16.msra.mxu1 %v12604_v55  ;;  %v14873_v14 = vpop.f32.mrf.mxu0  ;;  %v14879_v5 = vadd.f32 %v14376_v61, %v16921_v62  ;;  %v6682_v22 = vshll.u32 %v10830_v27, 16  ;;  %v12606_v12 = vld [vmem:[%s12723_s11 + $0x54] sm:$0xff]   ;;  %v12612_v55 = vld [vmem:[%s16708_s1 + $0x320] sm:$0xff]  }
 0x1f0   : > { %16916 = vst [vmem:[#allocation54_spill] sm:$0xff] %v14858_v6  ;;  %16919 = vst [vmem:[#allocation11_spill] sm:$0xff] %v14873_v14  ;;  %12224 = vmatprep.mubr.bf16.mxu1 %v10883_v2  ;;  %v6686_v57 = vshrl.u32 %v10830_v27, 16  ;;  %v6692_v16 = vshll.u32 %v10831_v30, 16  ;;  %12304 = vmatprep.subr.bf16.mxu1 %v12608_v52  ;;  %v6675_v26 = vrot.slane %v6673_v15, 4  ;;  %v12609_v14 = vld [vmem:[%s12723_s11 + $0x60] sm:$0xff]  }
 0x1f1   : > { %v14875_v20 = vpop.f32.mrf.mxu1  ;;  %v6661_v24 = vsel %vm12753_vm2, %v6656_v1, %v6660_v54  ;;  %v6666_v10 = vrot.slane %v6665_v32, 4  ;;  %v10834_v2 = vld [vmem:[%s12723_s11 + $0x5c] sm:$0x1]  ;;  %12259 = vmatpush3.bf16.msra.mxu0 %v12611_v25  ;;  %v6684_v61 = vrot.slane %v6682_v22, 5  ;;  %v6697_v27 = vshrl.u32 %v10832_v0, 16  ;;  %v12619_v30 = vld [vmem:[%s16708_s1 + $0x350] sm:$0xff]   ;;  %v14892_v37 = vpop.f32.mrf.mxu0 }
 0x1f2   : > { %16920 = vst [vmem:[#allocation53_spill] sm:$0xff] %v14875_v20  ;;  %v6678_v20 = vrot.slane %v6676_v19, 5  ;;  %v6688_v62 = vrot.slane %v6686_v57, 4  ;;  %v6694_v6 = vrot.slane %v6692_v16, 5  ;;  %12260 = vmatprep.subr.bf16.mxu0 %v12615_v23  ;;  %16922 = vst [vmem:[#allocation57_spill] sm:$0xff] %v14892_v37  ;;  %v6700_v32 = vshll.u32 %v10832_v0, 16 }
 0x1f3   : > { %v14894_v13 = vpop.f32.mrf.mxu1  ;;  %v6671_v54 = vsel %vm12753_vm2, %v6666_v10, %v6670_v49  ;;  %v6706_v25 = vshll.u32 %v10833_v31, 16  ;;  %12305 = vmatpush3.bf16.msra.mxu1 %v12608_v52  ;;  %v6699_v19 = vrot.slane %v6697_v27, 4  ;;  %v6710_v22 = vshrl.u32 %v10833_v31, 16  ;;  %v12616_v57 = vld [vmem:[%s16708_s1 + $0x318] sm:$0xff]   ;;  %v10836_v10 = vld [vmem:[%s12723_s11 + $0x64] sm:$0xf] }
 0x1f4   : > { %16923 = vst [vmem:[#allocation16_spill] sm:$0xff] %v14894_v13  ;;  %v6679_v1 = vor.u32 %v6678_v20, %v6675_v26  ;;  %v10884_v15 = vcombine.low %v6661_v24, %v6671_v54  ;;  %v6689_v16 = vor.u32 %v6688_v62, %v6684_v61  ;;  %12181 = vmatmul.mubr.bf16.gmra.mxu0 %v12606_v12  ;;  %v6702_v37 = vrot.slane %v6700_v32, 5  ;;  %v10835_v26 = vld [vmem:[%s12723_s11 + $0x60] sm:$0xf]  ;;  %v16924_v0 = vld [vmem:[#allocation5_spill] sm:$0xff]  ;;  %v16925_v12 = vld [vmem:[#allocation27_spill] sm:$0xff] }
 0x1f5   : > { %12306 = vmatprep.subr.bf16.mxu1 %v12612_v55  ;;  %v6708_v46 = vrot.slane %v6706_v25, 5  ;;  %v6716_v49 = vshll.u32 %v10834_v2, 16  ;;  %12184 = vmatprep.mubr.bf16.mxu0 %v12609_v14  ;;  %v14904_v20 = vadd.f32 %v14407_v56, %v16924_v0  ;;  %v6712_v31 = vrot.slane %v6710_v22, 4  ;;  %v12623_v14 = vld [vmem:[%s16708_s1 + $0x348] sm:$0xff]   ;;  %v14916_v2 = vpop.f32.mrf.mxu1  ;;  %v16928_v54 = vld [vmem:[#allocation13_spill] sm:$0xff] }
 0x1f6   : > { %v6680_v13 = vrot.slane %v6679_v1, 4  ;;  %12261 = vmatpush3.bf16.msra.mxu0 %v12615_v23  ;;  %12225 = vmatmul.mubr.bf16.gmra.mxu1 %v10884_v15  ;;  %v6690_v52 = vrot.slane %v6689_v16, 4  ;;  %v14908_v24 = vadd.f32 %v14418_v59, %v16925_v12  ;;  %v14914_v23 = vpop.f32.mrf.mxu0  ;;  %16927 = vst [vmem:[#allocation19_spill] sm:$0xff] %v14916_v2  ;;  %v6703_v62 = vor.u32 %v6702_v37, %v6699_v19  ;;  %v10837_v1 = vld [vmem:[%s12723_s11 + $0x68] sm:$0x1]  ;;  %v12610_v22 = vld [vmem:[%s12723_s11 + $0x6c] sm:$0xff]  }
 0x1f7   : > { %12262 = vmatprep.subr.bf16.mxu0 %v12619_v30  ;;  %16926 = vst [vmem:[#allocation55_spill] sm:$0xff] %v14914_v23  ;;  %v6718_v27 = vrot.slane %v6716_v49, 5  ;;  %v14922_v59 = vadd.f32 %v14433_v7, %v16928_v54  ;;  %12307 = vmatpush3.bf16.msra.mxu1 %v12612_v55  ;;  %v6713_v25 = vor.u32 %v6712_v31, %v6708_v46  ;;  %v6721_v15 = vshrl.u32 %v10835_v26, 16  ;;  %v10838_v0 = vld [vmem:[%s12723_s11 + $0x6c] sm:$0xf]  ;;  %v12613_v55 = vld [vmem:[%s12723_s11 + $0x78] sm:$0xff]  }
 0x1f8   : > { %v6685_v56 = vsel %vm12753_vm2, %v6680_v13, %v6684_v61  ;;  %v6695_v32 = vsel %vm12753_vm2, %v6690_v52, %v6694_v6  ;;  %v6724_v16 = vshll.u32 %v10835_v26, 16  ;;  %12308 = vmatprep.subr.bf16.mxu1 %v12616_v57  ;;  %v12620_v13 = vld [vmem:[%s16708_s1 + $0x310] sm:$0xff]   ;;  %v6704_v61 = vrot.slane %v6703_v62, 4  ;;  %v12627_v26 = vld [vmem:[%s16708_s1 + $0x340] sm:$0xff]  }
 0x1f9   : > { %v10885_v37 = vcombine.low %v6685_v56, %v6695_v32  ;;  %v6730_v7 = vshll.u32 %v10836_v10, 16  ;;  %v6734_v19 = vshrl.u32 %v10836_v10, 16  ;;  %v10839_v49 = vld [vmem:[%s12723_s11 + $0x70] sm:$0xf]  ;;  %v6714_v12 = vrot.slane %v6713_v25, 4  ;;  %v16931_v56 = vld [vmem:[#allocation14_spill] sm:$0xff] }
 0x1fa   : > { %12263 = vmatpush3.bf16.msra.mxu0 %v12619_v30  ;;  %v6723_v6 = vrot.slane %v6721_v15, 4  ;;  %v6726_v52 = vrot.slane %v6724_v16, 5  ;;  %v6740_v31 = vshll.u32 %v10837_v1, 16  ;;  %v14937_v54 = vpop.f32.mrf.mxu0  ;;  %v14939_v2 = vpop.f32.mrf.mxu1  ;;  %v6709_v10 = vsel %vm12753_vm2, %v6704_v61, %v6708_v46  ;;  %v10840_v1 = vld [vmem:[%s12723_s11 + $0x74] sm:$0x1] }
 0x1fb   : > { %12264 = vmatprep.subr.bf16.mxu0 %v12623_v14  ;;  %16929 = vst [vmem:[#allocation58_spill] sm:$0xff] %v14937_v54  ;;  %16930 = vst [vmem:[#allocation59_spill] sm:$0xff] %v14939_v2  ;;  %12228 = vmatprep.mubr.bf16.mxu1 %v10885_v37  ;;  %v14945_v30 = vadd.f32 %v16931_v56, %v14413_v33  ;;  %v6732_v62 = vrot.slane %v6730_v7, 5  ;;  %v6736_v32 = vrot.slane %v6734_v19, 4  ;;  %v6745_v2 = vshrl.u32 %v10838_v0, 16  ;;  %v16943_v54 = vld [vmem:[#allocation33_spill] sm:$0xff] }
 0x1fc   : > { %12309 = vmatpush3.bf16.msra.mxu1 %v12616_v57  ;;  %v6719_v25 = vsel %vm12753_vm2, %v6714_v12, %v6718_v27  ;;  %v6727_v15 = vor.u32 %v6726_v52, %v6723_v6  ;;  %v6742_v16 = vrot.slane %v6740_v31, 5  ;;  %12185 = vmatmul.mubr.bf16.gmra.mxu0 %v12610_v22  ;;  %v14950_v37 = vpop.f32.mrf.mxu0  ;;  %v14952_v46 = vpop.f32.mrf.mxu1  ;;  %v6748_v56 = vshll.u32 %v10838_v0, 16  ;;  %v10841_v19 = vld [vmem:[%s12723_s11 + $0x78] sm:$0xf]  ;;  %v12624_v57 = vld [vmem:[%s16708_s1 + $0x308] sm:$0xff]   ;;  %v16934_v52 = vld [vmem:[#allocation26_spill] sm:$0xff] }
 0x1fd   : > { %12310 = vmatprep.subr.bf16.mxu1 %v12620_v13  ;;  %16932 = vst [vmem:[#allocation61_spill] sm:$0xff] %v14950_v37  ;;  %16933 = vst [vmem:[#allocation56_spill] sm:$0xff] %v14952_v46  ;;  %v10886_v61 = vcombine.low %v6709_v10, %v6719_v25  ;;  %v6737_v33 = vor.u32 %v6736_v32, %v6732_v62  ;;  %v6754_v7 = vshll.u32 %v10839_v49, 16  ;;  %12188 = vmatprep.mubr.bf16.mxu0 %v12613_v55  ;;  %v14961_v0 = vld [vmem:[%s16708_s1 + $0x3b8] sm:$0xff]  }
 0x1fe   : > { %12265 = vmatpush3.bf16.msra.mxu0 %v12623_v14  ;;  %v6728_v27 = vrot.slane %v6727_v15, 4  ;;  %v6747_v22 = vrot.slane %v6745_v2, 4  ;;  %v6758_v12 = vshrl.u32 %v10839_v49, 16  ;;  %v6764_v6 = vshll.u32 %v10840_v1, 16  ;;  %v16935_v14 = vld [vmem:[#allocation21_spill] sm:$0xff]  ;;  %v14968_v49 = vpop.f32.mrf.mxu0  ;;  %v14970_v1 = vpop.f32.mrf.mxu1 }
 0x1ff   : > { %12266 = vmatprep.subr.bf16.mxu0 %v12627_v26  ;;  %12229 = vmatmul.mubr.bf16.gmra.mxu1 %v10886_v61  ;;  %v6738_v55 = vrot.slane %v6737_v33, 4  ;;  %v14965_v31 = vadd.f32 %v16935_v14, %v16934_v52  ;;  %v6750_v10 = vrot.slane %v6748_v56, 5  ;;  %v6756_v32 = vrot.slane %v6754_v7, 5  ;;  %v10842_v2 = vld [vmem:[%s12723_s11 + $0x7c] sm:$0xf]  ;;  %16937 = vst [vmem:[#allocation63_spill] sm:$0xff] %v14968_v49 }
 0x200   : > { %16938 = vst [vmem:[#allocation17_spill] sm:$0xff] %v14970_v1  ;;  %v6733_v25 = vsel %vm12753_vm2, %v6728_v27, %v6732_v62  ;;  %v6760_v15 = vrot.slane %v6758_v12, 4  ;;  %v6766_v46 = vrot.slane %v6764_v6, 5  ;;  %v16939_v37 = vld [vmem:[#allocation9_spill] sm:$0xff]  ;;  %v16940_v61 = vld [vmem:[#allocation18_spill] sm:$0xff]  ;;  %12311 = vmatpush3.bf16.msra.mxu1 %v12620_v13  ;;  %v16942_v49 = vld [vmem:[#allocation15_spill] sm:$0xff] }
 0x201   : > { %16936 = vst [vmem:[#allocation60_spill] sm:$0xff] %v14965_v31  ;;  %v14976_v33 = vadd.f32 %v16940_v61, %v16939_v37  ;;  %v10843_v52 = vld [vmem:[%s12723_s11 + $0x80] sm:$0x1]  ;;  %v12614_v14 = vld [vmem:[%s12723_s11 + $0x84] sm:$0xff]   ;;  %v6743_v56 = vsel %vm12753_vm2, %v6738_v55, %v6742_v16  ;;  %v6751_v7 = vor.u32 %v6750_v10, %v6747_v22  ;;  %v14984_v1 = vadd.f32 %v16943_v54, %v16942_v49  ;;  %v12617_v27 = vld [vmem:[%s12723_s11 + $0x90] sm:$0xff]   ;;  %v14993_v49 = vpop.f32.mrf.mxu0 }
 0x202   : > { %v6769_v62 = vshrl.u32 %v10841_v19, 16  ;;  %12312 = vmatprep.subr.bf16.mxu1 %v12624_v57  ;;  %12267 = vmatpush3.bf16.msra.mxu0 %v12627_v26  ;;  %v10887_v12 = vcombine.low %v6733_v25, %v6743_v56  ;;  %v6761_v6 = vor.u32 %v6760_v15, %v6756_v32  ;;  %v6772_v37 = vshll.u32 %v10841_v19, 16  ;;  %v12628_v13 = vld [vmem:[%s16708_s1 + $0x300] sm:$0xff]   ;;  %v10845_v10 = vld [vmem:[%s12723_s11 + $0x88] sm:$0xf]  ;;  %16945 = vst [vmem:[#allocation20_spill] sm:$0xff] %v14993_v49  ;;  %v14995_v26 = vpop.f32.mrf.mxu1 }
 0x203   : > { %16941 = vst [vmem:[#allocation62_spill] sm:$0xff] %v14976_v33  ;;  %16944 = vst [vmem:[#allocation65_spill] sm:$0xff] %v14984_v1  ;;  %v6778_v61 = vshll.u32 %v10842_v2, 16  ;;  %v10844_v33 = vld [vmem:[%s12723_s11 + $0x84] sm:$0xf]  ;;  %12348 = vmatprep.subr.bf16.mxu0 %v14961_v0  ;;  %v6752_v16 = vrot.slane %v6751_v7, 4 }
 0x204   : > { %v6771_v54 = vrot.slane %v6769_v62, 4  ;;  %v6782_v22 = vshrl.u32 %v10842_v2, 16  ;;  %v6788_v55 = vshll.u32 %v10843_v52, 16  ;;  %16946 = vst [vmem:[#allocation64_spill] sm:$0xff] %v14995_v26  ;;  %12232 = vmatprep.mubr.bf16.mxu1 %v10887_v12  ;;  %v6762_v19 = vrot.slane %v6761_v6, 4  ;;  %v16947_v25 = vld [vmem:[#allocation32_spill] sm:$0xff]  ;;  %12189 = vmatmul.mubr.bf16.gmra.mxu0 %v12614_v14 }
 0x205   : > { %v16948_v15 = vld [vmem:[#allocation28_spill] sm:$0xff]  ;;  %v6774_v1 = vrot.slane %v6772_v37, 5  ;;  %v6780_v31 = vrot.slane %v6778_v61, 5  ;;  %v6757_v7 = vsel %vm12753_vm2, %v6752_v16, %v6756_v32  ;;  %v10846_v62 = vld [vmem:[%s12723_s11 + $0x8c] sm:$0x1]  ;;  %v6793_v23 = vshrl.u32 %v10844_v33, 16  ;;  %12192 = vmatprep.mubr.bf16.mxu0 %v12617_v27  ;;  %12313 = vmatpush3.bf16.msra.mxu1 %v12624_v57 }
 0x206   : > { %v14999_v56 = vadd.f32 %v16948_v15, %v16947_v25  ;;  %v6784_v2 = vrot.slane %v6782_v22, 4  ;;  %v6790_v52 = vrot.slane %v6788_v55, 5  ;;  %v6767_v12 = vsel %vm12753_vm2, %v6762_v19, %v6766_v46  ;;  %12314 = vmatprep.subr.bf16.mxu1 %v12628_v13  ;;  %v10847_v16 = vld [vmem:[%s12723_s11 + $0x90] sm:$0xf]  ;;  %v15010_v27 = vld [vmem:[%s16708_s1 + $0x3f8] sm:$0xff]  }
 0x207   : > { %v6775_v6 = vor.u32 %v6774_v1, %v6771_v54  ;;  %v6796_v25 = vshll.u32 %v10844_v33, 16  ;;  %v6802_v15 = vshll.u32 %v10845_v10, 16  ;;  %v10888_v37 = vcombine.low %v6757_v7, %v6767_v12  ;;  %v15012_v57 = vpop.f32.mrf.mxu0  ;;  %v15014_v46 = vpop.f32.mrf.mxu1  ;;  %v12618_v55 = vld [vmem:[%s12723_s11 + $0x9c] sm:$0xff]   ;;  %v16954_v12 = vld [vmem:[#allocation23_spill] sm:$0xff] }
 0x208   : > { %16949 = vst [vmem:[#allocation66_spill] sm:$0xff] %v14999_v56  ;;  %v6785_v14 = vor.u32 %v6784_v2, %v6780_v31  ;;  %v6795_v61 = vrot.slane %v6793_v23, 4  ;;  %v6806_v32 = vshrl.u32 %v10845_v10, 16  ;;  %16950 = vst [vmem:[#allocation3_spill] sm:$0xff] %v15012_v57  ;;  %v6812_v22 = vshll.u32 %v10846_v62, 16  ;;  %v16952_v10 = vld [vmem:[#allocation22_spill] sm:$0xff] }
 0x209   : > { %16951 = vst [vmem:[#allocation24_spill] sm:$0xff] %v15014_v46  ;;  %v6776_v1 = vrot.slane %v6775_v6, 4  ;;  %v6798_v33 = vrot.slane %v6796_v25, 5  ;;  %v6804_v54 = vrot.slane %v6802_v15, 5  ;;  %12233 = vmatmul.mubr.bf16.gmra.mxu1 %v10888_v37  ;;  %v16953_v19 = vld [vmem:[#allocation25_spill] sm:$0xff]  ;;  %v12621_v56 = vld [vmem:[%s12723_s11 + $0xa8] sm:$0xff]   ;;  %v15027_v46 = vpop.f32.mrf.mxu0  ;;  %v15029_v6 = vpop.f32.mrf.mxu1 }
 0x20a   : > { %v6786_v23 = vrot.slane %v6785_v14, 4  ;;  %v15019_v7 = vadd.f32 %v16953_v19, %v16952_v10  ;;  %v6808_v2 = vrot.slane %v6806_v32, 4  ;;  %v16955_v26 = vld [vmem:[#allocation29_spill] sm:$0xff]  ;;  %v10848_v57 = vld [vmem:[%s12723_s11 + $0x94] sm:$0xf]  ;;  %16956 = vst [vmem:[#allocation4_spill] sm:$0xff] %v15029_v6  ;;  %12315 = vmatpush3.bf16.msra.mxu1 %v12628_v13 }
 0x20b   : > { %v15023_v49 = vadd.f32 %v16955_v26, %v16954_v12  ;;  %v6781_v62 = vsel %vm12753_vm2, %v6776_v1, %v6780_v31  ;;  %v6799_v25 = vor.u32 %v6798_v33, %v6795_v61  ;;  %v6814_v15 = vrot.slane %v6812_v22, 5  ;;  %v16957_v37 = vld [vmem:[#allocation37_spill] sm:$0xff]  ;;  %12396 = vmatprep.subr.bf16.mxu1 %v15010_v27  ;;  %v15044_v22 = vpop.f32.mrf.mxu1 }
 0x20c   : > { %v15035_v14 = vadd.f32 %v14561_v39, %v16957_v37  ;;  %v10849_v32 = vld [vmem:[%s12723_s11 + $0x98] sm:$0x1]  ;;  %v6791_v26 = vsel %vm12753_vm2, %v6786_v23, %v6790_v52  ;;  %v6809_v10 = vor.u32 %v6808_v2, %v6804_v54  ;;  %v6817_v19 = vshrl.u32 %v10847_v16, 16  ;;  %12193 = vmatmul.mubr.bf16.gmra.mxu0 %v12618_v55  ;;  %v10850_v33 = vld [vmem:[%s12723_s11 + $0x9c] sm:$0xf]  ;;  %v15042_v39 = vpop.f32.mrf.mxu0  ;;  %16960 = vst [vmem:[#allocation13_spill] sm:$0xff] %v15044_v22 }
 0x20d   : > { %v6820_v12 = vshll.u32 %v10847_v16, 16  ;;  %v10889_v6 = vcombine.low %v6781_v62, %v6791_v26  ;;  %v6800_v31 = vrot.slane %v6799_v25, 4  ;;  %v6826_v1 = vshll.u32 %v10848_v57, 16  ;;  %16959 = vst [vmem:[#allocation27_spill] sm:$0xff] %v15042_v39  ;;  %v10851_v2 = vld [vmem:[%s12723_s11 + $0xa0] sm:$0xf]  ;;  %12196 = vmatprep.mubr.bf16.mxu0 %v12621_v56 }
 0x20e   : > { %16958 = vst [vmem:[#allocation5_spill] sm:$0xff] %v15035_v14  ;;  %v6830_v61 = vshrl.u32 %v10848_v57, 16  ;;  %v6810_v13 = vrot.slane %v6809_v10, 4  ;;  %v6819_v37 = vrot.slane %v6817_v19, 4  ;;  %v6836_v23 = vshll.u32 %v10849_v32, 16  ;;  %v16961_v57 = vld [vmem:[#allocation40_spill] sm:$0xff]  ;;  %v15058_v14 = vpop.f32.mrf.mxu0 }
 0x20f   : > { %v6822_v52 = vrot.slane %v6820_v12, 5  ;;  %12236 = vmatprep.mubr.bf16.mxu1 %v10889_v6  ;;  %v6805_v16 = vsel %vm12753_vm2, %v6800_v31, %v6804_v54  ;;  %v15051_v55 = vadd.f32 %v14578_v35, %v16961_v57  ;;  %v6828_v62 = vrot.slane %v6826_v1, 5  ;;  %v10852_v26 = vld [vmem:[%s12723_s11 + $0xa4] sm:$0x1]  ;;  %v10853_v54 = vld [vmem:[%s12723_s11 + $0xa8] sm:$0xf]  ;;  %v15060_v35 = vpop.f32.mrf.mxu1 }
 0x210   : > { %v6832_v25 = vrot.slane %v6830_v61, 4  ;;  %v6815_v10 = vsel %vm12753_vm2, %v6810_v13, %v6814_v15  ;;  %v6838_v19 = vrot.slane %v6836_v23, 5  ;;  %v6841_v12 = vshrl.u32 %v10850_v33, 16  ;;  %v12622_v31 = vld [vmem:[%s12723_s11 + $0xb4] sm:$0xff]   ;;  %16962 = vst [vmem:[#allocation14_spill] sm:$0xff] %v15060_v35  ;;  %v12625_v13 = vld [vmem:[%s12723_s11 + $0xc0] sm:$0xff]  }
 0x211   : > { %v6823_v32 = vor.u32 %v6822_v52, %v6819_v37  ;;  %v10890_v56 = vcombine.low %v6805_v16, %v6815_v10  ;;  %v6844_v6 = vshll.u32 %v10850_v33, 16  ;;  %v6850_v39 = vshll.u32 %v10851_v2, 16  ;;  %v10854_v16 = vld [vmem:[%s12723_s11 + $0xac] sm:$0xf] }
 0x212   : > { %v6833_v22 = vor.u32 %v6832_v25, %v6828_v62  ;;  %v6843_v61 = vrot.slane %v6841_v12, 4  ;;  %v6854_v57 = vshrl.u32 %v10851_v2, 16  ;;  %v6860_v15 = vshll.u32 %v10852_v26, 16  ;;  %v10855_v26 = vld [vmem:[%s12723_s11 + $0xb0] sm:$0x1] }
 0x213   : > { %v6824_v1 = vrot.slane %v6823_v32, 4  ;;  %12237 = vmatmul.mubr.bf16.gmra.mxu1 %v10890_v56  ;;  %v15065_v52 = vadd.f32 %v14597_v47, %v14563_v9  ;;  %v6846_v33 = vrot.slane %v6844_v6, 5  ;;  %v6852_v23 = vrot.slane %v6850_v39, 5  ;;  %v16963_v32 = vld [vmem:[#allocation30_spill] sm:$0xff]  ;;  %v16966_v47 = vld [vmem:[#allocation41_spill] sm:$0xff] }
 0x214   : > { %v6834_v37 = vrot.slane %v6833_v22, 4  ;;  %v6856_v10 = vrot.slane %v6854_v57, 4  ;;  %v6862_v35 = vrot.slane %v6860_v15, 5  ;;  %v15072_v2 = vadd.f32 %v16963_v32, %v14573_v51  ;;  %v16965_v9 = vld [vmem:[#allocation38_spill] sm:$0xff]  ;;  %12197 = vmatmul.mubr.bf16.gmra.mxu0 %v12622_v31  ;;  %v15083_v6 = vpop.f32.mrf.mxu1  ;;  %v10856_v32 = vld [vmem:[%s12723_s11 + $0xb4] sm:$0xf] }
 0x215   : > { %v6829_v25 = vsel %vm12753_vm2, %v6824_v1, %v6828_v62  ;;  %v6847_v12 = vor.u32 %v6846_v33, %v6843_v61  ;;  %v15079_v39 = vadd.f32 %v16966_v47, %v16965_v9  ;;  %v6865_v56 = vshrl.u32 %v10853_v54, 16  ;;  %v15081_v62 = vpop.f32.mrf.mxu0  ;;  %16969 = vst [vmem:[#allocation18_spill] sm:$0xff] %v15083_v6  ;;  %12200 = vmatprep.mubr.bf16.mxu0 %v12625_v13  ;;  %v10857_v9 = vld [vmem:[%s12723_s11 + $0xb8] sm:$0xf] }
 0x216   : > { %16964 = vst [vmem:[#allocation26_spill] sm:$0xff] %v15072_v2  ;;  %v6839_v22 = vsel %vm12753_vm2, %v6834_v37, %v6838_v19  ;;  %16968 = vst [vmem:[#allocation9_spill] sm:$0xff] %v15081_v62  ;;  %v6857_v57 = vor.u32 %v6856_v10, %v6852_v23  ;;  %v6868_v51 = vshll.u32 %v10853_v54, 16  ;;  %v6874_v15 = vshll.u32 %v10854_v16, 16  ;;  %v15089_v31 = vpop.f32.mrf.mxu1  ;;  %v16972_v2 = vld [vmem:[#allocation42_spill] sm:$0xff] }
 0x217   : > { %16967 = vst [vmem:[#allocation21_spill] sm:$0xff] %v15079_v39  ;;  %v10891_v1 = vcombine.low %v6829_v25, %v6839_v22  ;;  %v6848_v19 = vrot.slane %v6847_v12, 4  ;;  %v6867_v61 = vrot.slane %v6865_v56, 4  ;;  %v6878_v37 = vshrl.u32 %v10854_v16, 16  ;;  %v15087_v47 = vpop.f32.mrf.mxu0  ;;  %16971 = vst [vmem:[#allocation33_spill] sm:$0xff] %v15089_v31  ;;  %v12626_v56 = vld [vmem:[%s12723_s11 + $0xcc] sm:$0xff]  }
 0x218   : > { %v6884_v33 = vshll.u32 %v10855_v26, 16  ;;  %16970 = vst [vmem:[#allocation15_spill] sm:$0xff] %v15087_v47  ;;  %v6858_v39 = vrot.slane %v6857_v57, 4  ;;  %v15093_v25 = vadd.f32 %v14630_v53, %v16972_v2  ;;  %v6870_v54 = vrot.slane %v6868_v51, 5  ;;  %v10858_v16 = vld [vmem:[%s12723_s11 + $0xbc] sm:$0x1]  ;;  %v15103_v53 = vpop.f32.mrf.mxu1 }
 0x219   : > { %12240 = vmatprep.mubr.bf16.mxu1 %v10891_v1  ;;  %v6876_v10 = vrot.slane %v6874_v15, 5  ;;  %v6853_v13 = vsel %vm12753_vm2, %v6848_v19, %v6852_v23  ;;  %v6880_v22 = vrot.slane %v6878_v37, 4  ;;  %v6889_v26 = vshrl.u32 %v10856_v32, 16  ;;  %v15101_v6 = vpop.f32.mrf.mxu0  ;;  %v10859_v62 = vld [vmem:[%s12723_s11 + $0xc0] sm:$0xf] }
 0x21a   : > { %16973 = vst [vmem:[#allocation32_spill] sm:$0xff] %v15093_v25  ;;  %v6886_v12 = vrot.slane %v6884_v33, 5  ;;  %v6863_v31 = vsel %vm12753_vm2, %v6858_v39, %v6862_v35  ;;  %v6871_v1 = vor.u32 %v6870_v54, %v6867_v61  ;;  %v6892_v57 = vshll.u32 %v10856_v32, 16 }
 0x21b   : > { %v6898_v47 = vshll.u32 %v10857_v9, 16  ;;  %v10892_v2 = vcombine.low %v6853_v13, %v6863_v31  ;;  %v6881_v51 = vor.u32 %v6880_v22, %v6876_v10  ;;  %v6891_v23 = vrot.slane %v6889_v26, 4  ;;  %v10860_v31 = vld [vmem:[%s12723_s11 + $0xc4] sm:$0xf]  ;;  %v16975_v13 = vld [vmem:[#allocation43_spill] sm:$0xff] }
 0x21c   : > { %v6902_v15 = vshrl.u32 %v10857_v9, 16  ;;  %v6872_v19 = vrot.slane %v6871_v1, 4  ;;  %v6894_v37 = vrot.slane %v6892_v57, 5  ;;  %v6908_v25 = vshll.u32 %v10858_v16, 16  ;;  %12201 = vmatmul.mubr.bf16.gmra.mxu0 %v12626_v56  ;;  %v10861_v16 = vld [vmem:[%s12723_s11 + $0xc8] sm:$0x1] }
 0x21d   : > { %v6900_v33 = vrot.slane %v6898_v47, 5  ;;  %12241 = vmatmul.mubr.bf16.gmra.mxu1 %v10892_v2  ;;  %v6882_v35 = vrot.slane %v6881_v51, 4  ;;  %v15108_v39 = vadd.f32 %v14647_v8, %v14618_v41  ;;  %v15112_v61 = vadd.f32 %v14655_v42, %v14625_v50  ;;  %v15122_v41 = vpop.f32.mrf.mxu0  ;;  %v15124_v8 = vpop.f32.mrf.mxu1  ;;  %v10862_v2 = vld [vmem:[%s12723_s11 + $0xcc] sm:$0xf] }
 0x21e   : > { %v6904_v32 = vrot.slane %v6902_v15, 4  ;;  %v6877_v9 = vsel %vm12753_vm2, %v6872_v19, %v6876_v10  ;;  %v6895_v47 = vor.u32 %v6894_v37, %v6891_v23  ;;  %v6910_v54 = vrot.slane %v6908_v25, 5  ;;  %v10863_v19 = vld [vmem:[%s12723_s11 + $0xd0] sm:$0xf] }
 0x21f   : > { %16974 = vst [vmem:[#allocation28_spill] sm:$0xff] %v15112_v61  ;;  %v15119_v22 = vadd.f32 %v16975_v13, %v14642_v4  ;;  %v6887_v50 = vsel %vm12753_vm2, %v6882_v35, %v6886_v12  ;;  %v6913_v26 = vshrl.u32 %v10859_v62, 16  ;;  %v6916_v56 = vshll.u32 %v10859_v62, 16  ;;  %v16977_v13 = vld [vmem:[#allocation34_spill] sm:$0xff] }
 0x220   : > { %v6905_v42 = vor.u32 %v6904_v32, %v6900_v33  ;;  %v10893_v10 = vcombine.low %v6877_v9, %v6887_v50  ;;  %v6896_v1 = vrot.slane %v6895_v47, 4  ;;  %v6922_v25 = vshll.u32 %v10860_v31, 16  ;;  %v16978_v12 = vld [vmem:[#allocation46_spill] sm:$0xff]  ;;  %v10864_v9 = vld [vmem:[%s12723_s11 + $0xd4] sm:$0x1] }
 0x221   : > { %16976 = vst [vmem:[#allocation22_spill] sm:$0xff] %v15119_v22  ;;  %v6926_v57 = vshrl.u32 %v10860_v31, 16  ;;  %v6915_v51 = vrot.slane %v6913_v26, 4  ;;  %v6918_v23 = vrot.slane %v6916_v56, 5  ;;  %v6932_v15 = vshll.u32 %v10861_v16, 16  ;;  %v15137_v47 = vpop.f32.mrf.mxu0  ;;  %v15139_v31 = vpop.f32.mrf.mxu1 }
 0x222   : > { %v6906_v4 = vrot.slane %v6905_v42, 4  ;;  %12244 = vmatprep.mubr.bf16.mxu1 %v10893_v10  ;;  %v6901_v37 = vsel %vm12753_vm2, %v6896_v1, %v6900_v33  ;;  %v15134_v35 = vadd.f32 %v16978_v12, %v16977_v13  ;;  %v6924_v62 = vrot.slane %v6922_v25, 5 }
 0x223   : > { %v6928_v32 = vrot.slane %v6926_v57, 4  ;;  %v6919_v50 = vor.u32 %v6918_v23, %v6915_v51  ;;  %v6934_v42 = vrot.slane %v6932_v15, 5  ;;  %v6937_v26 = vshrl.u32 %v10862_v2, 16  ;;  %v15144_v22 = vpop.f32.mrf.mxu0  ;;  %v15146_v61 = vpop.f32.mrf.mxu1 }
 0x224   : > { %16979 = vst [vmem:[#allocation25_spill] sm:$0xff] %v15134_v35  ;;  %v6911_v16 = vsel %vm12753_vm2, %v6906_v4, %v6910_v54  ;;  %v6940_v10 = vshll.u32 %v10862_v2, 16  ;;  %v6946_v1 = vshll.u32 %v10863_v19, 16  ;;  %v6950_v57 = vshrl.u32 %v10863_v19, 16  ;;  %v11001_v35 = vld [vmem:[%s12723_s11 + $0xc] sm:$0xe] }
 0x225   : > { %v10894_v56 = vcombine.low %v6901_v37, %v6911_v16  ;;  %v6929_v33 = vor.u32 %v6928_v32, %v6924_v62  ;;  %v6920_v13 = vrot.slane %v6919_v50, 4  ;;  %v6939_v25 = vrot.slane %v6937_v26, 4  ;;  %16980 = vst [vmem:[#allocation23_spill] sm:$0xff] %v15144_v22  ;;  %16981 = vst [vmem:[#allocation29_spill] sm:$0xff] %v15146_v61  ;;  %v16982_v4 = vld [vmem:[#allocation44_spill] sm:$0xff]  ;;  %v16984_v32 = vld [vmem:[#allocation31_spill] sm:$0xff] }
 0x226   : > { %v6956_v12 = vshll.u32 %v10864_v9, 16  ;;  %v15150_v51 = vadd.f32 %v14692_v45, %v16982_v4  ;;  %v6942_v2 = vrot.slane %v6940_v10, 5  ;;  %v6948_v23 = vrot.slane %v6946_v1, 5  ;;  %v16985_v9 = vld [vmem:[#allocation45_spill] sm:$0xff]  ;;  %v10938_v50 = vld [vmem:[%s12723_s11 + $0x10] sm:$0xf] }
 0x227   : > { %12245 = vmatmul.mubr.bf16.gmra.mxu1 %v10894_v56  ;;  %v6930_v54 = vrot.slane %v6929_v33, 4  ;;  %v6925_v15 = vsel %vm12753_vm2, %v6920_v13, %v6924_v62  ;;  %v6952_v37 = vrot.slane %v6950_v57, 4  ;;  %v15156_v16 = vadd.f32 %v16985_v9, %v16984_v32  ;;  %v10937_v26 = vld [vmem:[%s12723_s11 + $0xc] sm:$0xf]  ;;  %v16987_v61 = vld [vmem:[#allocation10_spill] sm:$0xff]  ;;  %v15169_v32 = vpop.f32.mrf.mxu1 }
 0x228   : > { %16983 = vst [vmem:[#allocation37_spill] sm:$0xff] %v15150_v51  ;;  %v6958_v19 = vrot.slane %v6956_v12, 5  ;;  %v6943_v33 = vor.u32 %v6942_v2, %v6939_v25  ;;  %v16988_v45 = vld [vmem:[#allocation35_spill] sm:$0xff]  ;;  %v10939_v10 = vld [vmem:[%s12723_s11 + $0x14] sm:$0x1]  ;;  %v11017_v1 = vrot.slane %v11001_v35, 9  ;;  %v15167_v12 = vpop.f32.mrf.mxu0 }
 0x229   : > { %16986 = vst [vmem:[#allocation40_spill] sm:$0xff] %v15156_v16  ;;  %v6935_v56 = vsel %vm12753_vm2, %v6930_v54, %v6934_v42  ;;  %v15164_v4 = vadd.f32 %v16988_v45, %v16987_v61  ;;  %v6953_v62 = vor.u32 %v6952_v37, %v6948_v23  ;;  %v7938_v13 = vrot.slane %v10938_v50, 5  ;;  %16990 = vst [vmem:[#allocation38_spill] sm:$0xff] %v15167_v12 }
 0x22a   : > { %v10895_v51 = vcombine.low %v6925_v15, %v6935_v56  ;;  %v7941_v57 = vrot.slane %v10939_v10, 5  ;;  %16991 = vst [vmem:[#allocation41_spill] sm:$0xff] %v15169_v32  ;;  %v6944_v9 = vrot.slane %v6943_v33, 4  ;;  %v7472_v16 = vshrl.u32 %v10937_v26, 16  ;;  %v11002_v33 = vld [vmem:[%s12723_s11 + $0x18] sm:$0xe] }
 0x22b   : > { %16989 = vst [vmem:[#allocation30_spill] sm:$0xff] %v15164_v4  ;;  %v7475_v22 = vshll.u32 %v10937_v26, 16  ;;  %v7481_v42 = vshll.u32 %v10938_v50, 16  ;;  %v6954_v25 = vrot.slane %v6953_v62, 4  ;;  %v7939_v54 = vsel %vm13224_vm5, %v11017_v1, %v7938_v13  ;;  %v10940_v1 = vld [vmem:[%s12723_s11 + $0x18] sm:$0xf] }
 0x22c   : > { %12248 = vmatprep.mubr.bf16.mxu1 %v10895_v51  ;;  %v7940_v35 = vrot.slane %v7938_v13, 4  ;;  %v7485_v2 = vshrl.u32 %v10938_v50, 16  ;;  %v6949_v15 = vsel %vm12753_vm2, %v6944_v9, %v6948_v23  ;;  %v7474_v37 = vrot.slane %v7472_v16, 4  ;;  %v15181_v13 = vpop.f32.mrf.mxu0  ;;  %v15183_v50 = vpop.f32.mrf.mxu1 }
 0x22d   : > { %v7477_v56 = vrot.slane %v7475_v22, 5  ;;  %v7483_v45 = vrot.slane %v7481_v42, 5  ;;  %v6959_v26 = vsel %vm12753_vm2, %v6954_v25, %v6958_v19  ;;  %v7491_v4 = vshll.u32 %v10939_v10, 16  ;;  %v10941_v42 = vld [vmem:[%s12723_s11 + $0x1c] sm:$0xf] }
 0x22e   : > { %v7942_v51 = vsel %vm13224_vm5, %v7940_v35, %v7941_v57  ;;  %v7487_v62 = vrot.slane %v7485_v2, 4  ;;  %v10896_v23 = vcombine.low %v6949_v15, %v6959_v26  ;;  %v4428_v22 = vadd.f32 %v14734_v18, %v14791_v58  ;;  %v10942_v19 = vld [vmem:[%s12723_s11 + $0x20] sm:$0x1]  ;;  %v16994_v26 = vld [vmem:[#allocation12_spill] sm:$0xff] }
 0x22f   : > { %v11049_v9 = vcombine.low %v7939_v54, %v7942_v51  ;;  %v7478_v16 = vor.u32 %v7477_v56, %v7474_v37  ;;  %v7493_v12 = vrot.slane %v7491_v4, 5  ;;  %v11018_v25 = vrot.slane %v11002_v33, 9  ;;  %v15194_v4 = vpop.f32.mrf.mxu0  ;;  %v15196_v56 = vpop.f32.mrf.mxu1  ;;  %v16993_v33 = vld [vmem:[#allocation36_spill] sm:$0xff] }
 0x230   : > { %v7488_v32 = vor.u32 %v7487_v62, %v7483_v45  ;;  %v7945_v57 = vrot.slane %v10941_v42, 5  ;;  %12249 = vmatmul.mubr.bf16.gmra.mxu1 %v10896_v23  ;;  %v15190_v35 = vadd.f32 %v14732_v44, %v4428_v22  ;;  %v7948_v2 = vrot.slane %v10942_v19, 5  ;;  %v11003_v22 = vld [vmem:[%s12723_s11 + $0x24] sm:$0xe] }
 0x231   : > { %12268 = vmatprep.mubr.bf16.mxu0 %v11049_v9  ;;  %v7479_v10 = vrot.slane %v7478_v16, 4  ;;  %v7496_v15 = vshrl.u32 %v10940_v1, 16  ;;  %v7499_v37 = vshll.u32 %v10940_v1, 16  ;;  %v15200_v51 = vadd.f32 %v16994_v26, %v16993_v33 }
 0x232   : > { %v7489_v54 = vrot.slane %v7488_v32, 4  ;;  %v7946_v18 = vsel %vm13224_vm5, %v11018_v25, %v7945_v57  ;;  %v7947_v58 = vrot.slane %v7945_v57, 4  ;;  %10587 = vst [vmem:[%s14196_s24 + $0x110] sm:$0xff] %v15190_v35  ;;  %v7505_v32 = vshll.u32 %v10941_v42, 16 }
 0x233   : > { %16995 = vst [vmem:[#allocation42_spill] sm:$0xff] %v15200_v51  ;;  %v7484_v44 = vsel %vm12753_vm2, %v7479_v10, %v7483_v45  ;;  %v7498_v62 = vrot.slane %v7496_v15, 4  ;;  %v7501_v9 = vrot.slane %v7499_v37, 5  ;;  %v7509_v16 = vshrl.u32 %v10941_v42, 16  ;;  %v12631_v45 = vld [vmem:[%s16708_s1 + $0x3b0] sm:$0xff]  }
 0x234   : > { %v7494_v23 = vsel %vm12753_vm2, %v7489_v54, %v7493_v12  ;;  %v7949_v1 = vsel %vm13224_vm5, %v7947_v58, %v7948_v2  ;;  %v7507_v33 = vrot.slane %v7505_v32, 5  ;;  %v7515_v26 = vshll.u32 %v10942_v19, 16  ;;  %v15219_v42 = vld [vmem:[%s12723_s11 + $0x28] sm:$0xf]  ;;  %v15221_v2 = vpop.f32.mrf.mxu0  ;;  %v15223_v54 = vpop.f32.mrf.mxu1 }
 0x235   : > { %v11073_v25 = vcombine.low %v7484_v44, %v7494_v23  ;;  %v11050_v57 = vcombine.low %v7946_v18, %v7949_v1  ;;  %v7502_v10 = vor.u32 %v7501_v9, %v7498_v62  ;;  %v7511_v15 = vrot.slane %v7509_v16, 4  ;;  %v16996_v18 = vld [vmem:[#allocation50_spill] sm:$0xff]  ;;  %v16998_v62 = vld [vmem:[#allocation7_spill] sm:$0xff] }
 0x236   : > { %v4426_v51 = vadd.f32 %v14743_v11, %v14803_v29  ;;  %v4429_v12 = vadd.f32 %v14751_v60, %v14813_v38  ;;  %v7517_v19 = vrot.slane %v7515_v26, 5  ;;  %v4427_v58 = vadd.f32 %v16996_v18, %v14832_v28  ;;  %v16997_v60 = vld [vmem:[#allocation47_spill] sm:$0xff]  ;;  %v10943_v1 = vld [vmem:[%s12723_s11 + $0x24] sm:$0xf] }
 0x237   : > { %12316 = vmatprep.mubr.bf16.mxu1 %v11073_v25  ;;  %12269 = vmatmul.mubr.bf16.vlgmr.msra.gmra.mxu0 %v11050_v57  ;;  %v11019_v37 = vrot.slane %v11003_v22, 9  ;;  %v7952_v11 = vrot.slane %v15219_v42, 5  ;;  %v7503_v29 = vrot.slane %v7502_v10, 4  ;;  %v7512_v44 = vor.u32 %v7511_v15, %v7507_v33  ;;  %v10945_v23 = vld [vmem:[%s12723_s11 + $0x2c] sm:$0x1]  ;;  %v15248_v15 = vpop.f32.mrf.mxu0 }
 0x238   : > { %12349 = vmatpush3.bf16.msra.mxu0 %v14961_v0  ;;  %v4924_v38 = vadd.f32 %v16997_v60, %v4426_v51  ;;  %v15231_v32 = vadd.f32 %v16998_v62, %v4429_v12  ;;  %v16999_v9 = vld [vmem:[#allocation39_spill] sm:$0xff]  ;;  %v7955_v25 = vrot.slane %v10945_v23, 5  ;;  %v5029_v51 = vmul.f32 %v15190_v35, %v15190_v35  ;;  %17000 = vst [vmem:[#allocation43_spill] sm:$0xff] %v15248_v15  ;;  %v15250_v12 = vpop.f32.mrf.mxu1  ;;  %v11004_v62 = vld [vmem:[%s12723_s11 + $0x30] sm:$0xe] }
 0x239   : > { %v4925_v16 = vadd.f32 %v16999_v9, %v4427_v58  ;;  %v7953_v28 = vsel %vm13224_vm5, %v11019_v37, %v7952_v11  ;;  %v7954_v22 = vrot.slane %v7952_v11, 4  ;;  %12350 = vmatprep.subr.bf16.mxu0 %v12631_v45  ;;  %v12633_v0 = vld [vmem:[%s16708_s1 + $0x3a8] sm:$0xff]   ;;  %v7508_v57 = vsel %vm12753_vm2, %v7503_v29, %v7507_v33  ;;  %17001 = vst [vmem:[#allocation34_spill] sm:$0xff] %v15250_v12  ;;  %v10947_v15 = vld [vmem:[%s12723_s11 + $0x34] sm:$0xf] }
 0x23a   : > { %v7513_v26 = vrot.slane %v7512_v44, 4  ;;  %10585 = vst [vmem:[%s14196_s24 + $0x100] sm:$0xff] %v4924_v38  ;;  %v5027_v10 = vmul.f32 %v4924_v38, %v4924_v38  ;;  %10588 = vst [vmem:[%s14196_s24 + $0x118] sm:$0xff] %v15231_v32  ;;  %v7520_v11 = vshrl.u32 %v10943_v1, 16  ;;  %v7523_v44 = vshll.u32 %v10943_v1, 16 }
 0x23b   : > { %10586 = vst [vmem:[%s14196_s24 + $0x108] sm:$0xff] %v4925_v16  ;;  %v4989_v18 = vadd.f32 %v4925_v16, %v4924_v38  ;;  %v5028_v58 = vmul.f32 %v4925_v16, %v4925_v16  ;;  %v7956_v37 = vsel %vm13224_vm5, %v7954_v22, %v7955_v25  ;;  %v7529_v60 = vshll.u32 %v15219_v42, 16  ;;  %v12632_v22 = vld [vmem:[%s16708_s1 + $0x3f0] sm:$0xff]  }
 0x23c   : > { %v7518_v33 = vsel %vm12753_vm2, %v7513_v26, %v7517_v19  ;;  %v11051_v29 = vcombine.low %v7953_v28, %v7956_v37  ;;  %12351 = vmatpush3.bf16.msra.mxu0 %v12631_v45  ;;  %v7522_v16 = vrot.slane %v7520_v11, 4  ;;  %v12635_v19 = vld [vmem:[%s16708_s1 + $0x3a0] sm:$0xff]   ;;  %v7525_v1 = vrot.slane %v7523_v44, 5  ;;  %v10946_v25 = vld [vmem:[%s12723_s11 + $0x30] sm:$0xf]  ;;  %v15273_v26 = vpop.f32.mrf.mxu1 }
 0x23d   : > { %v11074_v9 = vcombine.low %v7508_v57, %v7518_v33  ;;  %v15260_v12 = vadd.f32 %v4989_v18, %v15190_v35  ;;  %v5059_v38 = vadd.f32 %v5028_v58, %v5027_v10  ;;  %12352 = vmatprep.subr.bf16.mxu0 %v12633_v0  ;;  %v7531_v45 = vrot.slane %v7529_v60, 5  ;;  %v15271_v57 = vpop.f32.mrf.mxu0  ;;  %17003 = vst [vmem:[#allocation44_spill] sm:$0xff] %v15273_v26  ;;  %v10948_v58 = vld [vmem:[%s12723_s11 + $0x38] sm:$0x1] }
 0x23e   : > { %12272 = vmatprep.mubr.bf16.mxu0 %v11051_v29  ;;  %v7533_v28 = vshrl.u32 %v15219_v42, 16  ;;  %v7539_v35 = vshll.u32 %v10945_v23, 16  ;;  %17002 = vst [vmem:[#allocation46_spill] sm:$0xff] %v15271_v57  ;;  %v4432_v18 = vadd.f32 %v14774_v3, %v14836_v40  ;;  %v11020_v37 = vrot.slane %v11004_v62, 9  ;;  %v12634_v3 = vld [vmem:[%s16708_s1 + $0x3e8] sm:$0xff]   ;;  %v12637_v40 = vld [vmem:[%s16708_s1 + $0x398] sm:$0xff]  }
 0x23f   : > { %12317 = vmatmul.mubr.bf16.vlgmr.msra.gmra.mxu1 %v11074_v9  ;;  %v5060_v10 = vadd.f32 %v5059_v38, %v5029_v51  ;;  %v7959_v11 = vrot.slane %v10947_v15, 5  ;;  %v7526_v33 = vor.u32 %v7525_v1, %v7522_v16  ;;  %v7962_v42 = vrot.slane %v10948_v58, 5  ;;  %v15290_v38 = vpop.f32.mrf.mxu0  ;;  %v15292_v16 = vpop.f32.mrf.mxu1  ;;  %v11005_v57 = vld [vmem:[%s12723_s11 + $0x3c] sm:$0xe] }
 0x240   : > { %12397 = vmatpush3.bf16.msra.mxu1 %v15010_v27  ;;  %v7535_v29 = vrot.slane %v7533_v28, 4  ;;  %v7541_v44 = vrot.slane %v7539_v35, 5  ;;  %12353 = vmatpush3.bf16.msra.mxu0 %v12633_v0  ;;  %v15280_v23 = vadd.f32 %v14776_v21, %v4432_v18  ;;  %v7544_v9 = vshrl.u32 %v10946_v25, 16  ;;  %17004 = vst [vmem:[#allocation31_spill] sm:$0xff] %v15290_v38  ;;  %17005 = vst [vmem:[#allocation45_spill] sm:$0xff] %v15292_v16 }
 0x241   : > { %v7960_v51 = vsel %vm13224_vm5, %v11020_v37, %v7959_v11  ;;  %v7961_v60 = vrot.slane %v7959_v11, 4  ;;  %12398 = vmatprep.subr.bf16.mxu1 %v12632_v22  ;;  %12354 = vmatprep.subr.bf16.mxu0 %v12635_v19  ;;  %v7527_v27 = vrot.slane %v7526_v33, 4  ;;  %v7547_v62 = vshll.u32 %v10946_v25, 16 }
 0x242   : > { %v7536_v0 = vor.u32 %v7535_v29, %v7531_v45  ;;  %v7553_v21 = vshll.u32 %v10947_v15, 16  ;;  %v5030_v1 = vmul.f32 %v15231_v32, %v15231_v32  ;;  %10591 = vst [vmem:[%s14196_s24 + $0x130] sm:$0xff] %v15280_v23  ;;  %v7546_v35 = vrot.slane %v7544_v9, 4 }
 0x243   : > { %v7963_v28 = vsel %vm13224_vm5, %v7961_v60, %v7962_v42  ;;  %v7557_v18 = vshrl.u32 %v10947_v15, 16  ;;  %v7532_v37 = vsel %vm12753_vm2, %v7527_v27, %v7531_v45  ;;  %v7549_v33 = vrot.slane %v7547_v62, 5  ;;  %v12636_v15 = vld [vmem:[%s16708_s1 + $0x3e0] sm:$0xff]   ;;  %v15317_v42 = vpop.f32.mrf.mxu1 }
 0x244   : > { %v7537_v25 = vrot.slane %v7536_v0, 4  ;;  %v11052_v11 = vcombine.low %v7960_v51, %v7963_v28  ;;  %12399 = vmatpush3.bf16.msra.mxu1 %v12632_v22  ;;  %12355 = vmatpush3.bf16.msra.mxu0 %v12635_v19  ;;  %v7555_v29 = vrot.slane %v7553_v21, 5  ;;  %v7563_v38 = vshll.u32 %v10948_v58, 16  ;;  %v10950_v0 = vld [vmem:[%s12723_s11 + $0x40] sm:$0xf] }
 0x245   : > { %v7559_v16 = vrot.slane %v7557_v18, 4  ;;  %v4430_v26 = vadd.f32 %v14785_v34, %v14862_v63  ;;  %12400 = vmatprep.subr.bf16.mxu1 %v12634_v3  ;;  %12356 = vmatprep.subr.bf16.mxu0 %v12637_v40  ;;  %v7550_v22 = vor.u32 %v7549_v33, %v7546_v35  ;;  %v4991_v19 = vadd.f32 %v15260_v12, %v15231_v32  ;;  %v12639_v34 = vld [vmem:[%s16708_s1 + $0x390] sm:$0xff]   ;;  %v15315_v63 = vpop.f32.mrf.mxu0  ;;  %v10949_v18 = vld [vmem:[%s12723_s11 + $0x3c] sm:$0xf] }
 0x246   : > { %v7542_v45 = vsel %vm12753_vm2, %v7537_v25, %v7541_v44  ;;  %12273 = vmatmul.mubr.bf16.gmra.mxu0 %v11052_v11  ;;  %v5061_v58 = vadd.f32 %v5060_v10, %v5030_v1  ;;  %v7565_v9 = vrot.slane %v7563_v38, 5  ;;  %v4433_v32 = vadd.f32 %v14797_v43, %v14866_v48  ;;  %v17006_v12 = vld [vmem:[#allocation8_spill] sm:$0xff]  ;;  %v15327_v1 = vpop.f32.mrf.mxu1  ;;  %v12638_v43 = vld [vmem:[%s16708_s1 + $0x3d8] sm:$0xff]  }
 0x247   : > { %v11075_v51 = vcombine.low %v7532_v37, %v7542_v45  ;;  %v7560_v60 = vor.u32 %v7559_v16, %v7555_v29  ;;  %v4928_v44 = vadd.f32 %v14787_v17, %v4430_v26  ;;  %v7551_v27 = vrot.slane %v7550_v22, 4  ;;  %v15325_v21 = vpop.f32.mrf.mxu0  ;;  %v10951_v16 = vld [vmem:[%s12723_s11 + $0x44] sm:$0x1]  ;;  %v12641_v37 = vld [vmem:[%s16708_s1 + $0x388] sm:$0xff]  }
 0x248   : > { %v4431_v10 = vadd.f32 %v17006_v12, %v14879_v5  ;;  %v11021_v62 = vrot.slane %v11005_v57, 9  ;;  %12401 = vmatpush3.bf16.msra.mxu1 %v12634_v3  ;;  %12357 = vmatpush3.bf16.msra.mxu0 %v12637_v40  ;;  %v7966_v28 = vrot.slane %v10950_v0, 5  ;;  %v17007_v5 = vld [vmem:[#allocation49_spill] sm:$0xff]  ;;  %v17008_v3 = vld [vmem:[#allocation48_spill] sm:$0xff]  ;;  %v7969_v35 = vrot.slane %v10951_v16, 5 }
 0x249   : > { %12320 = vmatprep.mubr.bf16.mxu1 %v11075_v51  ;;  %v7561_v38 = vrot.slane %v7560_v60, 4  ;;  %10589 = vst [vmem:[%s14196_s24 + $0x120] sm:$0xff] %v4928_v44  ;;  %v4992_v17 = vadd.f32 %v4991_v19, %v4928_v44  ;;  %v5031_v26 = vmul.f32 %v4928_v44, %v4928_v44  ;;  %12402 = vmatprep.subr.bf16.mxu1 %v12636_v15  ;;  %v15353_v60 = vpop.f32.mrf.mxu0  ;;  %v15355_v44 = vpop.f32.mrf.mxu1  ;;  %v11006_v12 = vld [vmem:[%s12723_s11 + $0x48] sm:$0xe] }
 0x24a   : > { %v7556_v48 = vsel %vm12753_vm2, %v7551_v27, %v7555_v29  ;;  %v15337_v57 = vadd.f32 %v17007_v5, %v4433_v32  ;;  %v4929_v40 = vadd.f32 %v17008_v3, %v4431_v10  ;;  %12358 = vmatprep.subr.bf16.mxu0 %v12639_v34  ;;  %v7967_v33 = vsel %vm13224_vm5, %v11021_v62, %v7966_v28  ;;  %v12640_v10 = vld [vmem:[%s16708_s1 + $0x3d0] sm:$0xff]   ;;  %v10952_v3 = vld [vmem:[%s12723_s11 + $0x48] sm:$0xf] }
 0x24b   : > { %v7566_v25 = vsel %vm12753_vm2, %v7561_v38, %v7565_v9  ;;  %v5062_v11 = vadd.f32 %v5061_v58, %v5031_v26  ;;  %v7968_v29 = vrot.slane %v7966_v28, 4  ;;  %v5033_v45 = vmul.f32 %v15280_v23, %v15280_v23  ;;  %v12643_v26 = vld [vmem:[%s16708_s1 + $0x380] sm:$0xff]  }
 0x24c   : > { %v11076_v22 = vcombine.low %v7556_v48, %v7566_v25  ;;  %10592 = vst [vmem:[%s14196_s24 + $0x138] sm:$0xff] %v15337_v57  ;;  %10590 = vst [vmem:[%s14196_s24 + $0x128] sm:$0xff] %v4929_v40  ;;  %v4993_v19 = vadd.f32 %v4992_v17, %v4929_v40  ;;  %v5032_v51 = vmul.f32 %v4929_v40, %v4929_v40  ;;  %12403 = vmatpush3.bf16.msra.mxu1 %v12636_v15  ;;  %v10953_v25 = vld [vmem:[%s12723_s11 + $0x4c] sm:$0xf] }
 0x24d   : > { %v7970_v58 = vsel %vm13224_vm5, %v7968_v29, %v7969_v35  ;;  %v7568_v9 = vshrl.u32 %v10949_v18, 16  ;;  %v7571_v27 = vshll.u32 %v10949_v18, 16  ;;  %v7577_v32 = vshll.u32 %v10950_v0, 16  ;;  %12404 = vmatprep.subr.bf16.mxu1 %v12638_v43  ;;  %12359 = vmatpush3.bf16.msra.mxu0 %v12639_v34  ;;  %v17009_v18 = vld [vmem:[#allocation52_spill] sm:$0xff]  ;;  %v15374_v29 = vpop.f32.mrf.mxu1 }
 0x24e   : > { %12321 = vmatmul.mubr.bf16.gmra.mxu1 %v11076_v22  ;;  %v4994_v15 = vadd.f32 %v4993_v19, %v15280_v23  ;;  %v5063_v62 = vadd.f32 %v5062_v11, %v5032_v51  ;;  %v11053_v38 = vcombine.low %v7967_v33, %v7970_v58  ;;  %v7581_v17 = vshrl.u32 %v10950_v0, 16  ;;  %12360 = vmatprep.subr.bf16.mxu0 %v12641_v37  ;;  %v10954_v11 = vld [vmem:[%s12723_s11 + $0x50] sm:$0x1]  ;;  %v15372_v0 = vpop.f32.mrf.mxu0  ;;  %v17010_v58 = vld [vmem:[#allocation54_spill] sm:$0xff] }
 0x24f   : > { %v7570_v28 = vrot.slane %v7568_v9, 4  ;;  %v7573_v48 = vrot.slane %v7571_v27, 5  ;;  %v7579_v34 = vrot.slane %v7577_v32, 5  ;;  %v7587_v5 = vshll.u32 %v10951_v16, 16 }
 0x250   : > { %v5064_v40 = vadd.f32 %v5063_v62, %v5033_v45  ;;  %12276 = vmatprep.mubr.bf16.mxu0 %v11053_v38  ;;  %v7583_v35 = vrot.slane %v7581_v17, 4  ;;  %v4436_v23 = vadd.f32 %v17009_v18, %v14904_v20  ;;  %v11022_v33 = vrot.slane %v11006_v12, 9  ;;  %12405 = vmatpush3.bf16.msra.mxu1 %v12638_v43  ;;  %v12642_v45 = vld [vmem:[%s16708_s1 + $0x3c8] sm:$0xff]  }
 0x251   : > { %v7574_v22 = vor.u32 %v7573_v48, %v7570_v28  ;;  %v7589_v19 = vrot.slane %v7587_v5, 5  ;;  %v7973_v51 = vrot.slane %v10953_v25, 5  ;;  %v7976_v16 = vrot.slane %v10954_v11, 5  ;;  %12406 = vmatprep.subr.bf16.mxu1 %v12640_v10  ;;  %12361 = vmatpush3.bf16.msra.mxu0 %v12641_v37  ;;  %v15388_v5 = vpop.f32.mrf.mxu0 }
 0x252   : > { %v7584_v20 = vor.u32 %v7583_v35, %v7579_v34  ;;  %v15380_v9 = vadd.f32 %v17010_v58, %v4436_v23  ;;  %v7592_v43 = vshrl.u32 %v10952_v3, 16  ;;  %v7595_v27 = vshll.u32 %v10952_v3, 16  ;;  %12362 = vmatprep.subr.bf16.mxu0 %v12643_v26  ;;  %v15390_v3 = vpop.f32.mrf.mxu1 }
 0x253   : > { %v7575_v32 = vrot.slane %v7574_v22, 4  ;;  %v7974_v12 = vsel %vm13224_vm5, %v11022_v33, %v7973_v51  ;;  %v7975_v62 = vrot.slane %v7973_v51, 4  ;;  %v7601_v38 = vshll.u32 %v10953_v25, 16  ;;  %v12644_v22 = vld [vmem:[%s16708_s1 + $0x3c0] sm:$0xff]  }
 0x254   : > { %v5034_v37 = vmul.f32 %v15337_v57, %v15337_v57  ;;  %v7585_v17 = vrot.slane %v7584_v20, 4  ;;  %10595 = vst [vmem:[%s14196_s24 + $0x150] sm:$0xff] %v15380_v9  ;;  %v7594_v28 = vrot.slane %v7592_v43, 4  ;;  %v7597_v48 = vrot.slane %v7595_v27, 5  ;;  %12407 = vmatpush3.bf16.msra.mxu1 %v12640_v10  ;;  %v11007_v43 = vld [vmem:[%s12723_s11 + $0x54] sm:$0xe]  ;;  %v15404_v27 = vpop.f32.mrf.mxu1 }
 0x255   : > { %v7580_v35 = vsel %vm12753_vm2, %v7575_v32, %v7579_v34  ;;  %v7977_v18 = vsel %vm13224_vm5, %v7975_v62, %v7976_v16  ;;  %v7603_v23 = vrot.slane %v7601_v38, 5  ;;  %v7605_v33 = vshrl.u32 %v10953_v25, 16  ;;  %12408 = vmatprep.subr.bf16.mxu1 %v12642_v45  ;;  %12363 = vmatpush3.bf16.msra.mxu0 %v12643_v26  ;;  %v15402_v34 = vpop.f32.mrf.mxu0  ;;  %17011 = vst [vmem:[#allocation10_spill] sm:$0xff] %v15404_v27  ;;  %v17012_v26 = vld [vmem:[#allocation11_spill] sm:$0xff] }
 0x256   : > { %v7590_v10 = vsel %vm12753_vm2, %v7585_v17, %v7589_v19  ;;  %v11054_v51 = vcombine.low %v7974_v12, %v7977_v18  ;;  %v7598_v20 = vor.u32 %v7597_v48, %v7594_v28  ;;  %v7611_v58 = vshll.u32 %v10954_v11, 16  ;;  %v17013_v11 = vld [vmem:[#allocation57_spill] sm:$0xff] }
 0x257   : > { %v11077_v25 = vcombine.low %v7580_v35, %v7590_v10  ;;  %v7607_v16 = vrot.slane %v7605_v33, 4  ;;  %v4434_v32 = vadd.f32 %v17012_v26, %v14908_v24  ;;  %v4995_v62 = vadd.f32 %v4994_v15, %v15337_v57  ;;  %v10956_v28 = vld [vmem:[%s12723_s11 + $0x58] sm:$0xf]  ;;  %v17015_v33 = vld [vmem:[#allocation55_spill] sm:$0xff]  ;;  %v15416_v24 = vld [vmem:[%s12723_s11 + $0x5c] sm:$0x1] }
 0x258   : > { %12277 = vmatmul.mubr.bf16.gmra.mxu0 %v11054_v51  ;;  %v7599_v19 = vrot.slane %v7598_v20, 4  ;;  %v7613_v38 = vrot.slane %v7611_v58, 5  ;;  %v5065_v12 = vadd.f32 %v5064_v40, %v5034_v37  ;;  %v4437_v17 = vadd.f32 %v17013_v11, %v14922_v59  ;;  %12409 = vmatpush3.bf16.msra.mxu1 %v12642_v45  ;;  %v17014_v35 = vld [vmem:[#allocation53_spill] sm:$0xff]  ;;  %v10955_v15 = vld [vmem:[%s12723_s11 + $0x54] sm:$0xf]  ;;  %v15419_v40 = vpop.f32.mrf.mxu0  ;;  %v15421_v37 = vpop.f32.mrf.mxu1 }
 0x259   : > { %12324 = vmatprep.mubr.bf16.mxu1 %v11077_v25  ;;  %v7608_v48 = vor.u32 %v7607_v16, %v7603_v23  ;;  %v4932_v18 = vadd.f32 %v17014_v35, %v4434_v32  ;;  %v4435_v10 = vadd.f32 %v17015_v33, %v14945_v30  ;;  %v11023_v57 = vrot.slane %v11007_v43, 9  ;;  %12410 = vmatprep.subr.bf16.mxu1 %v12644_v22  ;;  %v17018_v45 = vld [vmem:[#allocation16_spill] sm:$0xff]  ;;  %v17019_v16 = vld [vmem:[#allocation19_spill] sm:$0xff] }
 0x25a   : > { %17016 = vst [vmem:[#allocation35_spill] sm:$0xff] %v15419_v40  ;;  %17017 = vst [vmem:[#allocation2_spill] sm:$0xff] %v15421_v37  ;;  %v7604_v59 = vsel %vm12753_vm2, %v7599_v19, %v7603_v23  ;;  %v15426_v51 = vadd.f32 %v17018_v45, %v4437_v17  ;;  %v7980_v20 = vrot.slane %v10956_v28, 5  ;;  %v7983_v30 = vrot.slane %v15416_v24, 5  ;;  %v15442_v33 = vpop.f32.mrf.mxu1  ;;  %v10958_v37 = vld [vmem:[%s12723_s11 + $0x60] sm:$0xf] }
 0x25b   : > { %v7609_v58 = vrot.slane %v7608_v48, 4  ;;  %10593 = vst [vmem:[%s14196_s24 + $0x140] sm:$0xff] %v4932_v18  ;;  %v4996_v25 = vadd.f32 %v4995_v62, %v4932_v18  ;;  %v5035_v43 = vmul.f32 %v4932_v18, %v4932_v18  ;;  %v4933_v26 = vadd.f32 %v17019_v16, %v4435_v10  ;;  %v15440_v18 = vpop.f32.mrf.mxu0  ;;  %17021 = vst [vmem:[#allocation12_spill] sm:$0xff] %v15442_v33  ;;  %v17032_v40 = vld [vmem:[#allocation61_spill] sm:$0xff] }
 0x25c   : > { %v5037_v32 = vmul.f32 %v15380_v9, %v15380_v9  ;;  %10596 = vst [vmem:[%s14196_s24 + $0x158] sm:$0xff] %v15426_v51  ;;  %v7981_v23 = vsel %vm13224_vm5, %v11023_v57, %v7980_v20  ;;  %v7982_v19 = vrot.slane %v7980_v20, 4  ;;  %v7616_v11 = vshrl.u32 %v10955_v15, 16  ;;  %12411 = vmatpush3.bf16.msra.mxu1 %v12644_v22  ;;  %17020 = vst [vmem:[#allocation36_spill] sm:$0xff] %v15440_v18  ;;  %v11008_v22 = vld [vmem:[%s12723_s11 + $0x60] sm:$0xe] }
 0x25d   : > { %v7614_v17 = vsel %vm12753_vm2, %v7609_v58, %v7613_v38  ;;  %v5066_v62 = vadd.f32 %v5065_v12, %v5035_v43  ;;  %10594 = vst [vmem:[%s14196_s24 + $0x148] sm:$0xff] %v4933_v26  ;;  %v4997_v48 = vadd.f32 %v4996_v25, %v4933_v26  ;;  %v5036_v35 = vmul.f32 %v4933_v26, %v4933_v26  ;;  %v10959_v43 = vld [vmem:[%s12723_s11 + $0x64] sm:$0xf]  ;;  %v17022_v18 = vld [vmem:[#allocation60_spill] sm:$0xff] }
 0x25e   : > { %v11078_v10 = vcombine.low %v7604_v59, %v7614_v17  ;;  %v7984_v57 = vsel %vm13224_vm5, %v7982_v19, %v7983_v30  ;;  %v7618_v45 = vrot.slane %v7616_v11, 4  ;;  %v7619_v20 = vshll.u32 %v10955_v15, 16  ;;  %v17023_v59 = vld [vmem:[#allocation58_spill] sm:$0xff] }
 0x25f   : > { %v4998_v16 = vadd.f32 %v4997_v48, %v15380_v9  ;;  %v5067_v38 = vadd.f32 %v5066_v62, %v5036_v35  ;;  %v11055_v58 = vcombine.low %v7981_v23, %v7984_v57  ;;  %v7625_v12 = vshll.u32 %v10956_v28, 16  ;;  %v15453_v9 = vpop.f32.mrf.mxu0  ;;  %v15455_v23 = vpop.f32.mrf.mxu1 }
 0x260   : > { %12325 = vmatmul.mubr.bf16.gmra.mxu1 %v11078_v10  ;;  %v7621_v25 = vrot.slane %v7619_v20, 5  ;;  %v7629_v26 = vshrl.u32 %v10956_v28, 16  ;;  %v7635_v33 = vshll.u32 %v15416_v24, 16  ;;  %v4440_v17 = vadd.f32 %v17023_v59, %v17022_v18  ;;  %17024 = vst [vmem:[#allocation50_spill] sm:$0xff] %v15453_v9  ;;  %17025 = vst [vmem:[#allocation47_spill] sm:$0xff] %v15455_v23  ;;  %v17026_v24 = vld [vmem:[#allocation59_spill] sm:$0xff] }
 0x261   : > { %v5068_v30 = vadd.f32 %v5067_v38, %v5037_v32  ;;  %12280 = vmatprep.mubr.bf16.mxu0 %v11055_v58  ;;  %v7627_v15 = vrot.slane %v7625_v12, 5  ;;  %v11024_v19 = vrot.slane %v11008_v22, 9  ;;  %v7987_v11 = vrot.slane %v10959_v43, 5  ;;  %v10960_v18 = vld [vmem:[%s12723_s11 + $0x68] sm:$0x1]  ;;  %v15465_v22 = vpop.f32.mrf.mxu0  ;;  %v15467_v38 = vpop.f32.mrf.mxu1  ;;  %v17031_v9 = vld [vmem:[#allocation62_spill] sm:$0xff] }
 0x262   : > { %v5038_v62 = vmul.f32 %v15426_v51, %v15426_v51  ;;  %v7622_v28 = vor.u32 %v7621_v25, %v7618_v45  ;;  %v7631_v48 = vrot.slane %v7629_v26, 4  ;;  %v15460_v35 = vadd.f32 %v17026_v24, %v4440_v17  ;;  %17027 = vst [vmem:[#allocation7_spill] sm:$0xff] %v15465_v22  ;;  %17028 = vst [vmem:[#allocation39_spill] sm:$0xff] %v15467_v38 }
 0x263   : > { %v7988_v32 = vsel %vm13224_vm5, %v11024_v19, %v7987_v11  ;;  %v7989_v10 = vrot.slane %v7987_v11, 4  ;;  %v7990_v57 = vrot.slane %v10960_v18, 5  ;;  %v7640_v20 = vshrl.u32 %v10958_v37, 16  ;;  %v15475_v38 = vpop.f32.mrf.mxu0 }
 0x264   : > { %v7623_v58 = vrot.slane %v7622_v28, 4  ;;  %v7632_v12 = vor.u32 %v7631_v48, %v7627_v15  ;;  %v7637_v59 = vrot.slane %v7635_v33, 5  ;;  %10599 = vst [vmem:[%s14196_s24 + $0x170] sm:$0xff] %v15460_v35  ;;  %v7643_v45 = vshll.u32 %v10958_v37, 16  ;;  %17029 = vst [vmem:[#allocation8_spill] sm:$0xff] %v15475_v38  ;;  %v15477_v28 = vpop.f32.mrf.mxu1  ;;  %v17037_v38 = vld [vmem:[#allocation20_spill] sm:$0xff] }
 0x265   : > { %v7991_v25 = vsel %vm13224_vm5, %v7989_v10, %v7990_v57  ;;  %v7642_v26 = vrot.slane %v7640_v20, 4  ;;  %v7649_v17 = vshll.u32 %v10959_v43, 16  ;;  %v7653_v19 = vshrl.u32 %v10959_v43, 16  ;;  %17030 = vst [vmem:[#allocation49_spill] sm:$0xff] %v15477_v28  ;;  %v11009_v57 = vld [vmem:[%s12723_s11 + $0x6c] sm:$0xe] }
 0x266   : > { %v7628_v11 = vsel %vm12753_vm2, %v7623_v58, %v7627_v15  ;;  %v7633_v24 = vrot.slane %v7632_v12, 4  ;;  %v11056_v22 = vcombine.low %v7988_v32, %v7991_v25  ;;  %v7645_v23 = vrot.slane %v7643_v45, 5  ;;  %v17033_v25 = vld [vmem:[#allocation56_spill] sm:$0xff]  ;;  %v17035_v28 = vld [vmem:[#allocation63_spill] sm:$0xff] }
 0x267   : > { %v7651_v33 = vrot.slane %v7649_v17, 5  ;;  %v7655_v48 = vrot.slane %v7653_v19, 4  ;;  %v7659_v37 = vshll.u32 %v10960_v18, 16  ;;  %v4438_v10 = vadd.f32 %v17032_v40, %v17031_v9  ;;  %v17034_v19 = vld [vmem:[#allocation65_spill] sm:$0xff]  ;;  %v17036_v9 = vld [vmem:[#allocation66_spill] sm:$0xff] }
 0x268   : > { %v7638_v43 = vsel %vm12753_vm2, %v7633_v24, %v7637_v59  ;;  %12281 = vmatmul.mubr.bf16.gmra.mxu0 %v11056_v22  ;;  %v7646_v15 = vor.u32 %v7645_v23, %v7642_v26  ;;  %v4999_v32 = vadd.f32 %v4998_v16, %v15426_v51  ;;  %v5069_v20 = vadd.f32 %v5068_v30, %v5038_v62  ;;  %v10962_v22 = vld [vmem:[%s12723_s11 + $0x70] sm:$0xf]  ;;  %v15491_v59 = vpop.f32.mrf.mxu0  ;;  %v15493_v51 = vpop.f32.mrf.mxu1  ;;  %v10963_v26 = vld [vmem:[%s12723_s11 + $0x74] sm:$0x1] }
 0x269   : > { %v11079_v58 = vcombine.low %v7628_v11, %v7638_v43  ;;  %v7656_v12 = vor.u32 %v7655_v48, %v7651_v33  ;;  %v7661_v45 = vrot.slane %v7659_v37, 5  ;;  %v4936_v17 = vadd.f32 %v17033_v25, %v4438_v10  ;;  %v17039_v48 = vld [vmem:[#allocation64_spill] sm:$0xff] }
 0x26a   : > { %v7647_v18 = vrot.slane %v7646_v15, 4  ;;  %v4441_v40 = vadd.f32 %v17035_v28, %v17034_v19  ;;  %v4439_v27 = vadd.f32 %v17037_v38, %v17036_v9  ;;  %v11025_v23 = vrot.slane %v11009_v57, 9  ;;  %v17038_v38 = vld [vmem:[#allocation17_spill] sm:$0xff]  ;;  %v10961_v57 = vld [vmem:[%s12723_s11 + $0x6c] sm:$0xf] }
 0x26b   : > { %12328 = vmatprep.mubr.bf16.mxu1 %v11079_v58  ;;  %v7657_v16 = vrot.slane %v7656_v12, 4  ;;  %10597 = vst [vmem:[%s14196_s24 + $0x160] sm:$0xff] %v4936_v17  ;;  %v5000_v30 = vadd.f32 %v4999_v32, %v4936_v17  ;;  %v5039_v62 = vmul.f32 %v4936_v17, %v4936_v17  ;;  %v7994_v11 = vrot.slane %v10962_v22, 5  ;;  %v15513_v17 = vpop.f32.mrf.mxu0  ;;  %v11010_v9 = vld [vmem:[%s12723_s11 + $0x78] sm:$0xe] }
 0x26c   : > { %v7652_v24 = vsel %vm12753_vm2, %v7647_v18, %v7651_v33  ;;  %v15500_v28 = vadd.f32 %v17038_v38, %v4441_v40  ;;  %v4937_v37 = vadd.f32 %v17039_v48, %v4439_v27  ;;  %v7997_v10 = vrot.slane %v10963_v26, 5  ;;  %v15515_v18 = vpop.f32.mrf.mxu1 }
 0x26d   : > { %v7662_v43 = vsel %vm12753_vm2, %v7657_v16, %v7661_v45  ;;  %v5070_v15 = vadd.f32 %v5069_v20, %v5039_v62  ;;  %v7995_v32 = vsel %vm13224_vm5, %v11025_v23, %v7994_v11  ;;  %v7996_v58 = vrot.slane %v7994_v11, 4  ;;  %17040 = vst [vmem:[#allocation48_spill] sm:$0xff] %v15515_v18  ;;  %v15521_v11 = vpop.f32.mrf.mxu0 }
 0x26e   : > { %v5041_v12 = vmul.f32 %v15460_v35, %v15460_v35  ;;  %v11080_v33 = vcombine.low %v7652_v24, %v7662_v43  ;;  %10600 = vst [vmem:[%s14196_s24 + $0x178] sm:$0xff] %v15500_v28  ;;  %10598 = vst [vmem:[%s14196_s24 + $0x168] sm:$0xff] %v4937_v37  ;;  %v5001_v25 = vadd.f32 %v5000_v30, %v4937_v37  ;;  %v7664_v45 = vshrl.u32 %v10961_v57, 16  ;;  %v15523_v24 = vpop.f32.mrf.mxu1  ;;  %v10964_v43 = vld [vmem:[%s12723_s11 + $0x78] sm:$0xf] }
 0x26f   : > { %v5040_v27 = vmul.f32 %v4937_v37, %v4937_v37  ;;  %v7998_v20 = vsel %vm13224_vm5, %v7996_v58, %v7997_v10  ;;  %v7667_v19 = vshll.u32 %v10961_v57, 16  ;;  %v7673_v40 = vshll.u32 %v10962_v22, 16  ;;  %17041 = vst [vmem:[#allocation52_spill] sm:$0xff] %v15523_v24  ;;  %v15530_v24 = vpop.f32.mrf.mxu0 }
 0x270   : > { %12329 = vmatmul.mubr.bf16.gmra.mxu1 %v11080_v33  ;;  %v5002_v23 = vadd.f32 %v5001_v25, %v15460_v35  ;;  %v11057_v30 = vcombine.low %v7995_v32, %v7998_v20  ;;  %v7677_v62 = vshrl.u32 %v10962_v22, 16  ;;  %v7666_v38 = vrot.slane %v7664_v45, 4  ;;  %v17042_v33 = vld [vmem:[#allocation3_spill] sm:$0xff]  ;;  %v10965_v35 = vld [vmem:[%s12723_s11 + $0x7c] sm:$0xf]  ;;  %17043 = vst [vmem:[#allocation54_spill] sm:$0xff] %v15530_v24  ;;  %v15532_v45 = vpop.f32.mrf.mxu1 }
 0x271   : > { %v5071_v16 = vadd.f32 %v5070_v15, %v5040_v27  ;;  %v7669_v48 = vrot.slane %v7667_v19, 5  ;;  %v7675_v37 = vrot.slane %v7673_v40, 5  ;;  %v7683_v10 = vshll.u32 %v10963_v26, 16  ;;  %v10966_v25 = vld [vmem:[%s12723_s11 + $0x80] sm:$0x1]  ;;  %17044 = vst [vmem:[#allocation11_spill] sm:$0xff] %v15532_v45 }
 0x272   : > { %12284 = vmatprep.mubr.bf16.mxu0 %v11057_v30  ;;  %v7679_v58 = vrot.slane %v7677_v62, 4  ;;  %v4444_v18 = vadd.f32 %v17042_v33, %v15019_v7  ;;  %v11026_v15 = vrot.slane %v11010_v9, 9  ;;  %v8001_v27 = vrot.slane %v10965_v35, 5  ;;  %v17045_v19 = vld [vmem:[#allocation24_spill] sm:$0xff] }
 0x273   : > { %v5072_v57 = vadd.f32 %v5071_v16, %v5041_v12  ;;  %v7670_v32 = vor.u32 %v7669_v48, %v7666_v38  ;;  %v7685_v22 = vrot.slane %v7683_v10, 5  ;;  %v8004_v20 = vrot.slane %v10966_v25, 5 }
 0x274   : > { %v7680_v26 = vor.u32 %v7679_v58, %v7675_v37  ;;  %v15535_v12 = vadd.f32 %v17045_v19, %v4444_v18  ;;  %v7688_v40 = vshrl.u32 %v10964_v43, 16  ;;  %v7691_v16 = vshll.u32 %v10964_v43, 16 }
 0x275   : > { %v7671_v30 = vrot.slane %v7670_v32, 4  ;;  %v8002_v7 = vsel %vm13224_vm5, %v11026_v15, %v8001_v27  ;;  %v8003_v9 = vrot.slane %v8001_v27, 4  ;;  %v7697_v62 = vshll.u32 %v10965_v35, 16  ;;  %v15547_v15 = vpop.f32.mrf.mxu0  ;;  %v15549_v27 = vpop.f32.mrf.mxu1 }
 0x276   : > { %v5042_v38 = vmul.f32 %v15500_v28, %v15500_v28  ;;  %v7681_v48 = vrot.slane %v7680_v26, 4  ;;  %10603 = vst [vmem:[%s14196_s24 + $0x190] sm:$0xff] %v15535_v12  ;;  %v7690_v10 = vrot.slane %v7688_v40, 4  ;;  %v7693_v58 = vrot.slane %v7691_v16, 5  ;;  %17046 = vst [vmem:[#allocation57_spill] sm:$0xff] %v15547_v15  ;;  %v17049_v15 = vld [vmem:[#allocation27_spill] sm:$0xff] }
 0x277   : > { %v7676_v18 = vsel %vm12753_vm2, %v7671_v30, %v7675_v37  ;;  %v8005_v43 = vsel %vm13224_vm5, %v8003_v9, %v8004_v20  ;;  %v7699_v33 = vrot.slane %v7697_v62, 5  ;;  %v7701_v32 = vshrl.u32 %v10965_v35, 16  ;;  %17047 = vst [vmem:[#allocation53_spill] sm:$0xff] %v15549_v27  ;;  %v11011_v16 = vld [vmem:[%s12723_s11 + $0x84] sm:$0xe]  ;;  %v17048_v27 = vld [vmem:[#allocation5_spill] sm:$0xff] }
 0x278   : > { %v7686_v26 = vsel %vm12753_vm2, %v7681_v48, %v7685_v22  ;;  %v11058_v19 = vcombine.low %v8002_v7, %v8005_v43  ;;  %v7694_v45 = vor.u32 %v7693_v58, %v7690_v10  ;;  %v7707_v40 = vshll.u32 %v10966_v25, 16  ;;  %v10968_v7 = vld [vmem:[%s12723_s11 + $0x88] sm:$0xf]  ;;  %v17050_v48 = vld [vmem:[#allocation4_spill] sm:$0xff] }
 0x279   : > { %v11081_v24 = vcombine.low %v7676_v18, %v7686_v26  ;;  %v7703_v37 = vrot.slane %v7701_v32, 4  ;;  %v4442_v20 = vadd.f32 %v15027_v46, %v15023_v49  ;;  %v5003_v35 = vadd.f32 %v5002_v23, %v15500_v28  ;;  %v10969_v18 = vld [vmem:[%s12723_s11 + $0x8c] sm:$0x1]  ;;  %v10967_v46 = vld [vmem:[%s12723_s11 + $0x84] sm:$0xf]  ;;  %v15565_v28 = vpop.f32.mrf.mxu0  ;;  %v15567_v23 = vpop.f32.mrf.mxu1 }
 0x27a   : > { %12285 = vmatmul.mubr.bf16.gmra.mxu0 %v11058_v19  ;;  %v7695_v30 = vrot.slane %v7694_v45, 4  ;;  %v7709_v9 = vrot.slane %v7707_v40, 5  ;;  %v5073_v62 = vadd.f32 %v5072_v57, %v5042_v38  ;;  %v4445_v22 = vadd.f32 %v17049_v15, %v17048_v27  ;;  %v17051_v45 = vld [vmem:[#allocation13_spill] sm:$0xff]  ;;  %v17052_v15 = vld [vmem:[#allocation14_spill] sm:$0xff] }
 0x27b   : > { %12332 = vmatprep.mubr.bf16.mxu1 %v11081_v24  ;;  %v7704_v25 = vor.u32 %v7703_v37, %v7699_v33  ;;  %v4940_v10 = vadd.f32 %v17050_v48, %v4442_v20  ;;  %v4443_v58 = vadd.f32 %v15058_v14, %v15051_v55  ;;  %v11027_v49 = vrot.slane %v11011_v16, 9  ;;  %v15576_v26 = vpop.f32.mrf.mxu0  ;;  %v15578_v19 = vpop.f32.mrf.mxu1 }
 0x27c   : > { %v7700_v57 = vsel %vm12753_vm2, %v7695_v30, %v7699_v33  ;;  %v15572_v38 = vadd.f32 %v17051_v45, %v4445_v22  ;;  %v8008_v24 = vrot.slane %v10968_v7, 5  ;;  %v8011_v43 = vrot.slane %v10969_v18, 5  ;;  %17053 = vst [vmem:[#allocation55_spill] sm:$0xff] %v15576_v26  ;;  %17054 = vst [vmem:[#allocation16_spill] sm:$0xff] %v15578_v19  ;;  %v11012_v45 = vld [vmem:[%s12723_s11 + $0x90] sm:$0xe] }
 0x27d   : > { %v7705_v32 = vrot.slane %v7704_v25, 4  ;;  %10601 = vst [vmem:[%s14196_s24 + $0x180] sm:$0xff] %v4940_v10  ;;  %v5004_v14 = vadd.f32 %v5003_v35, %v4940_v10  ;;  %v5043_v55 = vmul.f32 %v4940_v10, %v4940_v10  ;;  %v4941_v27 = vadd.f32 %v17052_v15, %v4443_v58  ;;  %v15592_v15 = vpop.f32.mrf.mxu0  ;;  %v17062_v19 = vld [vmem:[#allocation15_spill] sm:$0xff] }
 0x27e   : > { %v5045_v33 = vmul.f32 %v15535_v12, %v15535_v12  ;;  %10604 = vst [vmem:[%s14196_s24 + $0x198] sm:$0xff] %v15572_v38  ;;  %v8009_v40 = vsel %vm13224_vm5, %v11027_v49, %v8008_v24  ;;  %v8010_v16 = vrot.slane %v8008_v24, 4  ;;  %v7712_v37 = vshrl.u32 %v10967_v46, 16  ;;  %17055 = vst [vmem:[#allocation19_spill] sm:$0xff] %v15592_v15  ;;  %v15594_v49 = vpop.f32.mrf.mxu1 }
 0x27f   : > { %v7710_v20 = vsel %vm12753_vm2, %v7705_v32, %v7709_v9  ;;  %v5074_v35 = vadd.f32 %v5073_v62, %v5043_v55  ;;  %10602 = vst [vmem:[%s14196_s24 + $0x188] sm:$0xff] %v4941_v27  ;;  %v5005_v30 = vadd.f32 %v5004_v14, %v4941_v27  ;;  %v5044_v22 = vmul.f32 %v4941_v27, %v4941_v27  ;;  %v10971_v55 = vld [vmem:[%s12723_s11 + $0x94] sm:$0xf] }
 0x280   : > { %v11082_v25 = vcombine.low %v7700_v57, %v7710_v20  ;;  %v8012_v48 = vsel %vm13224_vm5, %v8010_v16, %v8011_v43  ;;  %v7714_v10 = vrot.slane %v7712_v37, 4  ;;  %v7715_v58 = vshll.u32 %v10967_v46, 16  ;;  %17056 = vst [vmem:[#allocation60_spill] sm:$0xff] %v15594_v49  ;;  %v17057_v43 = vld [vmem:[#allocation9_spill] sm:$0xff]  ;;  %v10970_v46 = vld [vmem:[%s12723_s11 + $0x90] sm:$0xf] }
 0x281   : > { %v5006_v24 = vadd.f32 %v5005_v30, %v15535_v12  ;;  %v5075_v9 = vadd.f32 %v5074_v35, %v5044_v22  ;;  %v11059_v32 = vcombine.low %v8009_v40, %v8012_v48  ;;  %v7721_v62 = vshll.u32 %v10968_v7, 16  ;;  %v17058_v30 = vld [vmem:[#allocation18_spill] sm:$0xff] }
 0x282   : > { %12333 = vmatmul.mubr.bf16.gmra.mxu1 %v11082_v25  ;;  %v7717_v57 = vrot.slane %v7715_v58, 5  ;;  %v7725_v14 = vshrl.u32 %v10968_v7, 16  ;;  %v7731_v27 = vshll.u32 %v10969_v18, 16  ;;  %v4448_v16 = vadd.f32 %v17057_v43, %v15065_v52  ;;  %v10972_v7 = vld [vmem:[%s12723_s11 + $0x98] sm:$0x1]  ;;  %v15607_v18 = vpop.f32.mrf.mxu0  ;;  %v15609_v25 = vpop.f32.mrf.mxu1 }
 0x283   : > { %v5076_v37 = vadd.f32 %v5075_v9, %v5045_v33  ;;  %12288 = vmatprep.mubr.bf16.mxu0 %v11059_v32  ;;  %v7723_v20 = vrot.slane %v7721_v62, 5  ;;  %v11028_v15 = vrot.slane %v11012_v45, 9  ;;  %v8015_v49 = vrot.slane %v10971_v55, 5  ;;  %17059 = vst [vmem:[#allocation58_spill] sm:$0xff] %v15607_v18  ;;  %17060 = vst [vmem:[#allocation59_spill] sm:$0xff] %v15609_v25 }
 0x284   : > { %v5046_v12 = vmul.f32 %v15572_v38, %v15572_v38  ;;  %v7718_v40 = vor.u32 %v7717_v57, %v7714_v10  ;;  %v7727_v35 = vrot.slane %v7725_v14, 4  ;;  %v15604_v22 = vadd.f32 %v17058_v30, %v4448_v16  ;;  %v15619_v25 = vpop.f32.mrf.mxu0 }
 0x285   : > { %v8016_v52 = vsel %vm13224_vm5, %v11028_v15, %v8015_v49  ;;  %v8017_v33 = vrot.slane %v8015_v49, 4  ;;  %v8018_v48 = vrot.slane %v10972_v7, 5  ;;  %v7736_v58 = vshrl.u32 %v10970_v46, 16 }
 0x286   : > { %v7719_v45 = vrot.slane %v7718_v40, 4  ;;  %v7728_v9 = vor.u32 %v7727_v35, %v7723_v20  ;;  %v7733_v32 = vrot.slane %v7731_v27, 5  ;;  %10607 = vst [vmem:[%s14196_s24 + $0x1b0] sm:$0xff] %v15604_v22  ;;  %v7739_v10 = vshll.u32 %v10970_v46, 16  ;;  %v15621_v40 = vpop.f32.mrf.mxu1  ;;  %v17061_v46 = vld [vmem:[#allocation26_spill] sm:$0xff] }
 0x287   : > { %v8019_v62 = vsel %vm13224_vm5, %v8017_v33, %v8018_v48  ;;  %v7738_v57 = vrot.slane %v7736_v58, 4  ;;  %v7745_v14 = vshll.u32 %v10971_v55, 16  ;;  %v7749_v43 = vshrl.u32 %v10971_v55, 16  ;;  %v11013_v33 = vld [vmem:[%s12723_s11 + $0x9c] sm:$0xe]  ;;  %v15629_v58 = vpop.f32.mrf.mxu0 }
 0x288   : > { %v7724_v16 = vsel %vm12753_vm2, %v7719_v45, %v7723_v20  ;;  %v7729_v15 = vrot.slane %v7728_v9, 4  ;;  %v11060_v49 = vcombine.low %v8016_v52, %v8019_v62  ;;  %v7741_v30 = vrot.slane %v7739_v10, 5  ;;  %17063 = vst [vmem:[#allocation62_spill] sm:$0xff] %v15629_v58  ;;  %v15631_v45 = vpop.f32.mrf.mxu1 }
 0x289   : > { %v7747_v27 = vrot.slane %v7745_v14, 5  ;;  %v7751_v35 = vrot.slane %v7749_v43, 4  ;;  %v7755_v18 = vshll.u32 %v10972_v7, 16  ;;  %v4446_v26 = vadd.f32 %v17062_v19, %v17061_v46  ;;  %17064 = vst [vmem:[#allocation61_spill] sm:$0xff] %v15631_v45  ;;  %v17065_v19 = vld [vmem:[#allocation33_spill] sm:$0xff] }
 0x28a   : > { %v7734_v55 = vsel %vm12753_vm2, %v7729_v15, %v7733_v32  ;;  %12289 = vmatmul.mubr.bf16.gmra.mxu0 %v11060_v49  ;;  %v7742_v20 = vor.u32 %v7741_v30, %v7738_v57  ;;  %v5007_v52 = vadd.f32 %v5006_v24, %v15572_v38  ;;  %v5077_v48 = vadd.f32 %v5076_v37, %v5046_v12  ;;  %v17066_v43 = vld [vmem:[#allocation21_spill] sm:$0xff]  ;;  %v17067_v15 = vld [vmem:[#allocation32_spill] sm:$0xff]  ;;  %v10974_v38 = vld [vmem:[%s12723_s11 + $0xa0] sm:$0xf]  ;;  %v15643_v30 = vpop.f32.mrf.mxu1 }
 0x28b   : > { %v11083_v7 = vcombine.low %v7724_v16, %v7734_v55  ;;  %v7752_v9 = vor.u32 %v7751_v35, %v7747_v27  ;;  %v7757_v10 = vrot.slane %v7755_v18, 5  ;;  %v4944_v62 = vadd.f32 %v17065_v19, %v4446_v26  ;;  %v10975_v16 = vld [vmem:[%s12723_s11 + $0xa4] sm:$0x1]  ;;  %v15641_v26 = vpop.f32.mrf.mxu0  ;;  %17069 = vst [vmem:[#allocation65_spill] sm:$0xff] %v15643_v30 }
 0x28c   : > { %v7743_v14 = vrot.slane %v7742_v20, 4  ;;  %v4449_v32 = vadd.f32 %v15101_v6, %v17066_v43  ;;  %v4447_v57 = vadd.f32 %v15122_v41, %v17067_v15  ;;  %v11029_v24 = vrot.slane %v11013_v33, 9  ;;  %17068 = vst [vmem:[#allocation56_spill] sm:$0xff] %v15641_v26  ;;  %v10973_v33 = vld [vmem:[%s12723_s11 + $0x9c] sm:$0xf] }
 0x28d   : > { %12336 = vmatprep.mubr.bf16.mxu1 %v11083_v7  ;;  %v7753_v37 = vrot.slane %v7752_v9, 4  ;;  %10605 = vst [vmem:[%s14196_s24 + $0x1a0] sm:$0xff] %v4944_v62  ;;  %v5008_v12 = vadd.f32 %v5007_v52, %v4944_v62  ;;  %v5047_v49 = vmul.f32 %v4944_v62, %v4944_v62  ;;  %v8022_v18 = vrot.slane %v10974_v38, 5 }
 0x28e   : > { %v7748_v6 = vsel %vm12753_vm2, %v7743_v14, %v7747_v27  ;;  %v15648_v41 = vadd.f32 %v15103_v53, %v4449_v32  ;;  %v4945_v35 = vadd.f32 %v15124_v8, %v4447_v57  ;;  %v8025_v46 = vrot.slane %v10975_v16, 5  ;;  %v11014_v14 = vld [vmem:[%s12723_s11 + $0xa8] sm:$0xe]  ;;  %v15664_v43 = vpop.f32.mrf.mxu0  ;;  %v15666_v32 = vpop.f32.mrf.mxu1 }
 0x28f   : > { %v7758_v55 = vsel %vm12753_vm2, %v7753_v37, %v7757_v10  ;;  %v5078_v20 = vadd.f32 %v5077_v48, %v5047_v49  ;;  %v8023_v52 = vsel %vm13224_vm5, %v11029_v24, %v8022_v18  ;;  %v8024_v7 = vrot.slane %v8022_v18, 4  ;;  %17070 = vst [vmem:[#allocation63_spill] sm:$0xff] %v15664_v43  ;;  %17071 = vst [vmem:[#allocation66_spill] sm:$0xff] %v15666_v32  ;;  %v10978_v32 = vld [vmem:[%s12723_s11 + $0xb0] sm:$0x1] }
 0x290   : > { %v5049_v9 = vmul.f32 %v15604_v22, %v15604_v22  ;;  %v11084_v27 = vcombine.low %v7748_v6, %v7758_v55  ;;  %10608 = vst [vmem:[%s14196_s24 + $0x1b8] sm:$0xff] %v15648_v41  ;;  %10606 = vst [vmem:[%s14196_s24 + $0x1a8] sm:$0xff] %v4945_v35  ;;  %v5009_v53 = vadd.f32 %v5008_v12, %v4945_v35  ;;  %v7760_v62 = vshrl.u32 %v10973_v33, 16 }
 0x291   : > { %v5048_v8 = vmul.f32 %v4945_v35, %v4945_v35  ;;  %v8026_v19 = vsel %vm13224_vm5, %v8024_v7, %v8025_v46  ;;  %v7763_v10 = vshll.u32 %v10973_v33, 16  ;;  %v7769_v48 = vshll.u32 %v10974_v38, 16  ;;  %v10976_v35 = vld [vmem:[%s12723_s11 + $0xa8] sm:$0xf]  ;;  %v10977_v7 = vld [vmem:[%s12723_s11 + $0xac] sm:$0xf] }
 0x292   : > { %12337 = vmatmul.mubr.bf16.gmra.mxu1 %v11084_v27  ;;  %v5010_v15 = vadd.f32 %v5009_v53, %v15604_v22  ;;  %v11061_v24 = vcombine.low %v8023_v52, %v8026_v19  ;;  %v7773_v37 = vshrl.u32 %v10974_v38, 16  ;;  %v7762_v12 = vrot.slane %v7760_v62, 4  ;;  %v15674_v38 = vpop.f32.mrf.mxu0  ;;  %v15676_v52 = vpop.f32.mrf.mxu1 }
 0x293   : > { %v5079_v57 = vadd.f32 %v5078_v20, %v5048_v8  ;;  %v7765_v49 = vrot.slane %v7763_v10, 5  ;;  %v7771_v18 = vrot.slane %v7769_v48, 5  ;;  %v7779_v6 = vshll.u32 %v10975_v16, 16  ;;  %17072 = vst [vmem:[#allocation20_spill] sm:$0xff] %v15674_v38  ;;  %17073 = vst [vmem:[#allocation17_spill] sm:$0xff] %v15676_v52 }
 0x294   : > { %12292 = vmatprep.mubr.bf16.mxu0 %v11061_v24  ;;  %v7775_v33 = vrot.slane %v7773_v37, 4  ;;  %v4452_v55 = vadd.f32 %v15137_v47, %v15108_v39  ;;  %v11030_v43 = vrot.slane %v11014_v14, 9  ;;  %v8029_v22 = vrot.slane %v10977_v7, 5  ;;  %v15683_v10 = vpop.f32.mrf.mxu0  ;;  %v15685_v48 = vpop.f32.mrf.mxu1 }
 0x295   : > { %v5080_v46 = vadd.f32 %v5079_v57, %v5049_v9  ;;  %v7766_v27 = vor.u32 %v7765_v49, %v7762_v12  ;;  %v7781_v30 = vrot.slane %v7779_v6, 5  ;;  %v8032_v20 = vrot.slane %v10978_v32, 5  ;;  %17074 = vst [vmem:[#allocation64_spill] sm:$0xff] %v15683_v10  ;;  %17075 = vst [vmem:[#allocation3_spill] sm:$0xff] %v15685_v48 }
 0x296   : > { %v7776_v16 = vor.u32 %v7775_v33, %v7771_v18  ;;  %v15679_v9 = vadd.f32 %v15139_v31, %v4452_v55  ;;  %v7784_v53 = vshrl.u32 %v10976_v35, 16  ;;  %v7787_v8 = vshll.u32 %v10976_v35, 16 }
 0x297   : > { %v7767_v19 = vrot.slane %v7766_v27, 4  ;;  %v8030_v39 = vsel %vm13224_vm5, %v11030_v43, %v8029_v22  ;;  %v8031_v47 = vrot.slane %v8029_v22, 4  ;;  %v7793_v62 = vshll.u32 %v10977_v7, 16  ;;  %v11015_v27 = vld [vmem:[%s12723_s11 + $0xb4] sm:$0xe]  ;;  %v15698_v22 = vpop.f32.mrf.mxu0 }
 0x298   : > { %v5050_v14 = vmul.f32 %v15648_v41, %v15648_v41  ;;  %v7777_v57 = vrot.slane %v7776_v16, 4  ;;  %10611 = vst [vmem:[%s14196_s24 + $0x1d0] sm:$0xff] %v15679_v9  ;;  %v7786_v31 = vrot.slane %v7784_v53, 4  ;;  %v7789_v24 = vrot.slane %v7787_v8, 5  ;;  %17076 = vst [vmem:[#allocation24_spill] sm:$0xff] %v15698_v22  ;;  %v15700_v16 = vpop.f32.mrf.mxu1  ;;  %v17078_v8 = vld [vmem:[#allocation28_spill] sm:$0xff] }
 0x299   : > { %v7772_v37 = vsel %vm12753_vm2, %v7767_v19, %v7771_v18  ;;  %v8033_v43 = vsel %vm13224_vm5, %v8031_v47, %v8032_v20  ;;  %v7795_v12 = vrot.slane %v7793_v62, 5  ;;  %v7797_v49 = vshrl.u32 %v10977_v7, 16  ;;  %17077 = vst [vmem:[#allocation5_spill] sm:$0xff] %v15700_v16  ;;  %v17079_v20 = vld [vmem:[#allocation23_spill] sm:$0xff]  ;;  %v17080_v62 = vld [vmem:[#allocation22_spill] sm:$0xff] }
 0x29a   : > { %v7782_v6 = vsel %vm12753_vm2, %v7777_v57, %v7781_v30  ;;  %v11062_v35 = vcombine.low %v8030_v39, %v8033_v43  ;;  %v7790_v33 = vor.u32 %v7789_v24, %v7786_v31  ;;  %v7803_v55 = vshll.u32 %v10978_v32, 16  ;;  %v17081_v32 = vld [vmem:[#allocation38_spill] sm:$0xff]  ;;  %v10980_v31 = vld [vmem:[%s12723_s11 + $0xb8] sm:$0xf] }
 0x29b   : > { %v11085_v53 = vcombine.low %v7772_v37, %v7782_v6  ;;  %v7799_v18 = vrot.slane %v7797_v49, 4  ;;  %v4450_v19 = vadd.f32 %v17079_v20, %v17078_v8  ;;  %v5011_v7 = vadd.f32 %v5010_v15, %v15648_v41  ;;  %v17082_v43 = vld [vmem:[#allocation29_spill] sm:$0xff]  ;;  %v10979_v41 = vld [vmem:[%s12723_s11 + $0xb4] sm:$0xf] }
 0x29c   : > { %12293 = vmatmul.mubr.bf16.gmra.mxu0 %v11062_v35  ;;  %v7791_v30 = vrot.slane %v7790_v33, 4  ;;  %v7805_v47 = vrot.slane %v7803_v55, 5  ;;  %v5081_v39 = vadd.f32 %v5080_v46, %v5050_v14  ;;  %v4453_v57 = vadd.f32 %v17081_v32, %v17080_v62  ;;  %v17083_v6 = vld [vmem:[#allocation25_spill] sm:$0xff]  ;;  %v15718_v55 = vpop.f32.mrf.mxu0 }
 0x29d   : > { %12340 = vmatprep.mubr.bf16.mxu1 %v11085_v53  ;;  %v7800_v24 = vor.u32 %v7799_v18, %v7795_v12  ;;  %v4948_v37 = vadd.f32 %v17082_v43, %v4450_v19  ;;  %v4451_v49 = vadd.f32 %v15181_v13, %v17083_v6  ;;  %v10981_v8 = vld [vmem:[%s12723_s11 + $0xbc] sm:$0x1]  ;;  %v11031_v20 = vrot.slane %v11015_v27, 9  ;;  %17085 = vst [vmem:[#allocation27_spill] sm:$0xff] %v15718_v55  ;;  %v15720_v53 = vpop.f32.mrf.mxu1  ;;  %v11097_v55 = vld [vmem:[%s12723_s11 + $0x18] sm:$0xf] }
 0x29e   : > { %v7796_v15 = vsel %vm12753_vm2, %v7791_v30, %v7795_v12  ;;  %v17084_v46 = vld [vmem:[#allocation41_spill] sm:$0xff]  ;;  %v8036_v35 = vrot.slane %v10980_v31, 5  ;;  %v8039_v33 = vrot.slane %v10981_v8, 5  ;;  %17086 = vst [vmem:[#allocation4_spill] sm:$0xff] %v15720_v53  ;;  %v5053_v12 = vmul.f32 %v15679_v9, %v15679_v9  ;;  %v15736_v53 = vpop.f32.mrf.mxu0 }
 0x29f   : > { %v15716_v14 = vadd.f32 %v17084_v46, %v4453_v57  ;;  %v7801_v18 = vrot.slane %v7800_v24, 4  ;;  %10609 = vst [vmem:[%s14196_s24 + $0x1c0] sm:$0xff] %v4948_v37  ;;  %v5012_v13 = vadd.f32 %v5011_v7, %v4948_v37  ;;  %v5051_v19 = vmul.f32 %v4948_v37, %v4948_v37  ;;  %v11016_v46 = vld [vmem:[%s12723_s11 + $0xc0] sm:$0xe]  ;;  %17087 = vst [vmem:[#allocation13_spill] sm:$0xff] %v15736_v53 }
 0x2a0   : > { %v4949_v27 = vadd.f32 %v15183_v50, %v4451_v49  ;;  %v8037_v30 = vsel %vm13224_vm5, %v11031_v20, %v8036_v35  ;;  %v8038_v62 = vrot.slane %v8036_v35, 4  ;;  %v7808_v32 = vshrl.u32 %v10979_v41, 16  ;;  %v15738_v20 = vpop.f32.mrf.mxu1 }
 0x2a1   : > { %10612 = vst [vmem:[%s14196_s24 + $0x1d8] sm:$0xff] %v15716_v14  ;;  %v7806_v57 = vsel %vm12753_vm2, %v7801_v18, %v7805_v47  ;;  %v5082_v24 = vadd.f32 %v5081_v39, %v5051_v19  ;;  %v7811_v49 = vshll.u32 %v10979_v41, 16  ;;  %17088 = vst [vmem:[#allocation14_spill] sm:$0xff] %v15738_v20  ;;  %v7817_v39 = vshll.u32 %v10980_v31, 16  ;;  %v10983_v19 = vld [vmem:[%s12723_s11 + $0xc4] sm:$0xf] }
 0x2a2   : > { %10610 = vst [vmem:[%s14196_s24 + $0x1c8] sm:$0xff] %v4949_v27  ;;  %v5013_v7 = vadd.f32 %v5012_v13, %v4949_v27  ;;  %v5052_v43 = vmul.f32 %v4949_v27, %v4949_v27  ;;  %v11086_v37 = vcombine.low %v7796_v15, %v7806_v57  ;;  %v8040_v50 = vsel %vm13224_vm5, %v8038_v62, %v8039_v33  ;;  %v17089_v33 = vld [vmem:[#allocation37_spill] sm:$0xff]  ;;  %v10982_v41 = vld [vmem:[%s12723_s11 + $0xc0] sm:$0xf]  ;;  %v15747_v57 = vpop.f32.mrf.mxu1 }
 0x2a3   : > { %v7810_v6 = vrot.slane %v7808_v32, 4  ;;  %v11063_v18 = vcombine.low %v8037_v30, %v8040_v50  ;;  %v7813_v13 = vrot.slane %v7811_v49, 5  ;;  %v7821_v15 = vshrl.u32 %v10980_v31, 16  ;;  %v15745_v32 = vpop.f32.mrf.mxu0  ;;  %17091 = vst [vmem:[#allocation18_spill] sm:$0xff] %v15747_v57 }
 0x2a4   : > { %v5014_v35 = vadd.f32 %v5013_v7, %v15679_v9  ;;  %v5083_v47 = vadd.f32 %v5082_v24, %v5052_v43  ;;  %12341 = vmatmul.mubr.bf16.gmra.mxu1 %v11086_v37  ;;  %v7827_v27 = vshll.u32 %v10981_v8, 16  ;;  %v4456_v62 = vadd.f32 %v15194_v4, %v17089_v33  ;;  %17090 = vst [vmem:[#allocation9_spill] sm:$0xff] %v15745_v32  ;;  %v10984_v4 = vld [vmem:[%s12723_s11 + $0xc8] sm:$0x1] }
 0x2a5   : > { %12296 = vmatprep.mubr.bf16.mxu0 %v11063_v18  ;;  %v7819_v9 = vrot.slane %v7817_v39, 5  ;;  %v11032_v30 = vrot.slane %v11016_v46, 9  ;;  %v8043_v24 = vrot.slane %v10983_v19, 5  ;;  %v5054_v7 = vmul.f32 %v15716_v14, %v15716_v14  ;;  %v15755_v37 = vpop.f32.mrf.mxu0 }
 0x2a6   : > { %v5084_v20 = vadd.f32 %v5083_v47, %v5053_v12  ;;  %v7814_v43 = vor.u32 %v7813_v13, %v7810_v6  ;;  %v7823_v31 = vrot.slane %v7821_v15, 4  ;;  %v15752_v8 = vadd.f32 %v15196_v56, %v4456_v62  ;;  %17092 = vst [vmem:[#allocation26_spill] sm:$0xff] %v15755_v37  ;;  %v15761_v6 = vpop.f32.mrf.mxu1 }
 0x2a7   : > { %v8044_v50 = vsel %vm13224_vm5, %v11032_v30, %v8043_v24  ;;  %v8045_v12 = vrot.slane %v8043_v24, 4  ;;  %v8046_v49 = vrot.slane %v10984_v4, 5  ;;  %v7832_v47 = vshrl.u32 %v10982_v41, 16  ;;  %17093 = vst [vmem:[#allocation15_spill] sm:$0xff] %v15761_v6  ;;  %v15763_v56 = vpop.f32.mrf.mxu0  ;;  %v17094_v6 = vld [vmem:[#allocation40_spill] sm:$0xff] }
 0x2a8   : > { %v7815_v18 = vrot.slane %v7814_v43, 4  ;;  %v7824_v46 = vor.u32 %v7823_v31, %v7819_v9  ;;  %v7829_v39 = vrot.slane %v7827_v27, 5  ;;  %10615 = vst [vmem:[%s14196_s24 + $0x1f0] sm:$0xff] %v15752_v8  ;;  %v7835_v33 = vshll.u32 %v10982_v41, 16 }
 0x2a9   : > { %v8047_v13 = vsel %vm13224_vm5, %v8045_v12, %v8046_v49  ;;  %v7834_v15 = vrot.slane %v7832_v47, 4  ;;  %v7841_v62 = vshll.u32 %v10983_v19, 16  ;;  %v7845_v30 = vshrl.u32 %v10983_v19, 16  ;;  %v15769_v37 = vpop.f32.mrf.mxu0 }
 0x2aa   : > { %v7820_v24 = vsel %vm12753_vm2, %v7815_v18, %v7819_v9  ;;  %v7825_v43 = vrot.slane %v7824_v46, 4  ;;  %v11064_v31 = vcombine.low %v8044_v50, %v8047_v13  ;;  %v7837_v27 = vrot.slane %v7835_v33, 5  ;;  %v15777_v50 = vpop.f32.mrf.mxu1  ;;  %v17096_v13 = vld [vmem:[#allocation43_spill] sm:$0xff] }
 0x2ab   : > { %v7843_v41 = vrot.slane %v7841_v62, 5  ;;  %v7847_v57 = vrot.slane %v7845_v30, 4  ;;  %v7851_v32 = vshll.u32 %v10984_v4, 16  ;;  %v4454_v53 = vadd.f32 %v15221_v2, %v17094_v6  ;;  %v15779_v47 = vpop.f32.mrf.mxu0  ;;  %v17095_v6 = vld [vmem:[#allocation30_spill] sm:$0xff] }
 0x2ac   : > { %v7830_v12 = vsel %vm12753_vm2, %v7825_v43, %v7829_v39  ;;  %12297 = vmatmul.mubr.bf16.gmra.mxu0 %v11064_v31  ;;  %v7838_v19 = vor.u32 %v7837_v27, %v7834_v15  ;;  %v5015_v9 = vadd.f32 %v5014_v35, %v15716_v14  ;;  %v5085_v49 = vadd.f32 %v5084_v20, %v5054_v7  ;;  %v17097_v62 = vld [vmem:[#allocation42_spill] sm:$0xff]  ;;  %v11098_v14 = vld [vmem:[%s12723_s11 + $0x1c] sm:$0xf]  ;;  %v15787_v35 = vpop.f32.mrf.mxu1  ;;  %v17100_v27 = vld [vmem:[#allocation44_spill] sm:$0xff] }
 0x2ad   : > { %v11087_v18 = vcombine.low %v7820_v24, %v7830_v12  ;;  %v7848_v4 = vor.u32 %v7847_v57, %v7843_v41  ;;  %v7853_v46 = vrot.slane %v7851_v32, 5  ;;  %v4952_v2 = vadd.f32 %v15223_v54, %v4454_v53  ;;  %v17098_v15 = vld [vmem:[#allocation46_spill] sm:$0xff]  ;;  %v15789_v7 = vpop.f32.mrf.mxu0 }
 0x2ae   : > { %v7839_v33 = vrot.slane %v7838_v19, 4  ;;  %v4457_v39 = vadd.f32 %v17096_v13, %v17095_v6  ;;  %v4455_v30 = vadd.f32 %v17098_v15, %v17097_v62  ;;  %v8660_v20 = vshrl.u32 %v11097_v55, 16  ;;  %v17099_v43 = vld [vmem:[#allocation34_spill] sm:$0xff]  ;;  %v15797_v13 = vpop.f32.mrf.mxu1  ;;  %v11185_v62 = vld [vmem:[%s12723_s11 + $0x18] sm:$0xe] }
 0x2af   : > { %12344 = vmatprep.mubr.bf16.mxu1 %v11087_v18  ;;  %v7849_v24 = vrot.slane %v7848_v4, 4  ;;  %10613 = vst [vmem:[%s14196_s24 + $0x1e0] sm:$0xff] %v4952_v2  ;;  %v5016_v32 = vadd.f32 %v5015_v9, %v4952_v2  ;;  %v5055_v54 = vmul.f32 %v4952_v2, %v4952_v2  ;;  %v8663_v53 = vshll.u32 %v11097_v55, 16  ;;  %v11099_v19 = vld [vmem:[%s12723_s11 + $0x20] sm:$0x1]  ;;  %v15799_v18 = vpop.f32.mrf.mxu0 }
 0x2b0   : > { %v7844_v57 = vsel %vm12753_vm2, %v7839_v33, %v7843_v41  ;;  %v4955_v31 = vadd.f32 %v17099_v43, %v4457_v39  ;;  %v4953_v12 = vadd.f32 %v17100_v27, %v4455_v30  ;;  %v8662_v6 = vrot.slane %v8660_v20, 4  ;;  %v15812_v22 = vpop.f32.mrf.mxu1 }
 0x2b1   : > { %v7854_v9 = vsel %vm12753_vm2, %v7849_v24, %v7853_v46  ;;  %v5086_v4 = vadd.f32 %v5085_v49, %v5055_v54  ;;  %v8665_v2 = vrot.slane %v8663_v53, 5  ;;  %v8669_v55 = vshll.u32 %v11098_v14, 16  ;;  %v15808_v30 = vpop.f32.mrf.mxu0  ;;  %v11100_v53 = vld [vmem:[%s12723_s11 + $0x24] sm:$0xf] }
 0x2b2   : > { %v5057_v41 = vmul.f32 %v15752_v8, %v15752_v8  ;;  %v11088_v33 = vcombine.low %v7844_v57, %v7854_v9  ;;  %10616 = vst [vmem:[%s14196_s24 + $0x1f8] sm:$0xff] %v4955_v31  ;;  %10614 = vst [vmem:[%s14196_s24 + $0x1e8] sm:$0xff] %v4953_v12  ;;  %v5017_v39 = vadd.f32 %v5016_v32, %v4953_v12  ;;  %v8673_v27 = vshrl.u32 %v11098_v14, 16 }
 0x2b3   : > { %v5056_v15 = vmul.f32 %v4953_v12, %v4953_v12  ;;  %v8666_v20 = vor.u32 %v8665_v2, %v8662_v6  ;;  %v8671_v43 = vrot.slane %v8669_v55, 5  ;;  %v8679_v16 = vshll.u32 %v11099_v19, 16  ;;  %v15814_v57 = vpop.f32.mrf.mxu0 }
 0x2b4   : > { %12345 = vmatmul.mubr.bf16.gmra.mxu1 %v11088_v33  ;;  %v5018_v49 = vadd.f32 %v5017_v39, %v15752_v8  ;;  %v11201_v24 = vrot.slane %v11185_v62, 9  ;;  %v9431_v54 = vrot.slane %v11098_v14, 5  ;;  %v5058_v32 = vmul.f32 %v4955_v31, %v4955_v31 }
 0x2b5   : > { %v5087_v46 = vadd.f32 %v5086_v4, %v5056_v15  ;;  %v8667_v12 = vrot.slane %v8666_v20, 4  ;;  %v8675_v9 = vrot.slane %v8673_v27, 4  ;;  %v9434_v6 = vrot.slane %v11099_v19, 5  ;;  %v11101_v4 = vld [vmem:[%s12723_s11 + $0x28] sm:$0xf]  ;;  %v15819_v62 = vpop.f32.mrf.mxu0 }
 0x2b6   : > { %v5019_v2 = vadd.f32 %v5018_v49, %v4955_v31  ;;  %v9432_v33 = vsel %vm13224_vm5, %v11201_v24, %v9431_v54  ;;  %v9433_v8 = vrot.slane %v9431_v54, 4  ;;  %17101 = vst [vmem:[#allocation33_spill] sm:$0xff] %v15819_v62  ;;  %v8681_v15 = vrot.slane %v8679_v16, 5  ;;  %v11102_v31 = vld [vmem:[%s12723_s11 + $0x2c] sm:$0x1]  ;;  %v15827_v49 = vpop.f32.mrf.mxu1 }
 0x2b7   : > { %v5088_v55 = vadd.f32 %v5087_v46, %v5057_v41  ;;  %v8672_v14 = vsel %vm12753_vm2, %v8667_v12, %v8671_v43  ;;  %v8676_v39 = vor.u32 %v8675_v9, %v8671_v43  ;;  %v8684_v48 = vshrl.u32 %v11100_v53, 16  ;;  %v11186_v27 = vld [vmem:[%s12723_s11 + $0x24] sm:$0xe]  ;;  %v15829_v46 = vpop.f32.mrf.mxu0 }
 0x2b8   : > { %v5020_v20 = vrot.slane %v5019_v2, 4  ;;  %v9435_v19 = vsel %vm13224_vm5, %v9433_v8, %v9434_v6  ;;  %v8687_v41 = vshll.u32 %v11100_v53, 16  ;;  %17102 = vst [vmem:[#allocation21_spill] sm:$0xff] %v15829_v46  ;;  %v8693_v38 = vshll.u32 %v11101_v4, 16  ;;  %v15831_v26 = vpop.f32.mrf.mxu1  ;;  %v11103_v46 = vld [vmem:[%s12723_s11 + $0x30] sm:$0xf] }
 0x2b9   : > { %v5089_v10 = vadd.f32 %v5088_v55, %v5058_v32  ;;  %v8677_v24 = vrot.slane %v8676_v39, 4  ;;  %v11233_v54 = vcombine.low %v9432_v33, %v9435_v19  ;;  %v8686_v52 = vrot.slane %v8684_v48, 4  ;;  %v15833_v32 = vpop.f32.mrf.mxu0 }
 0x2ba   : > { %v5021_v12 = vadd.f32 %v5020_v20, %v5019_v2  ;;  %v8689_v16 = vrot.slane %v8687_v41, 5  ;;  %v8697_v9 = vshrl.u32 %v11101_v4, 16  ;;  %17103 = vst [vmem:[#allocation32_spill] sm:$0xff] %v15833_v32  ;;  %v8695_v6 = vrot.slane %v8693_v38, 5  ;;  %v15837_v2 = vpop.f32.mrf.mxu1  ;;  %v17105_v32 = vld [vmem:[#allocation6_spill] sm:$0xff] }
 0x2bb   : > { %v5090_v43 = vrot.slane %v5089_v10, 4  ;;  %v8682_v53 = vsel %vm12753_vm2, %v8677_v24, %v8681_v15  ;;  %12412 = vmatprep.mubr.bf16.mxu1 %v11233_v54  ;;  %v8703_v55 = vshll.u32 %v11102_v31, 16  ;;  %v11202_v8 = vrot.slane %v11186_v27, 9  ;;  %v15839_v20 = vpop.f32.mrf.mxu0 }
 0x2bc   : > { %v5022_v39 = vrot.slane %v5021_v12, 2  ;;  %v11161_v48 = vcombine.low %v8672_v14, %v8682_v53  ;;  %v8690_v19 = vor.u32 %v8689_v16, %v8686_v52  ;;  %17104 = vst [vmem:[#allocation28_spill] sm:$0xff] %v15839_v20  ;;  %v8699_v41 = vrot.slane %v8697_v9, 4  ;;  %v17109_v9 = vld [vmem:[#allocation51_spill] sm:$0xff] }
 0x2bd   : > { %v5091_v33 = vadd.f32 %v5090_v43, %v5089_v10  ;;  %v9438_v45 = vrot.slane %v11101_v4, 5  ;;  %v9441_v58 = vrot.slane %v11102_v31, 5  ;;  %v17106_v15 = vrot.slane %v17105_v32, 1  ;;  %v15845_v10 = vpop.f32.mrf.mxu1  ;;  %v15847_v52 = vpop.f32.mrf.mxu0  ;;  %v11104_v31 = vld [vmem:[%s12723_s11 + $0x34] sm:$0xf] }
 0x2be   : > { %v5023_v38 = vadd.f32 %v5022_v39, %v5021_v12  ;;  %12364 = vmatprep.mubr.bf16.mxu0 %v11161_v48  ;;  %v8691_v27 = vrot.slane %v8690_v19, 4  ;;  %17107 = vst [vmem:[#allocation23_spill] sm:$0xff] %v15845_v10  ;;  %17108 = vst [vmem:[#allocation22_spill] sm:$0xff] %v15847_v52  ;;  %v8700_v14 = vor.u32 %v8699_v41, %v8695_v6  ;;  %v8705_v43 = vrot.slane %v8703_v55, 5 }
 0x2bf   : > { %v2441_v24 = vadd.f32 %v17106_v15, %v17105_v32  ;;  %v5092_v54 = vrot.slane %v5091_v33, 2  ;;  %v9439_v16 = vsel %vm13224_vm5, %v11202_v8, %v9438_v45  ;;  %v9440_v4 = vrot.slane %v9438_v45, 4  ;;  %v15857_v19 = vpop.f32.mrf.mxu0  ;;  %v15861_v45 = vpop.f32.mrf.mxu1 }
 0x2c0   : > { %v17110_v32 = vrot.slane %v17109_v9, 1  ;;  %v5024_v53 = vrot.slane %v5023_v38, 1  ;;  %v8696_v48 = vsel %vm12753_vm2, %v8691_v27, %v8695_v6  ;;  %17111 = vst [vmem:[#allocation38_spill] sm:$0xff] %v15857_v19  ;;  %v8701_v41 = vrot.slane %v8700_v14, 4  ;;  %17112 = vst [vmem:[#allocation29_spill] sm:$0xff] %v15861_v45 }
 0x2c1   : > { %v5093_v39 = vadd.f32 %v5092_v54, %v5091_v33  ;;  %v9442_v55 = vsel %vm13224_vm5, %v9440_v4, %v9441_v58  ;;  %v8708_v8 = vshrl.u32 %v11103_v46, 16  ;;  %v8711_v15 = vshll.u32 %v11103_v46, 16  ;;  %v11187_v33 = vld [vmem:[%s12723_s11 + $0x30] sm:$0xe]  ;;  %v15865_v54 = vpop.f32.mrf.mxu0  ;;  %v15869_v4 = vpop.f32.mrf.mxu1 }
 0x2c2   : > { %v2511_v12 = vadd.f32 %v17110_v32, %v17109_v9  ;;  %v5025_v52 = vadd.f32 %v5024_v53, %v5023_v38  ;;  %v11234_v20 = vcombine.low %v9439_v16, %v9442_v55  ;;  %v11105_v9 = vld [vmem:[%s12723_s11 + $0x38] sm:$0x1]  ;;  %v8717_v32 = vshll.u32 %v11104_v31, 16  ;;  %17113 = vst [vmem:[#allocation25_spill] sm:$0xff] %v15865_v54  ;;  %17114 = vst [vmem:[#allocation41_spill] sm:$0xff] %v15869_v4 }
 0x2c3   : > { %v5094_v10 = vrot.slane %v5093_v39, 1  ;;  %v8706_v6 = vsel %vm12753_vm2, %v8701_v41, %v8705_v43  ;;  %v8710_v27 = vrot.slane %v8708_v8, 4  ;;  %v8713_v14 = vrot.slane %v8711_v15, 5  ;;  %v11106_v55 = vld [vmem:[%s12723_s11 + $0x3c] sm:$0xf]  ;;  %v15874_v19 = vpop.f32.mrf.mxu0  ;;  %v15877_v8 = vpop.f32.mrf.mxu1 }
 0x2c4   : > { %v8721_v58 = vshrl.u32 %v11104_v31, 16  ;;  %v15871_v46 = vadd.f32 %v5025_v52, %v2441_v24  ;;  %v11162_v53 = vcombine.low %v8696_v48, %v8706_v6  ;;  %12413 = vmatmul.mubr.bf16.vlgmr.msra.gmra.mxu1 %v11234_v20  ;;  %v8719_v16 = vrot.slane %v8717_v32, 5  ;;  %17116 = vst [vmem:[#allocation40_spill] sm:$0xff] %v15874_v19  ;;  %v11107_v41 = vld [vmem:[%s12723_s11 + $0x40] sm:$0xf]  ;;  %17117 = vst [vmem:[#allocation30_spill] sm:$0xff] %v15877_v8 }
 0x2c5   : > { %v5095_v38 = vadd.f32 %v5094_v10, %v5093_v39  ;;  %v8714_v54 = vor.u32 %v8713_v14, %v8710_v27  ;;  %v8727_v62 = vshll.u32 %v11105_v9, 16  ;;  %v11203_v43 = vrot.slane %v11187_v33, 9  ;;  %v15881_v52 = vpop.f32.mrf.mxu0  ;;  %v11108_v32 = vld [vmem:[%s12723_s11 + $0x44] sm:$0x1]  ;;  %v15884_v27 = vpop.f32.mrf.mxu1  ;;  %v11110_v8 = vld [vmem:[%s12723_s11 + $0x4c] sm:$0xf] }
 0x2c6   : > { %17115 = vst [vmem:[#allocation37_spill] sm:$0xff] %v15871_v46  ;;  %v8723_v45 = vrot.slane %v8721_v58, 4  ;;  %12365 = vmatmul.mubr.bf16.vlgmr.msra.gmra.mxu0 %v11162_v53  ;;  %v9445_v24 = vrot.slane %v11104_v31, 5  ;;  %v9448_v10 = vrot.slane %v11105_v9, 5  ;;  %17119 = vst [vmem:[#allocation42_spill] sm:$0xff] %v15881_v52  ;;  %v8732_v6 = vshrl.u32 %v11106_v55, 16 }
 0x2c7   : > { %v15879_v15 = vadd.f32 %v5095_v38, %v2511_v12  ;;  %v8715_v20 = vrot.slane %v8714_v54, 4  ;;  %v8729_v48 = vrot.slane %v8727_v62, 5  ;;  %17120 = vst [vmem:[#allocation46_spill] sm:$0xff] %v15884_v27  ;;  %v8735_v58 = vshll.u32 %v11106_v55, 16  ;;  %v11188_v12 = vld [vmem:[%s12723_s11 + $0x3c] sm:$0xe]  ;;  %v15889_v38 = vpop.f32.mrf.mxu0 }
 0x2c8   : > { %v8724_v39 = vor.u32 %v8723_v45, %v8719_v16  ;;  %v9446_v33 = vsel %vm13224_vm5, %v11203_v43, %v9445_v24  ;;  %v9447_v14 = vrot.slane %v9445_v24, 4  ;;  %v8741_v46 = vshll.u32 %v11107_v41, 16  ;;  %17121 = vst [vmem:[#allocation34_spill] sm:$0xff] %v15889_v38  ;;  %v11109_v27 = vld [vmem:[%s12723_s11 + $0x48] sm:$0xf] }
 0x2c9   : > { %17118 = vst [vmem:[#allocation43_spill] sm:$0xff] %v15879_v15  ;;  %v8720_v31 = vsel %vm12753_vm2, %v8715_v20, %v8719_v16  ;;  %v8734_v45 = vrot.slane %v8732_v6, 4  ;;  %v8745_v62 = vshrl.u32 %v11107_v41, 16  ;;  %v8737_v53 = vrot.slane %v8735_v58, 5  ;;  %v15895_v24 = vpop.f32.mrf.mxu0  ;;  %v15899_v20 = vpop.f32.mrf.mxu1 }
 0x2ca   : > { %v8725_v9 = vrot.slane %v8724_v39, 4  ;;  %v9449_v54 = vsel %vm13224_vm5, %v9447_v14, %v9448_v10  ;;  %v8743_v15 = vrot.slane %v8741_v46, 5  ;;  %v8751_v43 = vshll.u32 %v11108_v32, 16  ;;  %17122 = vst [vmem:[#allocation44_spill] sm:$0xff] %v15895_v24  ;;  %17123 = vst [vmem:[#allocation6_spill] sm:$0xff] %v15899_v20 }
 0x2cb   : > { %v11235_v38 = vcombine.low %v9446_v33, %v9449_v54  ;;  %v8747_v52 = vrot.slane %v8745_v62, 4  ;;  %v11204_v16 = vrot.slane %v11188_v12, 9  ;;  %v8738_v6 = vor.u32 %v8737_v53, %v8734_v45  ;;  %v15903_v10 = vpop.f32.mrf.mxu0  ;;  %v11111_v24 = vld [vmem:[%s12723_s11 + $0x50] sm:$0x1]  ;;  %v15906_v4 = vpop.f32.mrf.mxu1 }
 0x2cc   : > { %v8730_v55 = vsel %vm12753_vm2, %v8725_v9, %v8729_v48  ;;  %v9452_v19 = vrot.slane %v11107_v41, 5  ;;  %17124 = vst [vmem:[#allocation51_spill] sm:$0xff] %v15903_v10  ;;  %v8753_v14 = vrot.slane %v8751_v43, 5  ;;  %v9455_v58 = vrot.slane %v11108_v32, 5  ;;  %17125 = vst [vmem:[#allocation67_spill] sm:$0xff] %v15906_v4 }
 0x2cd   : > { %v11163_v39 = vcombine.low %v8720_v31, %v8730_v55  ;;  %12416 = vmatprep.mubr.bf16.mxu1 %v11235_v38  ;;  %v8748_v46 = vor.u32 %v8747_v52, %v8743_v15  ;;  %v8739_v48 = vrot.slane %v8738_v6, 4  ;;  %v15910_v31 = vpop.f32.mrf.mxu0  ;;  %v8756_v9 = vshrl.u32 %v11109_v27, 16  ;;  %v15912_v52 = vpop.f32.mrf.mxu1  ;;  %v11189_v43 = vld [vmem:[%s12723_s11 + $0x48] sm:$0xe]  ;;  %v11112_v6 = vld [vmem:[%s12723_s11 + $0x54] sm:$0xf] }
 0x2ce   : > { %v9453_v33 = vsel %vm13224_vm5, %v11204_v16, %v9452_v19  ;;  %v9454_v12 = vrot.slane %v9452_v19, 4  ;;  %17126 = vst [vmem:[#allocation68_spill] sm:$0xff] %v15910_v31  ;;  %v8759_v45 = vshll.u32 %v11109_v27, 16  ;;  %v8765_v38 = vshll.u32 %v11110_v8, 16  ;;  %17127 = vst [vmem:[#allocation69_spill] sm:$0xff] %v15912_v52 }
 0x2cf   : > { %12368 = vmatprep.mubr.bf16.mxu0 %v11163_v39  ;;  %v8749_v41 = vrot.slane %v8748_v46, 4  ;;  %v8744_v32 = vsel %vm12753_vm2, %v8739_v48, %v8743_v15  ;;  %v8769_v54 = vshrl.u32 %v11110_v8, 16  ;;  %v8775_v53 = vshll.u32 %v11111_v24, 16  ;;  %v15919_v19 = vpop.f32.mrf.mxu0  ;;  %v15924_v46 = vpop.f32.mrf.mxu1  ;;  %v11113_v10 = vld [vmem:[%s12723_s11 + $0x58] sm:$0xf] }
 0x2d0   : > { %v9456_v62 = vsel %vm13224_vm5, %v9454_v12, %v9455_v58  ;;  %17128 = vst [vmem:[#allocation70_spill] sm:$0xff] %v15919_v19  ;;  %v8758_v27 = vrot.slane %v8756_v9, 4  ;;  %v8761_v39 = vrot.slane %v8759_v45, 5  ;;  %17129 = vst [vmem:[#allocation71_spill] sm:$0xff] %v15924_v46  ;;  %v8767_v15 = vrot.slane %v8765_v38, 5 }
 0x2d1   : > { %v8754_v55 = vsel %vm12753_vm2, %v8749_v41, %v8753_v14  ;;  %v11236_v16 = vcombine.low %v9453_v33, %v9456_v62  ;;  %v8771_v48 = vrot.slane %v8769_v54, 4  ;;  %v15927_v58 = vpop.f32.mrf.mxu0  ;;  %v11205_v52 = vrot.slane %v11189_v43, 9  ;;  %v11114_v41 = vld [vmem:[%s12723_s11 + $0x5c] sm:$0x1]  ;;  %v11116_v46 = vld [vmem:[%s12723_s11 + $0x64] sm:$0xf] }
 0x2d2   : > { %v11164_v31 = vcombine.low %v8744_v32, %v8754_v55  ;;  %17130 = vst [vmem:[#allocation72_spill] sm:$0xff] %v15927_v58  ;;  %v8762_v12 = vor.u32 %v8761_v39, %v8758_v27  ;;  %v9459_v19 = vrot.slane %v11110_v8, 5  ;;  %v9462_v4 = vrot.slane %v11111_v24, 5  ;;  %v11190_v27 = vld [vmem:[%s12723_s11 + $0x54] sm:$0xe] }
 0x2d3   : > { %12417 = vmatmul.mubr.bf16.gmra.mxu1 %v11236_v16  ;;  %v8772_v14 = vor.u32 %v8771_v48, %v8767_v15  ;;  %v8777_v33 = vrot.slane %v8775_v53, 5  ;;  %v8780_v9 = vshrl.u32 %v11112_v6, 16  ;;  %v8783_v45 = vshll.u32 %v11112_v6, 16  ;;  %v15930_v62 = vpop.f32.mrf.mxu1  ;;  %v15932_v32 = vpop.f32.mrf.mxu0 }
 0x2d4   : > { %12369 = vmatmul.mubr.bf16.gmra.mxu0 %v11164_v31  ;;  %17131 = vst [vmem:[#allocation73_spill] sm:$0xff] %v15930_v62  ;;  %17132 = vst [vmem:[#allocation74_spill] sm:$0xff] %v15932_v32  ;;  %v8763_v38 = vrot.slane %v8762_v12, 4  ;;  %v9460_v54 = vsel %vm13224_vm5, %v11205_v52, %v9459_v19  ;;  %v9461_v55 = vrot.slane %v9459_v19, 4  ;;  %v8789_v16 = vshll.u32 %v11113_v10, 16 }
 0x2d5   : > { %v8773_v43 = vrot.slane %v8772_v14, 4  ;;  %v8782_v8 = vrot.slane %v8780_v9, 4  ;;  %v8785_v24 = vrot.slane %v8783_v45, 5  ;;  %v8793_v31 = vshrl.u32 %v11113_v10, 16  ;;  %v15937_v53 = vpop.f32.mrf.mxu1  ;;  %v15939_v39 = vpop.f32.mrf.mxu0  ;;  %v11115_v62 = vld [vmem:[%s12723_s11 + $0x60] sm:$0xf] }
 0x2d6   : > { %17133 = vst [vmem:[#allocation75_spill] sm:$0xff] %v15937_v53  ;;  %17134 = vst [vmem:[#allocation76_spill] sm:$0xff] %v15939_v39  ;;  %v8768_v6 = vsel %vm12753_vm2, %v8763_v38, %v8767_v15  ;;  %v9463_v48 = vsel %vm13224_vm5, %v9461_v55, %v9462_v4  ;;  %v8791_v52 = vrot.slane %v8789_v16, 5  ;;  %v8799_v19 = vshll.u32 %v11114_v41, 16  ;;  %v11117_v16 = vld [vmem:[%s12723_s11 + $0x68] sm:$0x1] }
 0x2d7   : > { %v8778_v12 = vsel %vm12753_vm2, %v8773_v43, %v8777_v33  ;;  %v11237_v14 = vcombine.low %v9460_v54, %v9463_v48  ;;  %v8786_v9 = vor.u32 %v8785_v24, %v8782_v8  ;;  %v8795_v45 = vrot.slane %v8793_v31, 4  ;;  %v15947_v32 = vpop.f32.mrf.mxu1  ;;  %v15954_v33 = vpop.f32.mrf.mxu0 }
 0x2d8   : > { %17135 = vst [vmem:[#allocation77_spill] sm:$0xff] %v15947_v32  ;;  %v11165_v58 = vcombine.low %v8768_v6, %v8778_v12  ;;  %v11206_v53 = vrot.slane %v11190_v27, 9  ;;  %v9466_v39 = vrot.slane %v11113_v10, 5  ;;  %v8801_v4 = vrot.slane %v8799_v19, 5  ;;  %17137 = vst [vmem:[#allocation79_spill] sm:$0xff] %v15954_v33 }
 0x2d9   : > { %12420 = vmatprep.mubr.bf16.mxu1 %v11237_v14  ;;  %v8787_v15 = vrot.slane %v8786_v9, 4  ;;  %v8796_v38 = vor.u32 %v8795_v45, %v8791_v52  ;;  %v9469_v55 = vrot.slane %v11114_v41, 5  ;;  %v15952_v20 = vpop.f32.mrf.mxu1  ;;  %v8804_v24 = vshrl.u32 %v11115_v62, 16  ;;  %v11191_v19 = vld [vmem:[%s12723_s11 + $0x60] sm:$0xe]  ;;  %v17141_v45 = vld [vmem:[#allocation45_spill] sm:$0xff] }
 0x2da   : > { %17136 = vst [vmem:[#allocation78_spill] sm:$0xff] %v15952_v20  ;;  %12372 = vmatprep.mubr.bf16.mxu0 %v11165_v58  ;;  %v9467_v54 = vsel %vm13224_vm5, %v11206_v53, %v9466_v39  ;;  %v9468_v43 = vrot.slane %v9466_v39, 4  ;;  %v8807_v31 = vshll.u32 %v11115_v62, 16  ;;  %v8813_v27 = vshll.u32 %v11116_v46, 16  ;;  %v11118_v14 = vld [vmem:[%s12723_s11 + $0x6c] sm:$0xf] }
 0x2db   : > { %v8792_v10 = vsel %vm12753_vm2, %v8787_v15, %v8791_v52  ;;  %v8797_v8 = vrot.slane %v8796_v38, 4  ;;  %v8817_v6 = vshrl.u32 %v11116_v46, 16  ;;  %v8823_v48 = vshll.u32 %v11117_v16, 16  ;;  %v15968_v52 = vpop.f32.mrf.mxu0  ;;  %v17140_v62 = vld [vmem:[#allocation31_spill] sm:$0xff]  ;;  %v11119_v33 = vld [vmem:[%s12723_s11 + $0x70] sm:$0xf] }
 0x2dc   : > { %v9470_v41 = vsel %vm13224_vm5, %v9468_v43, %v9469_v55  ;;  %v8806_v53 = vrot.slane %v8804_v24, 4  ;;  %v8809_v39 = vrot.slane %v8807_v31, 5  ;;  %17139 = vst [vmem:[#allocation81_spill] sm:$0xff] %v15968_v52  ;;  %v15972_v15 = vadd.f32 %v17141_v45, %v17140_v62  ;;  %v11120_v52 = vld [vmem:[%s12723_s11 + $0x74] sm:$0x1] }
 0x2dd   : > { %v8802_v58 = vsel %vm12753_vm2, %v8797_v8, %v8801_v4  ;;  %v11238_v12 = vcombine.low %v9467_v54, %v9470_v41  ;;  %v15966_v9 = vpop.f32.mrf.mxu1  ;;  %v8815_v55 = vrot.slane %v8813_v27, 5  ;;  %v8819_v43 = vrot.slane %v8817_v6, 4 }
 0x2de   : > { %17138 = vst [vmem:[#allocation80_spill] sm:$0xff] %v15966_v9  ;;  %v11166_v38 = vcombine.low %v8792_v10, %v8802_v58  ;;  %v8810_v20 = vor.u32 %v8809_v39, %v8806_v53  ;;  %v11207_v4 = vrot.slane %v11191_v19, 9  ;;  %v9473_v54 = vrot.slane %v11116_v46, 5  ;;  %v15982_v19 = vpop.f32.mrf.mxu0 }
 0x2df   : > { %12421 = vmatmul.mubr.bf16.gmra.mxu1 %v11238_v12  ;;  %v9476_v8 = vrot.slane %v11117_v16, 5  ;;  %v15975_v24 = vpop.f32.mrf.mxu1  ;;  %v8820_v31 = vor.u32 %v8819_v43, %v8815_v55  ;;  %v8825_v41 = vrot.slane %v8823_v48, 5  ;;  %v8828_v9 = vshrl.u32 %v11118_v14, 16  ;;  %17144 = vst [vmem:[#allocation82_spill] sm:$0xff] %v15982_v19  ;;  %v11192_v48 = vld [vmem:[%s12723_s11 + $0x6c] sm:$0xe] }
 0x2e0   : > { %17142 = vst [vmem:[#allocation31_spill] sm:$0xff] %v15975_v24  ;;  %12373 = vmatmul.mubr.bf16.gmra.mxu0 %v11166_v38  ;;  %v8831_v32 = vshll.u32 %v11118_v14, 16  ;;  %v8811_v62 = vrot.slane %v8810_v20, 4  ;;  %v9474_v10 = vsel %vm13224_vm5, %v11207_v4, %v9473_v54  ;;  %v9475_v27 = vrot.slane %v9473_v54, 4  ;;  %v11121_v19 = vld [vmem:[%s12723_s11 + $0x78] sm:$0xf] }
 0x2e1   : > { %v8837_v6 = vshll.u32 %v11119_v33, 16  ;;  %v15980_v58 = vpop.f32.mrf.mxu1  ;;  %v8821_v46 = vrot.slane %v8820_v31, 4  ;;  %v8830_v16 = vrot.slane %v8828_v9, 4  ;;  %v8841_v53 = vshrl.u32 %v11119_v33, 16  ;;  %v17168_v24 = vld [vmem:[#allocation7_spill] sm:$0xff] }
 0x2e2   : > { %17143 = vst [vmem:[#allocation45_spill] sm:$0xff] %v15980_v58  ;;  %v8833_v12 = vrot.slane %v8831_v32, 5  ;;  %v8816_v39 = vsel %vm12753_vm2, %v8811_v62, %v8815_v55  ;;  %v9477_v20 = vsel %vm13224_vm5, %v9475_v27, %v9476_v8  ;;  %v8847_v45 = vshll.u32 %v11120_v52, 16  ;;  %v11122_v8 = vld [vmem:[%s12723_s11 + $0x7c] sm:$0xf]  ;;  %v15999_v27 = vpop.f32.mrf.mxu0 }
 0x2e3   : > { %v8839_v14 = vrot.slane %v8837_v6, 5  ;;  %v15989_v38 = vpop.f32.mrf.mxu1  ;;  %v8826_v43 = vsel %vm12753_vm2, %v8821_v46, %v8825_v41  ;;  %v11239_v9 = vcombine.low %v9474_v10, %v9477_v20  ;;  %v8843_v4 = vrot.slane %v8841_v53, 4  ;;  %17146 = vst [vmem:[#allocation84_spill] sm:$0xff] %v15999_v27  ;;  %v11123_v46 = vld [vmem:[%s12723_s11 + $0x80] sm:$0x1] }
 0x2e4   : > { %17145 = vst [vmem:[#allocation83_spill] sm:$0xff] %v15989_v38  ;;  %v8834_v32 = vor.u32 %v8833_v12, %v8830_v16  ;;  %v15995_v54 = vadd.f32 %v15317_v42, %v15315_v63  ;;  %v11167_v31 = vcombine.low %v8816_v39, %v8826_v43  ;;  %v11208_v55 = vrot.slane %v11192_v48, 9  ;;  %v11193_v20 = vld [vmem:[%s12723_s11 + $0x78] sm:$0xe] }
 0x2e5   : > { %v9480_v62 = vrot.slane %v11119_v33, 5  ;;  %12424 = vmatprep.mubr.bf16.mxu1 %v11239_v9  ;;  %v8844_v38 = vor.u32 %v8843_v4, %v8839_v14  ;;  %v8849_v58 = vrot.slane %v8847_v45, 5  ;;  %v9483_v41 = vrot.slane %v11120_v52, 5  ;;  %v16021_v45 = vpop.f32.mrf.mxu0 }
 0x2e6   : > { %v8835_v6 = vrot.slane %v8834_v32, 4  ;;  %v16006_v63 = vadd.f32 %v15327_v1, %v15325_v21  ;;  %v16010_v42 = vadd.f32 %v15355_v44, %v15353_v60  ;;  %12376 = vmatprep.mubr.bf16.mxu0 %v11167_v31  ;;  %v8852_v53 = vshrl.u32 %v11121_v19, 16  ;;  %17149 = vst [vmem:[#allocation87_spill] sm:$0xff] %v16021_v45 }
 0x2e7   : > { %v16002_v10 = vpop.f32.mrf.mxu1  ;;  %v9481_v33 = vsel %vm13224_vm5, %v11208_v55, %v9480_v62  ;;  %v9482_v16 = vrot.slane %v9480_v62, 4  ;;  %v8845_v12 = vrot.slane %v8844_v38, 4  ;;  %v8855_v48 = vshll.u32 %v11121_v19, 16  ;;  %v11124_v19 = vld [vmem:[%s12723_s11 + $0x84] sm:$0xf] }
 0x2e8   : > { %17147 = vst [vmem:[#allocation85_spill] sm:$0xff] %v16002_v10  ;;  %v8840_v52 = vsel %vm12753_vm2, %v8835_v6, %v8839_v14  ;;  %v8861_v1 = vshll.u32 %v11122_v8, 16  ;;  %v8865_v60 = vshrl.u32 %v11122_v8, 16  ;;  %v8871_v44 = vshll.u32 %v11123_v46, 16  ;;  %v11125_v6 = vld [vmem:[%s12723_s11 + $0x88] sm:$0xf] }
 0x2e9   : > { %v16016_v39 = vpop.f32.mrf.mxu1  ;;  %v9484_v21 = vsel %vm13224_vm5, %v9482_v16, %v9483_v41  ;;  %v8850_v43 = vsel %vm12753_vm2, %v8845_v12, %v8849_v58  ;;  %v8854_v14 = vrot.slane %v8852_v53, 4  ;;  %v8857_v38 = vrot.slane %v8855_v48, 5  ;;  %v11126_v53 = vld [vmem:[%s12723_s11 + $0x8c] sm:$0x1]  ;;  %v11135_v10 = vld [vmem:[%s12723_s11 + $0xb0] sm:$0x1] }
 0x2ea   : > { %17148 = vst [vmem:[#allocation86_spill] sm:$0xff] %v16016_v39  ;;  %v11240_v9 = vcombine.low %v9481_v33, %v9484_v21  ;;  %v16030_v4 = vadd.f32 %v15374_v29, %v15372_v0  ;;  %v11168_v31 = vcombine.low %v8840_v52, %v8850_v43  ;;  %v8863_v55 = vrot.slane %v8861_v1, 5  ;;  %v16036_v0 = vpop.f32.mrf.mxu0 }
 0x2eb   : > { %v16026_v32 = vpop.f32.mrf.mxu1  ;;  %v8867_v62 = vrot.slane %v8865_v60, 4  ;;  %v8858_v41 = vor.u32 %v8857_v38, %v8854_v14  ;;  %v11209_v16 = vrot.slane %v11193_v20, 9  ;;  %v9487_v39 = vrot.slane %v11122_v8, 5  ;;  %17152 = vst [vmem:[#allocation90_spill] sm:$0xff] %v16036_v0 }
 0x2ec   : > { %17150 = vst [vmem:[#allocation88_spill] sm:$0xff] %v16026_v32  ;;  %12425 = vmatmul.mubr.bf16.gmra.mxu1 %v11240_v9  ;;  %v9490_v58 = vrot.slane %v11123_v46, 5  ;;  %12377 = vmatmul.mubr.bf16.gmra.mxu0 %v11168_v31  ;;  %v8873_v12 = vrot.slane %v8871_v44, 5  ;;  %v8876_v48 = vshrl.u32 %v11124_v19, 16  ;;  %v8879_v21 = vshll.u32 %v11124_v19, 16 }
 0x2ed   : > { %v8868_v33 = vor.u32 %v8867_v62, %v8863_v55  ;;  %v16034_v32 = vpop.f32.mrf.mxu1  ;;  %v8859_v29 = vrot.slane %v8858_v41, 4  ;;  %v9488_v52 = vsel %vm13224_vm5, %v11209_v16, %v9487_v39  ;;  %v9489_v1 = vrot.slane %v9487_v39, 4  ;;  %v11194_v9 = vld [vmem:[%s12723_s11 + $0x84] sm:$0xe] }
 0x2ee   : > { %17151 = vst [vmem:[#allocation89_spill] sm:$0xff] %v16034_v32  ;;  %v8885_v60 = vshll.u32 %v11125_v6, 16  ;;  %v8878_v8 = vrot.slane %v8876_v48, 4  ;;  %v8881_v46 = vrot.slane %v8879_v21, 5  ;;  %v8889_v43 = vshrl.u32 %v11125_v6, 16 }
 0x2ef   : > { %v8869_v20 = vrot.slane %v8868_v33, 4  ;;  %v8864_v44 = vsel %vm12753_vm2, %v8859_v29, %v8863_v55  ;;  %v9491_v14 = vsel %vm13224_vm5, %v9489_v1, %v9490_v58  ;;  %v8895_v19 = vshll.u32 %v11126_v53, 16  ;;  %v16049_v33 = vpop.f32.mrf.mxu0  ;;  %v11127_v29 = vld [vmem:[%s12723_s11 + $0x90] sm:$0xf]  ;;  %v11128_v1 = vld [vmem:[%s12723_s11 + $0x94] sm:$0xf] }
 0x2f0   : > { %v8887_v38 = vrot.slane %v8885_v60, 5  ;;  %v11241_v39 = vcombine.low %v9488_v52, %v9491_v14  ;;  %v8882_v62 = vor.u32 %v8881_v46, %v8878_v8  ;;  %v8891_v41 = vrot.slane %v8889_v43, 4  ;;  %v16047_v16 = vpop.f32.mrf.mxu1  ;;  %17154 = vst [vmem:[#allocation92_spill] sm:$0xff] %v16049_v33  ;;  %v11129_v8 = vld [vmem:[%s12723_s11 + $0x98] sm:$0x1]  ;;  %v17155_v46 = vld [vmem:[#allocation10_spill] sm:$0xff] }
 0x2f1   : > { %v8874_v31 = vsel %vm12753_vm2, %v8869_v20, %v8873_v12  ;;  %17153 = vst [vmem:[#allocation91_spill] sm:$0xff] %v16047_v16  ;;  %v16053_v48 = vadd.f32 %v15390_v3, %v15388_v5  ;;  %v11210_v21 = vrot.slane %v11194_v9, 9  ;;  %v9494_v58 = vrot.slane %v11125_v6, 5  ;;  %v17156_v14 = vld [vmem:[#allocation35_spill] sm:$0xff]  ;;  %v17157_v33 = vld [vmem:[#allocation2_spill] sm:$0xff] }
 0x2f2   : > { %v11169_v55 = vcombine.low %v8864_v44, %v8874_v31  ;;  %12428 = vmatprep.mubr.bf16.mxu1 %v11241_v39  ;;  %v8883_v60 = vrot.slane %v8882_v62, 4  ;;  %v8892_v12 = vor.u32 %v8891_v41, %v8887_v38  ;;  %v8897_v52 = vrot.slane %v8895_v19, 5  ;;  %v16070_v31 = vpop.f32.mrf.mxu1 }
 0x2f3   : > { %v9497_v20 = vrot.slane %v11126_v53, 5  ;;  %v16060_v43 = vadd.f32 %v17155_v46, %v15402_v34  ;;  %v16064_v5 = vadd.f32 %v17157_v33, %v17156_v14  ;;  %v9495_v3 = vsel %vm13224_vm5, %v11210_v21, %v9494_v58  ;;  %17158 = vst [vmem:[#allocation10_spill] sm:$0xff] %v16070_v31  ;;  %v16072_v34 = vpop.f32.mrf.mxu0  ;;  %v17161_v46 = vld [vmem:[#allocation12_spill] sm:$0xff] }
 0x2f4   : > { %12380 = vmatprep.mubr.bf16.mxu0 %v11169_v55  ;;  %v9496_v6 = vrot.slane %v9494_v58, 4  ;;  %v8888_v9 = vsel %vm12753_vm2, %v8883_v60, %v8887_v38  ;;  %v8893_v53 = vrot.slane %v8892_v12, 4  ;;  %v8900_v44 = vshrl.u32 %v11127_v29, 16  ;;  %17159 = vst [vmem:[#allocation35_spill] sm:$0xff] %v16072_v34  ;;  %v11195_v55 = vld [vmem:[%s12723_s11 + $0x90] sm:$0xe]  ;;  %v16085_v27 = vpop.f32.mrf.mxu1 }
 0x2f5   : > { %v8903_v19 = vshll.u32 %v11127_v29, 16  ;;  %v8909_v62 = vshll.u32 %v11128_v1, 16  ;;  %v8913_v41 = vshrl.u32 %v11128_v1, 16  ;;  %v8919_v33 = vshll.u32 %v11129_v8, 16  ;;  %v11130_v12 = vld [vmem:[%s12723_s11 + $0x9c] sm:$0xf] }
 0x2f6   : > { %v9498_v39 = vsel %vm13224_vm5, %v9496_v6, %v9497_v20  ;;  %v8898_v21 = vsel %vm12753_vm2, %v8893_v53, %v8897_v52  ;;  %v8902_v38 = vrot.slane %v8900_v44, 4  ;;  %v17160_v29 = vld [vmem:[#allocation36_spill] sm:$0xff]  ;;  %v11131_v20 = vld [vmem:[%s12723_s11 + $0xa0] sm:$0xf]  ;;  %v11211_v16 = vrot.slane %v11195_v55, 9  ;;  %17162 = vst [vmem:[#allocation2_spill] sm:$0xff] %v16085_v27 }
 0x2f7   : > { %v11242_v58 = vcombine.low %v9495_v3, %v9498_v39  ;;  %v8905_v60 = vrot.slane %v8903_v19, 5  ;;  %v16082_v14 = vadd.f32 %v17161_v46, %v17160_v29  ;;  %v11170_v34 = vcombine.low %v8888_v9, %v8898_v21  ;;  %v16087_v52 = vpop.f32.mrf.mxu0  ;;  %v11132_v44 = vld [vmem:[%s12723_s11 + $0xa4] sm:$0x1] }
 0x2f8   : > { %v8911_v31 = vrot.slane %v8909_v62, 5  ;;  %v8915_v0 = vrot.slane %v8913_v41, 4  ;;  %v9501_v32 = vrot.slane %v11128_v1, 5  ;;  %v9504_v45 = vrot.slane %v11129_v8, 5  ;;  %17163 = vst [vmem:[#allocation36_spill] sm:$0xff] %v16087_v52 }
 0x2f9   : > { %12429 = vmatmul.mubr.bf16.gmra.mxu1 %v11242_v58  ;;  %v8906_v6 = vor.u32 %v8905_v60, %v8902_v38  ;;  %12381 = vmatmul.mubr.bf16.gmra.mxu0 %v11170_v34  ;;  %v8921_v53 = vrot.slane %v8919_v33, 5  ;;  %v8924_v19 = vshrl.u32 %v11130_v12, 16  ;;  %v8927_v39 = vshll.u32 %v11130_v12, 16  ;;  %v11196_v38 = vld [vmem:[%s12723_s11 + $0x9c] sm:$0xe]  ;;  %v16097_v12 = vpop.f32.mrf.mxu1 }
 0x2fa   : > { %v8916_v3 = vor.u32 %v8915_v0, %v8911_v31  ;;  %v9502_v62 = vsel %vm13224_vm5, %v11211_v16, %v9501_v32  ;;  %v9503_v41 = vrot.slane %v9501_v32, 4  ;;  %v8933_v21 = vshll.u32 %v11131_v20, 16  ;;  %17164 = vst [vmem:[#allocation12_spill] sm:$0xff] %v16097_v12  ;;  %v16099_v16 = vpop.f32.mrf.mxu0 }
 0x2fb   : > { %v8907_v9 = vrot.slane %v8906_v6, 4  ;;  %v8926_v1 = vrot.slane %v8924_v19, 4  ;;  %v8929_v8 = vrot.slane %v8927_v39, 5  ;;  %v8937_v58 = vshrl.u32 %v11131_v20, 16  ;;  %17165 = vst [vmem:[#allocation93_spill] sm:$0xff] %v16099_v16  ;;  %v17167_v19 = vld [vmem:[#allocation47_spill] sm:$0xff] }
 0x2fc   : > { %v8917_v55 = vrot.slane %v8916_v3, 4  ;;  %v9505_v34 = vsel %vm13224_vm5, %v9503_v41, %v9504_v45  ;;  %v8935_v33 = vrot.slane %v8933_v21, 5  ;;  %v8943_v60 = vshll.u32 %v11132_v44, 16  ;;  %v17166_v3 = vld [vmem:[#allocation50_spill] sm:$0xff]  ;;  %v11133_v41 = vld [vmem:[%s12723_s11 + $0xa8] sm:$0xf] }
 0x2fd   : > { %v8912_v0 = vsel %vm12753_vm2, %v8907_v9, %v8911_v31  ;;  %v11243_v29 = vcombine.low %v9502_v62, %v9505_v34  ;;  %v8930_v46 = vor.u32 %v8929_v8, %v8926_v1  ;;  %v8939_v6 = vrot.slane %v8937_v58, 4  ;;  %v11134_v21 = vld [vmem:[%s12723_s11 + $0xac] sm:$0xf]  ;;  %v17171_v1 = vld [vmem:[#allocation49_spill] sm:$0xff] }
 0x2fe   : > { %v8922_v32 = vsel %vm12753_vm2, %v8917_v55, %v8921_v53  ;;  %v16105_v39 = vadd.f32 %v17167_v19, %v17166_v3  ;;  %v11212_v9 = vrot.slane %v11196_v38, 9  ;;  %v9508_v45 = vrot.slane %v11131_v20, 5  ;;  %v17169_v53 = vld [vmem:[#allocation39_spill] sm:$0xff]  ;;  %v17170_v55 = vld [vmem:[#allocation8_spill] sm:$0xff] }
 0x2ff   : > { %v11171_v31 = vcombine.low %v8912_v0, %v8922_v32  ;;  %12432 = vmatprep.mubr.bf16.mxu1 %v11243_v29  ;;  %v8931_v52 = vrot.slane %v8930_v46, 4  ;;  %v8940_v12 = vor.u32 %v8939_v6, %v8935_v33  ;;  %v8945_v16 = vrot.slane %v8943_v60, 5  ;;  %v16120_v38 = vpop.f32.mrf.mxu1  ;;  %v16122_v0 = vpop.f32.mrf.mxu0  ;;  %v11197_v3 = vld [vmem:[%s12723_s11 + $0xa8] sm:$0xe] }
 0x300   : > { %v9511_v27 = vrot.slane %v11132_v44, 5  ;;  %v16112_v62 = vadd.f32 %v17169_v53, %v17168_v24  ;;  %v16116_v8 = vadd.f32 %v17171_v1, %v17170_v55  ;;  %v9509_v20 = vsel %vm13224_vm5, %v11212_v9, %v9508_v45  ;;  %17172 = vst [vmem:[#allocation50_spill] sm:$0xff] %v16120_v38  ;;  %17173 = vst [vmem:[#allocation47_spill] sm:$0xff] %v16122_v0  ;;  %v11136_v53 = vld [vmem:[%s12723_s11 + $0xb4] sm:$0xf] }
 0x301   : > { %12384 = vmatprep.mubr.bf16.mxu0 %v11171_v31  ;;  %v9510_v58 = vrot.slane %v9508_v45, 4  ;;  %v8936_v44 = vsel %vm12753_vm2, %v8931_v52, %v8935_v33  ;;  %v8941_v34 = vrot.slane %v8940_v12, 4  ;;  %v8948_v24 = vshrl.u32 %v11133_v41, 16  ;;  %v16137_v55 = vpop.f32.mrf.mxu1  ;;  %v16139_v1 = vpop.f32.mrf.mxu0 }
 0x302   : > { %v8951_v60 = vshll.u32 %v11133_v41, 16  ;;  %v8957_v29 = vshll.u32 %v11134_v21, 16  ;;  %v8961_v46 = vshrl.u32 %v11134_v21, 16  ;;  %v8967_v6 = vshll.u32 %v11135_v10, 16  ;;  %17174 = vst [vmem:[#allocation7_spill] sm:$0xff] %v16137_v55  ;;  %17175 = vst [vmem:[#allocation39_spill] sm:$0xff] %v16139_v1 }
 0x303   : > { %v9512_v32 = vsel %vm13224_vm5, %v9510_v58, %v9511_v27  ;;  %v8946_v19 = vsel %vm12753_vm2, %v8941_v34, %v8945_v16  ;;  %v8950_v9 = vrot.slane %v8948_v24, 4  ;;  %v16134_v52 = vadd.f32 %v15493_v51, %v15491_v59  ;;  %v11137_v27 = vld [vmem:[%s12723_s11 + $0xb8] sm:$0xf] }
 0x304   : > { %v11244_v31 = vcombine.low %v9509_v20, %v9512_v32  ;;  %v8953_v45 = vrot.slane %v8951_v60, 5  ;;  %v11172_v33 = vcombine.low %v8936_v44, %v8946_v19  ;;  %v8959_v12 = vrot.slane %v8957_v29, 5  ;;  %v11138_v32 = vld [vmem:[%s12723_s11 + $0xbc] sm:$0x1] }
 0x305   : > { %v8963_v41 = vrot.slane %v8961_v46, 4  ;;  %v11213_v16 = vrot.slane %v11197_v3, 9  ;;  %v9515_v20 = vrot.slane %v11134_v21, 5  ;;  %v9518_v34 = vrot.slane %v11135_v10, 5  ;;  %v11198_v21 = vld [vmem:[%s12723_s11 + $0xb4] sm:$0xe]  ;;  %v16145_v10 = vpop.f32.mrf.mxu1 }
 0x306   : > { %12433 = vmatmul.mubr.bf16.gmra.mxu1 %v11244_v31  ;;  %v8954_v58 = vor.u32 %v8953_v45, %v8950_v9  ;;  %12385 = vmatmul.mubr.bf16.gmra.mxu0 %v11172_v33  ;;  %v8969_v60 = vrot.slane %v8967_v6, 5  ;;  %v8972_v59 = vshrl.u32 %v11136_v53, 16  ;;  %v8975_v51 = vshll.u32 %v11136_v53, 16  ;;  %17176 = vst [vmem:[#allocation8_spill] sm:$0xff] %v16145_v10  ;;  %v16147_v3 = vpop.f32.mrf.mxu0 }
 0x307   : > { %v8964_v24 = vor.u32 %v8963_v41, %v8959_v12  ;;  %v9516_v29 = vsel %vm13224_vm5, %v11213_v16, %v9515_v20  ;;  %v9517_v46 = vrot.slane %v9515_v20, 4  ;;  %v8981_v19 = vshll.u32 %v11137_v27, 16  ;;  %17177 = vst [vmem:[#allocation49_spill] sm:$0xff] %v16147_v3  ;;  %v11141_v3 = vld [vmem:[%s12723_s11 + $0xc8] sm:$0x1] }
 0x308   : > { %v8955_v44 = vrot.slane %v8954_v58, 4  ;;  %v8974_v1 = vrot.slane %v8972_v59, 4  ;;  %v8977_v31 = vrot.slane %v8975_v51, 5  ;;  %v8985_v9 = vshrl.u32 %v11137_v27, 16 }
 0x309   : > { %v8965_v0 = vrot.slane %v8964_v24, 4  ;;  %v9519_v45 = vsel %vm13224_vm5, %v9517_v46, %v9518_v34  ;;  %v8983_v53 = vrot.slane %v8981_v19, 5  ;;  %v8991_v33 = vshll.u32 %v11138_v32, 16  ;;  %v17178_v24 = vld [vmem:[#allocation48_spill] sm:$0xff] }
 0x30a   : > { %v8960_v6 = vsel %vm12753_vm2, %v8955_v44, %v8959_v12  ;;  %v11245_v58 = vcombine.low %v9516_v29, %v9519_v45  ;;  %v8978_v16 = vor.u32 %v8977_v31, %v8974_v1  ;;  %v8987_v20 = vrot.slane %v8985_v9, 4  ;;  %v11139_v12 = vld [vmem:[%s12723_s11 + $0xc0] sm:$0xf]  ;;  %v11140_v44 = vld [vmem:[%s12723_s11 + $0xc4] sm:$0xf]  ;;  %v16164_v1 = vpop.f32.mrf.mxu0  ;;  %v17183_v31 = vld [vmem:[#allocation11_spill] sm:$0xff] }
 0x30b   : > { %v8970_v41 = vsel %vm12753_vm2, %v8965_v0, %v8969_v60  ;;  %v16157_v59 = vadd.f32 %v17178_v24, %v15513_v17  ;;  %v11214_v10 = vrot.slane %v11198_v21, 9  ;;  %v9522_v55 = vrot.slane %v11137_v27, 5  ;;  %v16162_v0 = vpop.f32.mrf.mxu1  ;;  %17180 = vst [vmem:[#allocation94_spill] sm:$0xff] %v16164_v1  ;;  %v17181_v60 = vld [vmem:[#allocation52_spill] sm:$0xff]  ;;  %v17182_v29 = vld [vmem:[#allocation54_spill] sm:$0xff] }
 0x30c   : > { %v11173_v51 = vcombine.low %v8960_v6, %v8970_v41  ;;  %12436 = vmatprep.mubr.bf16.mxu1 %v11245_v58  ;;  %v8979_v34 = vrot.slane %v8978_v16, 4  ;;  %v8988_v46 = vor.u32 %v8987_v20, %v8983_v53  ;;  %v8993_v19 = vrot.slane %v8991_v33, 5  ;;  %17179 = vst [vmem:[#allocation48_spill] sm:$0xff] %v16162_v0  ;;  %v11199_v20 = vld [vmem:[%s12723_s11 + $0xc0] sm:$0xe] }
 0x30d   : > { %v9525_v38 = vrot.slane %v11138_v32, 5  ;;  %v16168_v17 = vadd.f32 %v17181_v60, %v15521_v11  ;;  %v16172_v27 = vadd.f32 %v17183_v31, %v17182_v29  ;;  %v9523_v9 = vsel %vm13224_vm5, %v11214_v10, %v9522_v55  ;;  %v11142_v60 = vld [vmem:[%s12723_s11 + $0xcc] sm:$0xf]  ;;  %v11143_v0 = vld [vmem:[%s12723_s11 + $0xd0] sm:$0xf] }
 0x30e   : > { %12388 = vmatprep.mubr.bf16.mxu0 %v11173_v51  ;;  %v9524_v32 = vrot.slane %v9522_v55, 4  ;;  %v8984_v21 = vsel %vm12753_vm2, %v8979_v34, %v8983_v53  ;;  %v8989_v6 = vrot.slane %v8988_v46, 4  ;;  %v8996_v45 = vshrl.u32 %v11139_v12, 16  ;;  %v16184_v53 = vpop.f32.mrf.mxu1  ;;  %v16186_v34 = vpop.f32.mrf.mxu0  ;;  %v17188_v46 = vld [vmem:[#allocation53_spill] sm:$0xff] }
 0x30f   : > { %17184 = vst [vmem:[#allocation52_spill] sm:$0xff] %v16172_v27  ;;  %v8999_v33 = vshll.u32 %v11139_v12, 16  ;;  %v9005_v41 = vshll.u32 %v11140_v44, 16  ;;  %v9009_v58 = vshrl.u32 %v11140_v44, 16  ;;  %v9015_v16 = vshll.u32 %v11141_v3, 16  ;;  %17185 = vst [vmem:[#allocation54_spill] sm:$0xff] %v16184_v53 }
 0x310   : > { %v9526_v11 = vsel %vm13224_vm5, %v9524_v32, %v9525_v38  ;;  %v8994_v24 = vsel %vm12753_vm2, %v8989_v6, %v8993_v19  ;;  %v8998_v10 = vrot.slane %v8996_v45, 4  ;;  %17186 = vst [vmem:[#allocation11_spill] sm:$0xff] %v16186_v34  ;;  %v17187_v12 = vld [vmem:[#allocation57_spill] sm:$0xff]  ;;  %v11215_v19 = vrot.slane %v11199_v20, 9 }
 0x311   : > { %v11246_v51 = vcombine.low %v9523_v9, %v9526_v11  ;;  %v9001_v55 = vrot.slane %v8999_v33, 5  ;;  %v16190_v38 = vadd.f32 %v17188_v46, %v17187_v12  ;;  %v11174_v29 = vcombine.low %v8984_v21, %v8994_v24  ;;  %v11144_v11 = vld [vmem:[%s12723_s11 + $0xd4] sm:$0x1]  ;;  %v16198_v24 = vpop.f32.mrf.mxu0 }
 0x312   : > { %v9007_v31 = vrot.slane %v9005_v41, 5  ;;  %v9011_v32 = vrot.slane %v9009_v58, 4  ;;  %v9529_v9 = vrot.slane %v11140_v44, 5  ;;  %v9532_v6 = vrot.slane %v11141_v3, 5  ;;  %v16196_v58 = vpop.f32.mrf.mxu1  ;;  %17189 = vst [vmem:[#allocation57_spill] sm:$0xff] %v16198_v24 }
 0x313   : > { %12437 = vmatmul.mubr.bf16.gmra.mxu1 %v11246_v51  ;;  %v9002_v1 = vor.u32 %v9001_v55, %v8998_v10  ;;  %12389 = vmatmul.mubr.bf16.gmra.mxu0 %v11174_v29  ;;  %v9017_v33 = vrot.slane %v9015_v16, 5  ;;  %v9020_v53 = vshrl.u32 %v11142_v60, 16  ;;  %v9023_v34 = vshll.u32 %v11142_v60, 16  ;;  %v11200_v10 = vld [vmem:[%s12723_s11 + $0xcc] sm:$0xe]  ;;  %s10104_s11 = sshll.u32 %s12705_s26, 1 }
 0x314   : > { %v9012_v45 = vor.u32 %v9011_v32, %v9007_v31  ;;  %v9530_v12 = vsel %vm13224_vm5, %v11215_v19, %v9529_v9  ;;  %v9531_v21 = vrot.slane %v9529_v9, 4  ;;  %v9029_v41 = vshll.u32 %v11143_v0, 16  ;;  %v16211_v24 = vpop.f32.mrf.mxu1  ;;  %s184_s4 = scalar_lea.vmem %s16710_s3, %s10104_s11 }
 0x315   : > { %v9003_v27 = vrot.slane %v9002_v1, 4  ;;  %v9022_v44 = vrot.slane %v9020_v53, 4  ;;  %v9025_v3 = vrot.slane %v9023_v34, 5  ;;  %v9033_v51 = vshrl.u32 %v11143_v0, 16 }
 0x316   : > { %v9013_v20 = vrot.slane %v9012_v45, 4  ;;  %v9533_v1 = vsel %vm13224_vm5, %v9531_v21, %v9532_v6  ;;  %v9031_v55 = vrot.slane %v9029_v41, 5  ;;  %v9039_v60 = vshll.u32 %v11144_v11, 16 }
 0x317   : > { %v9008_v16 = vsel %vm12753_vm2, %v9003_v27, %v9007_v31  ;;  %v11247_v29 = vcombine.low %v9530_v12, %v9533_v1  ;;  %v9026_v32 = vor.u32 %v9025_v3, %v9022_v44  ;;  %v9035_v19 = vrot.slane %v9033_v51, 4  ;;  %v17191_v12 = vld [vmem:[#allocation16_spill] sm:$0xff]  ;;  %v17192_v44 = vld [vmem:[#allocation19_spill] sm:$0xff] }
 0x318   : > { %v9018_v46 = vsel %vm12753_vm2, %v9013_v20, %v9017_v33  ;;  %v16209_v53 = vadd.f32 %v15567_v23, %v15565_v28  ;;  %v11216_v9 = vrot.slane %v11200_v10, 9  ;;  %v9536_v45 = vrot.slane %v11143_v0, 5  ;;  %v16213_v27 = vpop.f32.mrf.mxu0  ;;  %v17190_v33 = vld [vmem:[#allocation55_spill] sm:$0xff]  ;;  %v17193_v3 = vld [vmem:[#allocation60_spill] sm:$0xff] }
 0x319   : > { %v11175_v34 = vcombine.low %v9008_v16, %v9018_v46  ;;  %12440 = vmatprep.mubr.bf16.mxu1 %v11247_v29  ;;  %v9027_v31 = vrot.slane %v9026_v32, 4  ;;  %v9036_v6 = vor.u32 %v9035_v19, %v9031_v55  ;;  %v9041_v21 = vrot.slane %v9039_v60, 5  ;;  %v16239_v29 = vpop.f32.mrf.mxu1 }
 0x31a   : > { %v9539_v41 = vrot.slane %v11144_v11, 5  ;;  %v16217_v20 = vadd.f32 %v17191_v12, %v17190_v33  ;;  %v16221_v28 = vadd.f32 %v17193_v3, %v17192_v44  ;;  %v9537_v23 = vsel %vm13224_vm5, %v11216_v9, %v9536_v45  ;;  %v17200_v12 = vld [vmem:[#allocation62_spill] sm:$0xff]  ;;  %v17201_v44 = vld [vmem:[#allocation61_spill] sm:$0xff] }
 0x31b   : > { %12392 = vmatprep.mubr.bf16.mxu0 %v11175_v34  ;;  %v9538_v0 = vrot.slane %v9536_v45, 4  ;;  %v9032_v51 = vsel %vm12753_vm2, %v9027_v31, %v9031_v55  ;;  %v9037_v10 = vrot.slane %v9036_v6, 4  ;;  %v6498_v11 = vadd.f32 %v15763_v56, %v15972_v15  ;;  %v16241_v56 = vpop.f32.mrf.mxu0  ;;  %v17197_v34 = vld [vmem:[#allocation21_spill] sm:$0xff]  ;;  %v17198_v6 = vld [vmem:[#allocation32_spill] sm:$0xff] }
 0x31c   : > { %v6496_v16 = vadd.f32 %v15769_v37, %v15995_v54  ;;  %v6499_v60 = vadd.f32 %v15779_v47, %v16006_v63  ;;  %v6497_v46 = vadd.f32 %v15789_v7, %v16010_v42  ;;  %v6502_v55 = vadd.f32 %v15799_v18, %v16030_v4  ;;  %v17194_v42 = vld [vmem:[#allocation58_spill] sm:$0xff]  ;;  %v17195_v4 = vld [vmem:[#allocation59_spill] sm:$0xff] }
 0x31d   : > { %v9540_v1 = vsel %vm13224_vm5, %v9538_v0, %v9539_v41  ;;  %v9042_v37 = vsel %vm12753_vm2, %v9037_v10, %v9041_v21  ;;  %v7252_v15 = vadd.f32 %v15777_v50, %v6498_v11  ;;  %v16254_v36 = vadd.f32 %v17195_v4, %v17194_v42  ;;  %v17199_v41 = vld [vmem:[#allocation28_spill] sm:$0xff] }
 0x31e   : > { %v11248_v61 = vcombine.low %v9537_v23, %v9540_v1  ;;  %v7250_v47 = vadd.f32 %v15787_v35, %v6496_v16  ;;  %v11176_v54 = vcombine.low %v9032_v51, %v9042_v37  ;;  %v7253_v7 = vadd.f32 %v15797_v13, %v6499_v60  ;;  %v17204_v51 = vld [vmem:[#allocation41_spill] sm:$0xff]  ;;  %v17206_v60 = vld [vmem:[#allocation56_spill] sm:$0xff]  ;;  %v17208_v37 = vld [vmem:[#allocation63_spill] sm:$0xff] }
 0x31f   : > { %v7251_v63 = vadd.f32 %v15812_v22, %v6497_v46  ;;  %v16250_v18 = vadd.f32 %v15827_v49, %v6502_v55  ;;  %v16258_v50 = vadd.f32 %v15621_v40, %v15619_v25  ;;  %10907 = vst [vmem:[%s14196_s24 + $0x210] sm:$0xff] %v7252_v15  ;;  %v6500_v35 = vadd.f32 %v15808_v30, %v16053_v48  ;;  %v16272_v40 = vpop.f32.mrf.mxu0  ;;  %v17207_v46 = vld [vmem:[#allocation65_spill] sm:$0xff] }
 0x320   : > { %12441 = vmatmul.mubr.bf16.gmra.mxu1 %v11248_v61  ;;  %10905 = vst [vmem:[%s14196_s24 + $0x200] sm:$0xff] %v7250_v47  ;;  %v6503_v22 = vadd.f32 %v15814_v57, %v16060_v43  ;;  %12393 = vmatmul.mubr.bf16.gmra.mxu0 %v11176_v54  ;;  %v7355_v13 = vmul.f32 %v7252_v15, %v7252_v15  ;;  %10908 = vst [vmem:[%s14196_s24 + $0x218] sm:$0xff] %v7253_v7  ;;  %v16270_v25 = vpop.f32.mrf.mxu1  ;;  %v17196_v57 = vld [vmem:[#allocation33_spill] sm:$0xff]  ;;  %v17209_v61 = vld [vmem:[#allocation66_spill] sm:$0xff] }
 0x321   : > { %v7353_v49 = vmul.f32 %v7250_v47, %v7250_v47  ;;  %10906 = vst [vmem:[%s14196_s24 + $0x208] sm:$0xff] %v7251_v63  ;;  %v7315_v32 = vadd.f32 %v7251_v63, %v7250_v47  ;;  %v7354_v19 = vmul.f32 %v7251_v63, %v7251_v63  ;;  %10911 = vst [vmem:[%s14196_s24 + $0x230] sm:$0xff] %v16250_v18  ;;  %v16300_v1 = vpop.f32.mrf.mxu0  ;;  %v17210_v47 = vld [vmem:[#allocation22_spill] sm:$0xff] }
 0x322   : > { %v7254_v30 = vadd.f32 %v15831_v26, %v6500_v35  ;;  %v7257_v48 = vadd.f32 %v15837_v2, %v6503_v22  ;;  %v6501_v43 = vadd.f32 %v17196_v57, %v16064_v5  ;;  %v6506_v9 = vadd.f32 %v17197_v34, %v16082_v14  ;;  %v17202_v5 = vld [vmem:[#allocation23_spill] sm:$0xff]  ;;  %v17203_v14 = vld [vmem:[#allocation29_spill] sm:$0xff]  ;;  %v16298_v16 = vpop.f32.mrf.mxu1 }
 0x323   : > { %v7316_v45 = vadd.f32 %v7315_v32, %v7252_v15  ;;  %v7385_v31 = vadd.f32 %v7354_v19, %v7353_v49  ;;  %v6504_v21 = vadd.f32 %v17198_v6, %v16105_v39  ;;  %v6507_v33 = vadd.f32 %v17199_v41, %v16112_v62  ;;  %v17205_v62 = vld [vmem:[#allocation30_spill] sm:$0xff]  ;;  %v17214_v57 = vld [vmem:[#allocation25_spill] sm:$0xff] }
 0x324   : > { %v16286_v26 = vadd.f32 %v17201_v44, %v17200_v12  ;;  %v7356_v2 = vmul.f32 %v7253_v7, %v7253_v7  ;;  %10909 = vst [vmem:[%s14196_s24 + $0x220] sm:$0xff] %v7254_v30  ;;  %10912 = vst [vmem:[%s14196_s24 + $0x238] sm:$0xff] %v7257_v48  ;;  %v7255_v3 = vadd.f32 %v17202_v5, %v6501_v43  ;;  %v17213_v32 = vld [vmem:[#allocation6_spill] sm:$0xff]  ;;  %v17215_v43 = vld [vmem:[#allocation40_spill] sm:$0xff]  ;;  %v16332_v41 = vpop.f32.mrf.mxu1 }
 0x325   : > { %v16292_v23 = vadd.f32 %v17203_v14, %v6506_v9  ;;  %v7386_v0 = vadd.f32 %v7385_v31, %v7355_v13  ;;  %v7317_v39 = vadd.f32 %v7316_v45, %v7253_v7  ;;  %v7258_v10 = vadd.f32 %v17204_v51, %v6504_v21  ;;  %v17211_v7 = vld [vmem:[#allocation38_spill] sm:$0xff]  ;;  %v17216_v9 = vld [vmem:[#allocation52_spill] sm:$0xff]  ;;  %v17220_v44 = vld [vmem:[#allocation17_spill] sm:$0xff] }
 0x326   : > { %v16296_v11 = vadd.f32 %v17205_v62, %v6507_v33  ;;  %v16304_v55 = vadd.f32 %v17207_v46, %v17206_v60  ;;  %v16308_v15 = vadd.f32 %v17209_v61, %v17208_v37  ;;  %10910 = vst [vmem:[%s14196_s24 + $0x228] sm:$0xff] %v7255_v3  ;;  %v6505_v54 = vadd.f32 %v17210_v47, %v16116_v8  ;;  %v17212_v13 = vld [vmem:[#allocation46_spill] sm:$0xff]  ;;  %v17219_v12 = vld [vmem:[#allocation20_spill] sm:$0xff]  ;;  %v17224_v62 = vld [vmem:[#allocation73_spill] sm:$0xff] }
 0x327   : > { %10915 = vst [vmem:[%s14196_s24 + $0x250] sm:$0xff] %v16292_v23  ;;  %v6510_v63 = vadd.f32 %v17211_v7, %v16134_v52  ;;  %v7318_v42 = vadd.f32 %v7317_v39, %v7254_v30  ;;  %v7357_v4 = vmul.f32 %v7254_v30, %v7254_v30  ;;  %v7387_v35 = vadd.f32 %v7386_v0, %v7356_v2  ;;  %v17217_v45 = vld [vmem:[#allocation42_spill] sm:$0xff]  ;;  %v17221_v2 = vld [vmem:[#allocation67_spill] sm:$0xff]  ;;  %v17225_v46 = vld [vmem:[#allocation64_spill] sm:$0xff] }
 0x328   : > { %v7358_v22 = vmul.f32 %v7255_v3, %v7255_v3  ;;  %10913 = vst [vmem:[%s14196_s24 + $0x240] sm:$0xff] %v7258_v10  ;;  %10916 = vst [vmem:[%s14196_s24 + $0x258] sm:$0xff] %v16296_v11  ;;  %v7259_v49 = vadd.f32 %v17212_v13, %v6505_v54  ;;  %v6508_v8 = vadd.f32 %v17214_v57, %v16157_v59  ;;  %v17218_v6 = vld [vmem:[#allocation34_spill] sm:$0xff]  ;;  %v16334_v33 = vpop.f32.mrf.mxu0  ;;  %v17223_v39 = vld [vmem:[#allocation71_spill] sm:$0xff]  ;;  %v16370_v13 = vpop.f32.mrf.mxu1 }
 0x329   : > { %v16322_v19 = vadd.f32 %v17213_v32, %v6510_v63  ;;  %v6511_v52 = vadd.f32 %v17215_v43, %v16168_v17  ;;  %v7388_v34 = vadd.f32 %v7387_v35, %v7357_v4  ;;  %v7319_v30 = vadd.f32 %v7318_v42, %v7255_v3  ;;  %v17222_v3 = vld [vmem:[#allocation69_spill] sm:$0xff]  ;;  %v17226_v37 = vld [vmem:[#allocation3_spill] sm:$0xff]  ;;  %v17227_v54 = vld [vmem:[#allocation44_spill] sm:$0xff] }
 0x32a   : > { %v6509_v31 = vadd.f32 %v17217_v45, %v17216_v9  ;;  %v6514_v21 = vadd.f32 %v17218_v6, %v16190_v38  ;;  %v6111_v59 = vadd.f32 %v17220_v44, %v17219_v12  ;;  %v7359_v17 = vmul.f32 %v16250_v18, %v16250_v18  ;;  %10914 = vst [vmem:[%s14196_s24 + $0x248] sm:$0xff] %v7259_v49  ;;  %v16372_v32 = vpop.f32.mrf.mxu0  ;;  %v17229_v57 = vld [vmem:[#allocation75_spill] sm:$0xff]  ;;  %v17233_v45 = vld [vmem:[#allocation72_spill] sm:$0xff]  ;;  %v17234_v6 = vld [vmem:[#allocation74_spill] sm:$0xff] }
 0x32b   : > { %10919 = vst [vmem:[%s14196_s24 + $0x270] sm:$0xff] %v16322_v19  ;;  %v16344_v5 = vadd.f32 %v17221_v2, %v6508_v8  ;;  %v16347_v38 = vadd.f32 %v17222_v3, %v6511_v52  ;;  %v7320_v14 = vadd.f32 %v7319_v30, %v16250_v18  ;;  %v7389_v0 = vadd.f32 %v7388_v34, %v7358_v22  ;;  %v17228_v18 = vld [vmem:[#allocation51_spill] sm:$0xff]  ;;  %v17232_v52 = vld [vmem:[#allocation70_spill] sm:$0xff]  ;;  %v17235_v12 = vld [vmem:[#allocation24_spill] sm:$0xff] }
 0x32c   : > { %v16351_v51 = vadd.f32 %v17223_v39, %v6509_v31  ;;  %v16354_v60 = vadd.f32 %v17224_v62, %v6514_v21  ;;  %v6122_v61 = vadd.f32 %v17226_v37, %v17225_v46  ;;  %v7360_v47 = vmul.f32 %v7257_v48, %v7257_v48  ;;  %v17236_v44 = vld [vmem:[#allocation5_spill] sm:$0xff]  ;;  %v17237_v2 = vld [vmem:[#allocation27_spill] sm:$0xff]  ;;  %v17238_v3 = vld [vmem:[#allocation4_spill] sm:$0xff] }
 0x32d   : > { %10917 = vst [vmem:[%s14196_s24 + $0x260] sm:$0xff] %v16344_v5  ;;  %10920 = vst [vmem:[%s14196_s24 + $0x278] sm:$0xff] %v16347_v38  ;;  %v6512_v7 = vadd.f32 %v17227_v54, %v16209_v53  ;;  %v6515_v63 = vadd.f32 %v17228_v18, %v16217_v20  ;;  %v7390_v42 = vadd.f32 %v7389_v0, %v7359_v17  ;;  %v17230_v53 = vld [vmem:[#allocation77_spill] sm:$0xff]  ;;  %v17231_v20 = vld [vmem:[#allocation68_spill] sm:$0xff]  ;;  %v16410_v54 = vpop.f32.mrf.mxu0 }
 0x32e   : > { %v7321_v4 = vadd.f32 %v7320_v14, %v7257_v48  ;;  %v7361_v35 = vmul.f32 %v7258_v10, %v7258_v10  ;;  %v7362_v22 = vmul.f32 %v7259_v49, %v7259_v49  ;;  %10918 = vst [vmem:[%s14196_s24 + $0x268] sm:$0xff] %v16351_v51  ;;  %10923 = vst [vmem:[%s14196_s24 + $0x290] sm:$0xff] %v16354_v60  ;;  %v17241_v39 = vld [vmem:[#allocation31_spill] sm:$0xff]  ;;  %v17242_v46 = vld [vmem:[#allocation45_spill] sm:$0xff] }
 0x32f   : > { %v16375_v8 = vadd.f32 %v17229_v57, %v6512_v7  ;;  %v16378_v43 = vadd.f32 %v17230_v53, %v6515_v63  ;;  %v6513_v48 = vadd.f32 %v17231_v20, %v16221_v28  ;;  %v6518_v34 = vadd.f32 %v17232_v52, %v16254_v36  ;;  %v17239_v28 = vld [vmem:[#allocation78_spill] sm:$0xff]  ;;  %v17243_v7 = vld [vmem:[#allocation13_spill] sm:$0xff]  ;;  %v17248_v53 = vld [vmem:[#allocation79_spill] sm:$0xff] }
 0x330   : > { %v7322_v30 = vadd.f32 %v7321_v4, %v7258_v10  ;;  %v7391_v9 = vadd.f32 %v7390_v42, %v7360_v47  ;;  %v6516_v31 = vadd.f32 %v17233_v45, %v16258_v50  ;;  %v6519_v21 = vadd.f32 %v17234_v6, %v16286_v26  ;;  %v17240_v10 = vld [vmem:[#allocation80_spill] sm:$0xff]  ;;  %v16408_v47 = vpop.f32.mrf.mxu1  ;;  %v17244_v18 = vld [vmem:[#allocation14_spill] sm:$0xff]  ;;  %v17245_v42 = vld [vmem:[#allocation9_spill] sm:$0xff] }
 0x331   : > { %v6114_v17 = vadd.f32 %v17236_v44, %v17235_v12  ;;  %v6135_v14 = vadd.f32 %v17238_v3, %v17237_v2  ;;  %10921 = vst [vmem:[%s14196_s24 + $0x280] sm:$0xff] %v16375_v8  ;;  %10924 = vst [vmem:[%s14196_s24 + $0x298] sm:$0xff] %v16378_v43  ;;  %v16397_v36 = vadd.f32 %v17239_v28, %v6513_v48  ;;  %v17246_v4 = vld [vmem:[#allocation18_spill] sm:$0xff]  ;;  %v17250_v45 = vld [vmem:[#allocation85_spill] sm:$0xff] }
 0x332   : > { %v16400_v50 = vadd.f32 %v17240_v10, %v6518_v34  ;;  %v7392_v0 = vadd.f32 %v7391_v9, %v7361_v35  ;;  %v7323_v26 = vadd.f32 %v7322_v30, %v7259_v49  ;;  %v16403_v62 = vadd.f32 %v17241_v39, %v6516_v31  ;;  %v17247_v49 = vld [vmem:[#allocation76_spill] sm:$0xff]  ;;  %v17249_v9 = vld [vmem:[#allocation83_spill] sm:$0xff]  ;;  %v17251_v31 = vld [vmem:[#allocation81_spill] sm:$0xff]  ;;  %v8532_v10 = vpop.f32.mrf.mxu1 }
 0x333   : > { %v16406_v37 = vadd.f32 %v17242_v46, %v6519_v21  ;;  %v6127_v63 = vadd.f32 %v17244_v18, %v17243_v7  ;;  %v6138_v57 = vadd.f32 %v17246_v4, %v17245_v42  ;;  %10922 = vst [vmem:[%s14196_s24 + $0x288] sm:$0xff] %v16397_v36  ;;  %v6517_v35 = vadd.f32 %v17247_v49, %v16304_v55  ;;  %v17252_v21 = vld [vmem:[#allocation82_spill] sm:$0xff]  ;;  %v17253_v2 = vld [vmem:[#allocation84_spill] sm:$0xff]  ;;  %v17254_v3 = vld [vmem:[#allocation87_spill] sm:$0xff] }
 0x334   : > { %10927 = vst [vmem:[%s14196_s24 + $0x2b0] sm:$0xff] %v16400_v50  ;;  %v6522_v20 = vadd.f32 %v17248_v53, %v16308_v15  ;;  %v7363_v48 = vmul.f32 %v16292_v23, %v16292_v23  ;;  %v7364_v52 = vmul.f32 %v16296_v11, %v16296_v11  ;;  %v7324_v34 = vadd.f32 %v7323_v26, %v16292_v23  ;;  %v17257_v7 = vld [vmem:[#allocation89_spill] sm:$0xff]  ;;  %v17258_v42 = vld [vmem:[#allocation91_spill] sm:$0xff]  ;;  %v17259_v49 = vld [vmem:[#allocation26_spill] sm:$0xff] }
 0x335   : > { %v7393_v30 = vadd.f32 %v7392_v0, %v7362_v22  ;;  %10925 = vst [vmem:[%s14196_s24 + $0x2a0] sm:$0xff] %v16403_v62  ;;  %10928 = vst [vmem:[%s14196_s24 + $0x2b8] sm:$0xff] %v16406_v37  ;;  %v16434_v55 = vadd.f32 %v17249_v9, %v6517_v35  ;;  %v6520_v6 = vadd.f32 %v17251_v31, %v6111_v59  ;;  %v8262_v0 = vpop.f32.mrf.mxu0  ;;  %v17260_v35 = vld [vmem:[#allocation15_spill] sm:$0xff]  ;;  %v12331_v9 = vpop.f32.mrf.mxu1  ;;  %v17263_v31 = vld [vmem:[#allocation10_spill] sm:$0xff] }
 0x336   : > { %v16437_v15 = vadd.f32 %v17250_v45, %v6522_v20  ;;  %v6523_v12 = vadd.f32 %v17252_v21, %v6122_v61  ;;  %v7325_v23 = vadd.f32 %v7324_v34, %v16296_v11  ;;  %v6521_v22 = vadd.f32 %v17253_v2, %v6114_v17  ;;  %v17255_v11 = vld [vmem:[#allocation86_spill] sm:$0xff]  ;;  %v17256_v61 = vld [vmem:[#allocation88_spill] sm:$0xff] }
 0x337   : > { %v7394_v44 = vadd.f32 %v7393_v30, %v7363_v48  ;;  %v6526_v28 = vadd.f32 %v17254_v3, %v6135_v14  ;;  %v7365_v26 = vmul.f32 %v16344_v5, %v16344_v5  ;;  %v7366_v39 = vmul.f32 %v16351_v51, %v16351_v51  ;;  %10926 = vst [vmem:[%s14196_s24 + $0x2a8] sm:$0xff] %v16434_v55  ;;  %v17261_v20 = vld [vmem:[#allocation90_spill] sm:$0xff]  ;;  %v17262_v34 = vld [vmem:[#allocation92_spill] sm:$0xff] }
 0x338   : > { %10931 = vst [vmem:[%s14196_s24 + $0x2d0] sm:$0xff] %v16437_v15  ;;  %v16453_v59 = vadd.f32 %v17255_v11, %v6520_v6  ;;  %v16456_v17 = vadd.f32 %v17256_v61, %v6523_v12  ;;  %v7326_v14 = vadd.f32 %v7325_v23, %v16344_v5  ;;  %v16460_v18 = vadd.f32 %v17257_v7, %v6521_v22  ;;  %v17264_v21 = vld [vmem:[#allocation2_spill] sm:$0xff]  ;;  %v17266_v3 = vld [vmem:[#allocation12_spill] sm:$0xff]  ;;  %v17267_v61 = vld [vmem:[#allocation49_spill] sm:$0xff]  ;;  %v8535_v7 = vpop.f32.mrf.mxu1 }
 0x339   : > { %v7395_v46 = vadd.f32 %v7394_v44, %v7364_v52  ;;  %v16463_v4 = vadd.f32 %v17258_v42, %v6526_v28  ;;  %v6130_v53 = vadd.f32 %v17260_v35, %v17259_v49  ;;  %v6524_v48 = vadd.f32 %v17261_v20, %v6127_v63  ;;  %v17265_v63 = vld [vmem:[#allocation35_spill] sm:$0xff] }
 0x33a   : > { %10929 = vst [vmem:[%s14196_s24 + $0x2c0] sm:$0xff] %v16453_v59  ;;  %10932 = vst [vmem:[%s14196_s24 + $0x2d8] sm:$0xff] %v16456_v17  ;;  %v6527_v30 = vadd.f32 %v17262_v34, %v6138_v57  ;;  %v7327_v52 = vadd.f32 %v7326_v14, %v16351_v51  ;;  %v12286_v45 = vpop.f32.mrf.mxu0  ;;  %v7367_v57 = vmul.f32 %v16322_v19, %v16322_v19  ;;  %v17268_v14 = vld [vmem:[#allocation54_spill] sm:$0xff]  ;;  %v17270_v35 = vld [vmem:[#allocation11_spill] sm:$0xff] }
 0x33b   : > { %v7396_v5 = vadd.f32 %v7395_v46, %v7365_v26  ;;  %10930 = vst [vmem:[%s14196_s24 + $0x2c8] sm:$0xff] %v16460_v18  ;;  %10935 = vst [vmem:[%s14196_s24 + $0x2f0] sm:$0xff] %v16463_v4  ;;  %v16479_v6 = vadd.f32 %v17263_v31, %v6524_v48  ;;  %v6525_v44 = vadd.f32 %v17265_v63, %v6130_v53 }
 0x33c   : > { %v16482_v12 = vadd.f32 %v17264_v21, %v6527_v30  ;;  %v7328_v51 = vadd.f32 %v7327_v52, %v16322_v19  ;;  %v7368_v2 = vmul.f32 %v16347_v38, %v16347_v38  ;;  %v7369_v22 = vmul.f32 %v16375_v8, %v16375_v8  ;;  %v8275_v42 = vpop.f32.mrf.mxu0 }
 0x33d   : > { %v7397_v23 = vadd.f32 %v7396_v5, %v7366_v39  ;;  %10933 = vst [vmem:[%s14196_s24 + $0x2e0] sm:$0xff] %v16479_v6  ;;  %v16497_v28 = vadd.f32 %v17266_v3, %v6525_v44  ;;  %v16502_v19 = vadd.f32 %v17268_v14, %v17267_v61  ;;  %v17269_v39 = vld [vmem:[#allocation94_spill] sm:$0xff]  ;;  %v7370_v49 = vmul.f32 %v16397_v36, %v16397_v36 }
 0x33e   : > { %10936 = vst [vmem:[%s14196_s24 + $0x2f8] sm:$0xff] %v16482_v12  ;;  %v7329_v11 = vadd.f32 %v7328_v51, %v16347_v38  ;;  %v16506_v46 = vadd.f32 %v16196_v58, %v17269_v39  ;;  %v16514_v53 = vadd.f32 %v16211_v24, %v17270_v35  ;;  %v17271_v38 = vld [vmem:[#allocation57_spill] sm:$0xff]  ;;  %v16522_v48 = vadd.f32 %v16270_v25, %v16213_v27 }
 0x33f   : > { %v7398_v26 = vadd.f32 %v7397_v23, %v7367_v57  ;;  %10934 = vst [vmem:[%s14196_s24 + $0x2e8] sm:$0xff] %v16497_v28  ;;  %v16518_v20 = vadd.f32 %v16239_v29, %v17271_v38  ;;  %v16527_v30 = vadd.f32 %v16298_v16, %v16241_v56  ;;  %v16531_v5 = vadd.f32 %v16332_v41, %v16272_v40  ;;  %v12287_v41 = vpop.f32.mrf.mxu0 }
 0x340   : > { %v7330_v58 = vadd.f32 %v7329_v11, %v16375_v8  ;;  %v16535_v24 = vadd.f32 %v16370_v13, %v16300_v1  ;;  %v16539_v29 = vadd.f32 %v16408_v47, %v16334_v33  ;;  %v16542_v27 = vadd.f32 %v8532_v10, %v16372_v32 }
 0x341   : > { %v7399_v34 = vadd.f32 %v7398_v26, %v7368_v2  ;;  %v16545_v25 = vadd.f32 %v12331_v9, %v16410_v54  ;;  %v16548_v8 = vadd.f32 %v8535_v7, %v8262_v0  ;;  %v7371_v1 = vmul.f32 %v16354_v60, %v16354_v60  ;;  %v8278_v9 = vpop.f32.mrf.mxu0 }
 0x342   : > { %v7331_v16 = vadd.f32 %v7330_v58, %v16397_v36  ;;  %v12334_v40 = vpop.f32.mrf.mxu1  ;;  %v7372_v54 = vmul.f32 %v16378_v43, %v16378_v43  ;;  %v7373_v21 = vmul.f32 %v16403_v62, %v16403_v62  ;;  %v7374_v63 = vmul.f32 %v16434_v55, %v16434_v55 }
 0x343   : > { %v7400_v56 = vadd.f32 %v7399_v34, %v7369_v22  ;;  %v16550_v52 = vadd.f32 %v12334_v40, %v12286_v45  ;;  %v7375_v2 = vmul.f32 %v16400_v50, %v16400_v50  ;;  %v7377_v39 = vmul.f32 %v16453_v59, %v16453_v59 }
 0x344   : > { %v7332_v33 = vadd.f32 %v7331_v16, %v16354_v60  ;;  %v8548_v32 = vpop.f32.mrf.mxu1  ;;  %v7378_v7 = vmul.f32 %v16460_v18, %v16460_v18 }
 0x345   : > { %v7401_v13 = vadd.f32 %v7400_v56, %v7370_v49  ;;  %v16555_v47 = vadd.f32 %v8548_v32, %v8275_v42  ;;  %v7381_v32 = vmul.f32 %v16479_v6, %v16479_v6 }
 0x346   : > { %v7333_v36 = vadd.f32 %v7332_v33, %v16378_v43  ;;  %v12335_v0 = vpop.f32.mrf.mxu1 }
 0x347   : > { %v7402_v10 = vadd.f32 %v7401_v13, %v7371_v1  ;;  %v16560_v31 = vadd.f32 %v12335_v0, %v12287_v41 }
 0x348   : > { %v7334_v45 = vadd.f32 %v7333_v36, %v16403_v62  ;;  %v8551_v44 = vpop.f32.mrf.mxu1  ;;  %v7376_v62 = vmul.f32 %v16406_v37, %v16406_v37 }
 0x349   : > { %v7403_v60 = vadd.f32 %v7402_v10, %v7372_v54  ;;  %v16567_v57 = vadd.f32 %v8551_v44, %v8278_v9  ;;  %v7382_v54 = vmul.f32 %v16497_v28, %v16497_v28 }
 0x34a   : > { %v7335_v23 = vadd.f32 %v7334_v45, %v16434_v55  ;;  %v12290_v43 = vpop.f32.mrf.mxu0 }
 0x34b   : > { %v7404_v51 = vadd.f32 %v7403_v60, %v7373_v21 }
 0x34c   : > { %v7336_v22 = vadd.f32 %v7335_v23, %v16400_v50  ;;  %v8291_v61 = vpop.f32.mrf.mxu0 }
 0x34d   : > { %v7405_v3 = vadd.f32 %v7404_v51, %v7374_v63 }
 0x34e   : > { %v7337_v11 = vadd.f32 %v7336_v22, %v16406_v37  ;;  %v12291_v35 = vpop.f32.mrf.mxu0  ;;  %v7379_v37 = vmul.f32 %v16437_v15, %v16437_v15 }
 0x34f   : > { %v7406_v26 = vadd.f32 %v7405_v3, %v7375_v2 }
 0x350   : > { %v7338_v14 = vadd.f32 %v7337_v11, %v16453_v59  ;;  %v7380_v59 = vmul.f32 %v16456_v17, %v16456_v17  ;;  %v8294_v1 = vpop.f32.mrf.mxu0 }
 0x351   : > { %v7407_v55 = vadd.f32 %v7406_v26, %v7376_v62 }
 0x352   : > { %v7339_v50 = vadd.f32 %v7338_v14, %v16460_v18  ;;  %v12338_v49 = vpop.f32.mrf.mxu1 }
 0x353   : > { %v7408_v42 = vadd.f32 %v7407_v55, %v7377_v39  ;;  %v16582_v38 = vadd.f32 %v12338_v49, %v12290_v43 }
 0x354   : > { %v7340_v58 = vadd.f32 %v7339_v50, %v16437_v15  ;;  %v8564_v56 = vpop.f32.mrf.mxu1 }
 0x355   : > { %v7409_v34 = vadd.f32 %v7408_v42, %v7378_v7  ;;  %v16587_v16 = vadd.f32 %v8564_v56, %v8291_v61 }
 0x356   : > { %v7341_v41 = vadd.f32 %v7340_v58, %v16456_v17  ;;  %v12339_v18 = vpop.f32.mrf.mxu1  ;;  %v7383_v17 = vmul.f32 %v16463_v4, %v16463_v4 }
 0x357   : > { %v7410_v40 = vadd.f32 %v7409_v34, %v7379_v37  ;;  %v16592_v33 = vadd.f32 %v12339_v18, %v12291_v35  ;;  %v17272_v34 = vld [vmem:[#allocation37_spill] sm:$0xff] }
 0x358   : > { %v7342_v13 = vadd.f32 %v7341_v41, %v16479_v6  ;;  %v8567_v10 = vpop.f32.mrf.mxu1  ;;  %v7384_v6 = vmul.f32 %v16482_v12, %v16482_v12  ;;  %v17273_v41 = vld [vmem:[#allocation43_spill] sm:$0xff] }
 0x359   : > { %v7411_v15 = vadd.f32 %v7410_v40, %v7380_v59  ;;  %v16599_v36 = vadd.f32 %v8567_v10, %v8294_v1 }
 0x35a   : > { %v7343_v9 = vadd.f32 %v7342_v13, %v16497_v28 }
 0x35b   : > { %v7412_v0 = vadd.f32 %v7411_v15, %v7381_v32 }
 0x35c   : > { %v7344_v45 = vadd.f32 %v7343_v9, %v16463_v4  ;;  %v12294_v60 = vpop.f32.mrf.mxu0 }
 0x35d   : > { %v7413_v21 = vadd.f32 %v7412_v0, %v7382_v54 }
 0x35e   : > { %v7345_v63 = vadd.f32 %v7344_v45, %v16482_v12  ;;  %v8307_v43 = vpop.f32.mrf.mxu0 }
 0x35f   : > { %v7414_v44 = vadd.f32 %v7413_v21, %v7383_v17 }
 0x360   : > { %v7346_v51 = vrot.slane %v7345_v63, 4  ;;  %v12295_v26 = vpop.f32.mrf.mxu0 }
 0x361   : > { %v7415_v23 = vadd.f32 %v7414_v44, %v7384_v6  ;;  %v17274_v6 = vld [vmem:[#allocation36_spill] sm:$0xff] }
 0x362   : > { %v7347_v2 = vadd.f32 %v7346_v51, %v7345_v63  ;;  %v8310_v42 = vpop.f32.mrf.mxu0  ;;  %v17275_v63 = vld [vmem:[#allocation50_spill] sm:$0xff] }
 0x363   : > { %v7416_v22 = vrot.slane %v7415_v23, 4  ;;  %v8493_v44 = vadd.f32 %v17275_v63, %v17274_v6 }
 0x364   : > { %v7348_v3 = vrot.slane %v7347_v2, 2  ;;  %v12342_v62 = vpop.f32.mrf.mxu1 }
 0x365   : > { %v7417_v28 = vadd.f32 %v7416_v22, %v7415_v23  ;;  %v16608_v11 = vadd.f32 %v12342_v62, %v12294_v60  ;;  %v17278_v62 = vld [vmem:[#allocation47_spill] sm:$0xff] }
 0x366   : > { %v7349_v4 = vadd.f32 %v7348_v3, %v7347_v2  ;;  %v8580_v14 = vpop.f32.mrf.mxu1  ;;  %v17277_v2 = vld [vmem:[#allocation7_spill] sm:$0xff] }
 0x367   : > { %v7418_v61 = vrot.slane %v7417_v28, 2  ;;  %v16610_v39 = vadd.f32 %v8580_v14, %v8307_v43  ;;  %v17276_v43 = vld [vmem:[#allocation93_spill] sm:$0xff] }
 0x368   : > { %v7350_v55 = vrot.slane %v7349_v4, 1  ;;  %v12343_v12 = vpop.f32.mrf.mxu1  ;;  %v8485_v22 = vadd.f32 %v17277_v2, %v17276_v43 }
 0x369   : > { %v7419_v7 = vadd.f32 %v7418_v61, %v7417_v28  ;;  %v16612_v50 = vadd.f32 %v12343_v12, %v12295_v26  ;;  %v17279_v26 = vld [vmem:[#allocation8_spill] sm:$0xff]  ;;  %v17280_v12 = vld [vmem:[#allocation39_spill] sm:$0xff] }
 0x36a   : > { %v7351_v49 = vadd.f32 %v7350_v55, %v7349_v4  ;;  %v8583_v37 = vpop.f32.mrf.mxu1  ;;  %v8496_v4 = vadd.f32 %v17279_v26, %v17278_v62 }
 0x36b   : > { %v7420_v35 = vrot.slane %v7419_v7, 1  ;;  %v16614_v58 = vadd.f32 %v8583_v37, %v8310_v42  ;;  %v17281_v42 = vld [vmem:[#allocation48_spill] sm:$0xff] }
 0x36c   : > { %v16617_v56 = vadd.f32 %v7351_v49, %v17272_v34  ;;  %v12298_v40 = vpop.f32.mrf.mxu0  ;;  %v8488_v49 = vadd.f32 %v17281_v42, %v17280_v12 }
 0x36d   : > { %v7421_v59 = vadd.f32 %v7420_v35, %v7419_v7 }
 0x36e   : > { %v8323_v1 = vpop.f32.mrf.mxu0 }
 0x36f   : > { %v16620_v18 = vadd.f32 %v7421_v59, %v17273_v41 }
 0x370   : > { %v12299_v32 = vpop.f32.mrf.mxu0 }
 0x372   : > { %v8326_v9 = vpop.f32.mrf.mxu0 }
 0x374   : > { %v12346_v13 = vpop.f32.mrf.mxu1 }
 0x375   : > { %v16622_v15 = vadd.f32 %v12346_v13, %v12298_v40 }
 0x376   : > { %v8596_v54 = vpop.f32.mrf.mxu1 }
 0x377   : > { %v16624_v10 = vadd.f32 %v8596_v54, %v8323_v1 }
 0x378   : > { %v12347_v0 = vpop.f32.mrf.mxu1 }
 0x379   : > { %v16626_v17 = vadd.f32 %v12347_v0, %v12299_v32 }
 0x37a   : > { %v8599_v45 = vpop.f32.mrf.mxu1 }
 0x37b   : > { %v16628_v21 = vadd.f32 %v8599_v45, %v8326_v9 }
 0x384   : > { %v12414_v60 = vpop.f32.mrf.mxu1 }
 0x386   : > { %v12366_v51 = vpop.f32.mrf.mxu0  ;;  %v9704_v23 = vpop.f32.mrf.mxu1 }
 0x387   : > { %v9335_v3 = vadd.f32 %v12366_v51, %v8493_v44 }
 0x388   : > { %v9206_v28 = vpop.f32.mrf.mxu0  ;;  %v12415_v7 = vpop.f32.mrf.mxu1 }
 0x389   : > { %v9833_v61 = vadd.f32 %v12414_v60, %v9335_v3  ;;  %v9333_v14 = vadd.f32 %v9206_v28, %v8485_v22 }
 0x38a   : > { %v12367_v55 = vpop.f32.mrf.mxu0  ;;  %v9707_v41 = vpop.f32.mrf.mxu1 }
 0x38b   : > { %11259 = vst [vmem:[%s14196_s24 + $0x310] sm:$0xff] %v9833_v61  ;;  %v9831_v35 = vadd.f32 %v9704_v23, %v9333_v14  ;;  %v9336_v37 = vadd.f32 %v12367_v55, %v8496_v4  ;;  %v9936_v0 = vmul.f32 %v9833_v61, %v9833_v61 }
 0x38c   : > { %v9209_v34 = vpop.f32.mrf.mxu0 }
 0x38d   : > { %11257 = vst [vmem:[%s14196_s24 + $0x300] sm:$0xff] %v9831_v35  ;;  %v9834_v59 = vadd.f32 %v12415_v7, %v9336_v37  ;;  %v9334_v40 = vadd.f32 %v9209_v34, %v8488_v49  ;;  %v9934_v13 = vmul.f32 %v9831_v35, %v9831_v35 }
 0x38f   : > { %11260 = vst [vmem:[%s14196_s24 + $0x318] sm:$0xff] %v9834_v59  ;;  %v9832_v1 = vadd.f32 %v9707_v41, %v9334_v40  ;;  %v9937_v43 = vmul.f32 %v9834_v59, %v9834_v59 }
 0x391   : > { %11258 = vst [vmem:[%s14196_s24 + $0x308] sm:$0xff] %v9832_v1  ;;  %v9896_v32 = vadd.f32 %v9832_v1, %v9831_v35  ;;  %v9935_v54 = vmul.f32 %v9832_v1, %v9832_v1 }
 0x393   : > { %v9897_v9 = vadd.f32 %v9896_v32, %v9833_v61  ;;  %v9966_v45 = vadd.f32 %v9935_v54, %v9934_v13  ;;  %v12418_v60 = vpop.f32.mrf.mxu1 }
 0x394   : > { %v12370_v6 = vpop.f32.mrf.mxu0 }
 0x395   : > { %v9967_v63 = vadd.f32 %v9966_v45, %v9936_v0  ;;  %v9339_v44 = vadd.f32 %v12370_v6, %v16502_v19  ;;  %v9720_v51 = vpop.f32.mrf.mxu1  ;;  %v9898_v3 = vadd.f32 %v9897_v9, %v9834_v59 }
 0x396   : > { %v9222_v23 = vpop.f32.mrf.mxu0 }
 0x397   : > { %v9837_v2 = vadd.f32 %v12418_v60, %v9339_v44  ;;  %v9337_v22 = vadd.f32 %v9222_v23, %v16506_v46  ;;  %v12419_v62 = vpop.f32.mrf.mxu1  ;;  %v9968_v4 = vadd.f32 %v9967_v63, %v9937_v43 }
 0x398   : > { %v12371_v28 = vpop.f32.mrf.mxu0 }
 0x399   : > { %11263 = vst [vmem:[%s14196_s24 + $0x330] sm:$0xff] %v9837_v2  ;;  %v9835_v26 = vadd.f32 %v9720_v51, %v9337_v22  ;;  %v9340_v61 = vadd.f32 %v12371_v28, %v16514_v53  ;;  %v9723_v42 = vpop.f32.mrf.mxu1  ;;  %v9940_v59 = vmul.f32 %v9837_v2, %v9837_v2 }
 0x39a   : > { %v9225_v14 = vpop.f32.mrf.mxu0 }
 0x39b   : > { %11261 = vst [vmem:[%s14196_s24 + $0x320] sm:$0xff] %v9835_v26  ;;  %v9899_v55 = vadd.f32 %v9898_v3, %v9835_v26  ;;  %v9938_v19 = vmul.f32 %v9835_v26, %v9835_v26  ;;  %v9838_v7 = vadd.f32 %v12419_v62, %v9340_v61  ;;  %v9338_v12 = vadd.f32 %v9225_v14, %v16518_v20 }
 0x39d   : > { %v9969_v49 = vadd.f32 %v9968_v4, %v9938_v19  ;;  %11264 = vst [vmem:[%s14196_s24 + $0x338] sm:$0xff] %v9838_v7  ;;  %v9836_v46 = vadd.f32 %v9723_v42, %v9338_v12  ;;  %v9941_v32 = vmul.f32 %v9838_v7, %v9838_v7 }
 0x39f   : > { %11262 = vst [vmem:[%s14196_s24 + $0x328] sm:$0xff] %v9836_v46  ;;  %v9900_v35 = vadd.f32 %v9899_v55, %v9836_v46  ;;  %v9939_v37 = vmul.f32 %v9836_v46, %v9836_v46  ;;  %v12422_v34 = vpop.f32.mrf.mxu1 }
 0x3a0   : > { %v12374_v53 = vpop.f32.mrf.mxu0 }
 0x3a1   : > { %v9901_v40 = vadd.f32 %v9900_v35, %v9837_v2  ;;  %v9970_v41 = vadd.f32 %v9969_v49, %v9939_v37  ;;  %v9343_v1 = vadd.f32 %v12374_v53, %v16522_v48  ;;  %v9736_v13 = vpop.f32.mrf.mxu1 }
 0x3a2   : > { %v9238_v20 = vpop.f32.mrf.mxu0 }
 0x3a3   : > { %v9971_v54 = vadd.f32 %v9970_v41, %v9940_v59  ;;  %v9902_v0 = vadd.f32 %v9901_v40, %v9838_v7  ;;  %v9841_v9 = vadd.f32 %v12422_v34, %v9343_v1  ;;  %v9341_v45 = vadd.f32 %v9238_v20, %v16527_v30  ;;  %v12423_v63 = vpop.f32.mrf.mxu1 }
 0x3a4   : > { %v12375_v6 = vpop.f32.mrf.mxu0 }
 0x3a5   : > { %v9972_v60 = vadd.f32 %v9971_v54, %v9941_v32  ;;  %11267 = vst [vmem:[%s14196_s24 + $0x350] sm:$0xff] %v9841_v9  ;;  %v9839_v44 = vadd.f32 %v9736_v13, %v9341_v45  ;;  %v9344_v51 = vadd.f32 %v12375_v6, %v16531_v5  ;;  %v9739_v3 = vpop.f32.mrf.mxu1  ;;  %v9944_v61 = vmul.f32 %v9841_v9, %v9841_v9 }
 0x3a6   : > { %v9241_v23 = vpop.f32.mrf.mxu0 }
 0x3a7   : > { %11265 = vst [vmem:[%s14196_s24 + $0x340] sm:$0xff] %v9839_v44  ;;  %v9903_v48 = vadd.f32 %v9902_v0, %v9839_v44  ;;  %v9942_v43 = vmul.f32 %v9839_v44, %v9839_v44  ;;  %v9842_v2 = vadd.f32 %v12423_v63, %v9344_v51  ;;  %v9342_v22 = vadd.f32 %v9241_v23, %v16535_v24 }
 0x3a9   : > { %v9973_v28 = vadd.f32 %v9972_v60, %v9942_v43  ;;  %11268 = vst [vmem:[%s14196_s24 + $0x358] sm:$0xff] %v9842_v2  ;;  %v9840_v62 = vadd.f32 %v9739_v3, %v9342_v22  ;;  %v9945_v12 = vmul.f32 %v9842_v2, %v9842_v2 }
 0x3ab   : > { %11266 = vst [vmem:[%s14196_s24 + $0x348] sm:$0xff] %v9840_v62  ;;  %v9904_v30 = vadd.f32 %v9903_v48, %v9840_v62  ;;  %v9943_v26 = vmul.f32 %v9840_v62, %v9840_v62 }
 0x3ac   : > { %v12426_v4 = vpop.f32.mrf.mxu1  ;;  %v12378_v5 = vpop.f32.mrf.mxu0 }
 0x3ad   : > { %v9905_v14 = vadd.f32 %v9904_v30, %v9841_v9  ;;  %v9974_v55 = vadd.f32 %v9973_v28, %v9943_v26  ;;  %v9347_v19 = vadd.f32 %v12378_v5, %v16539_v29 }
 0x3ae   : > { %v9752_v7 = vpop.f32.mrf.mxu1  ;;  %v9254_v24 = vpop.f32.mrf.mxu0 }
 0x3af   : > { %v9975_v42 = vadd.f32 %v9974_v55, %v9944_v61  ;;  %v9906_v49 = vadd.f32 %v9905_v14, %v9842_v2  ;;  %v9845_v46 = vadd.f32 %v12426_v4, %v9347_v19  ;;  %v9345_v35 = vadd.f32 %v9254_v24, %v16542_v27 }
 0x3b0   : > { %v12379_v34 = vpop.f32.mrf.mxu0  ;;  %v12427_v59 = vpop.f32.mrf.mxu1 }
 0x3b1   : > { %v9976_v37 = vadd.f32 %v9975_v42, %v9945_v12  ;;  %11271 = vst [vmem:[%s14196_s24 + $0x370] sm:$0xff] %v9845_v46  ;;  %v9843_v40 = vadd.f32 %v9752_v7, %v9345_v35  ;;  %v9348_v41 = vadd.f32 %v12379_v34, %v16545_v25  ;;  %v9948_v60 = vmul.f32 %v9845_v46, %v9845_v46 }
 0x3b2   : > { %v9257_v53 = vpop.f32.mrf.mxu0  ;;  %v9755_v54 = vpop.f32.mrf.mxu1 }
 0x3b3   : > { %11269 = vst [vmem:[%s14196_s24 + $0x360] sm:$0xff] %v9843_v40  ;;  %v9907_v29 = vadd.f32 %v9906_v49, %v9843_v40  ;;  %v9946_v1 = vmul.f32 %v9843_v40, %v9843_v40  ;;  %v9846_v13 = vadd.f32 %v12427_v59, %v9348_v41  ;;  %v9346_v32 = vadd.f32 %v9257_v53, %v16548_v8 }
 0x3b5   : > { %v9977_v20 = vadd.f32 %v9976_v37, %v9946_v1  ;;  %11272 = vst [vmem:[%s14196_s24 + $0x378] sm:$0xff] %v9846_v13  ;;  %v9844_v0 = vadd.f32 %v9755_v54, %v9346_v32  ;;  %v9949_v23 = vmul.f32 %v9846_v13, %v9846_v13 }
 0x3b7   : > { %11270 = vst [vmem:[%s14196_s24 + $0x368] sm:$0xff] %v9844_v0  ;;  %v9908_v27 = vadd.f32 %v9907_v29, %v9844_v0  ;;  %v9947_v9 = vmul.f32 %v9844_v0, %v9844_v0 }
 0x3b9   : > { %v12430_v45 = vpop.f32.mrf.mxu1  ;;  %v9909_v6 = vadd.f32 %v9908_v27, %v9845_v46  ;;  %v9978_v63 = vadd.f32 %v9977_v20, %v9947_v9  ;;  %v12382_v25 = vpop.f32.mrf.mxu0 }
 0x3ba   : > { %v9351_v44 = vadd.f32 %v12382_v25, %v16550_v52 }
 0x3bb   : > { %v9768_v51 = vpop.f32.mrf.mxu1  ;;  %v9979_v48 = vadd.f32 %v9978_v63, %v9948_v60  ;;  %v9270_v8 = vpop.f32.mrf.mxu0  ;;  %v9910_v43 = vadd.f32 %v9909_v6, %v9846_v13 }
 0x3bc   : > { %v9849_v2 = vadd.f32 %v12430_v45, %v9351_v44  ;;  %v9349_v22 = vadd.f32 %v9270_v8, %v16555_v47 }
 0x3bd   : > { %v9980_v3 = vadd.f32 %v9979_v48, %v9949_v23  ;;  %v12383_v28 = vpop.f32.mrf.mxu0  ;;  %v12431_v62 = vpop.f32.mrf.mxu1 }
 0x3be   : > { %11275 = vst [vmem:[%s14196_s24 + $0x390] sm:$0xff] %v9849_v2  ;;  %v9847_v30 = vadd.f32 %v9768_v51, %v9349_v22  ;;  %v9352_v26 = vadd.f32 %v12383_v28, %v16560_v31  ;;  %v9952_v24 = vmul.f32 %v9849_v2, %v9849_v2 }
 0x3bf   : > { %v9273_v4 = vpop.f32.mrf.mxu0  ;;  %v9771_v5 = vpop.f32.mrf.mxu1 }
 0x3c0   : > { %11273 = vst [vmem:[%s14196_s24 + $0x380] sm:$0xff] %v9847_v30  ;;  %v9911_v52 = vadd.f32 %v9910_v43, %v9847_v30  ;;  %v9950_v61 = vmul.f32 %v9847_v30, %v9847_v30  ;;  %v9850_v14 = vadd.f32 %v12431_v62, %v9352_v26  ;;  %v9350_v55 = vadd.f32 %v9273_v4, %v16567_v57 }
 0x3c2   : > { %v9981_v19 = vadd.f32 %v9980_v3, %v9950_v61  ;;  %11276 = vst [vmem:[%s14196_s24 + $0x398] sm:$0xff] %v9850_v14  ;;  %v9848_v7 = vadd.f32 %v9771_v5, %v9350_v55  ;;  %v9953_v34 = vmul.f32 %v9850_v14, %v9850_v14 }
 0x3c4   : > { %11274 = vst [vmem:[%s14196_s24 + $0x388] sm:$0xff] %v9848_v7  ;;  %v9912_v47 = vadd.f32 %v9911_v52, %v9848_v7  ;;  %v9951_v12 = vmul.f32 %v9848_v7, %v9848_v7 }
 0x3c6   : > { %v12434_v42 = vpop.f32.mrf.mxu1  ;;  %v9913_v49 = vadd.f32 %v9912_v47, %v9849_v2  ;;  %v9982_v46 = vadd.f32 %v9981_v19, %v9951_v12  ;;  %v12386_v31 = vpop.f32.mrf.mxu0 }
 0x3c7   : > { %v9355_v35 = vadd.f32 %v12386_v31, %v16582_v38 }
 0x3c8   : > { %v9784_v37 = vpop.f32.mrf.mxu1  ;;  %v9983_v59 = vadd.f32 %v9982_v46, %v9952_v24  ;;  %v9286_v57 = vpop.f32.mrf.mxu0  ;;  %v9914_v40 = vadd.f32 %v9913_v49, %v9850_v14 }
 0x3c9   : > { %v9853_v41 = vadd.f32 %v12434_v42, %v9355_v35  ;;  %v9353_v53 = vadd.f32 %v9286_v57, %v16587_v16 }
 0x3ca   : > { %v9984_v29 = vadd.f32 %v9983_v59, %v9953_v34  ;;  %v12387_v1 = vpop.f32.mrf.mxu0  ;;  %v12435_v13 = vpop.f32.mrf.mxu1 }
 0x3cb   : > { %11279 = vst [vmem:[%s14196_s24 + $0x3b0] sm:$0xff] %v9853_v41  ;;  %v9851_v32 = vadd.f32 %v9784_v37, %v9353_v53  ;;  %v9356_v54 = vadd.f32 %v12387_v1, %v16592_v33  ;;  %v9956_v44 = vmul.f32 %v9853_v41, %v9853_v41 }
 0x3cc   : > { %v9289_v20 = vpop.f32.mrf.mxu0  ;;  %v9787_v45 = vpop.f32.mrf.mxu1 }
 0x3cd   : > { %11277 = vst [vmem:[%s14196_s24 + $0x3a0] sm:$0xff] %v9851_v32  ;;  %v9915_v38 = vadd.f32 %v9914_v40, %v9851_v32  ;;  %v9954_v0 = vmul.f32 %v9851_v32, %v9851_v32  ;;  %v9854_v27 = vadd.f32 %v12435_v13, %v9356_v54  ;;  %v9354_v9 = vadd.f32 %v9289_v20, %v16599_v36 }
 0x3cf   : > { %v9985_v60 = vadd.f32 %v9984_v29, %v9954_v0  ;;  %11280 = vst [vmem:[%s14196_s24 + $0x3b8] sm:$0xff] %v9854_v27  ;;  %v9852_v6 = vadd.f32 %v9787_v45, %v9354_v9  ;;  %v9957_v43 = vmul.f32 %v9854_v27, %v9854_v27 }
 0x3d1   : > { %11278 = vst [vmem:[%s14196_s24 + $0x3a8] sm:$0xff] %v9852_v6  ;;  %v9916_v16 = vadd.f32 %v9915_v38, %v9852_v6  ;;  %v9955_v63 = vmul.f32 %v9852_v6, %v9852_v6 }
 0x3d3   : > { %v12438_v25 = vpop.f32.mrf.mxu1  ;;  %v9917_v51 = vadd.f32 %v9916_v16, %v9853_v41  ;;  %v9986_v23 = vadd.f32 %v9985_v60, %v9955_v63  ;;  %v12390_v33 = vpop.f32.mrf.mxu0 }
 0x3d4   : > { %v9359_v48 = vadd.f32 %v12390_v33, %v16608_v11 }
 0x3d5   : > { %v9800_v8 = vpop.f32.mrf.mxu1  ;;  %v9987_v2 = vadd.f32 %v9986_v23, %v9956_v44  ;;  %v9302_v36 = vpop.f32.mrf.mxu0  ;;  %v9918_v22 = vadd.f32 %v9917_v51, %v9854_v27 }
 0x3d6   : > { %v9857_v3 = vadd.f32 %v12438_v25, %v9359_v48  ;;  %v9357_v28 = vadd.f32 %v9302_v36, %v16610_v39 }
 0x3d7   : > { %v9988_v62 = vadd.f32 %v9987_v2, %v9957_v43  ;;  %v12391_v30 = vpop.f32.mrf.mxu0  ;;  %v12439_v26 = vpop.f32.mrf.mxu1 }
 0x3d8   : > { %11283 = vst [vmem:[%s14196_s24 + $0x3d0] sm:$0xff] %v9857_v3  ;;  %v9855_v4 = vadd.f32 %v9800_v8, %v9357_v28  ;;  %v9360_v52 = vadd.f32 %v12391_v30, %v16612_v50  ;;  %v9960_v24 = vmul.f32 %v9857_v3, %v9857_v3 }
 0x3d9   : > { %v9305_v61 = vpop.f32.mrf.mxu0  ;;  %v9803_v19 = vpop.f32.mrf.mxu1 }
 0x3da   : > { %11281 = vst [vmem:[%s14196_s24 + $0x3c0] sm:$0xff] %v9855_v4  ;;  %v9919_v11 = vadd.f32 %v9918_v22, %v9855_v4  ;;  %v9958_v14 = vmul.f32 %v9855_v4, %v9855_v4  ;;  %v9858_v55 = vadd.f32 %v12439_v26, %v9360_v52  ;;  %v9358_v5 = vadd.f32 %v9305_v61, %v16614_v58 }
 0x3dc   : > { %v9989_v7 = vadd.f32 %v9988_v62, %v9958_v14  ;;  %11284 = vst [vmem:[%s14196_s24 + $0x3d8] sm:$0xff] %v9858_v55  ;;  %v9856_v47 = vadd.f32 %v9803_v19, %v9358_v5  ;;  %v9961_v37 = vmul.f32 %v9858_v55, %v9858_v55 }
 0x3de   : > { %11282 = vst [vmem:[%s14196_s24 + $0x3c8] sm:$0xff] %v9856_v47  ;;  %v9920_v39 = vadd.f32 %v9919_v11, %v9856_v47  ;;  %v9959_v12 = vmul.f32 %v9856_v47, %v9856_v47 }
 0x3e0   : > { %v12442_v42 = vpop.f32.mrf.mxu1  ;;  %v9921_v49 = vadd.f32 %v9920_v39, %v9857_v3  ;;  %v9990_v46 = vadd.f32 %v9989_v7, %v9959_v12  ;;  %v12394_v50 = vpop.f32.mrf.mxu0 }
 0x3e1   : > { %v9363_v31 = vadd.f32 %v12394_v50, %v16622_v15 }
 0x3e2   : > { %v9816_v35 = vpop.f32.mrf.mxu1  ;;  %v9991_v34 = vadd.f32 %v9990_v46, %v9960_v24  ;;  %v9318_v58 = vpop.f32.mrf.mxu0  ;;  %v9922_v59 = vadd.f32 %v9921_v49, %v9858_v55 }
 0x3e3   : > { %v9861_v57 = vadd.f32 %v12442_v42, %v9363_v31  ;;  %v9361_v40 = vadd.f32 %v9318_v58, %v16624_v10 }
 0x3e4   : > { %v9992_v41 = vadd.f32 %v9991_v34, %v9961_v37  ;;  %v12395_v53 = vpop.f32.mrf.mxu0  ;;  %v12443_v29 = vpop.f32.mrf.mxu1 }
 0x3e5   : > { %11287 = vst [vmem:[%s14196_s24 + $0x3f0] sm:$0xff] %v9861_v57  ;;  %v9859_v1 = vadd.f32 %v9816_v35, %v9361_v40  ;;  %v9364_v13 = vadd.f32 %v12395_v53, %v16626_v17  ;;  %v9964_v60 = vmul.f32 %v9861_v57, %v9861_v57 }
 0x3e6   : > { %v9321_v32 = vpop.f32.mrf.mxu0  ;;  %v9819_v0 = vpop.f32.mrf.mxu1 }
 0x3e7   : > { %11285 = vst [vmem:[%s14196_s24 + $0x3e0] sm:$0xff] %v9859_v1  ;;  %v9923_v15 = vadd.f32 %v9922_v59, %v9859_v1  ;;  %v9962_v54 = vmul.f32 %v9859_v1, %v9859_v1  ;;  %v9862_v20 = vadd.f32 %v12443_v29, %v9364_v13  ;;  %v9362_v38 = vadd.f32 %v9321_v32, %v16628_v21 }
 0x3e9   : > { %v9993_v27 = vadd.f32 %v9992_v41, %v9962_v54  ;;  %11288 = vst [vmem:[%s14196_s24 + $0x3f8] sm:$0xff] %v9862_v20  ;;  %v9860_v9 = vadd.f32 %v9819_v0, %v9362_v38  ;;  %v9965_v63 = vmul.f32 %v9862_v20, %v9862_v20 }
 0x3eb   : > { %11286 = vst [vmem:[%s14196_s24 + $0x3e8] sm:$0xff] %v9860_v9  ;;  %v9924_v10 = vadd.f32 %v9923_v15, %v9860_v9  ;;  %v9963_v45 = vmul.f32 %v9860_v9, %v9860_v9 }
 0x3ed   : > { %v9925_v6 = vadd.f32 %v9924_v10, %v9861_v57  ;;  %v9994_v16 = vadd.f32 %v9993_v27, %v9963_v45 }
 0x3ef   : > { %v9926_v17 = vadd.f32 %v9925_v6, %v9862_v20  ;;  %v9995_v25 = vadd.f32 %v9994_v16, %v9964_v60 }
 0x3f1   : > { %v9927_v44 = vrot.slane %v9926_v17, 4  ;;  %v9996_v51 = vadd.f32 %v9995_v25, %v9965_v63 }
 0x3f3   : > { %v9928_v23 = vadd.f32 %v9927_v44, %v9926_v17  ;;  %v9997_v33 = vrot.slane %v9996_v51, 4 }
 0x3f5   : > { %v9929_v48 = vrot.slane %v9928_v23, 2  ;;  %v9998_v21 = vadd.f32 %v9997_v33, %v9996_v51 }
 0x3f7   : > { %v9930_v8 = vadd.f32 %v9929_v48, %v9928_v23  ;;  %v9999_v43 = vrot.slane %v9998_v21, 2 }
 0x3f9   : > { %v9931_v2 = vrot.slane %v9930_v8, 1  ;;  %v10000_v36 = vadd.f32 %v9999_v43, %v9998_v21 }
 0x3fb   : > { %v9932_v22 = vadd.f32 %v9931_v2, %v9930_v8  ;;  %v10001_v3 = vrot.slane %v10000_v36, 1 }
 0x3fd   : > { %v9933_v28 = vadd.f32 %v9932_v22, %v16617_v56  ;;  %v10002_v62 = vadd.f32 %v10001_v3, %v10000_v36 }
 0x3ff   : > { %v10003_v30 = vadd.f32 %v10002_v62, %v16620_v18  ;;  %10004 = vst [vmem:[%s184_s4] sm:$0x1] %v9933_v28 }
 0x401   : > { %10005 = vst [vmem:[%s184_s4 + $0x1] sm:$0x1] %v10003_v30 }
 0x402 PF: > { %s14_s12 = sadd.s32 1, %s12653_s12  }
 0x403   : > { %p11_p5 = scmp.ge.s32.totalorder %s14_s12, 4  }
 0x405   :  { %13 = sbr.rel (!%p11_p5) target bundleno = 1 (0x1), region = 90 }

</bundles_post_ra>
